<compile_context>
chip_gen: v6e
topology: v6e:2x2x1
jax: 0.10.0
libtpu: 0.0.40
codegen_flags: <defaults>
</compile_context>

<pallas_src>
import numpy as np
import jax
import jax.numpy as jnp
from jax import lax
from jax.experimental import pallas as pl
from jax.experimental.pallas import tpu as pltpu


def _make_fused_kernel(D, H, W, Cin, guard, negative_slope):
    """Fused conv3d(k3,p1)+LReLU -> conv+LReLU -> conv, one batch element."""
    S = D * H * W
    HW = H * W
    # Flat lane offset of each of the 27 taps; tap index t = (kd*3+kh)*3+kw.
    offs = [(kd - 1) * HW + (kh - 1) * W + (kw - 1)
            for kd in range(3) for kh in range(3) for kw in range(3)]

    def kernel(mask_ref, x_ref, w1_ref, b1_ref, w2_ref, b2_ref, w3_ref, b3_ref,
               o_ref, act_ref):
        # mask_ref : (27, 1, S)  f32 border-validity masks ("same" zero pad)
        # x_ref    : (1, Cin, S) flattened NCDHW input block
        # wN_ref   : (27, CoutN, Cin) tap-major weights; wN_ref[t] is aligned
        # bN_ref   : (CoutN, 1)
        # act_ref  : (Cin, guard + S + guard) guarded flat activation scratch

        def conv_layer(w_ref, b_ref, slope):
            # 27 tap-wise MXU matmuls, f32 accumulation (no im2col slab).
            acc = None
            for t, off in enumerate(offs):
                sl = act_ref[:, guard + off:guard + off + S]      # (Cin, S)
                # Centre tap: mask is all-ones -> skip the multiply.
                masked = sl if off == 0 else sl * mask_ref[t]
                d = jnp.dot(w_ref[t], masked,
                            preferred_element_type=jnp.float32)   # (Cout, S)
                acc = d if acc is None else acc + d
            y = acc + b_ref[...]                     # (Cout, 1) lane-bcast
            if slope is not None:
                y = jnp.where(y > 0, y, slope * y)   # LeakyReLU (f32)
            return y

        # Zero ONLY the guard bands (masks already null their contribution,
        # but the bands must hold finite values, not uninitialised VMEM).
        # Done every grid step so per-core scratch is covered under megacore
        # grid splits; cost is just 2*guard lanes per step.
        band = jnp.zeros((Cin, guard), jnp.float32)
        act_ref[:, :guard] = band
        act_ref[:, guard + S:] = band

        act_ref[:, guard:guard + S] = x_ref[0].astype(jnp.float32)
        h1 = conv_layer(w1_ref, b1_ref, negative_slope)
        act_ref[:, guard:guard + S] = h1
        h2 = conv_layer(w2_ref, b2_ref, negative_slope)
        act_ref[:, guard:guard + S] = h2
        flow = conv_layer(w3_ref, b3_ref, None)       # (Cout, S)
        o_ref[0] = flow.astype(o_ref.dtype)

    return kernel


def _border_masks(D, H, W):
    """(27, 1, D*H*W) f32 validity masks == exact 'same' zero padding."""
    S = D * H * W
    pos = np.arange(S)
    d = pos // (H * W)
    h = (pos // W) % H
    w = pos % W
    ms = []
    for kd in range(3):
        for kh in range(3):
            for kw in range(3):
                dd, hh, ww = d + kd - 1, h + kh - 1, w + kw - 1
                ms.append((dd >= 0) & (dd < D) & (hh >= 0) & (hh < H)
                          & (ww >= 0) & (ww < W))
    return jnp.asarray(np.stack(ms).astype(np.float32).reshape(27, 1, S))


@jax.jit
def flow_predictor_forward(x_ncdhw, params):
    """Forward pass matching FlowPredictor.forward.  Input/output are NCDHW."""
    B, Cin, D, H, W = x_ncdhw.shape
    S = D * H * W
    Cout = params["w3"].shape[1]

    # Guard lanes so every 3x3x3 tap is a static lane-slice of the flat
    # activation buffer; multiple of 128 keeps the centre slice lane-aligned.
    max_off = H * W + W + 1
    guard = max(128, ((max_off + 127) // 128) * 128)

    # NCDHW already has channels leading / spatial trailing -> just flatten
    # the spatial dims (free reshape; no transpose, no jnp.pad, no HBM copy).
    x_flat = x_ncdhw.reshape(B, Cin, S)
    masks = _border_masks(D, H, W)   # compile-time constant

    kernel = _make_fused_kernel(D, H, W, Cin, guard, negative_slope=0.2)
    out_flat = pl.pallas_call(
        kernel,
        out_shape=jax.ShapeDtypeStruct((B, Cout, S), jnp.float32),
        grid=(B,),
        in_specs=[
            pl.BlockSpec((27, 1, S), lambda b: (0, 0, 0)),      # masks (once)
            pl.BlockSpec((1, Cin, S), lambda b: (b, 0, 0)),     # x
            pl.BlockSpec((27, Cin, Cin), lambda b: (0, 0, 0)),  # w1 (tap-major)
            pl.BlockSpec((Cin, 1), lambda b: (0, 0)),           # b1
            pl.BlockSpec((27, Cin, Cin), lambda b: (0, 0, 0)),  # w2
            pl.BlockSpec((Cin, 1), lambda b: (0, 0)),           # b2
            pl.BlockSpec((27, Cout, Cin), lambda b: (0, 0, 0)), # w3
            pl.BlockSpec((Cout, 1), lambda b: (0, 0)),          # b3
        ],
        out_specs=pl.BlockSpec((1, Cout, S), lambda b: (b, 0, 0)),
        scratch_shapes=[
            pltpu.VMEM((Cin, 2 * guard + S), jnp.float32),      # guarded act
        ],
        compiler_params=pltpu.CompilerParams(
            dimension_semantics=("parallel",),      # batch shards over TCs
            vmem_limit_bytes=32 * 1024 * 1024),
    )(masks, x_flat,
      params["w1"], params["b1"],
      params["w2"], params["b2"],
      params["w3"], params["b3"])
    return out_flat.reshape(B, Cout, D, H, W)


def _oidhw_to_taps(w_oidhw):
    """(Cout, Cin, 3,3,3) torch layout -> (27, Cout, Cin) tap-major layout;
    tap index t = (kd*3+kh)*3+kw matches the kernel's `offs` ordering."""
    co, ci = w_oidhw.shape[0], w_oidhw.shape[1]
    return jnp.transpose(w_oidhw, (2, 3, 4, 0, 1)).reshape(27, co, ci)


def init_params(key, in_channels, out_channels=3):
    """Parameter init mirroring FlowPredictor.__init__ (torch OIDHW layout).

    conv1/conv2: torch-default-style uniform(-1/sqrt(fan_in), 1/sqrt(fan_in)).
    conv3: weights ~ Normal(0, 1e-5), bias = 0.
    """
    ks = jax.random.split(key, 5)
    Cin, Cout = in_channels, out_channels
    fan_in = Cin * 27
    bound = float(fan_in) ** -0.5

    w1 = jax.random.uniform(ks[0], (Cin, Cin, 3, 3, 3), jnp.float32,
                            minval=-bound, maxval=bound)
    b1 = jax.random.uniform(ks[1], (Cin,), jnp.float32,
                            minval=-bound, maxval=bound)
    w2 = jax.random.uniform(ks[2], (Cin, Cin, 3, 3, 3), jnp.float32,
                            minval=-bound, maxval=bound)
    b2 = jax.random.uniform(ks[3], (Cin,), jnp.float32,
                            minval=-bound, maxval=bound)
    w3 = 1e-5 * jax.random.normal(ks[4], (Cout, Cin, 3, 3, 3), jnp.float32)
    b3 = jnp.zeros((Cout,), jnp.float32)

    params = {
        "w1": _oidhw_to_taps(w1), "b1": b1.reshape(Cin, 1),
        "w2": _oidhw_to_taps(w2), "b2": b2.reshape(Cin, 1),
        "w3": _oidhw_to_taps(w3), "b3": b3.reshape(Cout, 1),
    }
    torch_layout = {"w1": w1, "b1": b1, "w2": w2, "b2": b2, "w3": w3, "b3": b3}
    return params, torch_layout


def reference_forward(x_ncdhw, tp):
    """Plain-JAX NCDHW reference (lax conv) for correctness checking."""
    def conv(x, w, b, slope=None):
        y = lax.conv_general_dilated(
            x, w, window_strides=(1, 1, 1), padding="SAME",
            dimension_numbers=("NCDHW", "OIDHW", "NCDHW"))
        y = y + b[None, :, None, None, None]
        if slope is not None:
            y = jnp.where(y > 0, y, slope * y)
        return y

    h = conv(x_ncdhw, tp["w1"], tp["b1"], 0.2)
    h = conv(h, tp["w2"], tp["b2"], 0.2)
    return conv(h, tp["w3"], tp["b3"], None)


if __name__ == "__main__":
    B, Cin, D, H, W = 2, 8, 8, 8, 8   # small shapes consistent with the module
    key = jax.random.PRNGKey(0)
    kx, kp = jax.random.split(key)

    x = jax.random.normal(kx, (B, Cin, D, H, W), jnp.float32)   # NCDHW input
    params, torch_params = init_params(kp, in_channels=Cin, out_channels=3)

    out = jax.block_until_ready(flow_predictor_forward(x, params))
    assert out.shape == (B, 3, D, H, W), out.shape

    ref = jax.block_until_ready(reference_forward(x, torch_params))
    max_err = float(jnp.max(jnp.abs(out - ref)))
    if not jnp.allclose(out, ref, rtol=1e-4, atol=1e-6):
        raise AssertionError(f"mismatch: max abs err = {max_err}")

    print("KERNEL_OK")
</pallas_src>

<mosaic_0001>
module attributes {stable_mosaic.version = 11 : i64} {
  func.func @kernel(%arg0: i32, %arg1: memref<27x1x512xf32, #tpu.memory_space<vmem>>, %arg2: memref<1x8x512xf32, #tpu.memory_space<vmem>>, %arg3: memref<27x8x8xf32, #tpu.memory_space<vmem>>, %arg4: memref<8x1xf32, #tpu.memory_space<vmem>>, %arg5: memref<27x8x8xf32, #tpu.memory_space<vmem>>, %arg6: memref<8x1xf32, #tpu.memory_space<vmem>>, %arg7: memref<27x3x8xf32, #tpu.memory_space<vmem>>, %arg8: memref<3x1xf32, #tpu.memory_space<vmem>>, %arg9: memref<1x3x512xf32, #tpu.memory_space<vmem>>, %arg10: memref<8x768xf32, #tpu.memory_space<vmem>>) attributes {dimension_semantics = [#tpu.dimension_semantics<parallel>], iteration_bounds = array<i64: 2>, scalar_prefetch = 0 : i64, scratch_operands = 1 : i64, tpu.core_type = #tpu.core_type<tc>, window_params = [{pipeline_mode = #tpu.pipeline_mode<synchronous>, transform_indices = @transform_0, window_bounds = array<i64: 27, 1, 512>}, {transform_indices = @transform_1, window_bounds = array<i64: 1, 8, 512>}, {pipeline_mode = #tpu.pipeline_mode<synchronous>, transform_indices = @transform_2, window_bounds = array<i64: 27, 8, 8>}, {pipeline_mode = #tpu.pipeline_mode<synchronous>, transform_indices = @transform_3, window_bounds = array<i64: 8, 1>}, {pipeline_mode = #tpu.pipeline_mode<synchronous>, transform_indices = @transform_4, window_bounds = array<i64: 27, 8, 8>}, {pipeline_mode = #tpu.pipeline_mode<synchronous>, transform_indices = @transform_5, window_bounds = array<i64: 8, 1>}, {pipeline_mode = #tpu.pipeline_mode<synchronous>, transform_indices = @transform_6, window_bounds = array<i64: 27, 3, 8>}, {pipeline_mode = #tpu.pipeline_mode<synchronous>, transform_indices = @transform_7, window_bounds = array<i64: 3, 1>}, {transform_indices = @transform_8, window_bounds = array<i64: 1, 3, 512>}]} {
    %cst = arith.constant 0.000000e+00 : f32
    %0 = vector.broadcast %cst : f32 to vector<8x128xf32>
    %c0 = arith.constant 0 : index
    %c0_0 = arith.constant 0 : index
    %1 = vector.load %arg10[%c0, %c0_0] : memref<8x768xf32, #tpu.memory_space<vmem>>, vector<8x128xf32>
    tpu.vector_store %arg10[%c0, %c0_0], %0 {strides = array<i32>} : memref<8x768xf32, #tpu.memory_space<vmem>>, vector<8x128xf32>,
    %c0_1 = arith.constant 0 : index
    %c640 = arith.constant 640 : index
    %2 = vector.load %arg10[%c0_1, %c640] : memref<8x768xf32, #tpu.memory_space<vmem>>, vector<8x128xf32>
    tpu.vector_store %arg10[%c0_1, %c640], %0 {strides = array<i32>} : memref<8x768xf32, #tpu.memory_space<vmem>>, vector<8x128xf32>,
    %c0_2 = arith.constant 0 : index
    %c0_3 = arith.constant 0 : index
    %c0_4 = arith.constant 0 : index
    %3 = vector.load %arg2[%c0_2, %c0_3, %c0_4] : memref<1x8x512xf32, #tpu.memory_space<vmem>>, vector<1x8x512xf32>
    %4 = vector.shape_cast %3 : vector<1x8x512xf32> to vector<8x512xf32>
    %c0_5 = arith.constant 0 : index
    %c128 = arith.constant 128 : index
    %5 = vector.load %arg10[%c0_5, %c128] : memref<8x768xf32, #tpu.memory_space<vmem>>, vector<8x512xf32>
    tpu.vector_store %arg10[%c0_5, %c128], %4 {strides = array<i32>} : memref<8x768xf32, #tpu.memory_space<vmem>>, vector<8x512xf32>,
    %c0_6 = arith.constant 0 : index
    %c55 = arith.constant 55 : index
    %6 = vector.load %arg10[%c0_6, %c55] : memref<8x768xf32, #tpu.memory_space<vmem>>, vector<8x512xf32>
    %c0_7 = arith.constant 0 : index
    %c0_8 = arith.constant 0 : index
    %c0_9 = arith.constant 0 : index
    %7 = vector.load %arg1[%c0_7, %c0_8, %c0_9] : memref<27x1x512xf32, #tpu.memory_space<vmem>>, vector<1x1x512xf32>
    %8 = vector.shape_cast %7 : vector<1x1x512xf32> to vector<1x512xf32>
    %9 = vector.broadcast %8 : vector<1x512xf32> to vector<8x512xf32>
    %10 = arith.mulf %6, %9 : vector<8x512xf32>
    %c0_10 = arith.constant 0 : index
    %c0_11 = arith.constant 0 : index
    %c0_12 = arith.constant 0 : index
    %11 = vector.load %arg3[%c0_10, %c0_11, %c0_12] : memref<27x8x8xf32, #tpu.memory_space<vmem>>, vector<1x8x8xf32>
    %12 = vector.shape_cast %11 : vector<1x8x8xf32> to vector<8x8xf32>
    %cst_13 = arith.constant dense<0.000000e+00> : vector<8x512xf32>
    %13 = tpu.matmul %12, %10, %cst_13 {dimension_numbers = #tpu.dot_dimension_numbers<[1], [0], [0], [1], [0, 0, 1, 1], [], []>} : vector<8x8xf32>, vector<8x512xf32>, vector<8x512xf32> -> vector<8x512xf32>
    %c0_14 = arith.constant 0 : index
    %c56 = arith.constant 56 : index
    %14 = vector.load %arg10[%c0_14, %c56] : memref<8x768xf32, #tpu.memory_space<vmem>>, vector<8x512xf32>
    %c1 = arith.constant 1 : index
    %c0_15 = arith.constant 0 : index
    %c0_16 = arith.constant 0 : index
    %15 = vector.load %arg1[%c1, %c0_15, %c0_16] : memref<27x1x512xf32, #tpu.memory_space<vmem>>, vector<1x1x512xf32>
    %16 = vector.shape_cast %15 : vector<1x1x512xf32> to vector<1x512xf32>
    %17 = vector.broadcast %16 : vector<1x512xf32> to vector<8x512xf32>
    %18 = arith.mulf %14, %17 : vector<8x512xf32>
    %c1_17 = arith.constant 1 : index
    %c0_18 = arith.constant 0 : index
    %c0_19 = arith.constant 0 : index
    %19 = vector.load %arg3[%c1_17, %c0_18, %c0_19] : memref<27x8x8xf32, #tpu.memory_space<vmem>>, vector<1x8x8xf32>
    %20 = vector.shape_cast %19 : vector<1x8x8xf32> to vector<8x8xf32>
    %cst_20 = arith.constant dense<0.000000e+00> : vector<8x512xf32>
    %21 = tpu.matmul %20, %18, %cst_20 {dimension_numbers = #tpu.dot_dimension_numbers<[1], [0], [0], [1], [0, 0, 1, 1], [], []>} : vector<8x8xf32>, vector<8x512xf32>, vector<8x512xf32> -> vector<8x512xf32>
    %22 = arith.addf %13, %21 : vector<8x512xf32>
    %c0_21 = arith.constant 0 : index
    %c57 = arith.constant 57 : index
    %23 = vector.load %arg10[%c0_21, %c57] : memref<8x768xf32, #tpu.memory_space<vmem>>, vector<8x512xf32>
    %c2 = arith.constant 2 : index
    %c0_22 = arith.constant 0 : index
    %c0_23 = arith.constant 0 : index
    %24 = vector.load %arg1[%c2, %c0_22, %c0_23] : memref<27x1x512xf32, #tpu.memory_space<vmem>>, vector<1x1x512xf32>
    %25 = vector.shape_cast %24 : vector<1x1x512xf32> to vector<1x512xf32>
    %26 = vector.broadcast %25 : vector<1x512xf32> to vector<8x512xf32>
    %27 = arith.mulf %23, %26 : vector<8x512xf32>
    %c2_24 = arith.constant 2 : index
    %c0_25 = arith.constant 0 : index
    %c0_26 = arith.constant 0 : index
    %28 = vector.load %arg3[%c2_24, %c0_25, %c0_26] : memref<27x8x8xf32, #tpu.memory_space<vmem>>, vector<1x8x8xf32>
    %29 = vector.shape_cast %28 : vector<1x8x8xf32> to vector<8x8xf32>
    %cst_27 = arith.constant dense<0.000000e+00> : vector<8x512xf32>
    %30 = tpu.matmul %29, %27, %cst_27 {dimension_numbers = #tpu.dot_dimension_numbers<[1], [0], [0], [1], [0, 0, 1, 1], [], []>} : vector<8x8xf32>, vector<8x512xf32>, vector<8x512xf32> -> vector<8x512xf32>
    %31 = arith.addf %22, %30 : vector<8x512xf32>
    %c0_28 = arith.constant 0 : index
    %c63 = arith.constant 63 : index
    %32 = vector.load %arg10[%c0_28, %c63] : memref<8x768xf32, #tpu.memory_space<vmem>>, vector<8x512xf32>
    %c3 = arith.constant 3 : index
    %c0_29 = arith.constant 0 : index
    %c0_30 = arith.constant 0 : index
    %33 = vector.load %arg1[%c3, %c0_29, %c0_30] : memref<27x1x512xf32, #tpu.memory_space<vmem>>, vector<1x1x512xf32>
    %34 = vector.shape_cast %33 : vector<1x1x512xf32> to vector<1x512xf32>
    %35 = vector.broadcast %34 : vector<1x512xf32> to vector<8x512xf32>
    %36 = arith.mulf %32, %35 : vector<8x512xf32>
    %c3_31 = arith.constant 3 : index
    %c0_32 = arith.constant 0 : index
    %c0_33 = arith.constant 0 : index
    %37 = vector.load %arg3[%c3_31, %c0_32, %c0_33] : memref<27x8x8xf32, #tpu.memory_space<vmem>>, vector<1x8x8xf32>
    %38 = vector.shape_cast %37 : vector<1x8x8xf32> to vector<8x8xf32>
    %cst_34 = arith.constant dense<0.000000e+00> : vector<8x512xf32>
    %39 = tpu.matmul %38, %36, %cst_34 {dimension_numbers = #tpu.dot_dimension_numbers<[1], [0], [0], [1], [0, 0, 1, 1], [], []>} : vector<8x8xf32>, vector<8x512xf32>, vector<8x512xf32> -> vector<8x512xf32>
    %40 = arith.addf %31, %39 : vector<8x512xf32>
    %c0_35 = arith.constant 0 : index
    %c64 = arith.constant 64 : index
    %41 = vector.load %arg10[%c0_35, %c64] : memref<8x768xf32, #tpu.memory_space<vmem>>, vector<8x512xf32>
    %c4 = arith.constant 4 : index
    %c0_36 = arith.constant 0 : index
    %c0_37 = arith.constant 0 : index
    %42 = vector.load %arg1[%c4, %c0_36, %c0_37] : memref<27x1x512xf32, #tpu.memory_space<vmem>>, vector<1x1x512xf32>
    %43 = vector.shape_cast %42 : vector<1x1x512xf32> to vector<1x512xf32>
    %44 = vector.broadcast %43 : vector<1x512xf32> to vector<8x512xf32>
    %45 = arith.mulf %41, %44 : vector<8x512xf32>
    %c4_38 = arith.constant 4 : index
    %c0_39 = arith.constant 0 : index
    %c0_40 = arith.constant 0 : index
    %46 = vector.load %arg3[%c4_38, %c0_39, %c0_40] : memref<27x8x8xf32, #tpu.memory_space<vmem>>, vector<1x8x8xf32>
    %47 = vector.shape_cast %46 : vector<1x8x8xf32> to vector<8x8xf32>
    %cst_41 = arith.constant dense<0.000000e+00> : vector<8x512xf32>
    %48 = tpu.matmul %47, %45, %cst_41 {dimension_numbers = #tpu.dot_dimension_numbers<[1], [0], [0], [1], [0, 0, 1, 1], [], []>} : vector<8x8xf32>, vector<8x512xf32>, vector<8x512xf32> -> vector<8x512xf32>
    %49 = arith.addf %40, %48 : vector<8x512xf32>
    %c0_42 = arith.constant 0 : index
    %c65 = arith.constant 65 : index
    %50 = vector.load %arg10[%c0_42, %c65] : memref<8x768xf32, #tpu.memory_space<vmem>>, vector<8x512xf32>
    %c5 = arith.constant 5 : index
    %c0_43 = arith.constant 0 : index
    %c0_44 = arith.constant 0 : index
    %51 = vector.load %arg1[%c5, %c0_43, %c0_44] : memref<27x1x512xf32, #tpu.memory_space<vmem>>, vector<1x1x512xf32>
    %52 = vector.shape_cast %51 : vector<1x1x512xf32> to vector<1x512xf32>
    %53 = vector.broadcast %52 : vector<1x512xf32> to vector<8x512xf32>
    %54 = arith.mulf %50, %53 : vector<8x512xf32>
    %c5_45 = arith.constant 5 : index
    %c0_46 = arith.constant 0 : index
    %c0_47 = arith.constant 0 : index
    %55 = vector.load %arg3[%c5_45, %c0_46, %c0_47] : memref<27x8x8xf32, #tpu.memory_space<vmem>>, vector<1x8x8xf32>
    %56 = vector.shape_cast %55 : vector<1x8x8xf32> to vector<8x8xf32>
    %cst_48 = arith.constant dense<0.000000e+00> : vector<8x512xf32>
    %57 = tpu.matmul %56, %54, %cst_48 {dimension_numbers = #tpu.dot_dimension_numbers<[1], [0], [0], [1], [0, 0, 1, 1], [], []>} : vector<8x8xf32>, vector<8x512xf32>, vector<8x512xf32> -> vector<8x512xf32>
    %58 = arith.addf %49, %57 : vector<8x512xf32>
    %c0_49 = arith.constant 0 : index
    %c71 = arith.constant 71 : index
    %59 = vector.load %arg10[%c0_49, %c71] : memref<8x768xf32, #tpu.memory_space<vmem>>, vector<8x512xf32>
    %c6 = arith.constant 6 : index
    %c0_50 = arith.constant 0 : index
    %c0_51 = arith.constant 0 : index
    %60 = vector.load %arg1[%c6, %c0_50, %c0_51] : memref<27x1x512xf32, #tpu.memory_space<vmem>>, vector<1x1x512xf32>
    %61 = vector.shape_cast %60 : vector<1x1x512xf32> to vector<1x512xf32>
    %62 = vector.broadcast %61 : vector<1x512xf32> to vector<8x512xf32>
    %63 = arith.mulf %59, %62 : vector<8x512xf32>
    %c6_52 = arith.constant 6 : index
    %c0_53 = arith.constant 0 : index
    %c0_54 = arith.constant 0 : index
    %64 = vector.load %arg3[%c6_52, %c0_53, %c0_54] : memref<27x8x8xf32, #tpu.memory_space<vmem>>, vector<1x8x8xf32>
    %65 = vector.shape_cast %64 : vector<1x8x8xf32> to vector<8x8xf32>
    %cst_55 = arith.constant dense<0.000000e+00> : vector<8x512xf32>
    %66 = tpu.matmul %65, %63, %cst_55 {dimension_numbers = #tpu.dot_dimension_numbers<[1], [0], [0], [1], [0, 0, 1, 1], [], []>} : vector<8x8xf32>, vector<8x512xf32>, vector<8x512xf32> -> vector<8x512xf32>
    %67 = arith.addf %58, %66 : vector<8x512xf32>
    %c0_56 = arith.constant 0 : index
    %c72 = arith.constant 72 : index
    %68 = vector.load %arg10[%c0_56, %c72] : memref<8x768xf32, #tpu.memory_space<vmem>>, vector<8x512xf32>
    %c7 = arith.constant 7 : index
    %c0_57 = arith.constant 0 : index
    %c0_58 = arith.constant 0 : index
    %69 = vector.load %arg1[%c7, %c0_57, %c0_58] : memref<27x1x512xf32, #tpu.memory_space<vmem>>, vector<1x1x512xf32>
    %70 = vector.shape_cast %69 : vector<1x1x512xf32> to vector<1x512xf32>
    %71 = vector.broadcast %70 : vector<1x512xf32> to vector<8x512xf32>
    %72 = arith.mulf %68, %71 : vector<8x512xf32>
    %c7_59 = arith.constant 7 : index
    %c0_60 = arith.constant 0 : index
    %c0_61 = arith.constant 0 : index
    %73 = vector.load %arg3[%c7_59, %c0_60, %c0_61] : memref<27x8x8xf32, #tpu.memory_space<vmem>>, vector<1x8x8xf32>
    %74 = vector.shape_cast %73 : vector<1x8x8xf32> to vector<8x8xf32>
    %cst_62 = arith.constant dense<0.000000e+00> : vector<8x512xf32>
    %75 = tpu.matmul %74, %72, %cst_62 {dimension_numbers = #tpu.dot_dimension_numbers<[1], [0], [0], [1], [0, 0, 1, 1], [], []>} : vector<8x8xf32>, vector<8x512xf32>, vector<8x512xf32> -> vector<8x512xf32>
    %76 = arith.addf %67, %75 : vector<8x512xf32>
    %c0_63 = arith.constant 0 : index
    %c73 = arith.constant 73 : index
    %77 = vector.load %arg10[%c0_63, %c73] : memref<8x768xf32, #tpu.memory_space<vmem>>, vector<8x512xf32>
    %c8 = arith.constant 8 : index
    %c0_64 = arith.constant 0 : index
    %c0_65 = arith.constant 0 : index
    %78 = vector.load %arg1[%c8, %c0_64, %c0_65] : memref<27x1x512xf32, #tpu.memory_space<vmem>>, vector<1x1x512xf32>
    %79 = vector.shape_cast %78 : vector<1x1x512xf32> to vector<1x512xf32>
    %80 = vector.broadcast %79 : vector<1x512xf32> to vector<8x512xf32>
    %81 = arith.mulf %77, %80 : vector<8x512xf32>
    %c8_66 = arith.constant 8 : index
    %c0_67 = arith.constant 0 : index
    %c0_68 = arith.constant 0 : index
    %82 = vector.load %arg3[%c8_66, %c0_67, %c0_68] : memref<27x8x8xf32, #tpu.memory_space<vmem>>, vector<1x8x8xf32>
    %83 = vector.shape_cast %82 : vector<1x8x8xf32> to vector<8x8xf32>
    %cst_69 = arith.constant dense<0.000000e+00> : vector<8x512xf32>
    %84 = tpu.matmul %83, %81, %cst_69 {dimension_numbers = #tpu.dot_dimension_numbers<[1], [0], [0], [1], [0, 0, 1, 1], [], []>} : vector<8x8xf32>, vector<8x512xf32>, vector<8x512xf32> -> vector<8x512xf32>
    %85 = arith.addf %76, %84 : vector<8x512xf32>
    %c0_70 = arith.constant 0 : index
    %c119 = arith.constant 119 : index
    %86 = vector.load %arg10[%c0_70, %c119] : memref<8x768xf32, #tpu.memory_space<vmem>>, vector<8x512xf32>
    %c9 = arith.constant 9 : index
    %c0_71 = arith.constant 0 : index
    %c0_72 = arith.constant 0 : index
    %87 = vector.load %arg1[%c9, %c0_71, %c0_72] : memref<27x1x512xf32, #tpu.memory_space<vmem>>, vector<1x1x512xf32>
    %88 = vector.shape_cast %87 : vector<1x1x512xf32> to vector<1x512xf32>
    %89 = vector.broadcast %88 : vector<1x512xf32> to vector<8x512xf32>
    %90 = arith.mulf %86, %89 : vector<8x512xf32>
    %c9_73 = arith.constant 9 : index
    %c0_74 = arith.constant 0 : index
    %c0_75 = arith.constant 0 : index
    %91 = vector.load %arg3[%c9_73, %c0_74, %c0_75] : memref<27x8x8xf32, #tpu.memory_space<vmem>>, vector<1x8x8xf32>
    %92 = vector.shape_cast %91 : vector<1x8x8xf32> to vector<8x8xf32>
    %cst_76 = arith.constant dense<0.000000e+00> : vector<8x512xf32>
    %93 = tpu.matmul %92, %90, %cst_76 {dimension_numbers = #tpu.dot_dimension_numbers<[1], [0], [0], [1], [0, 0, 1, 1], [], []>} : vector<8x8xf32>, vector<8x512xf32>, vector<8x512xf32> -> vector<8x512xf32>
    %94 = arith.addf %85, %93 : vector<8x512xf32>
    %c0_77 = arith.constant 0 : index
    %c120 = arith.constant 120 : index
    %95 = vector.load %arg10[%c0_77, %c120] : memref<8x768xf32, #tpu.memory_space<vmem>>, vector<8x512xf32>
    %c10 = arith.constant 10 : index
    %c0_78 = arith.constant 0 : index
    %c0_79 = arith.constant 0 : index
    %96 = vector.load %arg1[%c10, %c0_78, %c0_79] : memref<27x1x512xf32, #tpu.memory_space<vmem>>, vector<1x1x512xf32>
    %97 = vector.shape_cast %96 : vector<1x1x512xf32> to vector<1x512xf32>
    %98 = vector.broadcast %97 : vector<1x512xf32> to vector<8x512xf32>
    %99 = arith.mulf %95, %98 : vector<8x512xf32>
    %c10_80 = arith.constant 10 : index
    %c0_81 = arith.constant 0 : index
    %c0_82 = arith.constant 0 : index
    %100 = vector.load %arg3[%c10_80, %c0_81, %c0_82] : memref<27x8x8xf32, #tpu.memory_space<vmem>>, vector<1x8x8xf32>
    %101 = vector.shape_cast %100 : vector<1x8x8xf32> to vector<8x8xf32>
    %cst_83 = arith.constant dense<0.000000e+00> : vector<8x512xf32>
    %102 = tpu.matmul %101, %99, %cst_83 {dimension_numbers = #tpu.dot_dimension_numbers<[1], [0], [0], [1], [0, 0, 1, 1], [], []>} : vector<8x8xf32>, vector<8x512xf32>, vector<8x512xf32> -> vector<8x512xf32>
    %103 = arith.addf %94, %102 : vector<8x512xf32>
    %c0_84 = arith.constant 0 : index
    %c121 = arith.constant 121 : index
    %104 = vector.load %arg10[%c0_84, %c121] : memref<8x768xf32, #tpu.memory_space<vmem>>, vector<8x512xf32>
    %c11 = arith.constant 11 : index
    %c0_85 = arith.constant 0 : index
    %c0_86 = arith.constant 0 : index
    %105 = vector.load %arg1[%c11, %c0_85, %c0_86] : memref<27x1x512xf32, #tpu.memory_space<vmem>>, vector<1x1x512xf32>
    %106 = vector.shape_cast %105 : vector<1x1x512xf32> to vector<1x512xf32>
    %107 = vector.broadcast %106 : vector<1x512xf32> to vector<8x512xf32>
    %108 = arith.mulf %104, %107 : vector<8x512xf32>
    %c11_87 = arith.constant 11 : index
    %c0_88 = arith.constant 0 : index
    %c0_89 = arith.constant 0 : index
    %109 = vector.load %arg3[%c11_87, %c0_88, %c0_89] : memref<27x8x8xf32, #tpu.memory_space<vmem>>, vector<1x8x8xf32>
    %110 = vector.shape_cast %109 : vector<1x8x8xf32> to vector<8x8xf32>
    %cst_90 = arith.constant dense<0.000000e+00> : vector<8x512xf32>
    %111 = tpu.matmul %110, %108, %cst_90 {dimension_numbers = #tpu.dot_dimension_numbers<[1], [0], [0], [1], [0, 0, 1, 1], [], []>} : vector<8x8xf32>, vector<8x512xf32>, vector<8x512xf32> -> vector<8x512xf32>
    %112 = arith.addf %103, %111 : vector<8x512xf32>
    %c0_91 = arith.constant 0 : index
    %c127 = arith.constant 127 : index
    %113 = vector.load %arg10[%c0_91, %c127] : memref<8x768xf32, #tpu.memory_space<vmem>>, vector<8x512xf32>
    %c12 = arith.constant 12 : index
    %c0_92 = arith.constant 0 : index
    %c0_93 = arith.constant 0 : index
    %114 = vector.load %arg1[%c12, %c0_92, %c0_93] : memref<27x1x512xf32, #tpu.memory_space<vmem>>, vector<1x1x512xf32>
    %115 = vector.shape_cast %114 : vector<1x1x512xf32> to vector<1x512xf32>
    %116 = vector.broadcast %115 : vector<1x512xf32> to vector<8x512xf32>
    %117 = arith.mulf %113, %116 : vector<8x512xf32>
    %c12_94 = arith.constant 12 : index
    %c0_95 = arith.constant 0 : index
    %c0_96 = arith.constant 0 : index
    %118 = vector.load %arg3[%c12_94, %c0_95, %c0_96] : memref<27x8x8xf32, #tpu.memory_space<vmem>>, vector<1x8x8xf32>
    %119 = vector.shape_cast %118 : vector<1x8x8xf32> to vector<8x8xf32>
    %cst_97 = arith.constant dense<0.000000e+00> : vector<8x512xf32>
    %120 = tpu.matmul %119, %117, %cst_97 {dimension_numbers = #tpu.dot_dimension_numbers<[1], [0], [0], [1], [0, 0, 1, 1], [], []>} : vector<8x8xf32>, vector<8x512xf32>, vector<8x512xf32> -> vector<8x512xf32>
    %121 = arith.addf %112, %120 : vector<8x512xf32>
    %c0_98 = arith.constant 0 : index
    %c128_99 = arith.constant 128 : index
    %122 = vector.load %arg10[%c0_98, %c128_99] : memref<8x768xf32, #tpu.memory_space<vmem>>, vector<8x512xf32>
    %c13 = arith.constant 13 : index
    %c0_100 = arith.constant 0 : index
    %c0_101 = arith.constant 0 : index
    %123 = vector.load %arg3[%c13, %c0_100, %c0_101] : memref<27x8x8xf32, #tpu.memory_space<vmem>>, vector<1x8x8xf32>
    %124 = vector.shape_cast %123 : vector<1x8x8xf32> to vector<8x8xf32>
    %cst_102 = arith.constant dense<0.000000e+00> : vector<8x512xf32>
    %125 = tpu.matmul %124, %122, %cst_102 {dimension_numbers = #tpu.dot_dimension_numbers<[1], [0], [0], [1], [0, 0, 1, 1], [], []>} : vector<8x8xf32>, vector<8x512xf32>, vector<8x512xf32> -> vector<8x512xf32>
    %126 = arith.addf %121, %125 : vector<8x512xf32>
    %c0_103 = arith.constant 0 : index
    %c129 = arith.constant 129 : index
    %127 = vector.load %arg10[%c0_103, %c129] : memref<8x768xf32, #tpu.memory_space<vmem>>, vector<8x512xf32>
    %c14 = arith.constant 14 : index
    %c0_104 = arith.constant 0 : index
    %c0_105 = arith.constant 0 : index
    %128 = vector.load %arg1[%c14, %c0_104, %c0_105] : memref<27x1x512xf32, #tpu.memory_space<vmem>>, vector<1x1x512xf32>
    %129 = vector.shape_cast %128 : vector<1x1x512xf32> to vector<1x512xf32>
    %130 = vector.broadcast %129 : vector<1x512xf32> to vector<8x512xf32>
    %131 = arith.mulf %127, %130 : vector<8x512xf32>
    %c14_106 = arith.constant 14 : index
    %c0_107 = arith.constant 0 : index
    %c0_108 = arith.constant 0 : index
    %132 = vector.load %arg3[%c14_106, %c0_107, %c0_108] : memref<27x8x8xf32, #tpu.memory_space<vmem>>, vector<1x8x8xf32>
    %133 = vector.shape_cast %132 : vector<1x8x8xf32> to vector<8x8xf32>
    %cst_109 = arith.constant dense<0.000000e+00> : vector<8x512xf32>
    %134 = tpu.matmul %133, %131, %cst_109 {dimension_numbers = #tpu.dot_dimension_numbers<[1], [0], [0], [1], [0, 0, 1, 1], [], []>} : vector<8x8xf32>, vector<8x512xf32>, vector<8x512xf32> -> vector<8x512xf32>
    %135 = arith.addf %126, %134 : vector<8x512xf32>
    %c0_110 = arith.constant 0 : index
    %c135 = arith.constant 135 : index
    %136 = vector.load %arg10[%c0_110, %c135] : memref<8x768xf32, #tpu.memory_space<vmem>>, vector<8x512xf32>
    %c15 = arith.constant 15 : index
    %c0_111 = arith.constant 0 : index
    %c0_112 = arith.constant 0 : index
    %137 = vector.load %arg1[%c15, %c0_111, %c0_112] : memref<27x1x512xf32, #tpu.memory_space<vmem>>, vector<1x1x512xf32>
    %138 = vector.shape_cast %137 : vector<1x1x512xf32> to vector<1x512xf32>
    %139 = vector.broadcast %138 : vector<1x512xf32> to vector<8x512xf32>
    %140 = arith.mulf %136, %139 : vector<8x512xf32>
    %c15_113 = arith.constant 15 : index
    %c0_114 = arith.constant 0 : index
    %c0_115 = arith.constant 0 : index
    %141 = vector.load %arg3[%c15_113, %c0_114, %c0_115] : memref<27x8x8xf32, #tpu.memory_space<vmem>>, vector<1x8x8xf32>
    %142 = vector.shape_cast %141 : vector<1x8x8xf32> to vector<8x8xf32>
    %cst_116 = arith.constant dense<0.000000e+00> : vector<8x512xf32>
    %143 = tpu.matmul %142, %140, %cst_116 {dimension_numbers = #tpu.dot_dimension_numbers<[1], [0], [0], [1], [0, 0, 1, 1], [], []>} : vector<8x8xf32>, vector<8x512xf32>, vector<8x512xf32> -> vector<8x512xf32>
    %144 = arith.addf %135, %143 : vector<8x512xf32>
    %c0_117 = arith.constant 0 : index
    %c136 = arith.constant 136 : index
    %145 = vector.load %arg10[%c0_117, %c136] : memref<8x768xf32, #tpu.memory_space<vmem>>, vector<8x512xf32>
    %c16 = arith.constant 16 : index
    %c0_118 = arith.constant 0 : index
    %c0_119 = arith.constant 0 : index
    %146 = vector.load %arg1[%c16, %c0_118, %c0_119] : memref<27x1x512xf32, #tpu.memory_space<vmem>>, vector<1x1x512xf32>
    %147 = vector.shape_cast %146 : vector<1x1x512xf32> to vector<1x512xf32>
    %148 = vector.broadcast %147 : vector<1x512xf32> to vector<8x512xf32>
    %149 = arith.mulf %145, %148 : vector<8x512xf32>
    %c16_120 = arith.constant 16 : index
    %c0_121 = arith.constant 0 : index
    %c0_122 = arith.constant 0 : index
    %150 = vector.load %arg3[%c16_120, %c0_121, %c0_122] : memref<27x8x8xf32, #tpu.memory_space<vmem>>, vector<1x8x8xf32>
    %151 = vector.shape_cast %150 : vector<1x8x8xf32> to vector<8x8xf32>
    %cst_123 = arith.constant dense<0.000000e+00> : vector<8x512xf32>
    %152 = tpu.matmul %151, %149, %cst_123 {dimension_numbers = #tpu.dot_dimension_numbers<[1], [0], [0], [1], [0, 0, 1, 1], [], []>} : vector<8x8xf32>, vector<8x512xf32>, vector<8x512xf32> -> vector<8x512xf32>
    %153 = arith.addf %144, %152 : vector<8x512xf32>
    %c0_124 = arith.constant 0 : index
    %c137 = arith.constant 137 : index
    %154 = vector.load %arg10[%c0_124, %c137] : memref<8x768xf32, #tpu.memory_space<vmem>>, vector<8x512xf32>
    %c17 = arith.constant 17 : index
    %c0_125 = arith.constant 0 : index
    %c0_126 = arith.constant 0 : index
    %155 = vector.load %arg1[%c17, %c0_125, %c0_126] : memref<27x1x512xf32, #tpu.memory_space<vmem>>, vector<1x1x512xf32>
    %156 = vector.shape_cast %155 : vector<1x1x512xf32> to vector<1x512xf32>
    %157 = vector.broadcast %156 : vector<1x512xf32> to vector<8x512xf32>
    %158 = arith.mulf %154, %157 : vector<8x512xf32>
    %c17_127 = arith.constant 17 : index
    %c0_128 = arith.constant 0 : index
    %c0_129 = arith.constant 0 : index
    %159 = vector.load %arg3[%c17_127, %c0_128, %c0_129] : memref<27x8x8xf32, #tpu.memory_space<vmem>>, vector<1x8x8xf32>
    %160 = vector.shape_cast %159 : vector<1x8x8xf32> to vector<8x8xf32>
    %cst_130 = arith.constant dense<0.000000e+00> : vector<8x512xf32>
    %161 = tpu.matmul %160, %158, %cst_130 {dimension_numbers = #tpu.dot_dimension_numbers<[1], [0], [0], [1], [0, 0, 1, 1], [], []>} : vector<8x8xf32>, vector<8x512xf32>, vector<8x512xf32> -> vector<8x512xf32>
    %162 = arith.addf %153, %161 : vector<8x512xf32>
    %c0_131 = arith.constant 0 : index
    %c183 = arith.constant 183 : index
    %163 = vector.load %arg10[%c0_131, %c183] : memref<8x768xf32, #tpu.memory_space<vmem>>, vector<8x512xf32>
    %c18 = arith.constant 18 : index
    %c0_132 = arith.constant 0 : index
    %c0_133 = arith.constant 0 : index
    %164 = vector.load %arg1[%c18, %c0_132, %c0_133] : memref<27x1x512xf32, #tpu.memory_space<vmem>>, vector<1x1x512xf32>
    %165 = vector.shape_cast %164 : vector<1x1x512xf32> to vector<1x512xf32>
    %166 = vector.broadcast %165 : vector<1x512xf32> to vector<8x512xf32>
    %167 = arith.mulf %163, %166 : vector<8x512xf32>
    %c18_134 = arith.constant 18 : index
    %c0_135 = arith.constant 0 : index
    %c0_136 = arith.constant 0 : index
    %168 = vector.load %arg3[%c18_134, %c0_135, %c0_136] : memref<27x8x8xf32, #tpu.memory_space<vmem>>, vector<1x8x8xf32>
    %169 = vector.shape_cast %168 : vector<1x8x8xf32> to vector<8x8xf32>
    %cst_137 = arith.constant dense<0.000000e+00> : vector<8x512xf32>
    %170 = tpu.matmul %169, %167, %cst_137 {dimension_numbers = #tpu.dot_dimension_numbers<[1], [0], [0], [1], [0, 0, 1, 1], [], []>} : vector<8x8xf32>, vector<8x512xf32>, vector<8x512xf32> -> vector<8x512xf32>
    %171 = arith.addf %162, %170 : vector<8x512xf32>
    %c0_138 = arith.constant 0 : index
    %c184 = arith.constant 184 : index
    %172 = vector.load %arg10[%c0_138, %c184] : memref<8x768xf32, #tpu.memory_space<vmem>>, vector<8x512xf32>
    %c19 = arith.constant 19 : index
    %c0_139 = arith.constant 0 : index
    %c0_140 = arith.constant 0 : index
    %173 = vector.load %arg1[%c19, %c0_139, %c0_140] : memref<27x1x512xf32, #tpu.memory_space<vmem>>, vector<1x1x512xf32>
    %174 = vector.shape_cast %173 : vector<1x1x512xf32> to vector<1x512xf32>
    %175 = vector.broadcast %174 : vector<1x512xf32> to vector<8x512xf32>
    %176 = arith.mulf %172, %175 : vector<8x512xf32>
    %c19_141 = arith.constant 19 : index
    %c0_142 = arith.constant 0 : index
    %c0_143 = arith.constant 0 : index
    %177 = vector.load %arg3[%c19_141, %c0_142, %c0_143] : memref<27x8x8xf32, #tpu.memory_space<vmem>>, vector<1x8x8xf32>
    %178 = vector.shape_cast %177 : vector<1x8x8xf32> to vector<8x8xf32>
    %cst_144 = arith.constant dense<0.000000e+00> : vector<8x512xf32>
    %179 = tpu.matmul %178, %176, %cst_144 {dimension_numbers = #tpu.dot_dimension_numbers<[1], [0], [0], [1], [0, 0, 1, 1], [], []>} : vector<8x8xf32>, vector<8x512xf32>, vector<8x512xf32> -> vector<8x512xf32>
    %180 = arith.addf %171, %179 : vector<8x512xf32>
    %c0_145 = arith.constant 0 : index
    %c185 = arith.constant 185 : index
    %181 = vector.load %arg10[%c0_145, %c185] : memref<8x768xf32, #tpu.memory_space<vmem>>, vector<8x512xf32>
    %c20 = arith.constant 20 : index
    %c0_146 = arith.constant 0 : index
    %c0_147 = arith.constant 0 : index
    %182 = vector.load %arg1[%c20, %c0_146, %c0_147] : memref<27x1x512xf32, #tpu.memory_space<vmem>>, vector<1x1x512xf32>
    %183 = vector.shape_cast %182 : vector<1x1x512xf32> to vector<1x512xf32>
    %184 = vector.broadcast %183 : vector<1x512xf32> to vector<8x512xf32>
    %185 = arith.mulf %181, %184 : vector<8x512xf32>
    %c20_148 = arith.constant 20 : index
    %c0_149 = arith.constant 0 : index
    %c0_150 = arith.constant 0 : index
    %186 = vector.load %arg3[%c20_148, %c0_149, %c0_150] : memref<27x8x8xf32, #tpu.memory_space<vmem>>, vector<1x8x8xf32>
    %187 = vector.shape_cast %186 : vector<1x8x8xf32> to vector<8x8xf32>
    %cst_151 = arith.constant dense<0.000000e+00> : vector<8x512xf32>
    %188 = tpu.matmul %187, %185, %cst_151 {dimension_numbers = #tpu.dot_dimension_numbers<[1], [0], [0], [1], [0, 0, 1, 1], [], []>} : vector<8x8xf32>, vector<8x512xf32>, vector<8x512xf32> -> vector<8x512xf32>
    %189 = arith.addf %180, %188 : vector<8x512xf32>
    %c0_152 = arith.constant 0 : index
    %c191 = arith.constant 191 : index
    %190 = vector.load %arg10[%c0_152, %c191] : memref<8x768xf32, #tpu.memory_space<vmem>>, vector<8x512xf32>
    %c21 = arith.constant 21 : index
    %c0_153 = arith.constant 0 : index
    %c0_154 = arith.constant 0 : index
    %191 = vector.load %arg1[%c21, %c0_153, %c0_154] : memref<27x1x512xf32, #tpu.memory_space<vmem>>, vector<1x1x512xf32>
    %192 = vector.shape_cast %191 : vector<1x1x512xf32> to vector<1x512xf32>
    %193 = vector.broadcast %192 : vector<1x512xf32> to vector<8x512xf32>
    %194 = arith.mulf %190, %193 : vector<8x512xf32>
    %c21_155 = arith.constant 21 : index
    %c0_156 = arith.constant 0 : index
    %c0_157 = arith.constant 0 : index
    %195 = vector.load %arg3[%c21_155, %c0_156, %c0_157] : memref<27x8x8xf32, #tpu.memory_space<vmem>>, vector<1x8x8xf32>
    %196 = vector.shape_cast %195 : vector<1x8x8xf32> to vector<8x8xf32>
    %cst_158 = arith.constant dense<0.000000e+00> : vector<8x512xf32>
    %197 = tpu.matmul %196, %194, %cst_158 {dimension_numbers = #tpu.dot_dimension_numbers<[1], [0], [0], [1], [0, 0, 1, 1], [], []>} : vector<8x8xf32>, vector<8x512xf32>, vector<8x512xf32> -> vector<8x512xf32>
    %198 = arith.addf %189, %197 : vector<8x512xf32>
    %c0_159 = arith.constant 0 : index
    %c192 = arith.constant 192 : index
    %199 = vector.load %arg10[%c0_159, %c192] : memref<8x768xf32, #tpu.memory_space<vmem>>, vector<8x512xf32>
    %c22 = arith.constant 22 : index
    %c0_160 = arith.constant 0 : index
    %c0_161 = arith.constant 0 : index
    %200 = vector.load %arg1[%c22, %c0_160, %c0_161] : memref<27x1x512xf32, #tpu.memory_space<vmem>>, vector<1x1x512xf32>
    %201 = vector.shape_cast %200 : vector<1x1x512xf32> to vector<1x512xf32>
    %202 = vector.broadcast %201 : vector<1x512xf32> to vector<8x512xf32>
    %203 = arith.mulf %199, %202 : vector<8x512xf32>
    %c22_162 = arith.constant 22 : index
    %c0_163 = arith.constant 0 : index
    %c0_164 = arith.constant 0 : index
    %204 = vector.load %arg3[%c22_162, %c0_163, %c0_164] : memref<27x8x8xf32, #tpu.memory_space<vmem>>, vector<1x8x8xf32>
    %205 = vector.shape_cast %204 : vector<1x8x8xf32> to vector<8x8xf32>
    %cst_165 = arith.constant dense<0.000000e+00> : vector<8x512xf32>
    %206 = tpu.matmul %205, %203, %cst_165 {dimension_numbers = #tpu.dot_dimension_numbers<[1], [0], [0], [1], [0, 0, 1, 1], [], []>} : vector<8x8xf32>, vector<8x512xf32>, vector<8x512xf32> -> vector<8x512xf32>
    %207 = arith.addf %198, %206 : vector<8x512xf32>
    %c0_166 = arith.constant 0 : index
    %c193 = arith.constant 193 : index
    %208 = vector.load %arg10[%c0_166, %c193] : memref<8x768xf32, #tpu.memory_space<vmem>>, vector<8x512xf32>
    %c23 = arith.constant 23 : index
    %c0_167 = arith.constant 0 : index
    %c0_168 = arith.constant 0 : index
    %209 = vector.load %arg1[%c23, %c0_167, %c0_168] : memref<27x1x512xf32, #tpu.memory_space<vmem>>, vector<1x1x512xf32>
    %210 = vector.shape_cast %209 : vector<1x1x512xf32> to vector<1x512xf32>
    %211 = vector.broadcast %210 : vector<1x512xf32> to vector<8x512xf32>
    %212 = arith.mulf %208, %211 : vector<8x512xf32>
    %c23_169 = arith.constant 23 : index
    %c0_170 = arith.constant 0 : index
    %c0_171 = arith.constant 0 : index
    %213 = vector.load %arg3[%c23_169, %c0_170, %c0_171] : memref<27x8x8xf32, #tpu.memory_space<vmem>>, vector<1x8x8xf32>
    %214 = vector.shape_cast %213 : vector<1x8x8xf32> to vector<8x8xf32>
    %cst_172 = arith.constant dense<0.000000e+00> : vector<8x512xf32>
    %215 = tpu.matmul %214, %212, %cst_172 {dimension_numbers = #tpu.dot_dimension_numbers<[1], [0], [0], [1], [0, 0, 1, 1], [], []>} : vector<8x8xf32>, vector<8x512xf32>, vector<8x512xf32> -> vector<8x512xf32>
    %216 = arith.addf %207, %215 : vector<8x512xf32>
    %c0_173 = arith.constant 0 : index
    %c199 = arith.constant 199 : index
    %217 = vector.load %arg10[%c0_173, %c199] : memref<8x768xf32, #tpu.memory_space<vmem>>, vector<8x512xf32>
    %c24 = arith.constant 24 : index
    %c0_174 = arith.constant 0 : index
    %c0_175 = arith.constant 0 : index
    %218 = vector.load %arg1[%c24, %c0_174, %c0_175] : memref<27x1x512xf32, #tpu.memory_space<vmem>>, vector<1x1x512xf32>
    %219 = vector.shape_cast %218 : vector<1x1x512xf32> to vector<1x512xf32>
    %220 = vector.broadcast %219 : vector<1x512xf32> to vector<8x512xf32>
    %221 = arith.mulf %217, %220 : vector<8x512xf32>
    %c24_176 = arith.constant 24 : index
    %c0_177 = arith.constant 0 : index
    %c0_178 = arith.constant 0 : index
    %222 = vector.load %arg3[%c24_176, %c0_177, %c0_178] : memref<27x8x8xf32, #tpu.memory_space<vmem>>, vector<1x8x8xf32>
    %223 = vector.shape_cast %222 : vector<1x8x8xf32> to vector<8x8xf32>
    %cst_179 = arith.constant dense<0.000000e+00> : vector<8x512xf32>
    %224 = tpu.matmul %223, %221, %cst_179 {dimension_numbers = #tpu.dot_dimension_numbers<[1], [0], [0], [1], [0, 0, 1, 1], [], []>} : vector<8x8xf32>, vector<8x512xf32>, vector<8x512xf32> -> vector<8x512xf32>
    %225 = arith.addf %216, %224 : vector<8x512xf32>
    %c0_180 = arith.constant 0 : index
    %c200 = arith.constant 200 : index
    %226 = vector.load %arg10[%c0_180, %c200] : memref<8x768xf32, #tpu.memory_space<vmem>>, vector<8x512xf32>
    %c25 = arith.constant 25 : index
    %c0_181 = arith.constant 0 : index
    %c0_182 = arith.constant 0 : index
    %227 = vector.load %arg1[%c25, %c0_181, %c0_182] : memref<27x1x512xf32, #tpu.memory_space<vmem>>, vector<1x1x512xf32>
    %228 = vector.shape_cast %227 : vector<1x1x512xf32> to vector<1x512xf32>
    %229 = vector.broadcast %228 : vector<1x512xf32> to vector<8x512xf32>
    %230 = arith.mulf %226, %229 : vector<8x512xf32>
    %c25_183 = arith.constant 25 : index
    %c0_184 = arith.constant 0 : index
    %c0_185 = arith.constant 0 : index
    %231 = vector.load %arg3[%c25_183, %c0_184, %c0_185] : memref<27x8x8xf32, #tpu.memory_space<vmem>>, vector<1x8x8xf32>
    %232 = vector.shape_cast %231 : vector<1x8x8xf32> to vector<8x8xf32>
    %cst_186 = arith.constant dense<0.000000e+00> : vector<8x512xf32>
    %233 = tpu.matmul %232, %230, %cst_186 {dimension_numbers = #tpu.dot_dimension_numbers<[1], [0], [0], [1], [0, 0, 1, 1], [], []>} : vector<8x8xf32>, vector<8x512xf32>, vector<8x512xf32> -> vector<8x512xf32>
    %234 = arith.addf %225, %233 : vector<8x512xf32>
    %c0_187 = arith.constant 0 : index
    %c201 = arith.constant 201 : index
    %235 = vector.load %arg10[%c0_187, %c201] : memref<8x768xf32, #tpu.memory_space<vmem>>, vector<8x512xf32>
    %c26 = arith.constant 26 : index
    %c0_188 = arith.constant 0 : index
    %c0_189 = arith.constant 0 : index
    %236 = vector.load %arg1[%c26, %c0_188, %c0_189] : memref<27x1x512xf32, #tpu.memory_space<vmem>>, vector<1x1x512xf32>
    %237 = vector.shape_cast %236 : vector<1x1x512xf32> to vector<1x512xf32>
    %238 = vector.broadcast %237 : vector<1x512xf32> to vector<8x512xf32>
    %239 = arith.mulf %235, %238 : vector<8x512xf32>
    %c26_190 = arith.constant 26 : index
    %c0_191 = arith.constant 0 : index
    %c0_192 = arith.constant 0 : index
    %240 = vector.load %arg3[%c26_190, %c0_191, %c0_192] : memref<27x8x8xf32, #tpu.memory_space<vmem>>, vector<1x8x8xf32>
    %241 = vector.shape_cast %240 : vector<1x8x8xf32> to vector<8x8xf32>
    %cst_193 = arith.constant dense<0.000000e+00> : vector<8x512xf32>
    %242 = tpu.matmul %241, %239, %cst_193 {dimension_numbers = #tpu.dot_dimension_numbers<[1], [0], [0], [1], [0, 0, 1, 1], [], []>} : vector<8x8xf32>, vector<8x512xf32>, vector<8x512xf32> -> vector<8x512xf32>
    %243 = arith.addf %234, %242 : vector<8x512xf32>
    %c0_194 = arith.constant 0 : index
    %c0_195 = arith.constant 0 : index
    %244 = vector.load %arg4[%c0_194, %c0_195] : memref<8x1xf32, #tpu.memory_space<vmem>>, vector<8x1xf32>
    %245 = vector.broadcast %244 : vector<8x1xf32> to vector<8x512xf32>
    %246 = arith.addf %243, %245 : vector<8x512xf32>
    %cst_196 = arith.constant 0.000000e+00 : f32
    %247 = vector.broadcast %cst_196 : f32 to vector<8x512xf32>
    %248 = arith.cmpf ogt, %246, %247 : vector<8x512xf32>
    %cst_197 = arith.constant 2.000000e-01 : f32
    %249 = vector.broadcast %cst_197 : f32 to vector<8x512xf32>
    %250 = arith.mulf %249, %246 : vector<8x512xf32>
    %251 = arith.select %248, %246, %250 : vector<8x512xi1>, vector<8x512xf32>
    %c0_198 = arith.constant 0 : index
    %c128_199 = arith.constant 128 : index
    %252 = vector.load %arg10[%c0_198, %c128_199] : memref<8x768xf32, #tpu.memory_space<vmem>>, vector<8x512xf32>
    tpu.vector_store %arg10[%c0_198, %c128_199], %251 {strides = array<i32>} : memref<8x768xf32, #tpu.memory_space<vmem>>, vector<8x512xf32>,
    %c0_200 = arith.constant 0 : index
    %c55_201 = arith.constant 55 : index
    %253 = vector.load %arg10[%c0_200, %c55_201] : memref<8x768xf32, #tpu.memory_space<vmem>>, vector<8x512xf32>
    %c0_202 = arith.constant 0 : index
    %c0_203 = arith.constant 0 : index
    %c0_204 = arith.constant 0 : index
    %254 = vector.load %arg1[%c0_202, %c0_203, %c0_204] : memref<27x1x512xf32, #tpu.memory_space<vmem>>, vector<1x1x512xf32>
    %255 = vector.shape_cast %254 : vector<1x1x512xf32> to vector<1x512xf32>
    %256 = vector.broadcast %255 : vector<1x512xf32> to vector<8x512xf32>
    %257 = arith.mulf %253, %256 : vector<8x512xf32>
    %c0_205 = arith.constant 0 : index
    %c0_206 = arith.constant 0 : index
    %c0_207 = arith.constant 0 : index
    %258 = vector.load %arg5[%c0_205, %c0_206, %c0_207] : memref<27x8x8xf32, #tpu.memory_space<vmem>>, vector<1x8x8xf32>
    %259 = vector.shape_cast %258 : vector<1x8x8xf32> to vector<8x8xf32>
    %cst_208 = arith.constant dense<0.000000e+00> : vector<8x512xf32>
    %260 = tpu.matmul %259, %257, %cst_208 {dimension_numbers = #tpu.dot_dimension_numbers<[1], [0], [0], [1], [0, 0, 1, 1], [], []>} : vector<8x8xf32>, vector<8x512xf32>, vector<8x512xf32> -> vector<8x512xf32>
    %c0_209 = arith.constant 0 : index
    %c56_210 = arith.constant 56 : index
    %261 = vector.load %arg10[%c0_209, %c56_210] : memref<8x768xf32, #tpu.memory_space<vmem>>, vector<8x512xf32>
    %c1_211 = arith.constant 1 : index
    %c0_212 = arith.constant 0 : index
    %c0_213 = arith.constant 0 : index
    %262 = vector.load %arg1[%c1_211, %c0_212, %c0_213] : memref<27x1x512xf32, #tpu.memory_space<vmem>>, vector<1x1x512xf32>
    %263 = vector.shape_cast %262 : vector<1x1x512xf32> to vector<1x512xf32>
    %264 = vector.broadcast %263 : vector<1x512xf32> to vector<8x512xf32>
    %265 = arith.mulf %261, %264 : vector<8x512xf32>
    %c1_214 = arith.constant 1 : index
    %c0_215 = arith.constant 0 : index
    %c0_216 = arith.constant 0 : index
    %266 = vector.load %arg5[%c1_214, %c0_215, %c0_216] : memref<27x8x8xf32, #tpu.memory_space<vmem>>, vector<1x8x8xf32>
    %267 = vector.shape_cast %266 : vector<1x8x8xf32> to vector<8x8xf32>
    %cst_217 = arith.constant dense<0.000000e+00> : vector<8x512xf32>
    %268 = tpu.matmul %267, %265, %cst_217 {dimension_numbers = #tpu.dot_dimension_numbers<[1], [0], [0], [1], [0, 0, 1, 1], [], []>} : vector<8x8xf32>, vector<8x512xf32>, vector<8x512xf32> -> vector<8x512xf32>
    %269 = arith.addf %260, %268 : vector<8x512xf32>
    %c0_218 = arith.constant 0 : index
    %c57_219 = arith.constant 57 : index
    %270 = vector.load %arg10[%c0_218, %c57_219] : memref<8x768xf32, #tpu.memory_space<vmem>>, vector<8x512xf32>
    %c2_220 = arith.constant 2 : index
    %c0_221 = arith.constant 0 : index
    %c0_222 = arith.constant 0 : index
    %271 = vector.load %arg1[%c2_220, %c0_221, %c0_222] : memref<27x1x512xf32, #tpu.memory_space<vmem>>, vector<1x1x512xf32>
    %272 = vector.shape_cast %271 : vector<1x1x512xf32> to vector<1x512xf32>
    %273 = vector.broadcast %272 : vector<1x512xf32> to vector<8x512xf32>
    %274 = arith.mulf %270, %273 : vector<8x512xf32>
    %c2_223 = arith.constant 2 : index
    %c0_224 = arith.constant 0 : index
    %c0_225 = arith.constant 0 : index
    %275 = vector.load %arg5[%c2_223, %c0_224, %c0_225] : memref<27x8x8xf32, #tpu.memory_space<vmem>>, vector<1x8x8xf32>
    %276 = vector.shape_cast %275 : vector<1x8x8xf32> to vector<8x8xf32>
    %cst_226 = arith.constant dense<0.000000e+00> : vector<8x512xf32>
    %277 = tpu.matmul %276, %274, %cst_226 {dimension_numbers = #tpu.dot_dimension_numbers<[1], [0], [0], [1], [0, 0, 1, 1], [], []>} : vector<8x8xf32>, vector<8x512xf32>, vector<8x512xf32> -> vector<8x512xf32>
    %278 = arith.addf %269, %277 : vector<8x512xf32>
    %c0_227 = arith.constant 0 : index
    %c63_228 = arith.constant 63 : index
    %279 = vector.load %arg10[%c0_227, %c63_228] : memref<8x768xf32, #tpu.memory_space<vmem>>, vector<8x512xf32>
    %c3_229 = arith.constant 3 : index
    %c0_230 = arith.constant 0 : index
    %c0_231 = arith.constant 0 : index
    %280 = vector.load %arg1[%c3_229, %c0_230, %c0_231] : memref<27x1x512xf32, #tpu.memory_space<vmem>>, vector<1x1x512xf32>
    %281 = vector.shape_cast %280 : vector<1x1x512xf32> to vector<1x512xf32>
    %282 = vector.broadcast %281 : vector<1x512xf32> to vector<8x512xf32>
    %283 = arith.mulf %279, %282 : vector<8x512xf32>
    %c3_232 = arith.constant 3 : index
    %c0_233 = arith.constant 0 : index
    %c0_234 = arith.constant 0 : index
    %284 = vector.load %arg5[%c3_232, %c0_233, %c0_234] : memref<27x8x8xf32, #tpu.memory_space<vmem>>, vector<1x8x8xf32>
    %285 = vector.shape_cast %284 : vector<1x8x8xf32> to vector<8x8xf32>
    %cst_235 = arith.constant dense<0.000000e+00> : vector<8x512xf32>
    %286 = tpu.matmul %285, %283, %cst_235 {dimension_numbers = #tpu.dot_dimension_numbers<[1], [0], [0], [1], [0, 0, 1, 1], [], []>} : vector<8x8xf32>, vector<8x512xf32>, vector<8x512xf32> -> vector<8x512xf32>
    %287 = arith.addf %278, %286 : vector<8x512xf32>
    %c0_236 = arith.constant 0 : index
    %c64_237 = arith.constant 64 : index
    %288 = vector.load %arg10[%c0_236, %c64_237] : memref<8x768xf32, #tpu.memory_space<vmem>>, vector<8x512xf32>
    %c4_238 = arith.constant 4 : index
    %c0_239 = arith.constant 0 : index
    %c0_240 = arith.constant 0 : index
    %289 = vector.load %arg1[%c4_238, %c0_239, %c0_240] : memref<27x1x512xf32, #tpu.memory_space<vmem>>, vector<1x1x512xf32>
    %290 = vector.shape_cast %289 : vector<1x1x512xf32> to vector<1x512xf32>
    %291 = vector.broadcast %290 : vector<1x512xf32> to vector<8x512xf32>
    %292 = arith.mulf %288, %291 : vector<8x512xf32>
    %c4_241 = arith.constant 4 : index
    %c0_242 = arith.constant 0 : index
    %c0_243 = arith.constant 0 : index
    %293 = vector.load %arg5[%c4_241, %c0_242, %c0_243] : memref<27x8x8xf32, #tpu.memory_space<vmem>>, vector<1x8x8xf32>
    %294 = vector.shape_cast %293 : vector<1x8x8xf32> to vector<8x8xf32>
    %cst_244 = arith.constant dense<0.000000e+00> : vector<8x512xf32>
    %295 = tpu.matmul %294, %292, %cst_244 {dimension_numbers = #tpu.dot_dimension_numbers<[1], [0], [0], [1], [0, 0, 1, 1], [], []>} : vector<8x8xf32>, vector<8x512xf32>, vector<8x512xf32> -> vector<8x512xf32>
    %296 = arith.addf %287, %295 : vector<8x512xf32>
    %c0_245 = arith.constant 0 : index
    %c65_246 = arith.constant 65 : index
    %297 = vector.load %arg10[%c0_245, %c65_246] : memref<8x768xf32, #tpu.memory_space<vmem>>, vector<8x512xf32>
    %c5_247 = arith.constant 5 : index
    %c0_248 = arith.constant 0 : index
    %c0_249 = arith.constant 0 : index
    %298 = vector.load %arg1[%c5_247, %c0_248, %c0_249] : memref<27x1x512xf32, #tpu.memory_space<vmem>>, vector<1x1x512xf32>
    %299 = vector.shape_cast %298 : vector<1x1x512xf32> to vector<1x512xf32>
    %300 = vector.broadcast %299 : vector<1x512xf32> to vector<8x512xf32>
    %301 = arith.mulf %297, %300 : vector<8x512xf32>
    %c5_250 = arith.constant 5 : index
    %c0_251 = arith.constant 0 : index
    %c0_252 = arith.constant 0 : index
    %302 = vector.load %arg5[%c5_250, %c0_251, %c0_252] : memref<27x8x8xf32, #tpu.memory_space<vmem>>, vector<1x8x8xf32>
    %303 = vector.shape_cast %302 : vector<1x8x8xf32> to vector<8x8xf32>
    %cst_253 = arith.constant dense<0.000000e+00> : vector<8x512xf32>
    %304 = tpu.matmul %303, %301, %cst_253 {dimension_numbers = #tpu.dot_dimension_numbers<[1], [0], [0], [1], [0, 0, 1, 1], [], []>} : vector<8x8xf32>, vector<8x512xf32>, vector<8x512xf32> -> vector<8x512xf32>
    %305 = arith.addf %296, %304 : vector<8x512xf32>
    %c0_254 = arith.constant 0 : index
    %c71_255 = arith.constant 71 : index
    %306 = vector.load %arg10[%c0_254, %c71_255] : memref<8x768xf32, #tpu.memory_space<vmem>>, vector<8x512xf32>
    %c6_256 = arith.constant 6 : index
    %c0_257 = arith.constant 0 : index
    %c0_258 = arith.constant 0 : index
    %307 = vector.load %arg1[%c6_256, %c0_257, %c0_258] : memref<27x1x512xf32, #tpu.memory_space<vmem>>, vector<1x1x512xf32>
    %308 = vector.shape_cast %307 : vector<1x1x512xf32> to vector<1x512xf32>
    %309 = vector.broadcast %308 : vector<1x512xf32> to vector<8x512xf32>
    %310 = arith.mulf %306, %309 : vector<8x512xf32>
    %c6_259 = arith.constant 6 : index
    %c0_260 = arith.constant 0 : index
    %c0_261 = arith.constant 0 : index
    %311 = vector.load %arg5[%c6_259, %c0_260, %c0_261] : memref<27x8x8xf32, #tpu.memory_space<vmem>>, vector<1x8x8xf32>
    %312 = vector.shape_cast %311 : vector<1x8x8xf32> to vector<8x8xf32>
    %cst_262 = arith.constant dense<0.000000e+00> : vector<8x512xf32>
    %313 = tpu.matmul %312, %310, %cst_262 {dimension_numbers = #tpu.dot_dimension_numbers<[1], [0], [0], [1], [0, 0, 1, 1], [], []>} : vector<8x8xf32>, vector<8x512xf32>, vector<8x512xf32> -> vector<8x512xf32>
    %314 = arith.addf %305, %313 : vector<8x512xf32>
    %c0_263 = arith.constant 0 : index
    %c72_264 = arith.constant 72 : index
    %315 = vector.load %arg10[%c0_263, %c72_264] : memref<8x768xf32, #tpu.memory_space<vmem>>, vector<8x512xf32>
    %c7_265 = arith.constant 7 : index
    %c0_266 = arith.constant 0 : index
    %c0_267 = arith.constant 0 : index
    %316 = vector.load %arg1[%c7_265, %c0_266, %c0_267] : memref<27x1x512xf32, #tpu.memory_space<vmem>>, vector<1x1x512xf32>
    %317 = vector.shape_cast %316 : vector<1x1x512xf32> to vector<1x512xf32>
    %318 = vector.broadcast %317 : vector<1x512xf32> to vector<8x512xf32>
    %319 = arith.mulf %315, %318 : vector<8x512xf32>
    %c7_268 = arith.constant 7 : index
    %c0_269 = arith.constant 0 : index
    %c0_270 = arith.constant 0 : index
    %320 = vector.load %arg5[%c7_268, %c0_269, %c0_270] : memref<27x8x8xf32, #tpu.memory_space<vmem>>, vector<1x8x8xf32>
    %321 = vector.shape_cast %320 : vector<1x8x8xf32> to vector<8x8xf32>
    %cst_271 = arith.constant dense<0.000000e+00> : vector<8x512xf32>
    %322 = tpu.matmul %321, %319, %cst_271 {dimension_numbers = #tpu.dot_dimension_numbers<[1], [0], [0], [1], [0, 0, 1, 1], [], []>} : vector<8x8xf32>, vector<8x512xf32>, vector<8x512xf32> -> vector<8x512xf32>
    %323 = arith.addf %314, %322 : vector<8x512xf32>
    %c0_272 = arith.constant 0 : index
    %c73_273 = arith.constant 73 : index
    %324 = vector.load %arg10[%c0_272, %c73_273] : memref<8x768xf32, #tpu.memory_space<vmem>>, vector<8x512xf32>
    %c8_274 = arith.constant 8 : index
    %c0_275 = arith.constant 0 : index
    %c0_276 = arith.constant 0 : index
    %325 = vector.load %arg1[%c8_274, %c0_275, %c0_276] : memref<27x1x512xf32, #tpu.memory_space<vmem>>, vector<1x1x512xf32>
    %326 = vector.shape_cast %325 : vector<1x1x512xf32> to vector<1x512xf32>
    %327 = vector.broadcast %326 : vector<1x512xf32> to vector<8x512xf32>
    %328 = arith.mulf %324, %327 : vector<8x512xf32>
    %c8_277 = arith.constant 8 : index
    %c0_278 = arith.constant 0 : index
    %c0_279 = arith.constant 0 : index
    %329 = vector.load %arg5[%c8_277, %c0_278, %c0_279] : memref<27x8x8xf32, #tpu.memory_space<vmem>>, vector<1x8x8xf32>
    %330 = vector.shape_cast %329 : vector<1x8x8xf32> to vector<8x8xf32>
    %cst_280 = arith.constant dense<0.000000e+00> : vector<8x512xf32>
    %331 = tpu.matmul %330, %328, %cst_280 {dimension_numbers = #tpu.dot_dimension_numbers<[1], [0], [0], [1], [0, 0, 1, 1], [], []>} : vector<8x8xf32>, vector<8x512xf32>, vector<8x512xf32> -> vector<8x512xf32>
    %332 = arith.addf %323, %331 : vector<8x512xf32>
    %c0_281 = arith.constant 0 : index
    %c119_282 = arith.constant 119 : index
    %333 = vector.load %arg10[%c0_281, %c119_282] : memref<8x768xf32, #tpu.memory_space<vmem>>, vector<8x512xf32>
    %c9_283 = arith.constant 9 : index
    %c0_284 = arith.constant 0 : index
    %c0_285 = arith.constant 0 : index
    %334 = vector.load %arg1[%c9_283, %c0_284, %c0_285] : memref<27x1x512xf32, #tpu.memory_space<vmem>>, vector<1x1x512xf32>
    %335 = vector.shape_cast %334 : vector<1x1x512xf32> to vector<1x512xf32>
    %336 = vector.broadcast %335 : vector<1x512xf32> to vector<8x512xf32>
    %337 = arith.mulf %333, %336 : vector<8x512xf32>
    %c9_286 = arith.constant 9 : index
    %c0_287 = arith.constant 0 : index
    %c0_288 = arith.constant 0 : index
    %338 = vector.load %arg5[%c9_286, %c0_287, %c0_288] : memref<27x8x8xf32, #tpu.memory_space<vmem>>, vector<1x8x8xf32>
    %339 = vector.shape_cast %338 : vector<1x8x8xf32> to vector<8x8xf32>
    %cst_289 = arith.constant dense<0.000000e+00> : vector<8x512xf32>
    %340 = tpu.matmul %339, %337, %cst_289 {dimension_numbers = #tpu.dot_dimension_numbers<[1], [0], [0], [1], [0, 0, 1, 1], [], []>} : vector<8x8xf32>, vector<8x512xf32>, vector<8x512xf32> -> vector<8x512xf32>
    %341 = arith.addf %332, %340 : vector<8x512xf32>
    %c0_290 = arith.constant 0 : index
    %c120_291 = arith.constant 120 : index
    %342 = vector.load %arg10[%c0_290, %c120_291] : memref<8x768xf32, #tpu.memory_space<vmem>>, vector<8x512xf32>
    %c10_292 = arith.constant 10 : index
    %c0_293 = arith.constant 0 : index
    %c0_294 = arith.constant 0 : index
    %343 = vector.load %arg1[%c10_292, %c0_293, %c0_294] : memref<27x1x512xf32, #tpu.memory_space<vmem>>, vector<1x1x512xf32>
    %344 = vector.shape_cast %343 : vector<1x1x512xf32> to vector<1x512xf32>
    %345 = vector.broadcast %344 : vector<1x512xf32> to vector<8x512xf32>
    %346 = arith.mulf %342, %345 : vector<8x512xf32>
    %c10_295 = arith.constant 10 : index
    %c0_296 = arith.constant 0 : index
    %c0_297 = arith.constant 0 : index
    %347 = vector.load %arg5[%c10_295, %c0_296, %c0_297] : memref<27x8x8xf32, #tpu.memory_space<vmem>>, vector<1x8x8xf32>
    %348 = vector.shape_cast %347 : vector<1x8x8xf32> to vector<8x8xf32>
    %cst_298 = arith.constant dense<0.000000e+00> : vector<8x512xf32>
    %349 = tpu.matmul %348, %346, %cst_298 {dimension_numbers = #tpu.dot_dimension_numbers<[1], [0], [0], [1], [0, 0, 1, 1], [], []>} : vector<8x8xf32>, vector<8x512xf32>, vector<8x512xf32> -> vector<8x512xf32>
    %350 = arith.addf %341, %349 : vector<8x512xf32>
    %c0_299 = arith.constant 0 : index
    %c121_300 = arith.constant 121 : index
    %351 = vector.load %arg10[%c0_299, %c121_300] : memref<8x768xf32, #tpu.memory_space<vmem>>, vector<8x512xf32>
    %c11_301 = arith.constant 11 : index
    %c0_302 = arith.constant 0 : index
    %c0_303 = arith.constant 0 : index
    %352 = vector.load %arg1[%c11_301, %c0_302, %c0_303] : memref<27x1x512xf32, #tpu.memory_space<vmem>>, vector<1x1x512xf32>
    %353 = vector.shape_cast %352 : vector<1x1x512xf32> to vector<1x512xf32>
    %354 = vector.broadcast %353 : vector<1x512xf32> to vector<8x512xf32>
    %355 = arith.mulf %351, %354 : vector<8x512xf32>
    %c11_304 = arith.constant 11 : index
    %c0_305 = arith.constant 0 : index
    %c0_306 = arith.constant 0 : index
    %356 = vector.load %arg5[%c11_304, %c0_305, %c0_306] : memref<27x8x8xf32, #tpu.memory_space<vmem>>, vector<1x8x8xf32>
    %357 = vector.shape_cast %356 : vector<1x8x8xf32> to vector<8x8xf32>
    %cst_307 = arith.constant dense<0.000000e+00> : vector<8x512xf32>
    %358 = tpu.matmul %357, %355, %cst_307 {dimension_numbers = #tpu.dot_dimension_numbers<[1], [0], [0], [1], [0, 0, 1, 1], [], []>} : vector<8x8xf32>, vector<8x512xf32>, vector<8x512xf32> -> vector<8x512xf32>
    %359 = arith.addf %350, %358 : vector<8x512xf32>
    %c0_308 = arith.constant 0 : index
    %c127_309 = arith.constant 127 : index
    %360 = vector.load %arg10[%c0_308, %c127_309] : memref<8x768xf32, #tpu.memory_space<vmem>>, vector<8x512xf32>
    %c12_310 = arith.constant 12 : index
    %c0_311 = arith.constant 0 : index
    %c0_312 = arith.constant 0 : index
    %361 = vector.load %arg1[%c12_310, %c0_311, %c0_312] : memref<27x1x512xf32, #tpu.memory_space<vmem>>, vector<1x1x512xf32>
    %362 = vector.shape_cast %361 : vector<1x1x512xf32> to vector<1x512xf32>
    %363 = vector.broadcast %362 : vector<1x512xf32> to vector<8x512xf32>
    %364 = arith.mulf %360, %363 : vector<8x512xf32>
    %c12_313 = arith.constant 12 : index
    %c0_314 = arith.constant 0 : index
    %c0_315 = arith.constant 0 : index
    %365 = vector.load %arg5[%c12_313, %c0_314, %c0_315] : memref<27x8x8xf32, #tpu.memory_space<vmem>>, vector<1x8x8xf32>
    %366 = vector.shape_cast %365 : vector<1x8x8xf32> to vector<8x8xf32>
    %cst_316 = arith.constant dense<0.000000e+00> : vector<8x512xf32>
    %367 = tpu.matmul %366, %364, %cst_316 {dimension_numbers = #tpu.dot_dimension_numbers<[1], [0], [0], [1], [0, 0, 1, 1], [], []>} : vector<8x8xf32>, vector<8x512xf32>, vector<8x512xf32> -> vector<8x512xf32>
    %368 = arith.addf %359, %367 : vector<8x512xf32>
    %c0_317 = arith.constant 0 : index
    %c128_318 = arith.constant 128 : index
    %369 = vector.load %arg10[%c0_317, %c128_318] : memref<8x768xf32, #tpu.memory_space<vmem>>, vector<8x512xf32>
    %c13_319 = arith.constant 13 : index
    %c0_320 = arith.constant 0 : index
    %c0_321 = arith.constant 0 : index
    %370 = vector.load %arg5[%c13_319, %c0_320, %c0_321] : memref<27x8x8xf32, #tpu.memory_space<vmem>>, vector<1x8x8xf32>
    %371 = vector.shape_cast %370 : vector<1x8x8xf32> to vector<8x8xf32>
    %cst_322 = arith.constant dense<0.000000e+00> : vector<8x512xf32>
    %372 = tpu.matmul %371, %369, %cst_322 {dimension_numbers = #tpu.dot_dimension_numbers<[1], [0], [0], [1], [0, 0, 1, 1], [], []>} : vector<8x8xf32>, vector<8x512xf32>, vector<8x512xf32> -> vector<8x512xf32>
    %373 = arith.addf %368, %372 : vector<8x512xf32>
    %c0_323 = arith.constant 0 : index
    %c129_324 = arith.constant 129 : index
    %374 = vector.load %arg10[%c0_323, %c129_324] : memref<8x768xf32, #tpu.memory_space<vmem>>, vector<8x512xf32>
    %c14_325 = arith.constant 14 : index
    %c0_326 = arith.constant 0 : index
    %c0_327 = arith.constant 0 : index
    %375 = vector.load %arg1[%c14_325, %c0_326, %c0_327] : memref<27x1x512xf32, #tpu.memory_space<vmem>>, vector<1x1x512xf32>
    %376 = vector.shape_cast %375 : vector<1x1x512xf32> to vector<1x512xf32>
    %377 = vector.broadcast %376 : vector<1x512xf32> to vector<8x512xf32>
    %378 = arith.mulf %374, %377 : vector<8x512xf32>
    %c14_328 = arith.constant 14 : index
    %c0_329 = arith.constant 0 : index
    %c0_330 = arith.constant 0 : index
    %379 = vector.load %arg5[%c14_328, %c0_329, %c0_330] : memref<27x8x8xf32, #tpu.memory_space<vmem>>, vector<1x8x8xf32>
    %380 = vector.shape_cast %379 : vector<1x8x8xf32> to vector<8x8xf32>
    %cst_331 = arith.constant dense<0.000000e+00> : vector<8x512xf32>
    %381 = tpu.matmul %380, %378, %cst_331 {dimension_numbers = #tpu.dot_dimension_numbers<[1], [0], [0], [1], [0, 0, 1, 1], [], []>} : vector<8x8xf32>, vector<8x512xf32>, vector<8x512xf32> -> vector<8x512xf32>
    %382 = arith.addf %373, %381 : vector<8x512xf32>
    %c0_332 = arith.constant 0 : index
    %c135_333 = arith.constant 135 : index
    %383 = vector.load %arg10[%c0_332, %c135_333] : memref<8x768xf32, #tpu.memory_space<vmem>>, vector<8x512xf32>
    %c15_334 = arith.constant 15 : index
    %c0_335 = arith.constant 0 : index
    %c0_336 = arith.constant 0 : index
    %384 = vector.load %arg1[%c15_334, %c0_335, %c0_336] : memref<27x1x512xf32, #tpu.memory_space<vmem>>, vector<1x1x512xf32>
    %385 = vector.shape_cast %384 : vector<1x1x512xf32> to vector<1x512xf32>
    %386 = vector.broadcast %385 : vector<1x512xf32> to vector<8x512xf32>
    %387 = arith.mulf %383, %386 : vector<8x512xf32>
    %c15_337 = arith.constant 15 : index
    %c0_338 = arith.constant 0 : index
    %c0_339 = arith.constant 0 : index
    %388 = vector.load %arg5[%c15_337, %c0_338, %c0_339] : memref<27x8x8xf32, #tpu.memory_space<vmem>>, vector<1x8x8xf32>
    %389 = vector.shape_cast %388 : vector<1x8x8xf32> to vector<8x8xf32>
    %cst_340 = arith.constant dense<0.000000e+00> : vector<8x512xf32>
    %390 = tpu.matmul %389, %387, %cst_340 {dimension_numbers = #tpu.dot_dimension_numbers<[1], [0], [0], [1], [0, 0, 1, 1], [], []>} : vector<8x8xf32>, vector<8x512xf32>, vector<8x512xf32> -> vector<8x512xf32>
    %391 = arith.addf %382, %390 : vector<8x512xf32>
    %c0_341 = arith.constant 0 : index
    %c136_342 = arith.constant 136 : index
    %392 = vector.load %arg10[%c0_341, %c136_342] : memref<8x768xf32, #tpu.memory_space<vmem>>, vector<8x512xf32>
    %c16_343 = arith.constant 16 : index
    %c0_344 = arith.constant 0 : index
    %c0_345 = arith.constant 0 : index
    %393 = vector.load %arg1[%c16_343, %c0_344, %c0_345] : memref<27x1x512xf32, #tpu.memory_space<vmem>>, vector<1x1x512xf32>
    %394 = vector.shape_cast %393 : vector<1x1x512xf32> to vector<1x512xf32>
    %395 = vector.broadcast %394 : vector<1x512xf32> to vector<8x512xf32>
    %396 = arith.mulf %392, %395 : vector<8x512xf32>
    %c16_346 = arith.constant 16 : index
    %c0_347 = arith.constant 0 : index
    %c0_348 = arith.constant 0 : index
    %397 = vector.load %arg5[%c16_346, %c0_347, %c0_348] : memref<27x8x8xf32, #tpu.memory_space<vmem>>, vector<1x8x8xf32>
    %398 = vector.shape_cast %397 : vector<1x8x8xf32> to vector<8x8xf32>
    %cst_349 = arith.constant dense<0.000000e+00> : vector<8x512xf32>
    %399 = tpu.matmul %398, %396, %cst_349 {dimension_numbers = #tpu.dot_dimension_numbers<[1], [0], [0], [1], [0, 0, 1, 1], [], []>} : vector<8x8xf32>, vector<8x512xf32>, vector<8x512xf32> -> vector<8x512xf32>
    %400 = arith.addf %391, %399 : vector<8x512xf32>
    %c0_350 = arith.constant 0 : index
    %c137_351 = arith.constant 137 : index
    %401 = vector.load %arg10[%c0_350, %c137_351] : memref<8x768xf32, #tpu.memory_space<vmem>>, vector<8x512xf32>
    %c17_352 = arith.constant 17 : index
    %c0_353 = arith.constant 0 : index
    %c0_354 = arith.constant 0 : index
    %402 = vector.load %arg1[%c17_352, %c0_353, %c0_354] : memref<27x1x512xf32, #tpu.memory_space<vmem>>, vector<1x1x512xf32>
    %403 = vector.shape_cast %402 : vector<1x1x512xf32> to vector<1x512xf32>
    %404 = vector.broadcast %403 : vector<1x512xf32> to vector<8x512xf32>
    %405 = arith.mulf %401, %404 : vector<8x512xf32>
    %c17_355 = arith.constant 17 : index
    %c0_356 = arith.constant 0 : index
    %c0_357 = arith.constant 0 : index
    %406 = vector.load %arg5[%c17_355, %c0_356, %c0_357] : memref<27x8x8xf32, #tpu.memory_space<vmem>>, vector<1x8x8xf32>
    %407 = vector.shape_cast %406 : vector<1x8x8xf32> to vector<8x8xf32>
    %cst_358 = arith.constant dense<0.000000e+00> : vector<8x512xf32>
    %408 = tpu.matmul %407, %405, %cst_358 {dimension_numbers = #tpu.dot_dimension_numbers<[1], [0], [0], [1], [0, 0, 1, 1], [], []>} : vector<8x8xf32>, vector<8x512xf32>, vector<8x512xf32> -> vector<8x512xf32>
    %409 = arith.addf %400, %408 : vector<8x512xf32>
    %c0_359 = arith.constant 0 : index
    %c183_360 = arith.constant 183 : index
    %410 = vector.load %arg10[%c0_359, %c183_360] : memref<8x768xf32, #tpu.memory_space<vmem>>, vector<8x512xf32>
    %c18_361 = arith.constant 18 : index
    %c0_362 = arith.constant 0 : index
    %c0_363 = arith.constant 0 : index
    %411 = vector.load %arg1[%c18_361, %c0_362, %c0_363] : memref<27x1x512xf32, #tpu.memory_space<vmem>>, vector<1x1x512xf32>
    %412 = vector.shape_cast %411 : vector<1x1x512xf32> to vector<1x512xf32>
    %413 = vector.broadcast %412 : vector<1x512xf32> to vector<8x512xf32>
    %414 = arith.mulf %410, %413 : vector<8x512xf32>
    %c18_364 = arith.constant 18 : index
    %c0_365 = arith.constant 0 : index
    %c0_366 = arith.constant 0 : index
    %415 = vector.load %arg5[%c18_364, %c0_365, %c0_366] : memref<27x8x8xf32, #tpu.memory_space<vmem>>, vector<1x8x8xf32>
    %416 = vector.shape_cast %415 : vector<1x8x8xf32> to vector<8x8xf32>
    %cst_367 = arith.constant dense<0.000000e+00> : vector<8x512xf32>
    %417 = tpu.matmul %416, %414, %cst_367 {dimension_numbers = #tpu.dot_dimension_numbers<[1], [0], [0], [1], [0, 0, 1, 1], [], []>} : vector<8x8xf32>, vector<8x512xf32>, vector<8x512xf32> -> vector<8x512xf32>
    %418 = arith.addf %409, %417 : vector<8x512xf32>
    %c0_368 = arith.constant 0 : index
    %c184_369 = arith.constant 184 : index
    %419 = vector.load %arg10[%c0_368, %c184_369] : memref<8x768xf32, #tpu.memory_space<vmem>>, vector<8x512xf32>
    %c19_370 = arith.constant 19 : index
    %c0_371 = arith.constant 0 : index
    %c0_372 = arith.constant 0 : index
    %420 = vector.load %arg1[%c19_370, %c0_371, %c0_372] : memref<27x1x512xf32, #tpu.memory_space<vmem>>, vector<1x1x512xf32>
    %421 = vector.shape_cast %420 : vector<1x1x512xf32> to vector<1x512xf32>
    %422 = vector.broadcast %421 : vector<1x512xf32> to vector<8x512xf32>
    %423 = arith.mulf %419, %422 : vector<8x512xf32>
    %c19_373 = arith.constant 19 : index
    %c0_374 = arith.constant 0 : index
    %c0_375 = arith.constant 0 : index
    %424 = vector.load %arg5[%c19_373, %c0_374, %c0_375] : memref<27x8x8xf32, #tpu.memory_space<vmem>>, vector<1x8x8xf32>
    %425 = vector.shape_cast %424 : vector<1x8x8xf32> to vector<8x8xf32>
    %cst_376 = arith.constant dense<0.000000e+00> : vector<8x512xf32>
    %426 = tpu.matmul %425, %423, %cst_376 {dimension_numbers = #tpu.dot_dimension_numbers<[1], [0], [0], [1], [0, 0, 1, 1], [], []>} : vector<8x8xf32>, vector<8x512xf32>, vector<8x512xf32> -> vector<8x512xf32>
    %427 = arith.addf %418, %426 : vector<8x512xf32>
    %c0_377 = arith.constant 0 : index
    %c185_378 = arith.constant 185 : index
    %428 = vector.load %arg10[%c0_377, %c185_378] : memref<8x768xf32, #tpu.memory_space<vmem>>, vector<8x512xf32>
    %c20_379 = arith.constant 20 : index
    %c0_380 = arith.constant 0 : index
    %c0_381 = arith.constant 0 : index
    %429 = vector.load %arg1[%c20_379, %c0_380, %c0_381] : memref<27x1x512xf32, #tpu.memory_space<vmem>>, vector<1x1x512xf32>
    %430 = vector.shape_cast %429 : vector<1x1x512xf32> to vector<1x512xf32>
    %431 = vector.broadcast %430 : vector<1x512xf32> to vector<8x512xf32>
    %432 = arith.mulf %428, %431 : vector<8x512xf32>
    %c20_382 = arith.constant 20 : index
    %c0_383 = arith.constant 0 : index
    %c0_384 = arith.constant 0 : index
    %433 = vector.load %arg5[%c20_382, %c0_383, %c0_384] : memref<27x8x8xf32, #tpu.memory_space<vmem>>, vector<1x8x8xf32>
    %434 = vector.shape_cast %433 : vector<1x8x8xf32> to vector<8x8xf32>
    %cst_385 = arith.constant dense<0.000000e+00> : vector<8x512xf32>
    %435 = tpu.matmul %434, %432, %cst_385 {dimension_numbers = #tpu.dot_dimension_numbers<[1], [0], [0], [1], [0, 0, 1, 1], [], []>} : vector<8x8xf32>, vector<8x512xf32>, vector<8x512xf32> -> vector<8x512xf32>
    %436 = arith.addf %427, %435 : vector<8x512xf32>
    %c0_386 = arith.constant 0 : index
    %c191_387 = arith.constant 191 : index
    %437 = vector.load %arg10[%c0_386, %c191_387] : memref<8x768xf32, #tpu.memory_space<vmem>>, vector<8x512xf32>
    %c21_388 = arith.constant 21 : index
    %c0_389 = arith.constant 0 : index
    %c0_390 = arith.constant 0 : index
    %438 = vector.load %arg1[%c21_388, %c0_389, %c0_390] : memref<27x1x512xf32, #tpu.memory_space<vmem>>, vector<1x1x512xf32>
    %439 = vector.shape_cast %438 : vector<1x1x512xf32> to vector<1x512xf32>
    %440 = vector.broadcast %439 : vector<1x512xf32> to vector<8x512xf32>
    %441 = arith.mulf %437, %440 : vector<8x512xf32>
    %c21_391 = arith.constant 21 : index
    %c0_392 = arith.constant 0 : index
    %c0_393 = arith.constant 0 : index
    %442 = vector.load %arg5[%c21_391, %c0_392, %c0_393] : memref<27x8x8xf32, #tpu.memory_space<vmem>>, vector<1x8x8xf32>
    %443 = vector.shape_cast %442 : vector<1x8x8xf32> to vector<8x8xf32>
    %cst_394 = arith.constant dense<0.000000e+00> : vector<8x512xf32>
    %444 = tpu.matmul %443, %441, %cst_394 {dimension_numbers = #tpu.dot_dimension_numbers<[1], [0], [0], [1], [0, 0, 1, 1], [], []>} : vector<8x8xf32>, vector<8x512xf32>, vector<8x512xf32> -> vector<8x512xf32>
    %445 = arith.addf %436, %444 : vector<8x512xf32>
    %c0_395 = arith.constant 0 : index
    %c192_396 = arith.constant 192 : index
    %446 = vector.load %arg10[%c0_395, %c192_396] : memref<8x768xf32, #tpu.memory_space<vmem>>, vector<8x512xf32>
    %c22_397 = arith.constant 22 : index
    %c0_398 = arith.constant 0 : index
    %c0_399 = arith.constant 0 : index
    %447 = vector.load %arg1[%c22_397, %c0_398, %c0_399] : memref<27x1x512xf32, #tpu.memory_space<vmem>>, vector<1x1x512xf32>
    %448 = vector.shape_cast %447 : vector<1x1x512xf32> to vector<1x512xf32>
    %449 = vector.broadcast %448 : vector<1x512xf32> to vector<8x512xf32>
    %450 = arith.mulf %446, %449 : vector<8x512xf32>
    %c22_400 = arith.constant 22 : index
    %c0_401 = arith.constant 0 : index
    %c0_402 = arith.constant 0 : index
    %451 = vector.load %arg5[%c22_400, %c0_401, %c0_402] : memref<27x8x8xf32, #tpu.memory_space<vmem>>, vector<1x8x8xf32>
    %452 = vector.shape_cast %451 : vector<1x8x8xf32> to vector<8x8xf32>
    %cst_403 = arith.constant dense<0.000000e+00> : vector<8x512xf32>
    %453 = tpu.matmul %452, %450, %cst_403 {dimension_numbers = #tpu.dot_dimension_numbers<[1], [0], [0], [1], [0, 0, 1, 1], [], []>} : vector<8x8xf32>, vector<8x512xf32>, vector<8x512xf32> -> vector<8x512xf32>
    %454 = arith.addf %445, %453 : vector<8x512xf32>
    %c0_404 = arith.constant 0 : index
    %c193_405 = arith.constant 193 : index
    %455 = vector.load %arg10[%c0_404, %c193_405] : memref<8x768xf32, #tpu.memory_space<vmem>>, vector<8x512xf32>
    %c23_406 = arith.constant 23 : index
    %c0_407 = arith.constant 0 : index
    %c0_408 = arith.constant 0 : index
    %456 = vector.load %arg1[%c23_406, %c0_407, %c0_408] : memref<27x1x512xf32, #tpu.memory_space<vmem>>, vector<1x1x512xf32>
    %457 = vector.shape_cast %456 : vector<1x1x512xf32> to vector<1x512xf32>
    %458 = vector.broadcast %457 : vector<1x512xf32> to vector<8x512xf32>
    %459 = arith.mulf %455, %458 : vector<8x512xf32>
    %c23_409 = arith.constant 23 : index
    %c0_410 = arith.constant 0 : index
    %c0_411 = arith.constant 0 : index
    %460 = vector.load %arg5[%c23_409, %c0_410, %c0_411] : memref<27x8x8xf32, #tpu.memory_space<vmem>>, vector<1x8x8xf32>
    %461 = vector.shape_cast %460 : vector<1x8x8xf32> to vector<8x8xf32>
    %cst_412 = arith.constant dense<0.000000e+00> : vector<8x512xf32>
    %462 = tpu.matmul %461, %459, %cst_412 {dimension_numbers = #tpu.dot_dimension_numbers<[1], [0], [0], [1], [0, 0, 1, 1], [], []>} : vector<8x8xf32>, vector<8x512xf32>, vector<8x512xf32> -> vector<8x512xf32>
    %463 = arith.addf %454, %462 : vector<8x512xf32>
    %c0_413 = arith.constant 0 : index
    %c199_414 = arith.constant 199 : index
    %464 = vector.load %arg10[%c0_413, %c199_414] : memref<8x768xf32, #tpu.memory_space<vmem>>, vector<8x512xf32>
    %c24_415 = arith.constant 24 : index
    %c0_416 = arith.constant 0 : index
    %c0_417 = arith.constant 0 : index
    %465 = vector.load %arg1[%c24_415, %c0_416, %c0_417] : memref<27x1x512xf32, #tpu.memory_space<vmem>>, vector<1x1x512xf32>
    %466 = vector.shape_cast %465 : vector<1x1x512xf32> to vector<1x512xf32>
    %467 = vector.broadcast %466 : vector<1x512xf32> to vector<8x512xf32>
    %468 = arith.mulf %464, %467 : vector<8x512xf32>
    %c24_418 = arith.constant 24 : index
    %c0_419 = arith.constant 0 : index
    %c0_420 = arith.constant 0 : index
    %469 = vector.load %arg5[%c24_418, %c0_419, %c0_420] : memref<27x8x8xf32, #tpu.memory_space<vmem>>, vector<1x8x8xf32>
    %470 = vector.shape_cast %469 : vector<1x8x8xf32> to vector<8x8xf32>
    %cst_421 = arith.constant dense<0.000000e+00> : vector<8x512xf32>
    %471 = tpu.matmul %470, %468, %cst_421 {dimension_numbers = #tpu.dot_dimension_numbers<[1], [0], [0], [1], [0, 0, 1, 1], [], []>} : vector<8x8xf32>, vector<8x512xf32>, vector<8x512xf32> -> vector<8x512xf32>
    %472 = arith.addf %463, %471 : vector<8x512xf32>
    %c0_422 = arith.constant 0 : index
    %c200_423 = arith.constant 200 : index
    %473 = vector.load %arg10[%c0_422, %c200_423] : memref<8x768xf32, #tpu.memory_space<vmem>>, vector<8x512xf32>
    %c25_424 = arith.constant 25 : index
    %c0_425 = arith.constant 0 : index
    %c0_426 = arith.constant 0 : index
    %474 = vector.load %arg1[%c25_424, %c0_425, %c0_426] : memref<27x1x512xf32, #tpu.memory_space<vmem>>, vector<1x1x512xf32>
    %475 = vector.shape_cast %474 : vector<1x1x512xf32> to vector<1x512xf32>
    %476 = vector.broadcast %475 : vector<1x512xf32> to vector<8x512xf32>
    %477 = arith.mulf %473, %476 : vector<8x512xf32>
    %c25_427 = arith.constant 25 : index
    %c0_428 = arith.constant 0 : index
    %c0_429 = arith.constant 0 : index
    %478 = vector.load %arg5[%c25_427, %c0_428, %c0_429] : memref<27x8x8xf32, #tpu.memory_space<vmem>>, vector<1x8x8xf32>
    %479 = vector.shape_cast %478 : vector<1x8x8xf32> to vector<8x8xf32>
    %cst_430 = arith.constant dense<0.000000e+00> : vector<8x512xf32>
    %480 = tpu.matmul %479, %477, %cst_430 {dimension_numbers = #tpu.dot_dimension_numbers<[1], [0], [0], [1], [0, 0, 1, 1], [], []>} : vector<8x8xf32>, vector<8x512xf32>, vector<8x512xf32> -> vector<8x512xf32>
    %481 = arith.addf %472, %480 : vector<8x512xf32>
    %c0_431 = arith.constant 0 : index
    %c201_432 = arith.constant 201 : index
    %482 = vector.load %arg10[%c0_431, %c201_432] : memref<8x768xf32, #tpu.memory_space<vmem>>, vector<8x512xf32>
    %c26_433 = arith.constant 26 : index
    %c0_434 = arith.constant 0 : index
    %c0_435 = arith.constant 0 : index
    %483 = vector.load %arg1[%c26_433, %c0_434, %c0_435] : memref<27x1x512xf32, #tpu.memory_space<vmem>>, vector<1x1x512xf32>
    %484 = vector.shape_cast %483 : vector<1x1x512xf32> to vector<1x512xf32>
    %485 = vector.broadcast %484 : vector<1x512xf32> to vector<8x512xf32>
    %486 = arith.mulf %482, %485 : vector<8x512xf32>
    %c26_436 = arith.constant 26 : index
    %c0_437 = arith.constant 0 : index
    %c0_438 = arith.constant 0 : index
    %487 = vector.load %arg5[%c26_436, %c0_437, %c0_438] : memref<27x8x8xf32, #tpu.memory_space<vmem>>, vector<1x8x8xf32>
    %488 = vector.shape_cast %487 : vector<1x8x8xf32> to vector<8x8xf32>
    %cst_439 = arith.constant dense<0.000000e+00> : vector<8x512xf32>
    %489 = tpu.matmul %488, %486, %cst_439 {dimension_numbers = #tpu.dot_dimension_numbers<[1], [0], [0], [1], [0, 0, 1, 1], [], []>} : vector<8x8xf32>, vector<8x512xf32>, vector<8x512xf32> -> vector<8x512xf32>
    %490 = arith.addf %481, %489 : vector<8x512xf32>
    %c0_440 = arith.constant 0 : index
    %c0_441 = arith.constant 0 : index
    %491 = vector.load %arg6[%c0_440, %c0_441] : memref<8x1xf32, #tpu.memory_space<vmem>>, vector<8x1xf32>
    %492 = vector.broadcast %491 : vector<8x1xf32> to vector<8x512xf32>
    %493 = arith.addf %490, %492 : vector<8x512xf32>
    %cst_442 = arith.constant 0.000000e+00 : f32
    %494 = vector.broadcast %cst_442 : f32 to vector<8x512xf32>
    %495 = arith.cmpf ogt, %493, %494 : vector<8x512xf32>
    %cst_443 = arith.constant 2.000000e-01 : f32
    %496 = vector.broadcast %cst_443 : f32 to vector<8x512xf32>
    %497 = arith.mulf %496, %493 : vector<8x512xf32>
    %498 = arith.select %495, %493, %497 : vector<8x512xi1>, vector<8x512xf32>
    %c0_444 = arith.constant 0 : index
    %c128_445 = arith.constant 128 : index
    %499 = vector.load %arg10[%c0_444, %c128_445] : memref<8x768xf32, #tpu.memory_space<vmem>>, vector<8x512xf32>
    tpu.vector_store %arg10[%c0_444, %c128_445], %498 {strides = array<i32>} : memref<8x768xf32, #tpu.memory_space<vmem>>, vector<8x512xf32>,
    %c0_446 = arith.constant 0 : index
    %c55_447 = arith.constant 55 : index
    %500 = vector.load %arg10[%c0_446, %c55_447] : memref<8x768xf32, #tpu.memory_space<vmem>>, vector<8x512xf32>
    %c0_448 = arith.constant 0 : index
    %c0_449 = arith.constant 0 : index
    %c0_450 = arith.constant 0 : index
    %501 = vector.load %arg1[%c0_448, %c0_449, %c0_450] : memref<27x1x512xf32, #tpu.memory_space<vmem>>, vector<1x1x512xf32>
    %502 = vector.shape_cast %501 : vector<1x1x512xf32> to vector<1x512xf32>
    %503 = vector.broadcast %502 : vector<1x512xf32> to vector<8x512xf32>
    %504 = arith.mulf %500, %503 : vector<8x512xf32>
    %c0_451 = arith.constant 0 : index
    %c0_452 = arith.constant 0 : index
    %c0_453 = arith.constant 0 : index
    %505 = vector.load %arg7[%c0_451, %c0_452, %c0_453] : memref<27x3x8xf32, #tpu.memory_space<vmem>>, vector<1x3x8xf32>
    %506 = vector.shape_cast %505 : vector<1x3x8xf32> to vector<3x8xf32>
    %cst_454 = arith.constant dense<0.000000e+00> : vector<3x512xf32>
    %507 = tpu.matmul %506, %504, %cst_454 {dimension_numbers = #tpu.dot_dimension_numbers<[1], [0], [0], [1], [0, 0, 1, 1], [], []>} : vector<3x8xf32>, vector<8x512xf32>, vector<3x512xf32> -> vector<3x512xf32>
    %c0_455 = arith.constant 0 : index
    %c56_456 = arith.constant 56 : index
    %508 = vector.load %arg10[%c0_455, %c56_456] : memref<8x768xf32, #tpu.memory_space<vmem>>, vector<8x512xf32>
    %c1_457 = arith.constant 1 : index
    %c0_458 = arith.constant 0 : index
    %c0_459 = arith.constant 0 : index
    %509 = vector.load %arg1[%c1_457, %c0_458, %c0_459] : memref<27x1x512xf32, #tpu.memory_space<vmem>>, vector<1x1x512xf32>
    %510 = vector.shape_cast %509 : vector<1x1x512xf32> to vector<1x512xf32>
    %511 = vector.broadcast %510 : vector<1x512xf32> to vector<8x512xf32>
    %512 = arith.mulf %508, %511 : vector<8x512xf32>
    %c1_460 = arith.constant 1 : index
    %c0_461 = arith.constant 0 : index
    %c0_462 = arith.constant 0 : index
    %513 = vector.load %arg7[%c1_460, %c0_461, %c0_462] : memref<27x3x8xf32, #tpu.memory_space<vmem>>, vector<1x3x8xf32>
    %514 = vector.shape_cast %513 : vector<1x3x8xf32> to vector<3x8xf32>
    %cst_463 = arith.constant dense<0.000000e+00> : vector<3x512xf32>
    %515 = tpu.matmul %514, %512, %cst_463 {dimension_numbers = #tpu.dot_dimension_numbers<[1], [0], [0], [1], [0, 0, 1, 1], [], []>} : vector<3x8xf32>, vector<8x512xf32>, vector<3x512xf32> -> vector<3x512xf32>
    %516 = arith.addf %507, %515 : vector<3x512xf32>
    %c0_464 = arith.constant 0 : index
    %c57_465 = arith.constant 57 : index
    %517 = vector.load %arg10[%c0_464, %c57_465] : memref<8x768xf32, #tpu.memory_space<vmem>>, vector<8x512xf32>
    %c2_466 = arith.constant 2 : index
    %c0_467 = arith.constant 0 : index
    %c0_468 = arith.constant 0 : index
    %518 = vector.load %arg1[%c2_466, %c0_467, %c0_468] : memref<27x1x512xf32, #tpu.memory_space<vmem>>, vector<1x1x512xf32>
    %519 = vector.shape_cast %518 : vector<1x1x512xf32> to vector<1x512xf32>
    %520 = vector.broadcast %519 : vector<1x512xf32> to vector<8x512xf32>
    %521 = arith.mulf %517, %520 : vector<8x512xf32>
    %c2_469 = arith.constant 2 : index
    %c0_470 = arith.constant 0 : index
    %c0_471 = arith.constant 0 : index
    %522 = vector.load %arg7[%c2_469, %c0_470, %c0_471] : memref<27x3x8xf32, #tpu.memory_space<vmem>>, vector<1x3x8xf32>
    %523 = vector.shape_cast %522 : vector<1x3x8xf32> to vector<3x8xf32>
    %cst_472 = arith.constant dense<0.000000e+00> : vector<3x512xf32>
    %524 = tpu.matmul %523, %521, %cst_472 {dimension_numbers = #tpu.dot_dimension_numbers<[1], [0], [0], [1], [0, 0, 1, 1], [], []>} : vector<3x8xf32>, vector<8x512xf32>, vector<3x512xf32> -> vector<3x512xf32>
    %525 = arith.addf %516, %524 : vector<3x512xf32>
    %c0_473 = arith.constant 0 : index
    %c63_474 = arith.constant 63 : index
    %526 = vector.load %arg10[%c0_473, %c63_474] : memref<8x768xf32, #tpu.memory_space<vmem>>, vector<8x512xf32>
    %c3_475 = arith.constant 3 : index
    %c0_476 = arith.constant 0 : index
    %c0_477 = arith.constant 0 : index
    %527 = vector.load %arg1[%c3_475, %c0_476, %c0_477] : memref<27x1x512xf32, #tpu.memory_space<vmem>>, vector<1x1x512xf32>
    %528 = vector.shape_cast %527 : vector<1x1x512xf32> to vector<1x512xf32>
    %529 = vector.broadcast %528 : vector<1x512xf32> to vector<8x512xf32>
    %530 = arith.mulf %526, %529 : vector<8x512xf32>
    %c3_478 = arith.constant 3 : index
    %c0_479 = arith.constant 0 : index
    %c0_480 = arith.constant 0 : index
    %531 = vector.load %arg7[%c3_478, %c0_479, %c0_480] : memref<27x3x8xf32, #tpu.memory_space<vmem>>, vector<1x3x8xf32>
    %532 = vector.shape_cast %531 : vector<1x3x8xf32> to vector<3x8xf32>
    %cst_481 = arith.constant dense<0.000000e+00> : vector<3x512xf32>
    %533 = tpu.matmul %532, %530, %cst_481 {dimension_numbers = #tpu.dot_dimension_numbers<[1], [0], [0], [1], [0, 0, 1, 1], [], []>} : vector<3x8xf32>, vector<8x512xf32>, vector<3x512xf32> -> vector<3x512xf32>
    %534 = arith.addf %525, %533 : vector<3x512xf32>
    %c0_482 = arith.constant 0 : index
    %c64_483 = arith.constant 64 : index
    %535 = vector.load %arg10[%c0_482, %c64_483] : memref<8x768xf32, #tpu.memory_space<vmem>>, vector<8x512xf32>
    %c4_484 = arith.constant 4 : index
    %c0_485 = arith.constant 0 : index
    %c0_486 = arith.constant 0 : index
    %536 = vector.load %arg1[%c4_484, %c0_485, %c0_486] : memref<27x1x512xf32, #tpu.memory_space<vmem>>, vector<1x1x512xf32>
    %537 = vector.shape_cast %536 : vector<1x1x512xf32> to vector<1x512xf32>
    %538 = vector.broadcast %537 : vector<1x512xf32> to vector<8x512xf32>
    %539 = arith.mulf %535, %538 : vector<8x512xf32>
    %c4_487 = arith.constant 4 : index
    %c0_488 = arith.constant 0 : index
    %c0_489 = arith.constant 0 : index
    %540 = vector.load %arg7[%c4_487, %c0_488, %c0_489] : memref<27x3x8xf32, #tpu.memory_space<vmem>>, vector<1x3x8xf32>
    %541 = vector.shape_cast %540 : vector<1x3x8xf32> to vector<3x8xf32>
    %cst_490 = arith.constant dense<0.000000e+00> : vector<3x512xf32>
    %542 = tpu.matmul %541, %539, %cst_490 {dimension_numbers = #tpu.dot_dimension_numbers<[1], [0], [0], [1], [0, 0, 1, 1], [], []>} : vector<3x8xf32>, vector<8x512xf32>, vector<3x512xf32> -> vector<3x512xf32>
    %543 = arith.addf %534, %542 : vector<3x512xf32>
    %c0_491 = arith.constant 0 : index
    %c65_492 = arith.constant 65 : index
    %544 = vector.load %arg10[%c0_491, %c65_492] : memref<8x768xf32, #tpu.memory_space<vmem>>, vector<8x512xf32>
    %c5_493 = arith.constant 5 : index
    %c0_494 = arith.constant 0 : index
    %c0_495 = arith.constant 0 : index
    %545 = vector.load %arg1[%c5_493, %c0_494, %c0_495] : memref<27x1x512xf32, #tpu.memory_space<vmem>>, vector<1x1x512xf32>
    %546 = vector.shape_cast %545 : vector<1x1x512xf32> to vector<1x512xf32>
    %547 = vector.broadcast %546 : vector<1x512xf32> to vector<8x512xf32>
    %548 = arith.mulf %544, %547 : vector<8x512xf32>
    %c5_496 = arith.constant 5 : index
    %c0_497 = arith.constant 0 : index
    %c0_498 = arith.constant 0 : index
    %549 = vector.load %arg7[%c5_496, %c0_497, %c0_498] : memref<27x3x8xf32, #tpu.memory_space<vmem>>, vector<1x3x8xf32>
    %550 = vector.shape_cast %549 : vector<1x3x8xf32> to vector<3x8xf32>
    %cst_499 = arith.constant dense<0.000000e+00> : vector<3x512xf32>
    %551 = tpu.matmul %550, %548, %cst_499 {dimension_numbers = #tpu.dot_dimension_numbers<[1], [0], [0], [1], [0, 0, 1, 1], [], []>} : vector<3x8xf32>, vector<8x512xf32>, vector<3x512xf32> -> vector<3x512xf32>
    %552 = arith.addf %543, %551 : vector<3x512xf32>
    %c0_500 = arith.constant 0 : index
    %c71_501 = arith.constant 71 : index
    %553 = vector.load %arg10[%c0_500, %c71_501] : memref<8x768xf32, #tpu.memory_space<vmem>>, vector<8x512xf32>
    %c6_502 = arith.constant 6 : index
    %c0_503 = arith.constant 0 : index
    %c0_504 = arith.constant 0 : index
    %554 = vector.load %arg1[%c6_502, %c0_503, %c0_504] : memref<27x1x512xf32, #tpu.memory_space<vmem>>, vector<1x1x512xf32>
    %555 = vector.shape_cast %554 : vector<1x1x512xf32> to vector<1x512xf32>
    %556 = vector.broadcast %555 : vector<1x512xf32> to vector<8x512xf32>
    %557 = arith.mulf %553, %556 : vector<8x512xf32>
    %c6_505 = arith.constant 6 : index
    %c0_506 = arith.constant 0 : index
    %c0_507 = arith.constant 0 : index
    %558 = vector.load %arg7[%c6_505, %c0_506, %c0_507] : memref<27x3x8xf32, #tpu.memory_space<vmem>>, vector<1x3x8xf32>
    %559 = vector.shape_cast %558 : vector<1x3x8xf32> to vector<3x8xf32>
    %cst_508 = arith.constant dense<0.000000e+00> : vector<3x512xf32>
    %560 = tpu.matmul %559, %557, %cst_508 {dimension_numbers = #tpu.dot_dimension_numbers<[1], [0], [0], [1], [0, 0, 1, 1], [], []>} : vector<3x8xf32>, vector<8x512xf32>, vector<3x512xf32> -> vector<3x512xf32>
    %561 = arith.addf %552, %560 : vector<3x512xf32>
    %c0_509 = arith.constant 0 : index
    %c72_510 = arith.constant 72 : index
    %562 = vector.load %arg10[%c0_509, %c72_510] : memref<8x768xf32, #tpu.memory_space<vmem>>, vector<8x512xf32>
    %c7_511 = arith.constant 7 : index
    %c0_512 = arith.constant 0 : index
    %c0_513 = arith.constant 0 : index
    %563 = vector.load %arg1[%c7_511, %c0_512, %c0_513] : memref<27x1x512xf32, #tpu.memory_space<vmem>>, vector<1x1x512xf32>
    %564 = vector.shape_cast %563 : vector<1x1x512xf32> to vector<1x512xf32>
    %565 = vector.broadcast %564 : vector<1x512xf32> to vector<8x512xf32>
    %566 = arith.mulf %562, %565 : vector<8x512xf32>
    %c7_514 = arith.constant 7 : index
    %c0_515 = arith.constant 0 : index
    %c0_516 = arith.constant 0 : index
    %567 = vector.load %arg7[%c7_514, %c0_515, %c0_516] : memref<27x3x8xf32, #tpu.memory_space<vmem>>, vector<1x3x8xf32>
    %568 = vector.shape_cast %567 : vector<1x3x8xf32> to vector<3x8xf32>
    %cst_517 = arith.constant dense<0.000000e+00> : vector<3x512xf32>
    %569 = tpu.matmul %568, %566, %cst_517 {dimension_numbers = #tpu.dot_dimension_numbers<[1], [0], [0], [1], [0, 0, 1, 1], [], []>} : vector<3x8xf32>, vector<8x512xf32>, vector<3x512xf32> -> vector<3x512xf32>
    %570 = arith.addf %561, %569 : vector<3x512xf32>
    %c0_518 = arith.constant 0 : index
    %c73_519 = arith.constant 73 : index
    %571 = vector.load %arg10[%c0_518, %c73_519] : memref<8x768xf32, #tpu.memory_space<vmem>>, vector<8x512xf32>
    %c8_520 = arith.constant 8 : index
    %c0_521 = arith.constant 0 : index
    %c0_522 = arith.constant 0 : index
    %572 = vector.load %arg1[%c8_520, %c0_521, %c0_522] : memref<27x1x512xf32, #tpu.memory_space<vmem>>, vector<1x1x512xf32>
    %573 = vector.shape_cast %572 : vector<1x1x512xf32> to vector<1x512xf32>
    %574 = vector.broadcast %573 : vector<1x512xf32> to vector<8x512xf32>
    %575 = arith.mulf %571, %574 : vector<8x512xf32>
    %c8_523 = arith.constant 8 : index
    %c0_524 = arith.constant 0 : index
    %c0_525 = arith.constant 0 : index
    %576 = vector.load %arg7[%c8_523, %c0_524, %c0_525] : memref<27x3x8xf32, #tpu.memory_space<vmem>>, vector<1x3x8xf32>
    %577 = vector.shape_cast %576 : vector<1x3x8xf32> to vector<3x8xf32>
    %cst_526 = arith.constant dense<0.000000e+00> : vector<3x512xf32>
    %578 = tpu.matmul %577, %575, %cst_526 {dimension_numbers = #tpu.dot_dimension_numbers<[1], [0], [0], [1], [0, 0, 1, 1], [], []>} : vector<3x8xf32>, vector<8x512xf32>, vector<3x512xf32> -> vector<3x512xf32>
    %579 = arith.addf %570, %578 : vector<3x512xf32>
    %c0_527 = arith.constant 0 : index
    %c119_528 = arith.constant 119 : index
    %580 = vector.load %arg10[%c0_527, %c119_528] : memref<8x768xf32, #tpu.memory_space<vmem>>, vector<8x512xf32>
    %c9_529 = arith.constant 9 : index
    %c0_530 = arith.constant 0 : index
    %c0_531 = arith.constant 0 : index
    %581 = vector.load %arg1[%c9_529, %c0_530, %c0_531] : memref<27x1x512xf32, #tpu.memory_space<vmem>>, vector<1x1x512xf32>
    %582 = vector.shape_cast %581 : vector<1x1x512xf32> to vector<1x512xf32>
    %583 = vector.broadcast %582 : vector<1x512xf32> to vector<8x512xf32>
    %584 = arith.mulf %580, %583 : vector<8x512xf32>
    %c9_532 = arith.constant 9 : index
    %c0_533 = arith.constant 0 : index
    %c0_534 = arith.constant 0 : index
    %585 = vector.load %arg7[%c9_532, %c0_533, %c0_534] : memref<27x3x8xf32, #tpu.memory_space<vmem>>, vector<1x3x8xf32>
    %586 = vector.shape_cast %585 : vector<1x3x8xf32> to vector<3x8xf32>
    %cst_535 = arith.constant dense<0.000000e+00> : vector<3x512xf32>
    %587 = tpu.matmul %586, %584, %cst_535 {dimension_numbers = #tpu.dot_dimension_numbers<[1], [0], [0], [1], [0, 0, 1, 1], [], []>} : vector<3x8xf32>, vector<8x512xf32>, vector<3x512xf32> -> vector<3x512xf32>
    %588 = arith.addf %579, %587 : vector<3x512xf32>
    %c0_536 = arith.constant 0 : index
    %c120_537 = arith.constant 120 : index
    %589 = vector.load %arg10[%c0_536, %c120_537] : memref<8x768xf32, #tpu.memory_space<vmem>>, vector<8x512xf32>
    %c10_538 = arith.constant 10 : index
    %c0_539 = arith.constant 0 : index
    %c0_540 = arith.constant 0 : index
    %590 = vector.load %arg1[%c10_538, %c0_539, %c0_540] : memref<27x1x512xf32, #tpu.memory_space<vmem>>, vector<1x1x512xf32>
    %591 = vector.shape_cast %590 : vector<1x1x512xf32> to vector<1x512xf32>
    %592 = vector.broadcast %591 : vector<1x512xf32> to vector<8x512xf32>
    %593 = arith.mulf %589, %592 : vector<8x512xf32>
    %c10_541 = arith.constant 10 : index
    %c0_542 = arith.constant 0 : index
    %c0_543 = arith.constant 0 : index
    %594 = vector.load %arg7[%c10_541, %c0_542, %c0_543] : memref<27x3x8xf32, #tpu.memory_space<vmem>>, vector<1x3x8xf32>
    %595 = vector.shape_cast %594 : vector<1x3x8xf32> to vector<3x8xf32>
    %cst_544 = arith.constant dense<0.000000e+00> : vector<3x512xf32>
    %596 = tpu.matmul %595, %593, %cst_544 {dimension_numbers = #tpu.dot_dimension_numbers<[1], [0], [0], [1], [0, 0, 1, 1], [], []>} : vector<3x8xf32>, vector<8x512xf32>, vector<3x512xf32> -> vector<3x512xf32>
    %597 = arith.addf %588, %596 : vector<3x512xf32>
    %c0_545 = arith.constant 0 : index
    %c121_546 = arith.constant 121 : index
    %598 = vector.load %arg10[%c0_545, %c121_546] : memref<8x768xf32, #tpu.memory_space<vmem>>, vector<8x512xf32>
    %c11_547 = arith.constant 11 : index
    %c0_548 = arith.constant 0 : index
    %c0_549 = arith.constant 0 : index
    %599 = vector.load %arg1[%c11_547, %c0_548, %c0_549] : memref<27x1x512xf32, #tpu.memory_space<vmem>>, vector<1x1x512xf32>
    %600 = vector.shape_cast %599 : vector<1x1x512xf32> to vector<1x512xf32>
    %601 = vector.broadcast %600 : vector<1x512xf32> to vector<8x512xf32>
    %602 = arith.mulf %598, %601 : vector<8x512xf32>
    %c11_550 = arith.constant 11 : index
    %c0_551 = arith.constant 0 : index
    %c0_552 = arith.constant 0 : index
    %603 = vector.load %arg7[%c11_550, %c0_551, %c0_552] : memref<27x3x8xf32, #tpu.memory_space<vmem>>, vector<1x3x8xf32>
    %604 = vector.shape_cast %603 : vector<1x3x8xf32> to vector<3x8xf32>
    %cst_553 = arith.constant dense<0.000000e+00> : vector<3x512xf32>
    %605 = tpu.matmul %604, %602, %cst_553 {dimension_numbers = #tpu.dot_dimension_numbers<[1], [0], [0], [1], [0, 0, 1, 1], [], []>} : vector<3x8xf32>, vector<8x512xf32>, vector<3x512xf32> -> vector<3x512xf32>
    %606 = arith.addf %597, %605 : vector<3x512xf32>
    %c0_554 = arith.constant 0 : index
    %c127_555 = arith.constant 127 : index
    %607 = vector.load %arg10[%c0_554, %c127_555] : memref<8x768xf32, #tpu.memory_space<vmem>>, vector<8x512xf32>
    %c12_556 = arith.constant 12 : index
    %c0_557 = arith.constant 0 : index
    %c0_558 = arith.constant 0 : index
    %608 = vector.load %arg1[%c12_556, %c0_557, %c0_558] : memref<27x1x512xf32, #tpu.memory_space<vmem>>, vector<1x1x512xf32>
    %609 = vector.shape_cast %608 : vector<1x1x512xf32> to vector<1x512xf32>
    %610 = vector.broadcast %609 : vector<1x512xf32> to vector<8x512xf32>
    %611 = arith.mulf %607, %610 : vector<8x512xf32>
    %c12_559 = arith.constant 12 : index
    %c0_560 = arith.constant 0 : index
    %c0_561 = arith.constant 0 : index
    %612 = vector.load %arg7[%c12_559, %c0_560, %c0_561] : memref<27x3x8xf32, #tpu.memory_space<vmem>>, vector<1x3x8xf32>
    %613 = vector.shape_cast %612 : vector<1x3x8xf32> to vector<3x8xf32>
    %cst_562 = arith.constant dense<0.000000e+00> : vector<3x512xf32>
    %614 = tpu.matmul %613, %611, %cst_562 {dimension_numbers = #tpu.dot_dimension_numbers<[1], [0], [0], [1], [0, 0, 1, 1], [], []>} : vector<3x8xf32>, vector<8x512xf32>, vector<3x512xf32> -> vector<3x512xf32>
    %615 = arith.addf %606, %614 : vector<3x512xf32>
    %c0_563 = arith.constant 0 : index
    %c128_564 = arith.constant 128 : index
    %616 = vector.load %arg10[%c0_563, %c128_564] : memref<8x768xf32, #tpu.memory_space<vmem>>, vector<8x512xf32>
    %c13_565 = arith.constant 13 : index
    %c0_566 = arith.constant 0 : index
    %c0_567 = arith.constant 0 : index
    %617 = vector.load %arg7[%c13_565, %c0_566, %c0_567] : memref<27x3x8xf32, #tpu.memory_space<vmem>>, vector<1x3x8xf32>
    %618 = vector.shape_cast %617 : vector<1x3x8xf32> to vector<3x8xf32>
    %cst_568 = arith.constant dense<0.000000e+00> : vector<3x512xf32>
    %619 = tpu.matmul %618, %616, %cst_568 {dimension_numbers = #tpu.dot_dimension_numbers<[1], [0], [0], [1], [0, 0, 1, 1], [], []>} : vector<3x8xf32>, vector<8x512xf32>, vector<3x512xf32> -> vector<3x512xf32>
    %620 = arith.addf %615, %619 : vector<3x512xf32>
    %c0_569 = arith.constant 0 : index
    %c129_570 = arith.constant 129 : index
    %621 = vector.load %arg10[%c0_569, %c129_570] : memref<8x768xf32, #tpu.memory_space<vmem>>, vector<8x512xf32>
    %c14_571 = arith.constant 14 : index
    %c0_572 = arith.constant 0 : index
    %c0_573 = arith.constant 0 : index
    %622 = vector.load %arg1[%c14_571, %c0_572, %c0_573] : memref<27x1x512xf32, #tpu.memory_space<vmem>>, vector<1x1x512xf32>
    %623 = vector.shape_cast %622 : vector<1x1x512xf32> to vector<1x512xf32>
    %624 = vector.broadcast %623 : vector<1x512xf32> to vector<8x512xf32>
    %625 = arith.mulf %621, %624 : vector<8x512xf32>
    %c14_574 = arith.constant 14 : index
    %c0_575 = arith.constant 0 : index
    %c0_576 = arith.constant 0 : index
    %626 = vector.load %arg7[%c14_574, %c0_575, %c0_576] : memref<27x3x8xf32, #tpu.memory_space<vmem>>, vector<1x3x8xf32>
    %627 = vector.shape_cast %626 : vector<1x3x8xf32> to vector<3x8xf32>
    %cst_577 = arith.constant dense<0.000000e+00> : vector<3x512xf32>
    %628 = tpu.matmul %627, %625, %cst_577 {dimension_numbers = #tpu.dot_dimension_numbers<[1], [0], [0], [1], [0, 0, 1, 1], [], []>} : vector<3x8xf32>, vector<8x512xf32>, vector<3x512xf32> -> vector<3x512xf32>
    %629 = arith.addf %620, %628 : vector<3x512xf32>
    %c0_578 = arith.constant 0 : index
    %c135_579 = arith.constant 135 : index
    %630 = vector.load %arg10[%c0_578, %c135_579] : memref<8x768xf32, #tpu.memory_space<vmem>>, vector<8x512xf32>
    %c15_580 = arith.constant 15 : index
    %c0_581 = arith.constant 0 : index
    %c0_582 = arith.constant 0 : index
    %631 = vector.load %arg1[%c15_580, %c0_581, %c0_582] : memref<27x1x512xf32, #tpu.memory_space<vmem>>, vector<1x1x512xf32>
    %632 = vector.shape_cast %631 : vector<1x1x512xf32> to vector<1x512xf32>
    %633 = vector.broadcast %632 : vector<1x512xf32> to vector<8x512xf32>
    %634 = arith.mulf %630, %633 : vector<8x512xf32>
    %c15_583 = arith.constant 15 : index
    %c0_584 = arith.constant 0 : index
    %c0_585 = arith.constant 0 : index
    %635 = vector.load %arg7[%c15_583, %c0_584, %c0_585] : memref<27x3x8xf32, #tpu.memory_space<vmem>>, vector<1x3x8xf32>
    %636 = vector.shape_cast %635 : vector<1x3x8xf32> to vector<3x8xf32>
    %cst_586 = arith.constant dense<0.000000e+00> : vector<3x512xf32>
    %637 = tpu.matmul %636, %634, %cst_586 {dimension_numbers = #tpu.dot_dimension_numbers<[1], [0], [0], [1], [0, 0, 1, 1], [], []>} : vector<3x8xf32>, vector<8x512xf32>, vector<3x512xf32> -> vector<3x512xf32>
    %638 = arith.addf %629, %637 : vector<3x512xf32>
    %c0_587 = arith.constant 0 : index
    %c136_588 = arith.constant 136 : index
    %639 = vector.load %arg10[%c0_587, %c136_588] : memref<8x768xf32, #tpu.memory_space<vmem>>, vector<8x512xf32>
    %c16_589 = arith.constant 16 : index
    %c0_590 = arith.constant 0 : index
    %c0_591 = arith.constant 0 : index
    %640 = vector.load %arg1[%c16_589, %c0_590, %c0_591] : memref<27x1x512xf32, #tpu.memory_space<vmem>>, vector<1x1x512xf32>
    %641 = vector.shape_cast %640 : vector<1x1x512xf32> to vector<1x512xf32>
    %642 = vector.broadcast %641 : vector<1x512xf32> to vector<8x512xf32>
    %643 = arith.mulf %639, %642 : vector<8x512xf32>
    %c16_592 = arith.constant 16 : index
    %c0_593 = arith.constant 0 : index
    %c0_594 = arith.constant 0 : index
    %644 = vector.load %arg7[%c16_592, %c0_593, %c0_594] : memref<27x3x8xf32, #tpu.memory_space<vmem>>, vector<1x3x8xf32>
    %645 = vector.shape_cast %644 : vector<1x3x8xf32> to vector<3x8xf32>
    %cst_595 = arith.constant dense<0.000000e+00> : vector<3x512xf32>
    %646 = tpu.matmul %645, %643, %cst_595 {dimension_numbers = #tpu.dot_dimension_numbers<[1], [0], [0], [1], [0, 0, 1, 1], [], []>} : vector<3x8xf32>, vector<8x512xf32>, vector<3x512xf32> -> vector<3x512xf32>
    %647 = arith.addf %638, %646 : vector<3x512xf32>
    %c0_596 = arith.constant 0 : index
    %c137_597 = arith.constant 137 : index
    %648 = vector.load %arg10[%c0_596, %c137_597] : memref<8x768xf32, #tpu.memory_space<vmem>>, vector<8x512xf32>
    %c17_598 = arith.constant 17 : index
    %c0_599 = arith.constant 0 : index
    %c0_600 = arith.constant 0 : index
    %649 = vector.load %arg1[%c17_598, %c0_599, %c0_600] : memref<27x1x512xf32, #tpu.memory_space<vmem>>, vector<1x1x512xf32>
    %650 = vector.shape_cast %649 : vector<1x1x512xf32> to vector<1x512xf32>
    %651 = vector.broadcast %650 : vector<1x512xf32> to vector<8x512xf32>
    %652 = arith.mulf %648, %651 : vector<8x512xf32>
    %c17_601 = arith.constant 17 : index
    %c0_602 = arith.constant 0 : index
    %c0_603 = arith.constant 0 : index
    %653 = vector.load %arg7[%c17_601, %c0_602, %c0_603] : memref<27x3x8xf32, #tpu.memory_space<vmem>>, vector<1x3x8xf32>
    %654 = vector.shape_cast %653 : vector<1x3x8xf32> to vector<3x8xf32>
    %cst_604 = arith.constant dense<0.000000e+00> : vector<3x512xf32>
    %655 = tpu.matmul %654, %652, %cst_604 {dimension_numbers = #tpu.dot_dimension_numbers<[1], [0], [0], [1], [0, 0, 1, 1], [], []>} : vector<3x8xf32>, vector<8x512xf32>, vector<3x512xf32> -> vector<3x512xf32>
    %656 = arith.addf %647, %655 : vector<3x512xf32>
    %c0_605 = arith.constant 0 : index
    %c183_606 = arith.constant 183 : index
    %657 = vector.load %arg10[%c0_605, %c183_606] : memref<8x768xf32, #tpu.memory_space<vmem>>, vector<8x512xf32>
    %c18_607 = arith.constant 18 : index
    %c0_608 = arith.constant 0 : index
    %c0_609 = arith.constant 0 : index
    %658 = vector.load %arg1[%c18_607, %c0_608, %c0_609] : memref<27x1x512xf32, #tpu.memory_space<vmem>>, vector<1x1x512xf32>
    %659 = vector.shape_cast %658 : vector<1x1x512xf32> to vector<1x512xf32>
    %660 = vector.broadcast %659 : vector<1x512xf32> to vector<8x512xf32>
    %661 = arith.mulf %657, %660 : vector<8x512xf32>
    %c18_610 = arith.constant 18 : index
    %c0_611 = arith.constant 0 : index
    %c0_612 = arith.constant 0 : index
    %662 = vector.load %arg7[%c18_610, %c0_611, %c0_612] : memref<27x3x8xf32, #tpu.memory_space<vmem>>, vector<1x3x8xf32>
    %663 = vector.shape_cast %662 : vector<1x3x8xf32> to vector<3x8xf32>
    %cst_613 = arith.constant dense<0.000000e+00> : vector<3x512xf32>
    %664 = tpu.matmul %663, %661, %cst_613 {dimension_numbers = #tpu.dot_dimension_numbers<[1], [0], [0], [1], [0, 0, 1, 1], [], []>} : vector<3x8xf32>, vector<8x512xf32>, vector<3x512xf32> -> vector<3x512xf32>
    %665 = arith.addf %656, %664 : vector<3x512xf32>
    %c0_614 = arith.constant 0 : index
    %c184_615 = arith.constant 184 : index
    %666 = vector.load %arg10[%c0_614, %c184_615] : memref<8x768xf32, #tpu.memory_space<vmem>>, vector<8x512xf32>
    %c19_616 = arith.constant 19 : index
    %c0_617 = arith.constant 0 : index
    %c0_618 = arith.constant 0 : index
    %667 = vector.load %arg1[%c19_616, %c0_617, %c0_618] : memref<27x1x512xf32, #tpu.memory_space<vmem>>, vector<1x1x512xf32>
    %668 = vector.shape_cast %667 : vector<1x1x512xf32> to vector<1x512xf32>
    %669 = vector.broadcast %668 : vector<1x512xf32> to vector<8x512xf32>
    %670 = arith.mulf %666, %669 : vector<8x512xf32>
    %c19_619 = arith.constant 19 : index
    %c0_620 = arith.constant 0 : index
    %c0_621 = arith.constant 0 : index
    %671 = vector.load %arg7[%c19_619, %c0_620, %c0_621] : memref<27x3x8xf32, #tpu.memory_space<vmem>>, vector<1x3x8xf32>
    %672 = vector.shape_cast %671 : vector<1x3x8xf32> to vector<3x8xf32>
    %cst_622 = arith.constant dense<0.000000e+00> : vector<3x512xf32>
    %673 = tpu.matmul %672, %670, %cst_622 {dimension_numbers = #tpu.dot_dimension_numbers<[1], [0], [0], [1], [0, 0, 1, 1], [], []>} : vector<3x8xf32>, vector<8x512xf32>, vector<3x512xf32> -> vector<3x512xf32>
    %674 = arith.addf %665, %673 : vector<3x512xf32>
    %c0_623 = arith.constant 0 : index
    %c185_624 = arith.constant 185 : index
    %675 = vector.load %arg10[%c0_623, %c185_624] : memref<8x768xf32, #tpu.memory_space<vmem>>, vector<8x512xf32>
    %c20_625 = arith.constant 20 : index
    %c0_626 = arith.constant 0 : index
    %c0_627 = arith.constant 0 : index
    %676 = vector.load %arg1[%c20_625, %c0_626, %c0_627] : memref<27x1x512xf32, #tpu.memory_space<vmem>>, vector<1x1x512xf32>
    %677 = vector.shape_cast %676 : vector<1x1x512xf32> to vector<1x512xf32>
    %678 = vector.broadcast %677 : vector<1x512xf32> to vector<8x512xf32>
    %679 = arith.mulf %675, %678 : vector<8x512xf32>
    %c20_628 = arith.constant 20 : index
    %c0_629 = arith.constant 0 : index
    %c0_630 = arith.constant 0 : index
    %680 = vector.load %arg7[%c20_628, %c0_629, %c0_630] : memref<27x3x8xf32, #tpu.memory_space<vmem>>, vector<1x3x8xf32>
    %681 = vector.shape_cast %680 : vector<1x3x8xf32> to vector<3x8xf32>
    %cst_631 = arith.constant dense<0.000000e+00> : vector<3x512xf32>
    %682 = tpu.matmul %681, %679, %cst_631 {dimension_numbers = #tpu.dot_dimension_numbers<[1], [0], [0], [1], [0, 0, 1, 1], [], []>} : vector<3x8xf32>, vector<8x512xf32>, vector<3x512xf32> -> vector<3x512xf32>
    %683 = arith.addf %674, %682 : vector<3x512xf32>
    %c0_632 = arith.constant 0 : index
    %c191_633 = arith.constant 191 : index
    %684 = vector.load %arg10[%c0_632, %c191_633] : memref<8x768xf32, #tpu.memory_space<vmem>>, vector<8x512xf32>
    %c21_634 = arith.constant 21 : index
    %c0_635 = arith.constant 0 : index
    %c0_636 = arith.constant 0 : index
    %685 = vector.load %arg1[%c21_634, %c0_635, %c0_636] : memref<27x1x512xf32, #tpu.memory_space<vmem>>, vector<1x1x512xf32>
    %686 = vector.shape_cast %685 : vector<1x1x512xf32> to vector<1x512xf32>
    %687 = vector.broadcast %686 : vector<1x512xf32> to vector<8x512xf32>
    %688 = arith.mulf %684, %687 : vector<8x512xf32>
    %c21_637 = arith.constant 21 : index
    %c0_638 = arith.constant 0 : index
    %c0_639 = arith.constant 0 : index
    %689 = vector.load %arg7[%c21_637, %c0_638, %c0_639] : memref<27x3x8xf32, #tpu.memory_space<vmem>>, vector<1x3x8xf32>
    %690 = vector.shape_cast %689 : vector<1x3x8xf32> to vector<3x8xf32>
    %cst_640 = arith.constant dense<0.000000e+00> : vector<3x512xf32>
    %691 = tpu.matmul %690, %688, %cst_640 {dimension_numbers = #tpu.dot_dimension_numbers<[1], [0], [0], [1], [0, 0, 1, 1], [], []>} : vector<3x8xf32>, vector<8x512xf32>, vector<3x512xf32> -> vector<3x512xf32>
    %692 = arith.addf %683, %691 : vector<3x512xf32>
    %c0_641 = arith.constant 0 : index
    %c192_642 = arith.constant 192 : index
    %693 = vector.load %arg10[%c0_641, %c192_642] : memref<8x768xf32, #tpu.memory_space<vmem>>, vector<8x512xf32>
    %c22_643 = arith.constant 22 : index
    %c0_644 = arith.constant 0 : index
    %c0_645 = arith.constant 0 : index
    %694 = vector.load %arg1[%c22_643, %c0_644, %c0_645] : memref<27x1x512xf32, #tpu.memory_space<vmem>>, vector<1x1x512xf32>
    %695 = vector.shape_cast %694 : vector<1x1x512xf32> to vector<1x512xf32>
    %696 = vector.broadcast %695 : vector<1x512xf32> to vector<8x512xf32>
    %697 = arith.mulf %693, %696 : vector<8x512xf32>
    %c22_646 = arith.constant 22 : index
    %c0_647 = arith.constant 0 : index
    %c0_648 = arith.constant 0 : index
    %698 = vector.load %arg7[%c22_646, %c0_647, %c0_648] : memref<27x3x8xf32, #tpu.memory_space<vmem>>, vector<1x3x8xf32>
    %699 = vector.shape_cast %698 : vector<1x3x8xf32> to vector<3x8xf32>
    %cst_649 = arith.constant dense<0.000000e+00> : vector<3x512xf32>
    %700 = tpu.matmul %699, %697, %cst_649 {dimension_numbers = #tpu.dot_dimension_numbers<[1], [0], [0], [1], [0, 0, 1, 1], [], []>} : vector<3x8xf32>, vector<8x512xf32>, vector<3x512xf32> -> vector<3x512xf32>
    %701 = arith.addf %692, %700 : vector<3x512xf32>
    %c0_650 = arith.constant 0 : index
    %c193_651 = arith.constant 193 : index
    %702 = vector.load %arg10[%c0_650, %c193_651] : memref<8x768xf32, #tpu.memory_space<vmem>>, vector<8x512xf32>
    %c23_652 = arith.constant 23 : index
    %c0_653 = arith.constant 0 : index
    %c0_654 = arith.constant 0 : index
    %703 = vector.load %arg1[%c23_652, %c0_653, %c0_654] : memref<27x1x512xf32, #tpu.memory_space<vmem>>, vector<1x1x512xf32>
    %704 = vector.shape_cast %703 : vector<1x1x512xf32> to vector<1x512xf32>
    %705 = vector.broadcast %704 : vector<1x512xf32> to vector<8x512xf32>
    %706 = arith.mulf %702, %705 : vector<8x512xf32>
    %c23_655 = arith.constant 23 : index
    %c0_656 = arith.constant 0 : index
    %c0_657 = arith.constant 0 : index
    %707 = vector.load %arg7[%c23_655, %c0_656, %c0_657] : memref<27x3x8xf32, #tpu.memory_space<vmem>>, vector<1x3x8xf32>
    %708 = vector.shape_cast %707 : vector<1x3x8xf32> to vector<3x8xf32>
    %cst_658 = arith.constant dense<0.000000e+00> : vector<3x512xf32>
    %709 = tpu.matmul %708, %706, %cst_658 {dimension_numbers = #tpu.dot_dimension_numbers<[1], [0], [0], [1], [0, 0, 1, 1], [], []>} : vector<3x8xf32>, vector<8x512xf32>, vector<3x512xf32> -> vector<3x512xf32>
    %710 = arith.addf %701, %709 : vector<3x512xf32>
    %c0_659 = arith.constant 0 : index
    %c199_660 = arith.constant 199 : index
    %711 = vector.load %arg10[%c0_659, %c199_660] : memref<8x768xf32, #tpu.memory_space<vmem>>, vector<8x512xf32>
    %c24_661 = arith.constant 24 : index
    %c0_662 = arith.constant 0 : index
    %c0_663 = arith.constant 0 : index
    %712 = vector.load %arg1[%c24_661, %c0_662, %c0_663] : memref<27x1x512xf32, #tpu.memory_space<vmem>>, vector<1x1x512xf32>
    %713 = vector.shape_cast %712 : vector<1x1x512xf32> to vector<1x512xf32>
    %714 = vector.broadcast %713 : vector<1x512xf32> to vector<8x512xf32>
    %715 = arith.mulf %711, %714 : vector<8x512xf32>
    %c24_664 = arith.constant 24 : index
    %c0_665 = arith.constant 0 : index
    %c0_666 = arith.constant 0 : index
    %716 = vector.load %arg7[%c24_664, %c0_665, %c0_666] : memref<27x3x8xf32, #tpu.memory_space<vmem>>, vector<1x3x8xf32>
    %717 = vector.shape_cast %716 : vector<1x3x8xf32> to vector<3x8xf32>
    %cst_667 = arith.constant dense<0.000000e+00> : vector<3x512xf32>
    %718 = tpu.matmul %717, %715, %cst_667 {dimension_numbers = #tpu.dot_dimension_numbers<[1], [0], [0], [1], [0, 0, 1, 1], [], []>} : vector<3x8xf32>, vector<8x512xf32>, vector<3x512xf32> -> vector<3x512xf32>
    %719 = arith.addf %710, %718 : vector<3x512xf32>
    %c0_668 = arith.constant 0 : index
    %c200_669 = arith.constant 200 : index
    %720 = vector.load %arg10[%c0_668, %c200_669] : memref<8x768xf32, #tpu.memory_space<vmem>>, vector<8x512xf32>
    %c25_670 = arith.constant 25 : index
    %c0_671 = arith.constant 0 : index
    %c0_672 = arith.constant 0 : index
    %721 = vector.load %arg1[%c25_670, %c0_671, %c0_672] : memref<27x1x512xf32, #tpu.memory_space<vmem>>, vector<1x1x512xf32>
    %722 = vector.shape_cast %721 : vector<1x1x512xf32> to vector<1x512xf32>
    %723 = vector.broadcast %722 : vector<1x512xf32> to vector<8x512xf32>
    %724 = arith.mulf %720, %723 : vector<8x512xf32>
    %c25_673 = arith.constant 25 : index
    %c0_674 = arith.constant 0 : index
    %c0_675 = arith.constant 0 : index
    %725 = vector.load %arg7[%c25_673, %c0_674, %c0_675] : memref<27x3x8xf32, #tpu.memory_space<vmem>>, vector<1x3x8xf32>
    %726 = vector.shape_cast %725 : vector<1x3x8xf32> to vector<3x8xf32>
    %cst_676 = arith.constant dense<0.000000e+00> : vector<3x512xf32>
    %727 = tpu.matmul %726, %724, %cst_676 {dimension_numbers = #tpu.dot_dimension_numbers<[1], [0], [0], [1], [0, 0, 1, 1], [], []>} : vector<3x8xf32>, vector<8x512xf32>, vector<3x512xf32> -> vector<3x512xf32>
    %728 = arith.addf %719, %727 : vector<3x512xf32>
    %c0_677 = arith.constant 0 : index
    %c201_678 = arith.constant 201 : index
    %729 = vector.load %arg10[%c0_677, %c201_678] : memref<8x768xf32, #tpu.memory_space<vmem>>, vector<8x512xf32>
    %c26_679 = arith.constant 26 : index
    %c0_680 = arith.constant 0 : index
    %c0_681 = arith.constant 0 : index
    %730 = vector.load %arg1[%c26_679, %c0_680, %c0_681] : memref<27x1x512xf32, #tpu.memory_space<vmem>>, vector<1x1x512xf32>
    %731 = vector.shape_cast %730 : vector<1x1x512xf32> to vector<1x512xf32>
    %732 = vector.broadcast %731 : vector<1x512xf32> to vector<8x512xf32>
    %733 = arith.mulf %729, %732 : vector<8x512xf32>
    %c26_682 = arith.constant 26 : index
    %c0_683 = arith.constant 0 : index
    %c0_684 = arith.constant 0 : index
    %734 = vector.load %arg7[%c26_682, %c0_683, %c0_684] : memref<27x3x8xf32, #tpu.memory_space<vmem>>, vector<1x3x8xf32>
    %735 = vector.shape_cast %734 : vector<1x3x8xf32> to vector<3x8xf32>
    %cst_685 = arith.constant dense<0.000000e+00> : vector<3x512xf32>
    %736 = tpu.matmul %735, %733, %cst_685 {dimension_numbers = #tpu.dot_dimension_numbers<[1], [0], [0], [1], [0, 0, 1, 1], [], []>} : vector<3x8xf32>, vector<8x512xf32>, vector<3x512xf32> -> vector<3x512xf32>
    %737 = arith.addf %728, %736 : vector<3x512xf32>
    %c0_686 = arith.constant 0 : index
    %c0_687 = arith.constant 0 : index
    %738 = vector.load %arg8[%c0_686, %c0_687] : memref<3x1xf32, #tpu.memory_space<vmem>>, vector<3x1xf32>
    %739 = vector.broadcast %738 : vector<3x1xf32> to vector<3x512xf32>
    %740 = arith.addf %737, %739 : vector<3x512xf32>
    %c0_688 = arith.constant 0 : index
    %c0_689 = arith.constant 0 : index
    %c0_690 = arith.constant 0 : index
    %741 = vector.load %arg9[%c0_688, %c0_689, %c0_690] : memref<1x3x512xf32, #tpu.memory_space<vmem>>, vector<1x3x512xf32>
    %742 = vector.shape_cast %741 : vector<1x3x512xf32> to vector<3x512xf32>
    %743 = vector.shape_cast %740 : vector<3x512xf32> to vector<1x3x512xf32>
    tpu.vector_store %arg9[%c0_688, %c0_689, %c0_690], %743 {strides = array<i32>} : memref<1x3x512xf32, #tpu.memory_space<vmem>>, vector<1x3x512xf32>,
    return
  }
  func.func @transform_0(%arg0: i32) -> (i32, i32, i32) {
    %c0_i32 = arith.constant 0 : i32
    %c0_i32_0 = arith.constant 0 : i32
    %c0_i32_1 = arith.constant 0 : i32
    %c0_i32_2 = arith.constant 0 : i32
    return %c0_i32, %c0_i32_0, %c0_i32_1 : i32, i32, i32
  }
  func.func @transform_1(%arg0: i32) -> (i32, i32, i32) {
    %c0_i32 = arith.constant 0 : i32
    %c0_i32_0 = arith.constant 0 : i32
    %c0_i32_1 = arith.constant 0 : i32
    return %arg0, %c0_i32, %c0_i32_0 : i32, i32, i32
  }
  func.func @transform_2(%arg0: i32) -> (i32, i32, i32) {
    %c0_i32 = arith.constant 0 : i32
    %c0_i32_0 = arith.constant 0 : i32
    %c0_i32_1 = arith.constant 0 : i32
    %c0_i32_2 = arith.constant 0 : i32
    return %c0_i32, %c0_i32_0, %c0_i32_1 : i32, i32, i32
  }
  func.func @transform_3(%arg0: i32) -> (i32, i32) {
    %c0_i32 = arith.constant 0 : i32
    %c0_i32_0 = arith.constant 0 : i32
    %c0_i32_1 = arith.constant 0 : i32
    return %c0_i32, %c0_i32_0 : i32, i32
  }
  func.func @transform_4(%arg0: i32) -> (i32, i32, i32) {
    %c0_i32 = arith.constant 0 : i32
    %c0_i32_0 = arith.constant 0 : i32
    %c0_i32_1 = arith.constant 0 : i32
    %c0_i32_2 = arith.constant 0 : i32
    return %c0_i32, %c0_i32_0, %c0_i32_1 : i32, i32, i32
  }
  func.func @transform_5(%arg0: i32) -> (i32, i32) {
    %c0_i32 = arith.constant 0 : i32
    %c0_i32_0 = arith.constant 0 : i32
    %c0_i32_1 = arith.constant 0 : i32
    return %c0_i32, %c0_i32_0 : i32, i32
  }
  func.func @transform_6(%arg0: i32) -> (i32, i32, i32) {
    %c0_i32 = arith.constant 0 : i32
    %c0_i32_0 = arith.constant 0 : i32
    %c0_i32_1 = arith.constant 0 : i32
    %c0_i32_2 = arith.constant 0 : i32
    return %c0_i32, %c0_i32_0, %c0_i32_1 : i32, i32, i32
  }
  func.func @transform_7(%arg0: i32) -> (i32, i32) {
    %c0_i32 = arith.constant 0 : i32
    %c0_i32_0 = arith.constant 0 : i32
    %c0_i32_1 = arith.constant 0 : i32
    return %c0_i32, %c0_i32_0 : i32, i32
  }
  func.func @transform_8(%arg0: i32) -> (i32, i32, i32) {
    %c0_i32 = arith.constant 0 : i32
    %c0_i32_0 = arith.constant 0 : i32
    %c0_i32_1 = arith.constant 0 : i32
    return %arg0, %c0_i32, %c0_i32_0 : i32, i32, i32
  }
}

</mosaic_0001>

<bundles_post_ra>
// kernel: flow_predictor_forward.1
= control target key start
LH: loop header
LB: loop body
LE: loop exit
PB: predicated region body
PF: predicated region fallthrough
CT: control target
= control target key end

     0   :  { %s17988_s27 = smov 0   ;;  %s21898_s0 = inlined_call_operand.vmem [shape: f32[27,1,512], index: 0, kind: input, shape index: {}]   ;;  %s21899_s1 = inlined_call_operand.vmem [shape: f32[2,8,512], index: 1, kind: input, shape index: {}]   ;;  %s21900_s2 = inlined_call_operand.vmem [shape: f32[27,8,8], index: 2, kind: input, shape index: {}]   ;;  %s21901_s3 = inlined_call_operand.vmem [shape: f32[8,1], index: 3, kind: input, shape index: {}]   ;;  %s21902_s4 = inlined_call_operand.vmem [shape: f32[27,8,8], index: 4, kind: input, shape index: {}]   ;;  %s21903_s5 = inlined_call_operand.vmem [shape: f32[8,1], index: 5, kind: input, shape index: {}]   ;;  %s21904_s6 = inlined_call_operand.vmem [shape: f32[27,3,8], index: 6, kind: input, shape index: {}]   ;;  %s21905_s7 = inlined_call_operand.vmem [shape: f32[3,1], index: 7, kind: input, shape index: {}]   ;;  %s21906_s8 = inlined_call_operand.vmem [shape: f32[2,3,512], index: 8, kind: output, shape index: {}]  }
   0x1 LB: > { %s17555_s28 = sadd.s32 4294967295, %s17922_s27   ;;  %p17559_p0 = scmp.ge.s32.totalorder %s17922_s27, 1  ;;  %s17922_s27 = sphi %s17988_s27, %s18_s27  }
   0x2   : > { %p262_p1 = scmp.lt.s32.totalorder %s17922_s27, 3 }
   0x4   : > { %p263_p2 = pnand %p17559_p0, %p262_p1 }
   0x6   : > { %266 = sbr.rel (%p263_p2) target bundleno = 4489 (0x1189), region = 52 }
   0xb   : > { %v323_v0 = vlaneseq  ;;  %v321_v2 = vld [vmem:[%s21898_s0] sm:$0xf]  ;;  %s17924_s9 = smov 55   ;;  %v17564_v11 = vld [vmem:[%s21898_s0 + $0x4] sm:$0xf]  ;;  %s17925_s12 = smov 56  }
   0xc   : > { %v17570_v16 = vld [vmem:[%s21898_s0 + $0x8] sm:$0xf]  ;;  %s17926_s15 = smov 57   ;;  %v17574_v21 = vld [vmem:[%s21898_s0 + $0xc] sm:$0xf]  ;;  %s17927_s18 = smov 63  }
   0xd   : > { %v324_v1 = vshrl.u32 %v323_v0, 7  ;;  %v17578_v26 = vld [vmem:[%s21898_s0 + $0x10] sm:$0xf]  ;;  %s17928_s21 = smov 64   ;;  %v17582_v31 = vld [vmem:[%s21898_s0 + $0x14] sm:$0xf] }
   0xe   : > { %s17929_s24 = smov 65   ;;  %v17586_v36 = vld [vmem:[%s21898_s0 + $0x18] sm:$0xf]  ;;  %s17930_s29 = smov 71   ;;  %v18082_v41 = vld [vmem:[%s21898_s0 + $0x1c] sm:$0xf] }
   0xf   : > { %v17999_v3 = vsub.s32 2, %v324_v1  ;;  %v18001_v4 = vsub.s32 0, %v324_v1  ;;  %v18003_v5 = vsub.s32 3, %v324_v1  ;;  %v18005_v6 = vsub.s32 1, %v324_v1  ;;  %s17931_s11 = smov 72   ;;  %p296_p3 = scmp.lt.s32.totalorder %s17555_s28, 1 }
  0x10   : > { %s17932_s19 = smov 73   ;;  %vm389_vm0 = vcmask 457728   ;;  %vm347_vm1 = vcmask 449536   ;;  %vm771_vm2 = vcmask 465920   ;;  %vm987_vm3 = vcmask 515072   ;;  %s21928_s20 = smov 119  }
  0x11   : > { %21946 = vst [vmem:[#allocation3_spill] sm:$0xff] %v17999_v3  ;;  %21947 = vst [vmem:[#allocation4_spill] sm:$0xff] %v18001_v4  ;;  %v334_v7 = vrot.slane %v321_v2, %v17999_v3  ;;  %v326_v8 = vrot.slane %v321_v2, %v18001_v4  ;;  %v338_v9 = vrot.slane %v321_v2, %v18003_v5  ;;  %s22117_s28 = smov (!%p296_p3, %s17555_s28), 1  ;;  %vm1203_vm4 = vcmask 523264   ;;  %s21930_s25 = smov 9  }
  0x12   : > { %21948 = vst [vmem:[#allocation5_spill] sm:$0xff] %v18003_v5  ;;  %21949 = vst [vmem:[#allocation6_spill] sm:$0xff] %v18005_v6  ;;  %v330_v10 = vrot.slane %v321_v2, %v18005_v6  ;;  %v372_v12 = vrot.slane %v17564_v11, %v18005_v6  ;;  %v368_v13 = vrot.slane %v17564_v11, %v18001_v4  ;;  %s17881_s13 = sshll.u32 %s22117_s28, 5  ;;  %vm1018_vm5 = vcmask 531456   ;;  %s17936_s10 = smov 120  }
  0x13   : > { %343 = vrot.lane.b32.xlu1 %v334_v7, %s17924_s9  ;;  %339 = vrot.lane.b32.xlu0 %v326_v8, %s17924_s9  ;;  %v380_v14 = vrot.slane %v17564_v11, %v18003_v5  ;;  %v376_v15 = vrot.slane %v17564_v11, %v17999_v3  ;;  %v754_v17 = vrot.slane %v17570_v16, %v18005_v6  ;;  %s18099_s17 = scalar_lea.vmem %s21899_s1, %s17881_s13  ;;  %vm802_vm6 = vcmask 580608   ;;  %s17937_s16 = smov 8  }
  0x14   : > { %v750_v18 = vrot.slane %v17570_v16, %v18001_v4  ;;  %v762_v19 = vrot.slane %v17570_v16, %v18003_v5  ;;  %v758_v20 = vrot.slane %v17570_v16, %v17999_v3  ;;  %v966_v22 = vrot.slane %v17574_v21, %v18001_v4  ;;  %v18107_v46 = vld [vmem:[%s18099_s17 + $0x18] sm:$0xff]  ;;  %s17938_s26 = smov 121   ;;  %s21908_s14 = smov 7  }
  0x15   : > { %v970_v23 = vrot.slane %v17574_v21, %v18005_v6  ;;  %v974_v24 = vrot.slane %v17574_v21, %v17999_v3  ;;  %v978_v25 = vrot.slane %v17574_v21, %v18003_v5  ;;  %v1186_v27 = vrot.slane %v17578_v26, %v18005_v6  ;;  %s21915_s30 = smov 127   ;;  %s21913_s23 = smov 1  }
  0x16   : > { %v1182_v28 = vrot.slane %v17578_v26, %v18001_v4  ;;  %v1194_v29 = vrot.slane %v17578_v26, %v18003_v5  ;;  %v1190_v30 = vrot.slane %v17578_v26, %v17999_v3  ;;  %v1397_v32 = vrot.slane %v17582_v31, %v18001_v4  ;;  %s22008_s22 = smov 1   ;;  %s22009_s13 = smov 7  }
  0x17   : > { %345 = vrot.lane.b32.xlu1 %v338_v9, %s17924_s9  ;;  %341 = vrot.lane.b32.xlu0 %v330_v10, %s17924_s9  ;;  %v1401_v33 = vrot.slane %v17582_v31, %v18005_v6  ;;  %v1405_v34 = vrot.slane %v17582_v31, %v17999_v3  ;;  %v1409_v35 = vrot.slane %v17582_v31, %v18003_v5  ;;  %vm21907_vm7 = vcmask 588800  }
  0x18   : > { %v1615_v37 = vrot.slane %v17586_v36, %v18005_v6  ;;  %v1611_v38 = vrot.slane %v17586_v36, %v18001_v4  ;;  %v1623_v39 = vrot.slane %v17586_v36, %v18003_v5  ;;  %v1619_v40 = vrot.slane %v17586_v36, %v17999_v3 }
  0x19   : > { %v1825_v42 = vrot.slane %v18082_v41, %v18001_v4  ;;  %vm429_vm8 = vcmask 64512   ;;  %vm590_vm9 = vcmask 596992   ;;  %vm2274_vm10 = vcmask 973824  }
  0x1a   : > { %vm2305_vm11 = vcmask 72704   ;;  %vm2490_vm12 = vcmask 982016   ;;  %vm21917_vm13 = vcmask 990208   ;;  %vm21910_vm14 = vcmask 56320  }
  0x1b   : > { %383 = vrot.lane.b32.xlu1 %v372_v12, %s17925_s12  ;;  %381 = vrot.lane.b32.xlu0 %v368_v13, %s17925_s12  ;;  %vm21912_vm15 = vcmask 1039360  }
  0x1f   : > { %387 = vrot.lane.b32.xlu1 %v380_v14, %s17925_s12  ;;  %385 = vrot.lane.b32.xlu0 %v376_v15, %s17925_s12 }
  0x23   : > { %765 = vrot.lane.b32.xlu1 %v754_v17, %s17926_s15  ;;  %763 = vrot.lane.b32.xlu0 %v750_v18, %s17926_s15 }
  0x27   : > { %769 = vrot.lane.b32.xlu1 %v762_v19, %s17926_s15  ;;  %767 = vrot.lane.b32.xlu0 %v758_v20, %s17926_s15 }
  0x2b   : > { %979 = vrot.lane.b32.xlu1 %v966_v22, %s17927_s18  ;;  %981 = vrot.lane.b32.xlu0 %v970_v23, %s17927_s18  ;;  %v18172_v23 = vld [vmem:[%s18099_s17] sm:$0xff] }
  0x2f   : > { %983 = vrot.lane.b32.xlu1 %v974_v24, %s17927_s18  ;;  %985 = vrot.lane.b32.xlu0 %v978_v25, %s17927_s18 }
  0x33   : > { %1197 = vrot.lane.b32.xlu1 %v1186_v27, %s17928_s21  ;;  %1195 = vrot.lane.b32.xlu0 %v1182_v28, %s17928_s21  ;;  %v21918_v27 = vmov 0.0  }
  0x34   : > { %497 = vmatprep.mubr.f32.mxu0 %v21918_v27  ;;  %568 = vmatprep.mubr.f32.mxu1 %v21918_v27 }
  0x37   : > { %1201 = vrot.lane.b32.xlu1 %v1194_v29, %s17928_s21  ;;  %1199 = vrot.lane.b32.xlu0 %v1190_v30, %s17928_s21  ;;  %v18182_v29 = vld [vmem:[%s18099_s17 + $0x10] sm:$0xff] }
  0x3b   : > { %1410 = vrot.lane.b32.xlu1 %v1397_v32, %s17929_s24  ;;  %1412 = vrot.lane.b32.xlu0 %v1401_v33, %s17929_s24 }
  0x3f   : > { %1414 = vrot.lane.b32.xlu1 %v1405_v34, %s17929_s24  ;;  %1416 = vrot.lane.b32.xlu0 %v1409_v35, %s17929_s24  ;;  %v18191_v34 = vld [vmem:[%s18099_s17 + $0x8] sm:$0xff] }
  0x43   : > { %1626 = vrot.lane.b32.xlu1 %v1615_v37, %s17930_s29  ;;  %1624 = vrot.lane.b32.xlu0 %v1611_v38, %s17930_s29 }
  0x47   : > { %1630 = vrot.lane.b32.xlu1 %v1623_v39, %s17930_s29  ;;  %1628 = vrot.lane.b32.xlu0 %v1619_v40, %s17930_s29 }
  0x4b   : > { %1838 = vrot.lane.b32.xlu1 %v1825_v42, %s17931_s11 }
  0x85   : > { %v18101_v43 = vpop.permute.xlu1 %343  ;;  %v18103_v44 = vpop.permute.xlu0 %339 }
  0x86   : > { %v356_v45 = vmul.f32 0.0, %v18103_v44 }
  0x88   : > { %580 = vrot.lane.b32.xlu1 %v356_v45, %s17932_s19 }
  0x89   : > { %v18110_v47 = vpop.permute.xlu1 %345  ;;  %v18112_v48 = vpop.permute.xlu0 %341 }
  0x8a   : > { %v360_v49 = vmul.f32 %v18110_v47, %v18107_v46  ;;  %v349_v32 = vsel %vm347_vm1, %v18112_v48, %v18101_v43  ;;  %v348_v37 = vsel %vm347_vm1, %v18103_v44, %v18112_v48  ;;  %v350_v42 = vsel %vm347_vm1, %v18101_v43, %v18110_v47 }
  0x8b   : > { %v358_v36 = vmul.f32 %v349_v32, %v18191_v34  ;;  %v357_v40 = vmul.f32 %v348_v37, %v18172_v23  ;;  %v359_v48 = vmul.f32 %v350_v42, %v18182_v29 }
  0x8c   : > { %588 = vrot.lane.b32.xlu1 %v360_v49, %s17932_s19 }
  0x8d   : > { %v384_v50 = vpop.permute.xlu1 %383  ;;  %v382_v51 = vpop.permute.xlu0 %381 }
  0x8e   : > { %v398_v52 = vmul.f32 0.0, %v382_v51  ;;  %v390_v20 = vsel %vm389_vm0, %v382_v51, %v384_v50 }
  0x8f   : > { %v399_v25 = vmul.f32 %v390_v20, %v18172_v23 }
  0x90   : > { %410 = vrot.lane.b32.xlu0 %v398_v52, %s17931_s11 }
  0x91   : > { %v388_v53 = vpop.permute.xlu1 %387  ;;  %v386_v54 = vpop.permute.xlu0 %385 }
  0x92   : > { %v402_v55 = vmul.f32 %v388_v53, %v18107_v46  ;;  %v392_v26 = vsel %vm389_vm0, %v386_v54, %v388_v53  ;;  %v391_v33 = vsel %vm389_vm0, %v384_v50, %v386_v54 }
  0x93   : > { %v401_v31 = vmul.f32 %v392_v26, %v18182_v29  ;;  %v400_v35 = vmul.f32 %v391_v33, %v18191_v34 }
  0x94   : > { %418 = vrot.lane.b32.xlu0 %v402_v55, %s17931_s11 }
  0x95   : > { %v18120_v56 = vpop.permute.xlu1 %765  ;;  %v764_v57 = vpop.permute.xlu0 %763 }
  0x96   : > { %v780_v58 = vmul.f32 0.0, %v764_v57  ;;  %v772_v38 = vsel %vm771_vm2, %v764_v57, %v18120_v56 }
  0x97   : > { %v781_v39 = vmul.f32 %v772_v38, %v18172_v23 }
  0x98   : > { %792 = vrot.lane.b32.xlu0 %v780_v58, %s17930_s29 }
  0x99   : > { %v770_v59 = vpop.permute.xlu1 %769  ;;  %v18123_v60 = vpop.permute.xlu0 %767 }
  0x9a   : > { %v784_v61 = vmul.f32 %v770_v59, %v18107_v46  ;;  %v774_v45 = vsel %vm771_vm2, %v18123_v60, %v770_v59  ;;  %v773_v49 = vsel %vm771_vm2, %v18120_v56, %v18123_v60 }
  0x9b   : > { %v783_v44 = vmul.f32 %v774_v45, %v18182_v29  ;;  %v782_v50 = vmul.f32 %v773_v49, %v18191_v34 }
  0x9c   : > { %800 = vrot.lane.b32.xlu0 %v784_v61, %s17930_s29 }
  0x9d   : > { %v18127_v62 = vpop.permute.xlu1 %979  ;;  %v18129_v63 = vpop.permute.xlu0 %981 }
  0x9e   : > { %v996_v0 = vmul.f32 0.0, %v18127_v62  ;;  %v988_v51 = vsel %vm987_vm3, %v18127_v62, %v18129_v63 }
  0x9f   : > { %v997_v54 = vmul.f32 %v988_v51, %v18172_v23  ;;  %v361_v51 = vld [vmem:[%s21900_s2] sm:$0xff] }
  0xa0   : > { %1008 = vrot.lane.b32.xlu1 %v996_v0, %s17929_s24 }
  0xa1   : > { %v18133_v1 = vpop.permute.xlu1 %983  ;;  %v18135_v2 = vpop.permute.xlu0 %985 }
  0xa2   : > { %v1000_v7 = vmul.f32 %v18135_v2, %v18107_v46  ;;  %v989_v43 = vsel %vm987_vm3, %v18129_v63, %v18133_v1  ;;  %v990_v55 = vsel %vm987_vm3, %v18133_v1, %v18135_v2 }
  0xa3   : > { %v998_v47 = vmul.f32 %v989_v43, %v18191_v34  ;;  %v999_v58 = vmul.f32 %v990_v55, %v18182_v29 }
  0xa4   : > { %1016 = vrot.lane.b32.xlu1 %v1000_v7, %s17929_s24 }
  0xa5   : > { %v18140_v8 = vpop.permute.xlu1 %1197  ;;  %v18142_v9 = vpop.permute.xlu0 %1195 }
  0xa6   : > { %v1212_v10 = vmul.f32 0.0, %v18142_v9  ;;  %v1204_v52 = vsel %vm1203_vm4, %v18142_v9, %v18140_v8 }
  0xa7   : > { %v1213_v53 = vmul.f32 %v1204_v52, %v18172_v23 }
  0xa8   : > { %1224 = vrot.lane.b32.xlu0 %v1212_v10, %s17928_s21 }
  0xa9   : > { %v18146_v11 = vpop.permute.xlu1 %1201  ;;  %v18148_v12 = vpop.permute.xlu0 %1199 }
  0xaa   : > { %v1216_v13 = vmul.f32 %v18146_v11, %v18107_v46  ;;  %v1206_v56 = vsel %vm1203_vm4, %v18148_v12, %v18146_v11  ;;  %v1205_v59 = vsel %vm1203_vm4, %v18140_v8, %v18148_v12 }
  0xab   : > { %v1215_v57 = vmul.f32 %v1206_v56, %v18182_v29  ;;  %v1214_v62 = vmul.f32 %v1205_v59, %v18191_v34 }
  0xac   : > { %1232 = vrot.lane.b32.xlu0 %v1216_v13, %s17928_s21  ;;  %v1833_v13 = vrot.slane %v18082_v41, %v17999_v3 }
  0xad   : > { %v18153_v14 = vpop.permute.xlu1 %1410  ;;  %v18155_v15 = vpop.permute.xlu0 %1412 }
  0xae   : > { %v1426_v16 = vmul.f32 0.0, %v18153_v14  ;;  %v1418_v63 = vsel %vm1018_vm5, %v18153_v14, %v18155_v15 }
  0xaf   : > { %v1427_v7 = vmul.f32 %v1418_v63, %v18172_v23 }
  0xb0   : > { %1438 = vrot.lane.b32.xlu1 %v1426_v16, %s17927_s18  ;;  %v1829_v16 = vrot.slane %v18082_v41, %v18005_v6 }
  0xb1   : > { %v18159_v17 = vpop.permute.xlu1 %1414  ;;  %v18161_v18 = vpop.permute.xlu0 %1416 }
  0xb2   : > { %v1430_v19 = vmul.f32 %v18161_v18, %v18107_v46  ;;  %v1419_v60 = vsel %vm1018_vm5, %v18155_v15, %v18159_v17  ;;  %v1420_v8 = vsel %vm1018_vm5, %v18159_v17, %v18161_v18  ;;  %v1837_v18 = vrot.slane %v18082_v41, %v18003_v5 }
  0xb3   : > { %v1428_v61 = vmul.f32 %v1419_v60, %v18191_v34  ;;  %v1429_v11 = vmul.f32 %v1420_v8, %v18182_v29 }
  0xb4   : > { %1446 = vrot.lane.b32.xlu1 %v1430_v19, %s17927_s18 }
  0xb5   : > { %v18167_v21 = vpop.permute.xlu1 %1626  ;;  %v18169_v22 = vpop.permute.xlu0 %1624 }
  0xb6   : > { %v1640_v24 = vmul.f32 0.0, %v18169_v22  ;;  %v1632_v0 = vsel %vm802_vm6, %v18169_v22, %v18167_v21 }
  0xb7   : > { %v1641_v2 = vmul.f32 %v1632_v0, %v18172_v23 }
  0xb8   : > { %1652 = vrot.lane.b32.xlu0 %v1640_v24, %s17926_s15  ;;  %412 = vrot.lane.b32.xlu1 %v399_v25, %s17931_s11 }
  0xb9   : > { %v1631_v28 = vpop.permute.xlu1 %1630  ;;  %v1629_v1 = vpop.permute.xlu0 %1628 }
  0xba   : > { %v1644_v30 = vmul.f32 %v1631_v28, %v18107_v46  ;;  %v1634_v9 = vsel %vm802_vm6, %v1629_v1, %v1631_v28  ;;  %v1633_v12 = vsel %vm802_vm6, %v18167_v21, %v1629_v1 }
  0xbb   : > { %v1643_v10 = vmul.f32 %v1634_v9, %v18182_v29  ;;  %v1642_v14 = vmul.f32 %v1633_v12, %v18191_v34 }
  0xbc   : > { %1660 = vrot.lane.b32.xlu0 %v1644_v30, %s17926_s15  ;;  %416 = vrot.lane.b32.xlu1 %v401_v31, %s17931_s11 }
  0xbd   : > { %v18280_v15 = vpop.permute.xlu1 %1838 }
  0xbe   : > { %v1854_v17 = vmul.f32 0.0, %v18280_v15 }
  0xc0   : > { %414 = vrot.lane.b32.xlu0 %v400_v35, %s17931_s11  ;;  %584 = vrot.lane.b32.xlu1 %v358_v36, %s17932_s19 }
  0xc4   : > { %794 = vrot.lane.b32.xlu1 %v781_v39, %s17930_s29  ;;  %582 = vrot.lane.b32.xlu0 %v357_v40, %s17932_s19 }
  0xc8   : > { %798 = vrot.lane.b32.xlu1 %v783_v44, %s17930_s29  ;;  %586 = vrot.lane.b32.xlu0 %v359_v48, %s17932_s19  ;;  %v17565_v44 = vld [vmem:[%s21900_s2 + $0x8] sm:$0xff] }
  0xcc   : > { %1012 = vrot.lane.b32.xlu1 %v998_v47, %s17929_s24  ;;  %796 = vrot.lane.b32.xlu0 %v782_v50, %s17930_s29 }
  0xd0   : > { %1226 = vrot.lane.b32.xlu1 %v1213_v53, %s17928_s21  ;;  %1010 = vrot.lane.b32.xlu0 %v997_v54, %s17929_s24 }
  0xd4   : > { %1230 = vrot.lane.b32.xlu1 %v1215_v57, %s17928_s21  ;;  %1014 = vrot.lane.b32.xlu0 %v999_v58, %s17929_s24 }
  0xd8   : > { %1442 = vrot.lane.b32.xlu1 %v1428_v61, %s17927_s18  ;;  %1228 = vrot.lane.b32.xlu0 %v1214_v62, %s17928_s21  ;;  %v17571_v61 = vld [vmem:[%s21900_s2 + $0x10] sm:$0xff] }
  0xdc   : > { %1654 = vrot.lane.b32.xlu1 %v1641_v2, %s17926_s15  ;;  %1440 = vrot.lane.b32.xlu0 %v1427_v7, %s17927_s18  ;;  %v17575_v7 = vld [vmem:[%s21900_s2 + $0x18] sm:$0xff] }
  0xe0   : > { %1658 = vrot.lane.b32.xlu1 %v1643_v10, %s17926_s15  ;;  %1444 = vrot.lane.b32.xlu0 %v1429_v11, %s17927_s18 }
  0xe4   : > { %1656 = vrot.lane.b32.xlu0 %v1642_v14, %s17926_s15  ;;  %1842 = vrot.lane.b32.xlu1 %v1833_v13, %s17931_s11 }
  0xe8   : > { %1840 = vrot.lane.b32.xlu0 %v1829_v16, %s17931_s11  ;;  %1866 = vrot.lane.b32.xlu1 %v1854_v17, %s17925_s12 }
  0xec   : > { %1844 = vrot.lane.b32.xlu0 %v1837_v18, %s17931_s11  ;;  %v17579_v18 = vld [vmem:[%s21900_s2 + $0x20] sm:$0xff] }
  0xfa   : > { %v581_v20 = vpop.permute.xlu1 %580 }
  0xfe   : > { %v589_v22 = vpop.permute.xlu1 %588 }
 0x102   : > { %v411_v19 = vpop.permute.xlu0 %410 }
 0x106   : > { %v419_v21 = vpop.permute.xlu0 %418 }
 0x10a   : > { %v793_v24 = vpop.permute.xlu0 %792 }
 0x10e   : > { %v801_v26 = vpop.permute.xlu0 %800 }
 0x112   : > { %v18292_v25 = vpop.permute.xlu1 %1008 }
 0x116   : > { %v18294_v28 = vpop.permute.xlu1 %1016 }
 0x11a   : > { %v18296_v30 = vpop.permute.xlu0 %1224 }
 0x11e   : > { %v18300_v32 = vpop.permute.xlu0 %1232 }
 0x122   : > { %v18298_v31 = vpop.permute.xlu1 %1438 }
 0x126   : > { %v18302_v41 = vpop.permute.xlu1 %1446 }
 0x12a   : > { %v18304_v33 = vpop.permute.xlu0 %1652  ;;  %v413_v35 = vpop.permute.xlu1 %412 }
 0x12b   : > { %v421_v48 = vsel %vm21907_vm7, %v411_v19, %v413_v35 }
 0x12e   : > { %v18306_v36 = vpop.permute.xlu0 %1660  ;;  %v417_v37 = vpop.permute.xlu1 %416 }
 0x12f   : > { %v424_v38 = vsel %vm21907_vm7, %v417_v37, %v419_v21 }
 0x130   : > { %534 = vmatprep.subr.mxu1 %v424_v38 }
 0x132   : > { %v415_v39 = vpop.permute.xlu0 %414  ;;  %v585_v40 = vpop.permute.xlu1 %584 }
 0x133   : > { %v422_v42 = vsel %vm21907_vm7, %v413_v35, %v415_v39  ;;  %v423_v45 = vsel %vm21907_vm7, %v415_v39, %v417_v37 }
 0x134   : > { %463 = vmatprep.subr.mxu0 %v422_v42  ;;  %535 = vmatpush1.msra.mxu1 %v423_v45 }
 0x135   : > { %464 = vmatpush1.msra.mxu0 %v421_v48  ;;  %17567 = vmatmul.mubr.msk.f32.vlgmr.msra.gmra.mxu1 %vm429_vm8, %v17565_v44 }
 0x136   : > { %v795_v49 = vpop.permute.xlu1 %794  ;;  %v583_v43 = vpop.permute.xlu0 %582  ;;  %17566 = vmatmul.mubr.msk.f32.vlgmr.msra.gmra.mxu0 %vm429_vm8, %v17565_v44  ;;  %737 = vmatprep.mubr.f32.mxu1 %v21918_v27 }
 0x137   : > { %v592_v47 = vsel %vm590_vm9, %v583_v43, %v585_v40  ;;  %v591_v50 = vsel %vm590_vm9, %v581_v20, %v583_v43  ;;  %666 = vmatprep.mubr.f32.mxu0 %v21918_v27  ;;  %v803_v62 = vsel %vm802_vm6, %v793_v24, %v795_v49 }
 0x138   : > { %632 = vmatprep.subr.mxu0 %v592_v47 }
 0x139   : > { %633 = vmatpush1.msra.mxu0 %v591_v50 }
 0x13a   : > { %v799_v52 = vpop.permute.xlu1 %798  ;;  %v587_v53 = vpop.permute.xlu0 %586  ;;  %17568 = vmatmul.mubr.msk.f32.vlgmr.msra.gmra.mxu0 %vm429_vm8, %v361_v51 }
 0x13b   : > { %v594_v54 = vsel %vm590_vm9, %v587_v53, %v589_v22  ;;  %v593_v55 = vsel %vm590_vm9, %v585_v40, %v587_v53  ;;  %878 = vmatprep.mubr.f32.mxu0 %v21918_v27  ;;  %v806_v56 = vsel %vm802_vm6, %v799_v52, %v801_v26 }
 0x13c   : > { %703 = vmatprep.subr.mxu1 %v594_v54 }
 0x13d   : > { %704 = vmatpush1.msra.mxu1 %v593_v55 }
 0x13e   : > { %v1013_v57 = vpop.permute.xlu1 %1012  ;;  %915 = vmatprep.subr.mxu1 %v806_v56  ;;  %v797_v58 = vpop.permute.xlu0 %796  ;;  %17569 = vmatmul.mubr.msk.f32.vlgmr.msra.gmra.mxu1 %vm429_vm8, %v361_v51 }
 0x13f   : > { %v804_v59 = vsel %vm802_vm6, %v795_v49, %v797_v58  ;;  %v805_v60 = vsel %vm802_vm6, %v797_v58, %v799_v52  ;;  %949 = vmatprep.mubr.f32.mxu1 %v21918_v27 }
 0x140   : > { %844 = vmatprep.subr.mxu0 %v804_v59  ;;  %916 = vmatpush1.msra.mxu1 %v805_v60 }
 0x141   : > { %845 = vmatpush1.msra.mxu0 %v803_v62 }
 0x142   : > { %v1227_v63 = vpop.permute.xlu1 %1226  ;;  %v1011_v0 = vpop.permute.xlu0 %1010  ;;  %17572 = vmatmul.mubr.msk.f32.vlgmr.msra.gmra.mxu0 %vm429_vm8, %v17571_v61  ;;  %17573 = vmatmul.mubr.msk.f32.vlgmr.msra.gmra.mxu1 %vm429_vm8, %v17571_v61  ;;  %v17591_v61 = vld [vmem:[%s21900_s2 + $0x38] sm:$0xff] }
 0x143   : > { %v1020_v1 = vsel %vm1018_vm5, %v1011_v0, %v1013_v57  ;;  %v1019_v2 = vsel %vm1018_vm5, %v18292_v25, %v1011_v0  ;;  %1165 = vmatprep.mubr.f32.mxu1 %v21918_v27  ;;  %1094 = vmatprep.mubr.f32.mxu0 %v21918_v27  ;;  %v1234_v19 = vsel %vm1203_vm4, %v18296_v30, %v1227_v63  ;;  %v17583_v25 = vld [vmem:[%s21900_s2 + $0x28] sm:$0xff] }
 0x144   : > { %1060 = vmatprep.subr.mxu0 %v1020_v1 }
 0x145   : > { %1061 = vmatpush1.msra.mxu0 %v1019_v2 }
 0x146   : > { %v1231_v8 = vpop.permute.xlu1 %1230  ;;  %v1015_v9 = vpop.permute.xlu0 %1014  ;;  %17576 = vmatmul.mubr.msk.f32.vlgmr.msra.gmra.mxu0 %vm429_vm8, %v17575_v7 }
 0x147   : > { %v1022_v10 = vsel %vm1018_vm5, %v1015_v9, %v18294_v28  ;;  %v1021_v11 = vsel %vm1018_vm5, %v1013_v57, %v1015_v9  ;;  %1309 = vmatprep.mubr.f32.mxu0 %v21918_v27  ;;  %v1237_v12 = vsel %vm1203_vm4, %v1231_v8, %v18300_v32 }
 0x148   : > { %1131 = vmatprep.subr.mxu1 %v1022_v10 }
 0x149   : > { %1132 = vmatpush1.msra.mxu1 %v1021_v11 }
 0x14a   : > { %v1443_v13 = vpop.permute.xlu1 %1442  ;;  %1346 = vmatprep.subr.mxu1 %v1237_v12  ;;  %v1229_v14 = vpop.permute.xlu0 %1228  ;;  %17577 = vmatmul.mubr.msk.f32.vlgmr.msra.gmra.mxu1 %vm429_vm8, %v17575_v7 }
 0x14b   : > { %v1235_v16 = vsel %vm1203_vm4, %v1227_v63, %v1229_v14  ;;  %v1236_v17 = vsel %vm1203_vm4, %v1229_v14, %v1231_v8  ;;  %1380 = vmatprep.mubr.f32.mxu1 %v21918_v27 }
 0x14c   : > { %1275 = vmatprep.subr.mxu0 %v1235_v16  ;;  %1347 = vmatpush1.msra.mxu1 %v1236_v17 }
 0x14d   : > { %1276 = vmatpush1.msra.mxu0 %v1234_v19 }
 0x14e   : > { %v1655_v20 = vpop.permute.xlu1 %1654  ;;  %v1441_v21 = vpop.permute.xlu0 %1440  ;;  %17580 = vmatmul.mubr.msk.f32.vlgmr.msra.gmra.mxu0 %vm429_vm8, %v17579_v18  ;;  %17581 = vmatmul.mubr.msk.f32.vlgmr.msra.gmra.mxu1 %vm429_vm8, %v17579_v18 }
 0x14f   : > { %v1449_v22 = vsel %vm987_vm3, %v1441_v21, %v1443_v13  ;;  %v1448_v24 = vsel %vm987_vm3, %v18298_v31, %v1441_v21  ;;  %1594 = vmatprep.mubr.f32.mxu1 %v21918_v27  ;;  %1523 = vmatprep.mubr.f32.mxu0 %v21918_v27  ;;  %v1662_v39 = vsel %vm771_vm2, %v18304_v33, %v1655_v20 }
 0x150   : > { %1489 = vmatprep.subr.mxu0 %v1449_v22 }
 0x151   : > { %1490 = vmatpush1.msra.mxu0 %v1448_v24 }
 0x152   : > { %v1659_v26 = vpop.permute.xlu1 %1658  ;;  %v1445_v28 = vpop.permute.xlu0 %1444  ;;  %17584 = vmatmul.mubr.msk.f32.vlgmr.msra.gmra.mxu0 %vm429_vm8, %v17583_v25 }
 0x153   : > { %v1451_v30 = vsel %vm987_vm3, %v1445_v28, %v18302_v41  ;;  %v1450_v32 = vsel %vm987_vm3, %v1443_v13, %v1445_v28  ;;  %1737 = vmatprep.mubr.f32.mxu0 %v21918_v27  ;;  %v1665_v31 = vsel %vm771_vm2, %v1659_v26, %v18306_v36  ;;  %v17587_v41 = vld [vmem:[%s21900_s2 + $0x30] sm:$0xff]  ;;  %v17598_v13 = vld [vmem:[%s21898_s0 + $0x24] sm:$0xf] }
 0x154   : > { %1560 = vmatprep.subr.mxu1 %v1451_v30  ;;  %v2253_v17 = vrot.slane %v17598_v13, %v18001_v4  ;;  %v2261_v19 = vrot.slane %v17598_v13, %v17999_v3  ;;  %v2265_v21 = vrot.slane %v17598_v13, %v18003_v5  ;;  %v17595_v30 = vld [vmem:[%s21900_s2 + $0x40] sm:$0xff] }
 0x155   : > { %1561 = vmatpush1.msra.mxu1 %v1450_v32 }
 0x156   : > { %1774 = vmatprep.subr.mxu1 %v1665_v31  ;;  %v1657_v35 = vpop.permute.xlu0 %1656  ;;  %17585 = vmatmul.mubr.msk.f32.vlgmr.msra.gmra.mxu1 %vm429_vm8, %v17583_v25  ;;  %v1843_v36 = vpop.permute.xlu1 %1842 }
 0x157   : > { %v1663_v37 = vsel %vm771_vm2, %v1655_v20, %v1657_v35  ;;  %v1664_v38 = vsel %vm771_vm2, %v1657_v35, %v1659_v26  ;;  %1808 = vmatprep.mubr.f32.mxu1 %v21918_v27  ;;  %v2257_v20 = vrot.slane %v17598_v13, %v18005_v6 }
 0x158   : > { %1703 = vmatprep.subr.mxu0 %v1663_v37  ;;  %1775 = vmatpush1.msra.mxu1 %v1664_v38 }
 0x159   : > { %1704 = vmatpush1.msra.mxu0 %v1662_v39 }
 0x15a   : > { %v1841_v40 = vpop.permute.xlu0 %1840  ;;  %17588 = vmatmul.mubr.msk.f32.vlgmr.msra.gmra.mxu0 %vm429_vm8, %v17587_v41  ;;  %17589 = vmatmul.mubr.msk.f32.vlgmr.msra.gmra.mxu1 %vm429_vm8, %v17587_v41  ;;  %v1867_v54 = vpop.permute.xlu1 %1866 }
 0x15b   : > { %v1846_v42 = vsel %vm21907_vm7, %v18280_v15, %v1841_v40  ;;  %v1847_v45 = vsel %vm21907_vm7, %v1841_v40, %v1843_v36  ;;  %1951 = vmatprep.mubr.f32.mxu0 %v21918_v27  ;;  %2022 = vmatprep.mubr.f32.mxu1 %v21918_v27  ;;  %v17594_v15 = vld [vmem:[%s21898_s0 + $0x20] sm:$0xf] }
 0x15c   : > { %v1856_v44 = vmul.f32 %v1847_v45, %v18191_v34  ;;  %v1855_v33 = vmul.f32 %v1846_v42, %v18172_v23  ;;  %v2043_v50 = vrot.slane %v17594_v15, %v18005_v6  ;;  %v2039_v51 = vrot.slane %v17594_v15, %v18001_v4 }
 0x15d   : > { %v2051_v52 = vrot.slane %v17594_v15, %v18003_v5  ;;  %v2047_v53 = vrot.slane %v17594_v15, %v17999_v3 }
 0x15e   : > { %1870 = vrot.lane.b32.xlu1 %v1856_v44, %s17925_s12  ;;  %1868 = vrot.lane.b32.xlu0 %v1855_v33, %s17925_s12  ;;  %v1845_v48 = vpop.permute.xlu0 %1844 }
 0x15f   : > { %v1848_v49 = vsel %vm21907_vm7, %v1843_v36, %v1845_v48  ;;  %v1858_v43 = vmul.f32 %v1845_v48, %v18107_v46  ;;  %vm21911_vm7 = vcmask 7168  }
 0x160   : > { %v1857_v47 = vmul.f32 %v1848_v49, %v18182_v29 }
 0x162   : > { %1874 = vrot.lane.b32.xlu1 %v1858_v43, %s17925_s12  ;;  %1872 = vrot.lane.b32.xlu0 %v1857_v47, %s17925_s12  ;;  %v17602_v43 = vld [vmem:[%s21898_s0 + $0x28] sm:$0xf] }
 0x163   : > { %v2473_v47 = vrot.slane %v17602_v43, %v18005_v6 }
 0x166   : > { %2054 = vrot.lane.b32.xlu1 %v2043_v50, %s17932_s19  ;;  %2052 = vrot.lane.b32.xlu0 %v2039_v51, %s17932_s19  ;;  %v2469_v50 = vrot.slane %v17602_v43, %v18001_v4  ;;  %v2481_v51 = vrot.slane %v17602_v43, %v18003_v5 }
 0x16a   : > { %2058 = vrot.lane.b32.xlu1 %v2051_v52, %s17932_s19  ;;  %2056 = vrot.lane.b32.xlu0 %v2047_v53, %s17932_s19  ;;  %v2477_v52 = vrot.slane %v17602_v43, %v17999_v3 }
 0x1d0   : > { %v1871_v55 = vpop.permute.xlu1 %1870  ;;  %v1869_v56 = vpop.permute.xlu0 %1868 }
 0x1d1   : > { %v1877_v57 = vsel %vm389_vm0, %v1869_v56, %v1871_v55  ;;  %v1876_v58 = vsel %vm389_vm0, %v1867_v54, %v1869_v56 }
 0x1d2   : > { %1917 = vmatprep.subr.mxu0 %v1877_v57 }
 0x1d3   : > { %1918 = vmatpush1.msra.mxu0 %v1876_v58 }
 0x1d4   : > { %v1875_v59 = vpop.permute.xlu1 %1874  ;;  %v1873_v60 = vpop.permute.xlu0 %1872  ;;  %17592 = vmatmul.mubr.msk.f32.vlgmr.msra.gmra.mxu0 %vm429_vm8, %v17591_v61 }
 0x1d5   : > { %v1879_v62 = vsel %vm389_vm0, %v1873_v60, %v1875_v59  ;;  %v1878_v63 = vsel %vm389_vm0, %v1871_v55, %v1873_v60  ;;  %2165 = vmatprep.mubr.f32.mxu0 %v21918_v27  ;;  %v17599_v60 = vld [vmem:[%s21900_s2 + $0x48] sm:$0xff] }
 0x1d6   : > { %1988 = vmatprep.subr.mxu1 %v1879_v62 }
 0x1d7   : > { %1989 = vmatpush1.msra.mxu1 %v1878_v63 }
 0x1d8   : > { %v2055_v0 = vpop.permute.xlu1 %2054  ;;  %v2053_v1 = vpop.permute.xlu0 %2052  ;;  %17593 = vmatmul.mubr.msk.f32.vlgmr.msra.gmra.mxu1 %vm429_vm8, %v17591_v61 }
 0x1d9   : > { %v2060_v2 = vsel %vm590_vm9, %v2053_v1, %v2055_v0  ;;  %v2068_v7 = vmul.f32 0.0, %v2053_v1  ;;  %2236 = vmatprep.mubr.f32.mxu1 %v21918_v27 }
 0x1da   : > { %v2069_v8 = vmul.f32 %v2060_v2, %v18172_v23 }
 0x1db   : > { %2080 = vrot.lane.b32.xlu0 %v2068_v7, %s17924_s9 }
 0x1dc   : > { %v2059_v9 = vpop.permute.xlu1 %2058  ;;  %2082 = vrot.lane.b32.xlu1 %v2069_v8, %s17924_s9  ;;  %v2057_v10 = vpop.permute.xlu0 %2056 }
 0x1dd   : > { %v2061_v11 = vsel %vm590_vm9, %v2055_v0, %v2057_v10  ;;  %v2062_v12 = vsel %vm590_vm9, %v2057_v10, %v2059_v9  ;;  %v2072_v18 = vmul.f32 %v2059_v9, %v18107_v46 }
 0x1de   : > { %v2071_v14 = vmul.f32 %v2062_v12, %v18182_v29  ;;  %v2070_v16 = vmul.f32 %v2061_v11, %v18191_v34  ;;  %v17606_v12 = vld [vmem:[%s21898_s0 + $0x2c] sm:$0xf] }
 0x1e0   : > { %2086 = vrot.lane.b32.xlu1 %v2071_v14, %s17924_s9  ;;  %2084 = vrot.lane.b32.xlu0 %v2070_v16, %s17924_s9  ;;  %v2684_v16 = vrot.slane %v17606_v12, %v18001_v4 }
 0x1e4   : > { %2266 = vrot.lane.b32.xlu1 %v2253_v17, %s21928_s20  ;;  %2088 = vrot.lane.b32.xlu0 %v2072_v18, %s17924_s9  ;;  %v2692_v18 = vrot.slane %v17606_v12, %v17999_v3 }
 0x1e8   : > { %2270 = vrot.lane.b32.xlu1 %v2261_v19, %s21928_s20  ;;  %2268 = vrot.lane.b32.xlu0 %v2257_v20, %s21928_s20  ;;  %v2688_v19 = vrot.slane %v17606_v12, %v18005_v6  ;;  %v2696_v20 = vrot.slane %v17606_v12, %v18003_v5 }
 0x1ec   : > { %2272 = vrot.lane.b32.xlu0 %v2265_v21, %s21928_s20 }
 0x24d   : > { %v2081_v22 = vpop.permute.xlu0 %2080 }
 0x24e   : > { %v2083_v24 = vpop.permute.xlu1 %2082 }
 0x24f   : > { %v2090_v32 = vsel %vm347_vm1, %v2081_v22, %v2083_v24 }
 0x252   : > { %v2087_v25 = vpop.permute.xlu1 %2086  ;;  %v2085_v26 = vpop.permute.xlu0 %2084 }
 0x253   : > { %v2091_v28 = vsel %vm347_vm1, %v2083_v24, %v2085_v26  ;;  %v2092_v41 = vsel %vm347_vm1, %v2085_v26, %v2087_v25 }
 0x254   : > { %2131 = vmatprep.subr.mxu0 %v2091_v28  ;;  %v17603_v28 = vld [vmem:[%s21900_s2 + $0x50] sm:$0xff] }
 0x255   : > { %2132 = vmatpush1.msra.mxu0 %v2090_v32 }
 0x256   : > { %v2267_v31 = vpop.permute.xlu1 %2266  ;;  %v2089_v35 = vpop.permute.xlu0 %2088  ;;  %17596 = vmatmul.mubr.msk.f32.vlgmr.msra.gmra.mxu0 %vm429_vm8, %v17595_v30 }
 0x257   : > { %v2283_v37 = vmul.f32 0.0, %v2267_v31  ;;  %v2093_v38 = vsel %vm347_vm1, %v2087_v25, %v2089_v35  ;;  %2381 = vmatprep.mubr.f32.mxu0 %v21918_v27 }
 0x258   : > { %2202 = vmatprep.subr.mxu1 %v2093_v38 }
 0x259   : > { %2295 = vrot.lane.b32.xlu1 %v2283_v37, %s21930_s25  ;;  %2203 = vmatpush1.msra.mxu1 %v2092_v41 }
 0x25a   : > { %v2271_v39 = vpop.permute.xlu1 %2270  ;;  %v2269_v36 = vpop.permute.xlu0 %2268  ;;  %17597 = vmatmul.mubr.msk.f32.vlgmr.msra.gmra.mxu1 %vm429_vm8, %v17595_v30 }
 0x25b   : > { %v2275_v40 = vsel %vm2274_vm10, %v2267_v31, %v2269_v36  ;;  %v2276_v42 = vsel %vm2274_vm10, %v2269_v36, %v2271_v39  ;;  %2452 = vmatprep.mubr.f32.mxu1 %v21918_v27 }
 0x25c   : > { %v2285_v45 = vmul.f32 %v2276_v42, %v18191_v34  ;;  %v2284_v44 = vmul.f32 %v2275_v40, %v18172_v23 }
 0x25e   : > { %2299 = vrot.lane.b32.xlu1 %v2285_v45, %s21930_s25  ;;  %2297 = vrot.lane.b32.xlu0 %v2284_v44, %s21930_s25  ;;  %v2273_v33 = vpop.permute.xlu0 %2272 }
 0x25f   : > { %v2277_v48 = vsel %vm2274_vm10, %v2271_v39, %v2273_v33  ;;  %v2287_v49 = vmul.f32 %v2273_v33, %v18107_v46 }
 0x260   : > { %v2286_v15 = vmul.f32 %v2277_v48, %v18182_v29 }
 0x262   : > { %2303 = vrot.lane.b32.xlu1 %v2287_v49, %s21930_s25  ;;  %2301 = vrot.lane.b32.xlu0 %v2286_v15, %s21930_s25  ;;  %v17610_v49 = vld [vmem:[%s21898_s0 + $0x30] sm:$0xf] }
 0x263   : > { %v2904_v15 = vrot.slane %v17610_v49, %v18005_v6 }
 0x266   : > { %2484 = vrot.lane.b32.xlu1 %v2473_v47, %s17936_s10  ;;  %2482 = vrot.lane.b32.xlu0 %v2469_v50, %s17936_s10  ;;  %v2900_v47 = vrot.slane %v17610_v49, %v18001_v4  ;;  %v2908_v50 = vrot.slane %v17610_v49, %v17999_v3 }
 0x26a   : > { %2488 = vrot.lane.b32.xlu1 %v2481_v51, %s17936_s10  ;;  %2486 = vrot.lane.b32.xlu0 %v2477_v52, %s17936_s10 }
 0x2cb   : > { %v2296_v53 = vpop.permute.xlu1 %2295 }
 0x2d0   : > { %v2300_v54 = vpop.permute.xlu1 %2299  ;;  %v2298_v55 = vpop.permute.xlu0 %2297 }
 0x2d1   : > { %v2307_v56 = vsel %vm2305_vm11, %v2298_v55, %v2300_v54  ;;  %v2306_v57 = vsel %vm2305_vm11, %v2296_v53, %v2298_v55 }
 0x2d2   : > { %2347 = vmatprep.subr.mxu0 %v2307_v56 }
 0x2d3   : > { %2348 = vmatpush1.msra.mxu0 %v2306_v57 }
 0x2d4   : > { %v2304_v58 = vpop.permute.xlu1 %2303  ;;  %v2302_v59 = vpop.permute.xlu0 %2301  ;;  %17600 = vmatmul.mubr.msk.f32.vlgmr.msra.gmra.mxu0 %vm429_vm8, %v17599_v60 }
 0x2d5   : > { %v2309_v61 = vsel %vm2305_vm11, %v2302_v59, %v2304_v58  ;;  %v2308_v62 = vsel %vm2305_vm11, %v2300_v54, %v2302_v59  ;;  %2596 = vmatprep.mubr.f32.mxu0 %v21918_v27  ;;  %v17607_v58 = vld [vmem:[%s21900_s2 + $0x58] sm:$0xff] }
 0x2d6   : > { %2418 = vmatprep.subr.mxu1 %v2309_v61 }
 0x2d7   : > { %2419 = vmatpush1.msra.mxu1 %v2308_v62 }
 0x2d8   : > { %v2485_v63 = vpop.permute.xlu1 %2484  ;;  %v2483_v0 = vpop.permute.xlu0 %2482  ;;  %17601 = vmatmul.mubr.msk.f32.vlgmr.msra.gmra.mxu1 %vm429_vm8, %v17599_v60 }
 0x2d9   : > { %v2491_v1 = vsel %vm2490_vm12, %v2483_v0, %v2485_v63  ;;  %v2499_v2 = vmul.f32 0.0, %v2483_v0  ;;  %2667 = vmatprep.mubr.f32.mxu1 %v21918_v27 }
 0x2da   : > { %v2500_v7 = vmul.f32 %v2491_v1, %v18172_v23 }
 0x2db   : > { %2511 = vrot.lane.b32.xlu0 %v2499_v2, %s17937_s16 }
 0x2dc   : > { %v2489_v8 = vpop.permute.xlu1 %2488  ;;  %2513 = vrot.lane.b32.xlu1 %v2500_v7, %s17937_s16  ;;  %v2487_v9 = vpop.permute.xlu0 %2486 }
 0x2dd   : > { %v2492_v10 = vsel %vm2490_vm12, %v2485_v63, %v2487_v9  ;;  %v2493_v11 = vsel %vm2490_vm12, %v2487_v9, %v2489_v8  ;;  %v2503_v17 = vmul.f32 %v2489_v8, %v18107_v46 }
 0x2de   : > { %v2502_v13 = vmul.f32 %v2493_v11, %v18182_v29  ;;  %v2501_v14 = vmul.f32 %v2492_v10, %v18191_v34  ;;  %v17617_v10 = vld [vmem:[%s21898_s0 + $0x38] sm:$0xf] }
 0x2e0   : > { %2517 = vrot.lane.b32.xlu1 %v2502_v13, %s17937_s16  ;;  %2515 = vrot.lane.b32.xlu0 %v2501_v14, %s17937_s16  ;;  %v3272_v13 = vrot.slane %v17617_v10, %v18001_v4  ;;  %v18578_v14 = vld [vmem:[%s18099_s17 + $0x18] sm:$0xff] }
 0x2e4   : > { %2697 = vrot.lane.b32.xlu1 %v2684_v16, %s17938_s26  ;;  %2519 = vrot.lane.b32.xlu0 %v2503_v17, %s17937_s16  ;;  %v3280_v17 = vrot.slane %v17617_v10, %v17999_v3 }
 0x2e8   : > { %2701 = vrot.lane.b32.xlu1 %v2692_v18, %s17938_s26  ;;  %2699 = vrot.lane.b32.xlu0 %v2688_v19, %s17938_s26  ;;  %v3276_v18 = vrot.slane %v17617_v10, %v18005_v6  ;;  %v3284_v19 = vrot.slane %v17617_v10, %v18003_v5  ;;  %v18662_v10 = vld [vmem:[%s18099_s17 + $0x10] sm:$0xff] }
 0x2ec   : > { %2703 = vrot.lane.b32.xlu0 %v2696_v20, %s17938_s26 }
 0x34d   : > { %v2512_v21 = vpop.permute.xlu0 %2511 }
 0x34e   : > { %v2514_v22 = vpop.permute.xlu1 %2513 }
 0x34f   : > { %v2521_v30 = vsel %vm429_vm8, %v2512_v21, %v2514_v22 }
 0x352   : > { %v2518_v24 = vpop.permute.xlu1 %2517  ;;  %v2516_v25 = vpop.permute.xlu0 %2515 }
 0x353   : > { %v2522_v26 = vsel %vm429_vm8, %v2514_v22, %v2516_v25  ;;  %v2523_v38 = vsel %vm429_vm8, %v2516_v25, %v2518_v24 }
 0x354   : > { %2562 = vmatprep.subr.mxu0 %v2522_v26  ;;  %v17611_v26 = vld [vmem:[%s21900_s2 + $0x60] sm:$0xff] }
 0x355   : > { %2563 = vmatpush1.msra.mxu0 %v2521_v30 }
 0x356   : > { %v2698_v32 = vpop.permute.xlu1 %2697  ;;  %v2520_v31 = vpop.permute.xlu0 %2519  ;;  %17604 = vmatmul.mubr.msk.f32.vlgmr.msra.gmra.mxu0 %vm429_vm8, %v17603_v28 }
 0x357   : > { %v2714_v35 = vmul.f32 0.0, %v2698_v32  ;;  %v2524_v37 = vsel %vm429_vm8, %v2518_v24, %v2520_v31  ;;  %2812 = vmatprep.mubr.f32.mxu0 %v21918_v27 }
 0x358   : > { %2633 = vmatprep.subr.mxu1 %v2524_v37  ;;  %v17614_v37 = vld [vmem:[%s21900_s2 + $0x68] sm:$0xff] }
 0x359   : > { %2726 = vrot.lane.b32.xlu1 %v2714_v35, %s21908_s14  ;;  %2634 = vmatpush1.msra.mxu1 %v2523_v38 }
 0x35a   : > { %v2702_v41 = vpop.permute.xlu1 %2701  ;;  %v2700_v39 = vpop.permute.xlu0 %2699  ;;  %17605 = vmatmul.mubr.msk.f32.vlgmr.msra.gmra.mxu1 %vm429_vm8, %v17603_v28 }
 0x35b   : > { %v2706_v36 = vsel %vm21917_vm13, %v2698_v32, %v2700_v39  ;;  %v2707_v40 = vsel %vm21917_vm13, %v2700_v39, %v2702_v41  ;;  %2883 = vmatprep.mubr.f32.mxu1 %v21918_v27 }
 0x35c   : > { %v2715_v42 = vmul.f32 %v2706_v36, %v18172_v23  ;;  %v2716_v45 = vmul.f32 %v2707_v40, %v18191_v34 }
 0x35e   : > { %2730 = vrot.lane.b32.xlu1 %v2716_v45, %s21908_s14  ;;  %2728 = vrot.lane.b32.xlu0 %v2715_v42, %s21908_s14  ;;  %v2704_v44 = vpop.permute.xlu0 %2703 }
 0x35f   : > { %v2708_v33 = vsel %vm21917_vm13, %v2702_v41, %v2704_v44  ;;  %v2718_v48 = vmul.f32 %v2704_v44, %v18107_v46  ;;  %v2912_v46 = vrot.slane %v17610_v49, %v18003_v5 }
 0x360   : > { %v2717_v43 = vmul.f32 %v2708_v33, %v18182_v29 }
 0x362   : > { %2734 = vrot.lane.b32.xlu1 %v2718_v48, %s21908_s14  ;;  %2732 = vrot.lane.b32.xlu0 %v2717_v43, %s21908_s14  ;;  %v17621_v48 = vld [vmem:[%s21898_s0 + $0x3c] sm:$0xf] }
 0x363   : > { %v3486_v49 = vrot.slane %v17621_v48, %v18001_v4  ;;  %v3498_v43 = vrot.slane %v17621_v48, %v18003_v5 }
 0x366   : > { %2915 = vrot.lane.b32.xlu1 %v2904_v15, %s21915_s30  ;;  %2913 = vrot.lane.b32.xlu0 %v2900_v47, %s21915_s30  ;;  %v3494_v15 = vrot.slane %v17621_v48, %v17999_v3 }
 0x36a   : > { %2919 = vrot.lane.b32.xlu1 %v2912_v46, %s21915_s30  ;;  %2917 = vrot.lane.b32.xlu0 %v2908_v50, %s21915_s30 }
 0x3cb   : > { %v2727_v51 = vpop.permute.xlu1 %2726 }
 0x3d0   : > { %v2731_v52 = vpop.permute.xlu1 %2730  ;;  %v2729_v53 = vpop.permute.xlu0 %2728 }
 0x3d1   : > { %v2738_v54 = vsel %vm21910_vm14, %v2729_v53, %v2731_v52  ;;  %v2737_v55 = vsel %vm21910_vm14, %v2727_v51, %v2729_v53 }
 0x3d2   : > { %2778 = vmatprep.subr.mxu0 %v2738_v54 }
 0x3d3   : > { %2779 = vmatpush1.msra.mxu0 %v2737_v55  ;;  %v17618_v55 = vld [vmem:[%s21900_s2 + $0x70] sm:$0xff] }
 0x3d4   : > { %v2735_v56 = vpop.permute.xlu1 %2734  ;;  %v2733_v57 = vpop.permute.xlu0 %2732  ;;  %17608 = vmatmul.mubr.msk.f32.vlgmr.msra.gmra.mxu0 %vm429_vm8, %v17607_v58 }
 0x3d5   : > { %v2740_v59 = vsel %vm21910_vm14, %v2733_v57, %v2735_v56  ;;  %v2739_v60 = vsel %vm21910_vm14, %v2731_v52, %v2733_v57  ;;  %3028 = vmatprep.mubr.f32.mxu0 %v21918_v27 }
 0x3d6   : > { %2849 = vmatprep.subr.mxu1 %v2740_v59 }
 0x3d7   : > { %2850 = vmatpush1.msra.mxu1 %v2739_v60 }
 0x3d8   : > { %v2916_v61 = vpop.permute.xlu1 %2915  ;;  %v2914_v62 = vpop.permute.xlu0 %2913  ;;  %17609 = vmatmul.mubr.msk.f32.vlgmr.msra.gmra.mxu1 %vm429_vm8, %v17607_v58 }
 0x3d9   : > { %v2922_v63 = vsel %vm21912_vm15, %v2914_v62, %v2916_v61  ;;  %v2930_v0 = vmul.f32 0.0, %v2914_v62  ;;  %3099 = vmatprep.mubr.f32.mxu1 %v21918_v27 }
 0x3da   : > { %v2931_v1 = vmul.f32 %v2922_v63, %v18172_v23  ;;  %v18651_v63 = vld [vmem:[%s18099_s17 + $0x8] sm:$0xff] }
 0x3db   : > { %2942 = vrot.lane.b32.xlu0 %v2930_v0, %s21913_s23 }
 0x3dc   : > { %v2920_v2 = vpop.permute.xlu1 %2919  ;;  %2944 = vrot.lane.b32.xlu1 %v2931_v1, %s21913_s23  ;;  %v2918_v7 = vpop.permute.xlu0 %2917 }
 0x3dd   : > { %v2923_v8 = vsel %vm21912_vm15, %v2916_v61, %v2918_v7  ;;  %v2924_v9 = vsel %vm21912_vm15, %v2918_v7, %v2920_v2  ;;  %v2934_v16 = vmul.f32 %v18578_v14, %v2920_v2  ;;  %v18646_v61 = vld [vmem:[%s18099_s17] sm:$0xff]  ;;  %s22007_s17 = smov 127  }
 0x3de   : > { %v2932_v11 = vmul.f32 %v2923_v8, %v18191_v34  ;;  %v2933_v12 = vmul.f32 %v2924_v9, %v18182_v29  ;;  %v17625_v9 = vld [vmem:[%s21898_s0 + $0x40] sm:$0xf] }
 0x3e0   : > { %2948 = vrot.lane.b32.xlu1 %v2933_v12, %s21913_s23  ;;  %2946 = vrot.lane.b32.xlu0 %v2932_v11, %s21913_s23 }
 0x3e4   : > { %3285 = vrot.lane.b32.xlu1 %v3272_v13, %s21913_s23  ;;  %2950 = vrot.lane.b32.xlu0 %v2934_v16, %s21913_s23  ;;  %v3700_v13 = vrot.slane %v17625_v9, %v18001_v4 }
 0x3e8   : > { %3289 = vrot.lane.b32.xlu1 %v3280_v17, %s21913_s23  ;;  %3287 = vrot.lane.b32.xlu0 %v3276_v18, %s21913_s23  ;;  %v3708_v17 = vrot.slane %v17625_v9, %v17999_v3  ;;  %v3704_v18 = vrot.slane %v17625_v9, %v18005_v6 }
 0x3ec   : > { %3291 = vrot.lane.b32.xlu0 %v3284_v19, %s21913_s23  ;;  %v3712_v19 = vrot.slane %v17625_v9, %v18003_v5 }
 0x44d   : > { %v2943_v20 = vpop.permute.xlu0 %2942 }
 0x44e   : > { %v2945_v21 = vpop.permute.xlu1 %2944 }
 0x44f   : > { %v2953_v28 = vsel %vm21911_vm7, %v2943_v20, %v2945_v21 }
 0x452   : > { %v2949_v22 = vpop.permute.xlu1 %2948  ;;  %v2947_v24 = vpop.permute.xlu0 %2946 }
 0x453   : > { %v2954_v25 = vsel %vm21911_vm7, %v2945_v21, %v2947_v24  ;;  %v2955_v38 = vsel %vm21911_vm7, %v2947_v24, %v2949_v22 }
 0x454   : > { %2994 = vmatprep.subr.mxu0 %v2954_v25 }
 0x455   : > { %2995 = vmatpush1.msra.mxu0 %v2953_v28 }
 0x456   : > { %v3286_v30 = vpop.permute.xlu1 %3285  ;;  %v2951_v32 = vpop.permute.xlu0 %2950  ;;  %17612 = vmatmul.mubr.msk.f32.vlgmr.msra.gmra.mxu0 %vm429_vm8, %v17611_v26  ;;  %3145 = vmatprep.subr.mxu0 %v18191_v34 }
 0x457   : > { %v3301_v31 = vmul.f32 %v3286_v30, %v18172_v23  ;;  %v2956_v35 = vsel %vm21911_vm7, %v2949_v22, %v2951_v32  ;;  %3146 = vmatpush1.msra.mxu0 %v18172_v23  ;;  %3179 = vmatprep.mubr.f32.mxu0 %v21918_v27 }
 0x458   : > { %3065 = vmatprep.subr.mxu1 %v2956_v35 }
 0x459   : > { %3313 = vrot.lane.b32.xlu1 %v3301_v31, %s21915_s30  ;;  %3066 = vmatpush1.msra.mxu1 %v2955_v38 }
 0x45a   : > { %v3290_v41 = vpop.permute.xlu1 %3289  ;;  %v3288_v39 = vpop.permute.xlu0 %3287  ;;  %17613 = vmatmul.mubr.msk.f32.vlgmr.msra.gmra.mxu1 %vm429_vm8, %v17611_v26  ;;  %17615 = vmatmul.mubr.msk.f32.vlgmr.msra.gmra.mxu0 %vm429_vm8, %v17614_v37  ;;  %v17622_v26 = vld [vmem:[%s21900_s2 + $0x78] sm:$0xff] }
 0x45b   : > { %v3293_v23 = vsel %vm21911_vm7, %v3286_v30, %v3288_v39  ;;  %v3294_v36 = vsel %vm21911_vm7, %v3288_v39, %v3290_v41  ;;  %3216 = vmatprep.subr.mxu1 %v18578_v14  ;;  %3250 = vmatprep.mubr.f32.mxu1 %v21918_v27 }
 0x45c   : > { %v3302_v40 = vmul.f32 %v3293_v23, %v18191_v34  ;;  %v3303_v42 = vmul.f32 %v3294_v36, %v18182_v29  ;;  %3217 = vmatpush1.msra.mxu1 %v18182_v29  ;;  %3398 = vmatprep.mubr.f32.mxu0 %v21918_v27  ;;  %v3490_v29 = vrot.slane %v17621_v48, %v18005_v6 }
 0x45e   : > { %3317 = vrot.lane.b32.xlu1 %v3303_v42, %s21915_s30  ;;  %3315 = vrot.lane.b32.xlu0 %v3302_v40, %s21915_s30  ;;  %v3292_v45 = vpop.permute.xlu0 %3291 }
 0x45f   : > { %v3295_v44 = vsel %vm21911_vm7, %v3290_v41, %v3292_v45  ;;  %v3305_v33 = vmul.f32 0.0, %v3292_v45  ;;  %17616 = vmatmul.mubr.msk.f32.vlgmr.msra.gmra.mxu1 %vm429_vm8, %v17614_v37 }
 0x460   : > { %v3304_v34 = vmul.f32 %v18578_v14, %v3295_v44  ;;  %3469 = vmatprep.mubr.f32.mxu1 %v21918_v27 }
 0x462   : > { %3321 = vrot.lane.b32.xlu1 %v3305_v33, %s21915_s30  ;;  %3319 = vrot.lane.b32.xlu0 %v3304_v34, %s21915_s30  ;;  %v17629_v33 = vld [vmem:[%s21898_s0 + $0x44] sm:$0xf]  ;;  %s22065_s30 = smov 9  }
 0x463   : > { %v3918_v34 = vrot.slane %v17629_v33, %v18005_v6 }
 0x466   : > { %3501 = vrot.lane.b32.xlu1 %v3490_v29, %s21908_s14  ;;  %3499 = vrot.lane.b32.xlu0 %v3486_v49, %s21908_s14  ;;  %v3914_v29 = vrot.slane %v17629_v33, %v18001_v4  ;;  %v3926_v49 = vrot.slane %v17629_v33, %v18003_v5 }
 0x46a   : > { %3505 = vrot.lane.b32.xlu1 %v3498_v43, %s21908_s14  ;;  %3503 = vrot.lane.b32.xlu0 %v3494_v15, %s21908_s14  ;;  %v3922_v43 = vrot.slane %v17629_v33, %v17999_v3 }
 0x4cb   : > { %v3314_v47 = vpop.permute.xlu1 %3313 }
 0x4d0   : > { %v3318_v46 = vpop.permute.xlu1 %3317  ;;  %v3316_v50 = vpop.permute.xlu0 %3315 }
 0x4d1   : > { %v3324_v51 = vsel %vm21912_vm15, %v3316_v50, %v3318_v46  ;;  %v3323_v52 = vsel %vm21912_vm15, %v3314_v47, %v3316_v50 }
 0x4d2   : > { %3364 = vmatprep.subr.mxu0 %v3324_v51 }
 0x4d3   : > { %3365 = vmatpush1.msra.mxu0 %v3323_v52 }
 0x4d4   : > { %v3322_v53 = vpop.permute.xlu1 %3321  ;;  %v3320_v54 = vpop.permute.xlu0 %3319  ;;  %17619 = vmatmul.mubr.msk.f32.vlgmr.msra.gmra.mxu0 %vm429_vm8, %v17618_v55 }
 0x4d5   : > { %v3326_v56 = vsel %vm21912_vm15, %v3320_v54, %v3322_v53  ;;  %v3325_v57 = vsel %vm21912_vm15, %v3318_v46, %v3320_v54  ;;  %3612 = vmatprep.mubr.f32.mxu0 %v21918_v27  ;;  %v17626_v54 = vld [vmem:[%s21900_s2 + $0x80] sm:$0xff] }
 0x4d6   : > { %3435 = vmatprep.subr.mxu1 %v3326_v56 }
 0x4d7   : > { %3436 = vmatpush1.msra.mxu1 %v3325_v57 }
 0x4d8   : > { %v3502_v58 = vpop.permute.xlu1 %3501  ;;  %v3500_v59 = vpop.permute.xlu0 %3499  ;;  %17620 = vmatmul.mubr.msk.f32.vlgmr.msra.gmra.mxu1 %vm429_vm8, %v17618_v55 }
 0x4d9   : > { %v3507_v60 = vsel %vm21910_vm14, %v3500_v59, %v3502_v58  ;;  %v3515_v62 = vmul.f32 %v18646_v61, %v3500_v59  ;;  %3683 = vmatprep.mubr.f32.mxu1 %v21918_v27 }
 0x4da   : > { %v3516_v0 = vmul.f32 %v18651_v63, %v3507_v60 }
 0x4db   : > { %3527 = vrot.lane.b32.xlu0 %v3515_v62, %s17938_s26 }
 0x4dc   : > { %v3506_v1 = vpop.permute.xlu1 %3505  ;;  %3529 = vrot.lane.b32.xlu1 %v3516_v0, %s17938_s26  ;;  %v3504_v2 = vpop.permute.xlu0 %3503 }
 0x4dd   : > { %v3508_v7 = vsel %vm21910_vm14, %v3502_v58, %v3504_v2  ;;  %v3509_v8 = vsel %vm21910_vm14, %v3504_v2, %v3506_v1  ;;  %v3519_v16 = vmul.f32 0.0, %v3506_v1  ;;  %vm21950_vm14 = vcmask 588800  }
 0x4de   : > { %v3517_v11 = vmul.f32 %v18662_v10, %v3508_v7  ;;  %v3518_v12 = vmul.f32 %v18578_v14, %v3509_v8  ;;  %v17633_v8 = vld [vmem:[%s21898_s0 + $0x48] sm:$0xf]  ;;  %vm21951_vm7 = vmmov %vm21950_vm14 }
 0x4df   : > { %vm21952_vm15 = vmmov %vm21951_vm7 }
 0x4e0   : > { %3533 = vrot.lane.b32.xlu1 %v3518_v12, %s17938_s26  ;;  %3531 = vrot.lane.b32.xlu0 %v3517_v11, %s17938_s26  ;;  %v4128_v12 = vrot.slane %v17633_v8, %v18001_v4 }
 0x4e4   : > { %3713 = vrot.lane.b32.xlu1 %v3700_v13, %s17937_s16  ;;  %3535 = vrot.lane.b32.xlu0 %v3519_v16, %s17938_s26  ;;  %v4136_v16 = vrot.slane %v17633_v8, %v17999_v3 }
 0x4e8   : > { %3717 = vrot.lane.b32.xlu1 %v3708_v17, %s17937_s16  ;;  %3715 = vrot.lane.b32.xlu0 %v3704_v18, %s17937_s16  ;;  %v4132_v17 = vrot.slane %v17633_v8, %v18005_v6  ;;  %v4140_v18 = vrot.slane %v17633_v8, %v18003_v5  ;;  %v17657_v8 = vld [vmem:[%s21898_s0 + $0x60] sm:$0xf] }
 0x4ec   : > { %3719 = vrot.lane.b32.xlu0 %v3712_v19, %s17937_s16 }
 0x54d   : > { %v3528_v20 = vpop.permute.xlu0 %3527 }
 0x54e   : > { %v3530_v21 = vpop.permute.xlu1 %3529 }
 0x54f   : > { %v3537_v28 = vsel %vm21917_vm13, %v3528_v20, %v3530_v21 }
 0x552   : > { %v3534_v22 = vpop.permute.xlu1 %3533  ;;  %v3532_v24 = vpop.permute.xlu0 %3531 }
 0x553   : > { %v3538_v25 = vsel %vm21917_vm13, %v3530_v21, %v3532_v24  ;;  %v3539_v37 = vsel %vm21917_vm13, %v3532_v24, %v3534_v22 }
 0x554   : > { %3578 = vmatprep.subr.mxu0 %v3538_v25  ;;  %v17630_v25 = vld [vmem:[%s21900_s2 + $0x88] sm:$0xff] }
 0x555   : > { %3579 = vmatpush1.msra.mxu0 %v3537_v28 }
 0x556   : > { %v3714_v30 = vpop.permute.xlu1 %3713  ;;  %v3536_v32 = vpop.permute.xlu0 %3535  ;;  %17623 = vmatmul.mubr.msk.f32.vlgmr.msra.gmra.mxu0 %vm429_vm8, %v17622_v26 }
 0x557   : > { %v3729_v31 = vmul.f32 %v18646_v61, %v3714_v30  ;;  %v3540_v35 = vsel %vm21917_vm13, %v3534_v22, %v3536_v32  ;;  %3826 = vmatprep.mubr.f32.mxu0 %v21918_v27  ;;  %vm21955_vm13 = vmmov %vm21951_vm7 }
 0x558   : > { %3649 = vmatprep.subr.mxu1 %v3540_v35 }
 0x559   : > { %3741 = vrot.lane.b32.xlu1 %v3729_v31, %s17936_s10  ;;  %3650 = vmatpush1.msra.mxu1 %v3539_v37 }
 0x55a   : > { %v3718_v38 = vpop.permute.xlu1 %3717  ;;  %v3716_v41 = vpop.permute.xlu0 %3715  ;;  %17624 = vmatmul.mubr.msk.f32.vlgmr.msra.gmra.mxu1 %vm429_vm8, %v17622_v26 }
 0x55b   : > { %v3721_v39 = vsel %vm429_vm8, %v3714_v30, %v3716_v41  ;;  %v3722_v23 = vsel %vm429_vm8, %v3716_v41, %v3718_v38  ;;  %3897 = vmatprep.mubr.f32.mxu1 %v21918_v27 }
 0x55c   : > { %v3730_v36 = vmul.f32 %v18651_v63, %v3721_v39  ;;  %v3731_v40 = vmul.f32 %v18662_v10, %v3722_v23 }
 0x55e   : > { %3745 = vrot.lane.b32.xlu1 %v3731_v40, %s17936_s10  ;;  %3743 = vrot.lane.b32.xlu0 %v3730_v36, %s17936_s10  ;;  %v3720_v42 = vpop.permute.xlu0 %3719 }
 0x55f   : > { %v3723_v45 = vsel %vm429_vm8, %v3718_v38, %v3720_v42  ;;  %v3733_v44 = vmul.f32 0.0, %v3720_v42 }
 0x560   : > { %v3732_v48 = vmul.f32 %v18578_v14, %v3723_v45 }
 0x562   : > { %3749 = vrot.lane.b32.xlu1 %v3733_v44, %s17936_s10  ;;  %3747 = vrot.lane.b32.xlu0 %v3732_v48, %s17936_s10  ;;  %v17637_v44 = vld [vmem:[%s21898_s0 + $0x4c] sm:$0xf] }
 0x563   : > { %v4346_v48 = vrot.slane %v17637_v44, %v18005_v6 }
 0x566   : > { %3929 = vrot.lane.b32.xlu1 %v3918_v34, %s21930_s25  ;;  %3927 = vrot.lane.b32.xlu0 %v3914_v29, %s21930_s25  ;;  %v4342_v34 = vrot.slane %v17637_v44, %v18001_v4  ;;  %v4354_v29 = vrot.slane %v17637_v44, %v18003_v5 }
 0x56a   : > { %3933 = vrot.lane.b32.xlu1 %v3926_v49, %s21930_s25  ;;  %3931 = vrot.lane.b32.xlu0 %v3922_v43, %s21930_s25  ;;  %v4350_v49 = vrot.slane %v17637_v44, %v17999_v3  ;;  %v17641_v43 = vld [vmem:[%s21898_s0 + $0x50] sm:$0xf] }
 0x5cb   : > { %v3742_v15 = vpop.permute.xlu1 %3741 }
 0x5d0   : > { %v3746_v47 = vpop.permute.xlu1 %3745  ;;  %v3744_v46 = vpop.permute.xlu0 %3743 }
 0x5d1   : > { %v3752_v50 = vsel %vm2490_vm12, %v3744_v46, %v3746_v47  ;;  %v3751_v51 = vsel %vm2490_vm12, %v3742_v15, %v3744_v46  ;;  %v4560_v15 = vrot.slane %v17641_v43, %v18005_v6  ;;  %v4568_v46 = vrot.slane %v17641_v43, %v18003_v5 }
 0x5d2   : > { %3792 = vmatprep.subr.mxu0 %v3752_v50  ;;  %v4564_v50 = vrot.slane %v17641_v43, %v17999_v3 }
 0x5d3   : > { %3793 = vmatpush1.msra.mxu0 %v3751_v51  ;;  %v17645_v51 = vld [vmem:[%s21898_s0 + $0x54] sm:$0xf] }
 0x5d4   : > { %v3750_v52 = vpop.permute.xlu1 %3749  ;;  %v3748_v53 = vpop.permute.xlu0 %3747  ;;  %17627 = vmatmul.mubr.msk.f32.vlgmr.msra.gmra.mxu0 %vm429_vm8, %v17626_v54 }
 0x5d5   : > { %v3754_v55 = vsel %vm2490_vm12, %v3748_v53, %v3750_v52  ;;  %v3753_v56 = vsel %vm2490_vm12, %v3746_v47, %v3748_v53  ;;  %4040 = vmatprep.mubr.f32.mxu0 %v21918_v27  ;;  %v4556_v47 = vrot.slane %v17641_v43, %v18001_v4  ;;  %v4770_v52 = vrot.slane %v17645_v51, %v18001_v4 }
 0x5d6   : > { %3863 = vmatprep.subr.mxu1 %v3754_v55  ;;  %v4774_v53 = vrot.slane %v17645_v51, %v18005_v6  ;;  %v4782_v55 = vrot.slane %v17645_v51, %v18003_v5 }
 0x5d7   : > { %3864 = vmatpush1.msra.mxu1 %v3753_v56  ;;  %v17649_v56 = vld [vmem:[%s21898_s0 + $0x58] sm:$0xf] }
 0x5d8   : > { %v3930_v57 = vpop.permute.xlu1 %3929  ;;  %v3928_v58 = vpop.permute.xlu0 %3927  ;;  %17628 = vmatmul.mubr.msk.f32.vlgmr.msra.gmra.mxu1 %vm429_vm8, %v17626_v54  ;;  %v4778_v54 = vrot.slane %v17645_v51, %v17999_v3 }
 0x5d9   : > { %v3935_v59 = vsel %vm2305_vm11, %v3928_v58, %v3930_v57  ;;  %v3943_v60 = vmul.f32 %v18646_v61, %v3928_v58  ;;  %4111 = vmatprep.mubr.f32.mxu1 %v21918_v27  ;;  %v4984_v58 = vrot.slane %v17649_v56, %v18001_v4 }
 0x5da   : > { %v3944_v62 = vmul.f32 %v18651_v63, %v3935_v59  ;;  %v4996_v59 = vrot.slane %v17649_v56, %v18003_v5 }
 0x5db   : > { %3955 = vrot.lane.b32.xlu0 %v3943_v60, %s21928_s20  ;;  %v4992_v60 = vrot.slane %v17649_v56, %v17999_v3 }
 0x5dc   : > { %v3934_v0 = vpop.permute.xlu1 %3933  ;;  %3957 = vrot.lane.b32.xlu1 %v3944_v62, %s21928_s20  ;;  %v3932_v1 = vpop.permute.xlu0 %3931  ;;  %v17653_v62 = vld [vmem:[%s21898_s0 + $0x5c] sm:$0xf] }
 0x5dd   : > { %v3936_v2 = vsel %vm2305_vm11, %v3930_v57, %v3932_v1  ;;  %v3937_v7 = vsel %vm2305_vm11, %v3932_v1, %v3934_v0  ;;  %v3947_v13 = vmul.f32 0.0, %v3934_v0  ;;  %v4988_v57 = vrot.slane %v17649_v56, %v18005_v6 }
 0x5de   : > { %v3945_v9 = vmul.f32 %v18662_v10, %v3936_v2  ;;  %v3946_v11 = vmul.f32 %v18578_v14, %v3937_v7  ;;  %v5198_v0 = vrot.slane %v17653_v62, %v18001_v4  ;;  %v5202_v1 = vrot.slane %v17653_v62, %v18005_v6 }
 0x5df   : > { %v5206_v2 = vrot.slane %v17653_v62, %v17999_v3  ;;  %v5210_v7 = vrot.slane %v17653_v62, %v18003_v5 }
 0x5e0   : > { %3961 = vrot.lane.b32.xlu1 %v3946_v11, %s21928_s20  ;;  %3959 = vrot.lane.b32.xlu0 %v3945_v9, %s21928_s20  ;;  %v5416_v9 = vrot.slane %v17657_v8, %v18005_v6  ;;  %v5412_v11 = vrot.slane %v17657_v8, %v18001_v4 }
 0x5e4   : > { %4141 = vrot.lane.b32.xlu1 %v4128_v12, %s17924_s9  ;;  %3963 = vrot.lane.b32.xlu0 %v3947_v13, %s21928_s20  ;;  %v5424_v12 = vrot.slane %v17657_v8, %v18003_v5  ;;  %v5420_v13 = vrot.slane %v17657_v8, %v17999_v3 }
 0x5e8   : > { %4145 = vrot.lane.b32.xlu1 %v4136_v16, %s17924_s9  ;;  %4143 = vrot.lane.b32.xlu0 %v4132_v17, %s17924_s9  ;;  %v17661_v16 = vld [vmem:[%s21898_s0 + $0x64] sm:$0xf] }
 0x5e9   : > { %v5626_v17 = vrot.slane %v17661_v16, %v18001_v4 }
 0x5ec   : > { %4147 = vrot.lane.b32.xlu0 %v4140_v18, %s17924_s9  ;;  %v5630_v18 = vrot.slane %v17661_v16, %v18005_v6 }
 0x64d   : > { %v3956_v19 = vpop.permute.xlu0 %3955 }
 0x64e   : > { %v3958_v20 = vpop.permute.xlu1 %3957 }
 0x64f   : > { %v3965_v26 = vsel %vm2274_vm10, %v3956_v19, %v3958_v20  ;;  %v5634_v19 = vrot.slane %v17661_v16, %v17999_v3 }
 0x652   : > { %v3962_v21 = vpop.permute.xlu1 %3961  ;;  %v3960_v22 = vpop.permute.xlu0 %3959 }
 0x653   : > { %v3966_v24 = vsel %vm2274_vm10, %v3958_v20, %v3960_v22  ;;  %v3967_v35 = vsel %vm2274_vm10, %v3960_v22, %v3962_v21  ;;  %v5638_v20 = vrot.slane %v17661_v16, %v18003_v5 }
 0x654   : > { %4006 = vmatprep.subr.mxu0 %v3966_v24 }
 0x655   : > { %4007 = vmatpush1.msra.mxu0 %v3965_v26 }
 0x656   : > { %v4142_v28 = vpop.permute.xlu1 %4141  ;;  %v3964_v30 = vpop.permute.xlu0 %3963  ;;  %17631 = vmatmul.mubr.msk.f32.vlgmr.msra.gmra.mxu0 %vm429_vm8, %v17630_v25 }
 0x657   : > { %v4157_v32 = vmul.f32 %v18646_v61, %v4142_v28  ;;  %v3968_v31 = vsel %vm2274_vm10, %v3962_v21, %v3964_v30  ;;  %4254 = vmatprep.mubr.f32.mxu0 %v21918_v27  ;;  %v17665_v21 = vld [vmem:[%s21898_s0 + $0x68] sm:$0xf] }
 0x658   : > { %4077 = vmatprep.subr.mxu1 %v3968_v31  ;;  %v5844_v22 = vrot.slane %v17665_v21, %v18005_v6  ;;  %v5840_v24 = vrot.slane %v17665_v21, %v18001_v4  ;;  %v5848_v26 = vrot.slane %v17665_v21, %v17999_v3 }
 0x659   : > { %4169 = vrot.lane.b32.xlu1 %v4157_v32, %s17932_s19  ;;  %4078 = vmatpush1.msra.mxu1 %v3967_v35 }
 0x65a   : > { %v4146_v37 = vpop.permute.xlu1 %4145  ;;  %v4144_v38 = vpop.permute.xlu0 %4143  ;;  %17632 = vmatmul.mubr.msk.f32.vlgmr.msra.gmra.mxu1 %vm429_vm8, %v17630_v25  ;;  %v5852_v25 = vrot.slane %v17665_v21, %v18003_v5 }
 0x65b   : > { %v4149_v41 = vsel %vm347_vm1, %v4142_v28, %v4144_v38  ;;  %v4150_v39 = vsel %vm347_vm1, %v4144_v38, %v4146_v37  ;;  %4325 = vmatprep.mubr.f32.mxu1 %v21918_v27  ;;  %v17942_v28 = vmov 0  }
 0x65c   : > { %v4158_v23 = vmul.f32 %v18651_v63, %v4149_v41  ;;  %v4159_v36 = vmul.f32 %v18662_v10, %v4150_v39  ;;  %17910 = vset.pattern.permute.xlu0 %v17942_v28  ;;  %17911 = vset.pattern.permute.xlu1 %v17942_v28 }
 0x65e   : > { %4173 = vrot.lane.b32.xlu1 %v4159_v36, %s17932_s19  ;;  %4171 = vrot.lane.b32.xlu0 %v4158_v23, %s17932_s19  ;;  %v4148_v40 = vpop.permute.xlu0 %4147  ;;  %v17634_v36 = vld [vmem:[%s21900_s2 + $0x90] sm:$0xff] }
 0x65f   : > { %v4151_v42 = vsel %vm347_vm1, %v4146_v37, %v4148_v40  ;;  %v4161_v45 = vmul.f32 0.0, %v4148_v40 }
 0x660   : > { %v4160_v33 = vmul.f32 %v18578_v14, %v4151_v42 }
 0x662   : > { %4177 = vrot.lane.b32.xlu1 %v4161_v45, %s17932_s19  ;;  %4175 = vrot.lane.b32.xlu0 %v4160_v33, %s17932_s19 }
 0x666   : > { %4357 = vrot.lane.b32.xlu1 %v4346_v48, %s17925_s12  ;;  %4355 = vrot.lane.b32.xlu0 %v4342_v34, %s17925_s12 }
 0x66a   : > { %4361 = vrot.lane.b32.xlu1 %v4354_v29, %s17925_s12  ;;  %4359 = vrot.lane.b32.xlu0 %v4350_v49, %s17925_s12 }
 0x66e   : > { %4571 = vrot.lane.b32.xlu1 %v4560_v15, %s17926_s15  ;;  %4569 = vrot.lane.b32.xlu0 %v4556_v47, %s17926_s15 }
 0x672   : > { %4575 = vrot.lane.b32.xlu1 %v4568_v46, %s17926_s15  ;;  %4573 = vrot.lane.b32.xlu0 %v4564_v50, %s17926_s15 }
 0x676   : > { %4783 = vrot.lane.b32.xlu0 %v4770_v52, %s17927_s18  ;;  %4785 = vrot.lane.b32.xlu1 %v4774_v53, %s17927_s18 }
 0x67a   : > { %4787 = vrot.lane.b32.xlu0 %v4778_v54, %s17927_s18  ;;  %4789 = vrot.lane.b32.xlu1 %v4782_v55, %s17927_s18 }
 0x67e   : > { %4999 = vrot.lane.b32.xlu1 %v4988_v57, %s17928_s21  ;;  %4997 = vrot.lane.b32.xlu0 %v4984_v58, %s17928_s21 }
 0x682   : > { %5003 = vrot.lane.b32.xlu1 %v4996_v59, %s17928_s21  ;;  %5001 = vrot.lane.b32.xlu0 %v4992_v60, %s17928_s21 }
 0x686   : > { %5211 = vrot.lane.b32.xlu0 %v5198_v0, %s17929_s24  ;;  %5213 = vrot.lane.b32.xlu1 %v5202_v1, %s17929_s24 }
 0x68a   : > { %5215 = vrot.lane.b32.xlu0 %v5206_v2, %s17929_s24  ;;  %5217 = vrot.lane.b32.xlu1 %v5210_v7, %s17929_s24 }
 0x68e   : > { %5427 = vrot.lane.b32.xlu1 %v5416_v9, %s17930_s29  ;;  %5425 = vrot.lane.b32.xlu0 %v5412_v11, %s17930_s29 }
 0x692   : > { %5431 = vrot.lane.b32.xlu1 %v5424_v12, %s17930_s29  ;;  %5429 = vrot.lane.b32.xlu0 %v5420_v13, %s17930_s29 }
 0x696   : > { %5639 = vrot.lane.b32.xlu0 %v5626_v17, %s17931_s11  ;;  %5641 = vrot.lane.b32.xlu1 %v5630_v18, %s17931_s11 }
 0x69a   : > { %5643 = vrot.lane.b32.xlu0 %v5634_v19, %s17931_s11  ;;  %5645 = vrot.lane.b32.xlu1 %v5638_v20, %s17931_s11 }
 0x69e   : > { %5855 = vrot.lane.b32.xlu1 %v5844_v22, %s17932_s19  ;;  %5853 = vrot.lane.b32.xlu0 %v5840_v24, %s17932_s19 }
 0x6a2   : > { %5859 = vrot.lane.b32.xlu1 %v5852_v25, %s17932_s19  ;;  %5857 = vrot.lane.b32.xlu0 %v5848_v26, %s17932_s19 }
 0x6cb   : > { %v4170_v30 = vpop.permute.xlu1 %4169 }
 0x6d0   : > { %v4174_v32 = vpop.permute.xlu1 %4173  ;;  %v4172_v31 = vpop.permute.xlu0 %4171 }
 0x6d1   : > { %v4180_v35 = vsel %vm590_vm9, %v4172_v31, %v4174_v32  ;;  %v4179_v37 = vsel %vm590_vm9, %v4170_v30, %v4172_v31 }
 0x6d2   : > { %4220 = vmatprep.subr.mxu0 %v4180_v35 }
 0x6d3   : > { %4221 = vmatpush1.msra.mxu0 %v4179_v37 }
 0x6d4   : > { %v4178_v38 = vpop.permute.xlu1 %4177  ;;  %v4176_v41 = vpop.permute.xlu0 %4175  ;;  %17635 = vmatmul.mubr.msk.f32.vlgmr.msra.gmra.mxu0 %vm429_vm8, %v17634_v36 }
 0x6d5   : > { %v4182_v39 = vsel %vm590_vm9, %v4176_v41, %v4178_v38  ;;  %v4181_v23 = vsel %vm590_vm9, %v4174_v32, %v4176_v41  ;;  %4468 = vmatprep.mubr.f32.mxu0 %v21918_v27 }
 0x6d6   : > { %4291 = vmatprep.subr.mxu1 %v4182_v39 }
 0x6d7   : > { %4292 = vmatpush1.msra.mxu1 %v4181_v23 }
 0x6d8   : > { %v4358_v40 = vpop.permute.xlu1 %4357  ;;  %v4356_v42 = vpop.permute.xlu0 %4355  ;;  %17636 = vmatmul.mubr.msk.f32.vlgmr.msra.gmra.mxu1 %vm429_vm8, %v17634_v36 }
 0x6d9   : > { %v4363_v45 = vsel %vm389_vm0, %v4356_v42, %v4358_v40  ;;  %4539 = vmatprep.mubr.f32.mxu1 %v21918_v27  ;;  %v4371_v46 = vmul.f32 %v18646_v61, %v4356_v42 }
 0x6da   : > { %v4372_v44 = vmul.f32 %v18651_v63, %v4363_v45 }
 0x6dc   : > { %v4362_v33 = vpop.permute.xlu1 %4361  ;;  %4385 = vrot.lane.b32.xlu0 %v4372_v44, %s17931_s11  ;;  %v4360_v48 = vpop.permute.xlu0 %4359 }
 0x6dd   : > { %v4364_v34 = vsel %vm389_vm0, %v4358_v40, %v4360_v48  ;;  %v4365_v29 = vsel %vm389_vm0, %v4360_v48, %v4362_v33  ;;  %v4375_v50 = vmul.f32 0.0, %v4362_v33 }
 0x6de   : > { %v4373_v49 = vmul.f32 %v18662_v10, %v4364_v34  ;;  %v4374_v43 = vmul.f32 %v18578_v14, %v4365_v29 }
 0x6e0   : > { %v4572_v15 = vpop.permute.xlu1 %4571  ;;  %4389 = vrot.lane.b32.xlu0 %v4374_v43, %s17931_s11  ;;  %4387 = vrot.lane.b32.xlu1 %v4373_v49, %s17931_s11  ;;  %v4570_v47 = vpop.permute.xlu0 %4569 }
 0x6e1   : > { %v4577_v51 = vsel %vm771_vm2, %v4570_v47, %v4572_v15  ;;  %v4585_v9 = vmul.f32 %v18646_v61, %v4570_v47 }
 0x6e2   : > { %v4586_v55 = vmul.f32 %v18651_v63, %v4577_v51 }
 0x6e4   : > { %v4576_v52 = vpop.permute.xlu1 %4575  ;;  %4383 = vrot.lane.b32.xlu0 %v4371_v46, %s17931_s11  ;;  %4391 = vrot.lane.b32.xlu1 %v4375_v50, %s17931_s11  ;;  %v4574_v53 = vpop.permute.xlu0 %4573 }
 0x6e5   : > { %v4578_v54 = vsel %vm771_vm2, %v4572_v15, %v4574_v53  ;;  %v4579_v57 = vsel %vm771_vm2, %v4574_v53, %v4576_v52  ;;  %v4589_v58 = vmul.f32 0.0, %v4576_v52 }
 0x6e6   : > { %v4587_v56 = vmul.f32 %v18662_v10, %v4578_v54  ;;  %v4588_v0 = vmul.f32 %v18578_v14, %v4579_v57 }
 0x6e8   : > { %4599 = vrot.lane.b32.xlu1 %v4586_v55, %s17930_s29  ;;  %4601 = vrot.lane.b32.xlu0 %v4587_v56, %s17930_s29  ;;  %v4784_v59 = vpop.permute.xlu0 %4783  ;;  %v4786_v60 = vpop.permute.xlu1 %4785 }
 0x6e9   : > { %v4791_v62 = vsel %vm987_vm3, %v4784_v59, %v4786_v60  ;;  %v4799_v21 = vmul.f32 %v18646_v61, %v4784_v59 }
 0x6ea   : > { %v4800_v1 = vmul.f32 %v18651_v63, %v4791_v62 }
 0x6ec   : > { %4603 = vrot.lane.b32.xlu1 %v4588_v0, %s17930_s29  ;;  %4605 = vrot.lane.b32.xlu0 %v4589_v58, %s17930_s29  ;;  %v4788_v2 = vpop.permute.xlu0 %4787  ;;  %v4790_v7 = vpop.permute.xlu1 %4789 }
 0x6ed   : > { %v4793_v8 = vsel %vm987_vm3, %v4788_v2, %v4790_v7  ;;  %v4792_v11 = vsel %vm987_vm3, %v4786_v60, %v4788_v2  ;;  %v4803_v22 = vmul.f32 0.0, %v4790_v7 }
 0x6ee   : > { %v4802_v12 = vmul.f32 %v18578_v14, %v4793_v8  ;;  %v4801_v17 = vmul.f32 %v18662_v10, %v4792_v11 }
 0x6f0   : > { %4597 = vrot.lane.b32.xlu1 %v4585_v9, %s17930_s29  ;;  %4813 = vrot.lane.b32.xlu0 %v4800_v1, %s17929_s24  ;;  %v5000_v13 = vpop.permute.xlu1 %4999  ;;  %v4998_v16 = vpop.permute.xlu0 %4997 }
 0x6f1   : > { %v5005_v24 = vsel %vm1203_vm4, %v4998_v16, %v5000_v13  ;;  %v5013_v40 = vmul.f32 %v18646_v61, %v4998_v16 }
 0x6f2   : > { %v5014_v30 = vmul.f32 %v18651_v63, %v5005_v24 }
 0x6f4   : > { %4817 = vrot.lane.b32.xlu0 %v4802_v12, %s17929_s24  ;;  %4815 = vrot.lane.b32.xlu1 %v4801_v17, %s17929_s24  ;;  %v5004_v18 = vpop.permute.xlu1 %5003  ;;  %v5002_v19 = vpop.permute.xlu0 %5001 }
 0x6f5   : > { %v5006_v20 = vsel %vm1203_vm4, %v5000_v13, %v5002_v19  ;;  %v5007_v32 = vsel %vm1203_vm4, %v5002_v19, %v5004_v18  ;;  %v5017_v31 = vmul.f32 0.0, %v5004_v18 }
 0x6f6   : > { %v5015_v25 = vmul.f32 %v18662_v10, %v5006_v20  ;;  %v5016_v41 = vmul.f32 %v18578_v14, %v5007_v32 }
 0x6f8   : > { %4811 = vrot.lane.b32.xlu0 %v4799_v21, %s17929_s24  ;;  %4819 = vrot.lane.b32.xlu1 %v4803_v22, %s17929_s24  ;;  %v5212_v26 = vpop.permute.xlu0 %5211  ;;  %v5214_v28 = vpop.permute.xlu1 %5213  ;;  %v6048_v22 = vld [vmem:[%s21901_s3] sm:$0xff] }
 0x6f9   : > { %v5219_v38 = vsel %vm1018_vm5, %v5212_v26, %v5214_v28  ;;  %v5227_v49 = vmul.f32 %v18646_v61, %v5212_v26 }
 0x6fa   : > { %v5228_v39 = vmul.f32 %v18651_v63, %v5219_v38 }
 0x6fc   : > { %5027 = vrot.lane.b32.xlu1 %v5014_v30, %s17928_s21  ;;  %5029 = vrot.lane.b32.xlu0 %v5015_v25, %s17928_s21  ;;  %v5216_v35 = vpop.permute.xlu0 %5215  ;;  %v5218_v37 = vpop.permute.xlu1 %5217  ;;  %v17669_v25 = vld [vmem:[%s21898_s0 + $0x4] sm:$0xf] }
 0x6fd   : > { %v5221_v36 = vsel %vm1018_vm5, %v5216_v35, %v5218_v37  ;;  %v5220_v45 = vsel %vm1018_vm5, %v5214_v28, %v5216_v35  ;;  %v5231_v43 = vmul.f32 0.0, %v5218_v37  ;;  %v6124_v28 = vrot.slane %v17669_v25, %v18001_v4 }
 0x6fe   : > { %v5230_v44 = vmul.f32 %v18578_v14, %v5221_v36  ;;  %v5229_v48 = vmul.f32 %v18662_v10, %v5220_v45  ;;  %v6132_v30 = vrot.slane %v17669_v25, %v17999_v3  ;;  %v6128_v32 = vrot.slane %v17669_v25, %v18005_v6 }
 0x700   : > { %5031 = vrot.lane.b32.xlu1 %v5016_v41, %s17928_s21  ;;  %5033 = vrot.lane.b32.xlu0 %v5017_v31, %s17928_s21  ;;  %v5426_v23 = vpop.permute.xlu0 %5425  ;;  %v5428_v42 = vpop.permute.xlu1 %5427  ;;  %v6136_v31 = vrot.slane %v17669_v25, %v18003_v5 }
 0x701   : > { %v5433_v47 = vsel %vm802_vm6, %v5426_v23, %v5428_v42  ;;  %v5441_v62 = vmul.f32 %v18646_v61, %v5426_v23 }
 0x702   : > { %v5442_v51 = vmul.f32 %v18651_v63, %v5433_v47 }
 0x704   : > { %5025 = vrot.lane.b32.xlu1 %v5013_v40, %s17928_s21  ;;  %5241 = vrot.lane.b32.xlu0 %v5228_v39, %s17927_s18  ;;  %v5430_v33 = vpop.permute.xlu0 %5429  ;;  %v5432_v34 = vpop.permute.xlu1 %5431 }
 0x705   : > { %v5434_v29 = vsel %vm802_vm6, %v5428_v42, %v5430_v33  ;;  %v5435_v52 = vsel %vm802_vm6, %v5430_v33, %v5432_v34  ;;  %v5445_v53 = vmul.f32 0.0, %v5432_v34  ;;  %v17638_v42 = vld [vmem:[%s21900_s2 + $0x98] sm:$0xff] }
 0x706   : > { %v5443_v46 = vmul.f32 %v18662_v10, %v5434_v29  ;;  %v5444_v56 = vmul.f32 %v18578_v14, %v5435_v52 }
 0x708   : > { %5245 = vrot.lane.b32.xlu0 %v5230_v44, %s17927_s18  ;;  %5243 = vrot.lane.b32.xlu1 %v5229_v48, %s17927_s18  ;;  %v5640_v15 = vpop.permute.xlu0 %5639  ;;  %v5642_v50 = vpop.permute.xlu1 %5641 }
 0x709   : > { %v5647_v55 = vsel %vm21950_vm14, %v5640_v15, %v5642_v50  ;;  %v5655_v11 = vmul.f32 %v18646_v61, %v5640_v15  ;;  %vm21953_vm14 = vmmov %vm21951_vm7  ;;  %v17642_v15 = vld [vmem:[%s21900_s2 + $0xa0] sm:$0xff] }
 0x70a   : > { %v5656_v58 = vmul.f32 %v18651_v63, %v5647_v55 }
 0x70c   : > { %5239 = vrot.lane.b32.xlu0 %v5227_v49, %s17927_s18  ;;  %5247 = vrot.lane.b32.xlu1 %v5231_v43, %s17927_s18  ;;  %v5644_v54 = vpop.permute.xlu0 %5643  ;;  %v5646_v57 = vpop.permute.xlu1 %5645 }
 0x70d   : > { %v5649_v60 = vsel %vm21951_vm7, %v5644_v54, %v5646_v57  ;;  %v5648_v0 = vsel %vm21952_vm15, %v5642_v50, %v5644_v54  ;;  %v5659_v12 = vmul.f32 0.0, %v5646_v57  ;;  %vm21954_vm15 = vmmov %vm21951_vm7 }
 0x70e   : > { %v5658_v1 = vmul.f32 %v18578_v14, %v5649_v60  ;;  %v5657_v2 = vmul.f32 %v18662_v10, %v5648_v0 }
 0x710   : > { %5455 = vrot.lane.b32.xlu1 %v5442_v51, %s17926_s15  ;;  %5457 = vrot.lane.b32.xlu0 %v5443_v46, %s17926_s15  ;;  %v5854_v59 = vpop.permute.xlu0 %5853  ;;  %v5856_v7 = vpop.permute.xlu1 %5855 }
 0x711   : > { %v5861_v13 = vsel %vm590_vm9, %v5854_v59, %v5856_v7 }
 0x712   : > { %v5870_v18 = vmul.f32 %v18651_v63, %v5861_v13  ;;  %v6079_v63 = vld [vmem:[%s21898_s0] sm:$0xf] }
 0x713   : > { %v6084_v24 = vrot.slane %v6079_v63, %v18001_v4  ;;  %v6088_v26 = vrot.slane %v6079_v63, %v18005_v6 }
 0x714   : > { %5459 = vrot.lane.b32.xlu1 %v5444_v56, %s17926_s15  ;;  %5461 = vrot.lane.b32.xlu0 %v5445_v53, %s17926_s15  ;;  %v5858_v8 = vpop.permute.xlu0 %5857  ;;  %v5860_v16 = vpop.permute.xlu1 %5859 }
 0x715   : > { %v5862_v9 = vsel %vm590_vm9, %v5856_v7, %v5858_v8  ;;  %v5863_v19 = vsel %vm590_vm9, %v5858_v8, %v5860_v16  ;;  %v5873_v20 = vmul.f32 0.0, %v5860_v16 }
 0x716   : > { %v5871_v17 = vmul.f32 %v18662_v10, %v5862_v9  ;;  %v5872_v21 = vmul.f32 %v18578_v14, %v5863_v19  ;;  %v5869_v10 = vmul.f32 %v18646_v61, %v5854_v59  ;;  %v6092_v14 = vrot.slane %v6079_v63, %v17999_v3  ;;  %v17650_v9 = vld [vmem:[%s21900_s2 + $0xb0] sm:$0xff] }
 0x717   : > { %v6096_v61 = vrot.slane %v6079_v63, %v18003_v5  ;;  %v17654_v63 = vld [vmem:[%s21900_s2 + $0xb8] sm:$0xff] }
 0x718   : > { %5453 = vrot.lane.b32.xlu1 %v5441_v62, %s17926_s15  ;;  %5669 = vrot.lane.b32.xlu0 %v5656_v58, %s17925_s12  ;;  %v17646_v58 = vld [vmem:[%s21900_s2 + $0xa8] sm:$0xff] }
 0x71c   : > { %5673 = vrot.lane.b32.xlu0 %v5658_v1, %s17925_s12  ;;  %5671 = vrot.lane.b32.xlu1 %v5657_v2, %s17925_s12 }
 0x720   : > { %5667 = vrot.lane.b32.xlu0 %v5655_v11, %s17925_s12  ;;  %5675 = vrot.lane.b32.xlu1 %v5659_v12, %s17925_s12 }
 0x724   : > { %5883 = vrot.lane.b32.xlu1 %v5870_v18, %s17924_s9  ;;  %5885 = vrot.lane.b32.xlu0 %v5871_v17, %s17924_s9 }
 0x728   : > { %5887 = vrot.lane.b32.xlu1 %v5872_v21, %s17924_s9  ;;  %5889 = vrot.lane.b32.xlu0 %v5873_v20, %s17924_s9 }
 0x72c   : > { %5881 = vrot.lane.b32.xlu1 %v5869_v10, %s17924_s9  ;;  %6051 = vperm.xlu0 %17910, %v6048_v22  }
 0x730   : > { %6097 = vrot.lane.b32.xlu1 %v6084_v24, %s17924_s9  ;;  %6101 = vrot.lane.b32.xlu0 %v6092_v14, %s17924_s9 }
 0x734   : > { %6099 = vrot.lane.b32.xlu1 %v6088_v26, %s17924_s9  ;;  %6137 = vrot.lane.b32.xlu0 %v6124_v28, %s17925_s12 }
 0x738   : > { %6103 = vrot.lane.b32.xlu1 %v6096_v61, %s17924_s9  ;;  %6141 = vrot.lane.b32.xlu0 %v6132_v30, %s17925_s12 }
 0x73c   : > { %6139 = vrot.lane.b32.xlu1 %v6128_v32, %s17925_s12  ;;  %v17658_v32 = vld [vmem:[%s21900_s2 + $0xc0] sm:$0xff] }
 0x740   : > { %6143 = vrot.lane.b32.xlu1 %v6136_v31, %s17925_s12 }
 0x74e   : > { %v4386_v35 = vpop.permute.xlu0 %4385 }
 0x752   : > { %v4388_v37 = vpop.permute.xlu1 %4387  ;;  %v4390_v38 = vpop.permute.xlu0 %4389 }
 0x753   : > { %v4394_v41 = vsel %vm21951_vm7, %v4386_v35, %v4388_v37  ;;  %v4395_v45 = vsel %vm21955_vm13, %v4388_v37, %v4390_v38 }
 0x754   : > { %4434 = vmatprep.subr.mxu0 %v4394_v41 }
 0x756   : > { %v4392_v39 = vpop.permute.xlu1 %4391  ;;  %v4384_v23 = vpop.permute.xlu0 %4383 }
 0x757   : > { %v4393_v36 = vsel %vm21953_vm14, %v4384_v23, %v4386_v35  ;;  %v4396_v40 = vsel %vm21954_vm15, %v4390_v38, %v4392_v39  ;;  %v19053_v38 = vpop.f32.mrf.mxu1 }
 0x758   : > { %4435 = vmatpush1.msra.mxu0 %v4393_v36  ;;  %4505 = vmatprep.subr.mxu1 %v4396_v40  ;;  %v19059_v40 = vpop.f32.mrf.mxu0 }
 0x759   : > { %4506 = vmatpush1.msra.mxu1 %v4395_v45  ;;  %17639 = vmatmul.mubr.msk.f32.vlgmr.msra.gmra.mxu0 %vm429_vm8, %v17638_v42  ;;  %v19057_v36 = vpop.f32.mrf.mxu1 }
 0x75a   : > { %v4600_v44 = vpop.permute.xlu1 %4599  ;;  %v4602_v33 = vpop.permute.xlu0 %4601  ;;  %17640 = vmatmul.mubr.msk.f32.vlgmr.msra.gmra.mxu1 %vm429_vm8, %v17638_v42  ;;  %4682 = vmatprep.mubr.f32.mxu0 %v21918_v27 }
 0x75b   : > { %v4608_v48 = vsel %vm802_vm6, %v4600_v44, %v4602_v33  ;;  %4753 = vmatprep.mubr.f32.mxu1 %v21918_v27 }
 0x75c   : > { %4648 = vmatprep.subr.mxu0 %v4608_v48  ;;  %v17662_v48 = vld [vmem:[%s21900_s2 + $0xc8] sm:$0xff] }
 0x75e   : > { %v4604_v34 = vpop.permute.xlu1 %4603  ;;  %v4606_v29 = vpop.permute.xlu0 %4605 }
 0x75f   : > { %v4610_v49 = vsel %vm802_vm6, %v4604_v34, %v4606_v29  ;;  %v4609_v43 = vsel %vm802_vm6, %v4602_v33, %v4604_v34  ;;  %v19068_v29 = vpop.f32.mrf.mxu1 }
 0x760   : > { %4719 = vmatprep.subr.mxu1 %v4610_v49  ;;  %v19070_v49 = vpop.f32.mrf.mxu0 }
 0x761   : > { %4720 = vmatpush1.msra.mxu1 %v4609_v43 }
 0x762   : > { %v4598_v47 = vpop.permute.xlu1 %4597  ;;  %v4814_v46 = vpop.permute.xlu0 %4813  ;;  %17644 = vmatmul.mubr.msk.f32.vlgmr.msra.gmra.mxu1 %vm429_vm8, %v17642_v15 }
 0x763   : > { %v4607_v50 = vsel %vm802_vm6, %v4598_v47, %v4600_v44  ;;  %4967 = vmatprep.mubr.f32.mxu1 %v21918_v27 }
 0x764   : > { %4649 = vmatpush1.msra.mxu0 %v4607_v50  ;;  %v19078_v50 = vpop.f32.mrf.mxu0 }
 0x765   : > { %17643 = vmatmul.mubr.msk.f32.vlgmr.msra.gmra.mxu0 %vm429_vm8, %v17642_v15 }
 0x766   : > { %v4816_v51 = vpop.permute.xlu1 %4815  ;;  %v4818_v52 = vpop.permute.xlu0 %4817  ;;  %4896 = vmatprep.mubr.f32.mxu0 %v21918_v27 }
 0x767   : > { %v4822_v53 = vsel %vm1018_vm5, %v4814_v46, %v4816_v51  ;;  %v4823_v59 = vsel %vm1018_vm5, %v4816_v51, %v4818_v52 }
 0x768   : > { %4862 = vmatprep.subr.mxu0 %v4822_v53 }
 0x76a   : > { %v4820_v54 = vpop.permute.xlu1 %4819  ;;  %v4812_v55 = vpop.permute.xlu0 %4811 }
 0x76b   : > { %v4821_v56 = vsel %vm1018_vm5, %v4812_v55, %v4814_v46  ;;  %v4824_v57 = vsel %vm1018_vm5, %v4818_v52, %v4820_v54  ;;  %v19076_v46 = vpop.f32.mrf.mxu1  ;;  %v17666_v55 = vld [vmem:[%s21900_s2 + $0xd0] sm:$0xff] }
 0x76c   : > { %4863 = vmatpush1.msra.mxu0 %v4821_v56  ;;  %4933 = vmatprep.subr.mxu1 %v4824_v57  ;;  %v19085_v56 = vpop.f32.mrf.mxu0 }
 0x76d   : > { %4934 = vmatpush1.msra.mxu1 %v4823_v59  ;;  %17647 = vmatmul.mubr.msk.f32.vlgmr.msra.gmra.mxu0 %vm429_vm8, %v17646_v58 }
 0x76e   : > { %v5028_v60 = vpop.permute.xlu1 %5027  ;;  %v5030_v62 = vpop.permute.xlu0 %5029  ;;  %17648 = vmatmul.mubr.msk.f32.vlgmr.msra.gmra.mxu1 %vm429_vm8, %v17646_v58  ;;  %5110 = vmatprep.mubr.f32.mxu0 %v21918_v27 }
 0x76f   : > { %v5036_v0 = vsel %vm1203_vm4, %v5028_v60, %v5030_v62  ;;  %5181 = vmatprep.mubr.f32.mxu1 %v21918_v27  ;;  %v19088_v58 = vpop.f32.mrf.mxu1 }
 0x770   : > { %5076 = vmatprep.subr.mxu0 %v5036_v0  ;;  %v17675_v0 = vld [vmem:[%s21898_s0 + $0x8] sm:$0xf] }
 0x772   : > { %v5032_v1 = vpop.permute.xlu1 %5031  ;;  %v5034_v2 = vpop.permute.xlu0 %5033 }
 0x773   : > { %v5038_v7 = vsel %vm1203_vm4, %v5032_v1, %v5034_v2  ;;  %v5037_v8 = vsel %vm1203_vm4, %v5030_v62, %v5032_v1  ;;  %v19100_v1 = vpop.f32.mrf.mxu1 }
 0x774   : > { %5147 = vmatprep.subr.mxu1 %v5038_v7  ;;  %v6505_v7 = vrot.slane %v17675_v0, %v18005_v6 }
 0x775   : > { %5148 = vmatpush1.msra.mxu1 %v5037_v8 }
 0x776   : > { %v5026_v11 = vpop.permute.xlu1 %5025  ;;  %v5242_v12 = vpop.permute.xlu0 %5241  ;;  %17652 = vmatmul.mubr.msk.f32.vlgmr.msra.gmra.mxu1 %vm429_vm8, %v17650_v9 }
 0x777   : > { %v5035_v13 = vsel %vm1203_vm4, %v5026_v11, %v5028_v60  ;;  %5395 = vmatprep.mubr.f32.mxu1 %v21918_v27  ;;  %v19093_v60 = vpop.f32.mrf.mxu0 }
 0x778   : > { %5077 = vmatpush1.msra.mxu0 %v5035_v13 }
 0x779   : > { %17651 = vmatmul.mubr.msk.f32.vlgmr.msra.gmra.mxu0 %vm429_vm8, %v17650_v9  ;;  %v19106_v8 = vpop.f32.mrf.mxu0  ;;  %v19108_v9 = vpop.f32.mrf.mxu1 }
 0x77a   : > { %v5244_v16 = vpop.permute.xlu1 %5243  ;;  %v5246_v17 = vpop.permute.xlu0 %5245  ;;  %5324 = vmatprep.mubr.f32.mxu0 %v21918_v27 }
 0x77b   : > { %v5250_v18 = vsel %vm987_vm3, %v5242_v12, %v5244_v16  ;;  %v5251_v10 = vsel %vm987_vm3, %v5244_v16, %v5246_v17  ;;  %v19114_v13 = vpop.f32.mrf.mxu0  ;;  %v19119_v16 = vld [vmem:[%s21898_s0 + $0xc] sm:$0xf] }
 0x77c   : > { %5290 = vmatprep.subr.mxu0 %v5250_v18 }
 0x77e   : > { %v5248_v19 = vpop.permute.xlu1 %5247  ;;  %v5240_v20 = vpop.permute.xlu0 %5239 }
 0x77f   : > { %v5249_v21 = vsel %vm987_vm3, %v5240_v20, %v5242_v12  ;;  %v5252_v22 = vsel %vm987_vm3, %v5246_v17, %v5248_v19  ;;  %v6513_v12 = vrot.slane %v17675_v0, %v18003_v5  ;;  %v19121_v17 = vpop.f32.mrf.mxu1  ;;  %v6714_v19 = vrot.slane %v19119_v16, %v18001_v4  ;;  %v19128_v20 = vpop.f32.mrf.mxu0 }
 0x780   : > { %5291 = vmatpush1.msra.mxu0 %v5249_v21  ;;  %5361 = vmatprep.subr.mxu1 %v5252_v22 }
 0x781   : > { %5362 = vmatpush1.msra.mxu1 %v5251_v10  ;;  %17655 = vmatmul.mubr.msk.f32.vlgmr.msra.gmra.mxu0 %vm429_vm8, %v17654_v63  ;;  %v19130_v21 = vpop.f32.mrf.mxu1  ;;  %v1311_v10 = vpop.f32.mrf.mxu0 }
 0x782   : > { %v5456_v24 = vpop.permute.xlu1 %5455  ;;  %v5458_v14 = vpop.permute.xlu0 %5457  ;;  %17656 = vmatmul.mubr.msk.f32.vlgmr.msra.gmra.mxu1 %vm429_vm8, %v17654_v63  ;;  %5538 = vmatprep.mubr.f32.mxu0 %v21918_v27 }
 0x783   : > { %v5464_v25 = vsel %vm771_vm2, %v5456_v24, %v5458_v14  ;;  %5609 = vmatprep.mubr.f32.mxu1 %v21918_v27 }
 0x784   : > { %5504 = vmatprep.subr.mxu0 %v5464_v25  ;;  %v19140_v25 = vpop.f32.mrf.mxu1 }
 0x786   : > { %v5460_v26 = vpop.permute.xlu1 %5459  ;;  %v5462_v28 = vpop.permute.xlu0 %5461 }
 0x787   : > { %v5466_v61 = vsel %vm771_vm2, %v5460_v26, %v5462_v28  ;;  %v5465_v30 = vsel %vm771_vm2, %v5458_v14, %v5460_v26  ;;  %v6501_v14 = vrot.slane %v17675_v0, %v18001_v4  ;;  %v19142_v26 = vpop.f32.mrf.mxu0  ;;  %v6509_v28 = vrot.slane %v17675_v0, %v17999_v3 }
 0x788   : > { %5575 = vmatprep.subr.mxu1 %v5466_v61  ;;  %v1596_v61 = vpop.f32.mrf.mxu1 }
 0x789   : > { %5576 = vmatpush1.msra.mxu1 %v5465_v30  ;;  %v1525_v30 = vpop.f32.mrf.mxu0 }
 0x78a   : > { %v5454_v31 = vpop.permute.xlu1 %5453  ;;  %v5670_v35 = vpop.permute.xlu0 %5669  ;;  %17660 = vmatmul.mubr.msk.f32.vlgmr.msra.gmra.mxu1 %vm429_vm8, %v17658_v32 }
 0x78b   : > { %v5463_v37 = vsel %vm771_vm2, %v5454_v31, %v5456_v24  ;;  %5823 = vmatprep.mubr.f32.mxu1 %v21918_v27  ;;  %v6722_v24 = vrot.slane %v19119_v16, %v17999_v3  ;;  %v19150_v31 = vpop.f32.mrf.mxu0 }
 0x78c   : > { %5505 = vmatpush1.msra.mxu0 %v5463_v37 }
 0x78d   : > { %17659 = vmatmul.mubr.msk.f32.vlgmr.msra.gmra.mxu0 %vm429_vm8, %v17658_v32  ;;  %v19148_v32 = vpop.f32.mrf.mxu1  ;;  %v1739_v37 = vpop.f32.mrf.mxu0 }
 0x78e   : > { %v5672_v41 = vpop.permute.xlu1 %5671  ;;  %v5674_v39 = vpop.permute.xlu0 %5673  ;;  %5752 = vmatprep.mubr.f32.mxu0 %v21918_v27 }
 0x78f   : > { %v5678_v23 = vsel %vm389_vm0, %v5670_v35, %v5672_v41  ;;  %v5679_v34 = vsel %vm389_vm0, %v5672_v41, %v5674_v39 }
 0x790   : > { %5718 = vmatprep.subr.mxu0 %v5678_v23 }
 0x792   : > { %v5676_v42 = vpop.permute.xlu1 %5675  ;;  %v5668_v45 = vpop.permute.xlu0 %5667 }
 0x793   : > { %v5677_v44 = vsel %vm389_vm0, %v5668_v45, %v5670_v35  ;;  %v5680_v33 = vsel %vm389_vm0, %v5674_v39, %v5676_v42  ;;  %v1810_v35 = vpop.f32.mrf.mxu1  ;;  %v19154_v39 = vpop.f32.mrf.mxu0 }
 0x794   : > { %5719 = vmatpush1.msra.mxu0 %v5677_v44  ;;  %5789 = vmatprep.subr.mxu1 %v5680_v33 }
 0x795   : > { %5790 = vmatpush1.msra.mxu1 %v5679_v34  ;;  %17663 = vmatmul.mubr.msk.f32.vlgmr.msra.gmra.mxu0 %vm429_vm8, %v17662_v48  ;;  %v19152_v41 = vpop.f32.mrf.mxu1  ;;  %v1953_v42 = vpop.f32.mrf.mxu0 }
 0x796   : > { %v5884_v43 = vpop.permute.xlu1 %5883  ;;  %v5886_v15 = vpop.permute.xlu0 %5885  ;;  %17664 = vmatmul.mubr.msk.f32.vlgmr.msra.gmra.mxu1 %vm429_vm8, %v17662_v48  ;;  %5966 = vmatprep.mubr.f32.mxu0 %v21918_v27 }
 0x797   : > { %v5892_v47 = vsel %vm347_vm1, %v5884_v43, %v5886_v15  ;;  %6037 = vmatprep.mubr.f32.mxu1 %v21918_v27  ;;  %v2024_v23 = vpop.f32.mrf.mxu1  ;;  %v19158_v44 = vpop.f32.mrf.mxu0 }
 0x798   : > { %5932 = vmatprep.subr.mxu0 %v5892_v47 }
 0x799   : > { %v19156_v45 = vpop.f32.mrf.mxu1  ;;  %v2167_v48 = vpop.f32.mrf.mxu0 }
 0x79a   : > { %v5888_v51 = vpop.permute.xlu1 %5887  ;;  %v5890_v52 = vpop.permute.xlu0 %5889 }
 0x79b   : > { %v5894_v53 = vsel %vm347_vm1, %v5888_v51, %v5890_v52  ;;  %v5893_v54 = vsel %vm347_vm1, %v5886_v15, %v5888_v51  ;;  %v2238_v33 = vpop.f32.mrf.mxu1 }
 0x79c   : > { %6003 = vmatprep.subr.mxu1 %v5894_v53 }
 0x79d   : > { %6004 = vmatpush1.msra.mxu1 %v5893_v54  ;;  %v19160_v34 = vpop.f32.mrf.mxu1 }
 0x79e   : > { %v5882_v57 = vpop.permute.xlu1 %5881  ;;  %17668 = vmatmul.mubr.msk.f32.vlgmr.msra.gmra.mxu1 %vm429_vm8, %v17666_v55 }
 0x79f   : > { %v5891_v59 = vsel %vm347_vm1, %v5882_v57, %v5884_v43  ;;  %6321 = vmatprep.mubr.f32.mxu1 %v21918_v27  ;;  %v19162_v43 = vpop.f32.mrf.mxu0  ;;  %v2454_v15 = vpop.f32.mrf.mxu1 }
 0x7a0   : > { %5933 = vmatpush1.msra.mxu0 %v5891_v59 }
 0x7a1   : > { %17667 = vmatmul.mubr.msk.f32.vlgmr.msra.gmra.mxu0 %vm429_vm8, %v17666_v55  ;;  %v2383_v47 = vpop.f32.mrf.mxu0  ;;  %v19164_v51 = vpop.f32.mrf.mxu1 }
 0x7a2   : > { %v19095_v62 = vpop.permute.xlu1 %6097  ;;  %6250 = vmatprep.mubr.f32.mxu0 %v21918_v27 }
 0x7a3   : > { %21956 = vst [vmem:[#allocation7_spill] sm:$0xff] %v19095_v62  ;;  %v6113_v2 = vmul.f32 0.0, %v19095_v62  ;;  %v19166_v52 = vpop.f32.mrf.mxu0  ;;  %v2669_v53 = vpop.f32.mrf.mxu1 }
 0x7a5   : > { %6333 = vrot.lane.b32.xlu1 %v6113_v2, %s17932_s19  ;;  %v2598_v54 = vpop.f32.mrf.mxu0  ;;  %v19168_v55 = vpop.f32.mrf.mxu1 }
 0x7a6   : > { %21960 = vst [vmem:[#allocation11_spill] sm:$0xff] %v19168_v55 }
 0x7a7   : > { %v19110_v11 = vpop.permute.xlu0 %6051  ;;  %v19170_v57 = vpop.f32.mrf.mxu0 }
 0x7a8   : > { %21957 = vst [vmem:[#allocation8_spill] sm:$0xff] %v19110_v11  ;;  %v2885_v59 = vpop.f32.mrf.mxu1 }
 0x7a9   : > { %6516 = vrot.lane.b32.xlu1 %v6505_v7, %s17926_s15  ;;  %v19172_v0 = vpop.f32.mrf.mxu0 }
 0x7aa   : > { %v19174_v2 = vpop.f32.mrf.mxu1 }
 0x7ab   : > { %v19123_v18 = vpop.permute.xlu0 %6101  ;;  %21961 = vst [vmem:[#allocation12_spill] sm:$0xff] %v19174_v2  ;;  %v19176_v7 = vpop.f32.mrf.mxu0  ;;  %v669_v2 = vadd.f32 %v19078_v50, %v19059_v40 }
 0x7ac   : > { %21958 = vst [vmem:[#allocation9_spill] sm:$0xff] %v19123_v18  ;;  %21962 = vst [vmem:[#allocation13_spill] sm:$0xff] %v19176_v7  ;;  %v740_v18 = vadd.f32 %v19068_v29, %v19053_v38  ;;  %v19201_v7 = vpop.permute.xlu1 %6099 }
 0x7ad   : > { %6520 = vrot.lane.b32.xlu1 %v6513_v12, %s17926_s15  ;;  %v19178_v12 = vpop.f32.mrf.mxu1  ;;  %21967 = vst [vmem:[#allocation18_spill] sm:$0xff] %v19201_v7  ;;  %v956_v55 = vadd.f32 %v19093_v60, %v669_v2 }
 0x7af   : > { %v19132_v22 = vpop.permute.xlu0 %6137  ;;  %v1172_v29 = vadd.f32 %v19114_v13, %v956_v55 }
 0x7b0   : > { %21959 = vst [vmem:[#allocation10_spill] sm:$0xff] %v19132_v22  ;;  %v6153_v63 = vmul.f32 0.0, %v19132_v22  ;;  %v19214_v40 = vpop.permute.xlu1 %6103 }
 0x7b1   : > { %6727 = vrot.lane.b32.xlu1 %v6714_v19, %s17927_s18  ;;  %v19180_v19 = vpop.f32.mrf.mxu0  ;;  %21970 = vst [vmem:[#allocation21_spill] sm:$0xff] %v19214_v40 }
 0x7b2   : > { %6165 = vrot.lane.b32.xlu0 %v6153_v63, %s17931_s11  ;;  %v19182_v63 = vpop.f32.mrf.mxu1 }
 0x7b3   : > { %21963 = vst [vmem:[#allocation14_spill] sm:$0xff] %v19182_v63  ;;  %v958_v63 = vadd.f32 %v19088_v58, %v740_v18  ;;  %v1387_v18 = vadd.f32 %v1311_v10, %v1172_v29 }
 0x7b4   : > { %v19221_v2 = vpop.permute.xlu1 %6139 }
 0x7b5   : > { %6731 = vrot.lane.b32.xlu1 %v6722_v24, %s17927_s18  ;;  %v19184_v24 = vpop.f32.mrf.mxu0 }
 0x7b6   : > { %6514 = vrot.lane.b32.xlu0 %v6501_v14, %s17926_s15  ;;  %21964 = vst [vmem:[#allocation15_spill] sm:$0xff] %v19184_v24  ;;  %v19186_v14 = vpop.f32.mrf.mxu1 }
 0x7b8   : > { %v19190_v27 = vpop.f32.mrf.mxu1  ;;  %v19227_v55 = vpop.permute.xlu1 %6143 }
 0x7b9   : > { %21965 = vst [vmem:[#allocation16_spill] sm:$0xff] %v19190_v27  ;;  %v1174_v27 = vadd.f32 %v19108_v9, %v958_v63  ;;  %v1601_v9 = vadd.f32 %v1525_v30, %v1387_v18  ;;  %21973 = vst [vmem:[#allocation24_spill] sm:$0xff] %v19227_v55 }
 0x7ba   : > { %6518 = vrot.lane.b32.xlu0 %v6509_v28, %s17926_s15  ;;  %v19188_v28 = vpop.f32.mrf.mxu0  ;;  %v19198_v22 = vpop.f32.mrf.mxu1 }
 0x7bb   : > { %v1389_v50 = vadd.f32 %v19130_v21, %v1174_v27  ;;  %v1815_v40 = vadd.f32 %v1739_v37, %v1601_v9  ;;  %v19243_v9 = vpop.permute.xlu0 %6141 }
 0x7bc   : > { %v19194_v62 = vpop.f32.mrf.mxu0  ;;  %v19206_v11 = vpop.f32.mrf.mxu1 }
 0x7bd   : > { %21966 = vst [vmem:[#allocation17_spill] sm:$0xff] %v19194_v62  ;;  %21968 = vst [vmem:[#allocation19_spill] sm:$0xff] %v19206_v11  ;;  %v1603_v60 = vadd.f32 %v1596_v61, %v1389_v50  ;;  %v2029_v29 = vadd.f32 %v1953_v42, %v1815_v40 }
 0x7be   : > { %v19203_v24 = vpop.f32.mrf.mxu0  ;;  %v19212_v62 = vpop.f32.mrf.mxu1 }
 0x7bf   : > { %v1817_v13 = vadd.f32 %v1810_v35, %v1603_v60  ;;  %v2243_v30 = vadd.f32 %v2167_v48, %v2029_v29 }
 0x7c0   : > { %v19209_v38 = vpop.f32.mrf.mxu0  ;;  %v19219_v7 = vpop.f32.mrf.mxu1 }
 0x7c1   : > { %21969 = vst [vmem:[#allocation20_spill] sm:$0xff] %v19209_v38  ;;  %21971 = vst [vmem:[#allocation22_spill] sm:$0xff] %v19219_v7  ;;  %v2031_v21 = vadd.f32 %v2024_v23, %v1817_v13  ;;  %v2459_v37 = vadd.f32 %v2383_v47, %v2243_v30 }
 0x7c2   : > { %v19217_v58 = vpop.f32.mrf.mxu0  ;;  %v19225_v63 = vpop.f32.mrf.mxu1 }
 0x7c3   : > { %v2245_v50 = vadd.f32 %v2238_v33, %v2031_v21  ;;  %v2674_v33 = vadd.f32 %v2598_v54, %v2459_v37 }
 0x7c4   : > { %v19223_v11 = vpop.f32.mrf.mxu0  ;;  %v19231_v27 = vpop.f32.mrf.mxu1 }
 0x7c5   : > { %21972 = vst [vmem:[#allocation23_spill] sm:$0xff] %v19223_v11  ;;  %21974 = vst [vmem:[#allocation25_spill] sm:$0xff] %v19231_v27  ;;  %v2461_v35 = vadd.f32 %v2454_v15, %v2245_v50  ;;  %v17683_v15 = vld [vmem:[%s21898_s0 + $0x10] sm:$0xf] }
 0x7c6   : > { %v19229_v38 = vpop.f32.mrf.mxu0  ;;  %v4113_v61 = vpop.f32.mrf.mxu1  ;;  %v6931_v54 = vrot.slane %v17683_v15, %v18005_v6 }
 0x7c7   : > { %v2676_v13 = vadd.f32 %v2669_v53, %v2461_v35  ;;  %v2890_v53 = vadd.f32 %v19172_v0, %v2674_v33 }
 0x7c8   : > { %v19233_v10 = vpop.f32.mrf.mxu0  ;;  %v19237_v18 = vpop.f32.mrf.mxu1 }
 0x7c9   : > { %v2892_v21 = vadd.f32 %v2885_v59, %v2676_v13 }
 0x7ca   : > { %v4042_v11 = vpop.f32.mrf.mxu0  ;;  %v4327_v23 = vpop.f32.mrf.mxu1 }
 0x7cb   : > { %v3108_v59 = vadd.f32 %v19178_v12, %v2892_v21  ;;  %v6718_v12 = vrot.slane %v19119_v16, %v18005_v6 }
 0x7cc   : > { %v19241_v55 = vpop.f32.mrf.mxu0  ;;  %v19247_v40 = vpop.f32.mrf.mxu1 }
 0x7cd   : > { %v3259_v0 = vadd.f32 %v19186_v14, %v3108_v59 }
 0x7ce   : > { %v4256_v42 = vpop.f32.mrf.mxu0 }
 0x7d0   : > { %v19257_v50 = vpop.f32.mrf.mxu0 }
 0x817   : > { %v19235_v7 = vpop.permute.xlu1 %6333 }
 0x818   : > { %21975 = vst [vmem:[#allocation26_spill] sm:$0xff] %v19235_v7  ;;  %v3106_v7 = vadd.f32 %v19180_v19, %v2890_v53  ;;  %v6726_v53 = vrot.slane %v19119_v16, %v18003_v5  ;;  %v6935_v16 = vrot.slane %v17683_v15, %v17999_v3 }
 0x819   : > { %v4470_v13 = vpop.f32.mrf.mxu0 }
 0x81a   : > { %v4541_v30 = vpop.f32.mrf.mxu1  ;;  %v3257_v21 = vadd.f32 %v19188_v28, %v3106_v7  ;;  %v6927_v7 = vrot.slane %v17683_v15, %v18001_v4 }
 0x81b   : > { %v19239_v60 = vpop.permute.xlu1 %6516  ;;  %v19275_v33 = vpop.f32.mrf.mxu0 }
 0x81f   : > { %v19245_v27 = vpop.permute.xlu1 %6520 }
 0x823   : > { %v19249_v48 = vpop.permute.xlu1 %6727 }
 0x824   : > { %21976 = vst [vmem:[#allocation27_spill] sm:$0xff] %v19249_v48  ;;  %v6743_v29 = vmul.f32 0.0, %v19249_v48  ;;  %v19255_v47 = vpop.permute.xlu0 %6165  ;;  %v19269_v48 = vpop.f32.mrf.mxu1 }
 0x825   : > { %21977 = vst [vmem:[#allocation28_spill] sm:$0xff] %v19255_v47  ;;  %v6939_v47 = vrot.slane %v17683_v15, %v18003_v5  ;;  %v4684_v14 = vpop.f32.mrf.mxu0 }
 0x826   : > { %6755 = vrot.lane.b32.xlu1 %v6743_v29, %s17929_s24  ;;  %v4755_v19 = vpop.f32.mrf.mxu1  ;;  %v3478_v29 = vadd.f32 %v19198_v22, %v3259_v0 }
 0x827   : > { %v19289_v28 = vpop.f32.mrf.mxu0 }
 0x828   : > { %v19263_v35 = vpop.permute.xlu0 %6514  ;;  %v19284_v59 = vpop.f32.mrf.mxu1 }
 0x829   : > { %v6530_v37 = vmul.f32 0.0, %v19263_v35 }
 0x82a   : > { %6942 = vrot.lane.b32.xlu1 %v6931_v54, %s17928_s21  ;;  %v3476_v54 = vadd.f32 %v19203_v24, %v3257_v21 }
 0x82b   : > { %6542 = vrot.lane.b32.xlu0 %v6530_v37, %s17930_s29  ;;  %v3692_v37 = vadd.f32 %v19212_v62, %v3478_v29  ;;  %v671_v29 = vadd.f32 %v19085_v56, %v19070_v49 }
 0x82c   : > { %v3690_v22 = vadd.f32 %v19217_v58, %v3476_v54 }
 0x82d   : > { %v3906_v0 = vadd.f32 %v19225_v63, %v3692_v37  ;;  %v4898_v24 = vpop.f32.mrf.mxu0  ;;  %v742_v37 = vadd.f32 %v19076_v46, %v19057_v36  ;;  %v957_v15 = vadd.f32 %v19106_v8, %v671_v29 }
 0x82e   : > { %6946 = vrot.lane.b32.xlu1 %v6939_v47, %s17928_s21  ;;  %v4969_v47 = vpop.f32.mrf.mxu1 }
 0x82f   : > { %6729 = vrot.lane.b32.xlu0 %v6718_v12, %s17927_s18  ;;  %v3904_v12 = vadd.f32 %v19229_v38, %v3690_v22  ;;  %v4120_v62 = vadd.f32 %v4113_v61, %v3906_v0  ;;  %v959_v0 = vadd.f32 %v19100_v1, %v742_v37 }
 0x830   : > { %v19296_v21 = vpop.f32.mrf.mxu1 }
 0x831   : > { %v4118_v58 = vadd.f32 %v4042_v11, %v3904_v12  ;;  %v4334_v63 = vadd.f32 %v4327_v23, %v4120_v62  ;;  %v1175_v23 = vadd.f32 %v19121_v17, %v959_v0 }
 0x833   : > { %6733 = vrot.lane.b32.xlu0 %v6726_v53, %s17927_s18  ;;  %v19301_v53 = vpop.f32.mrf.mxu0  ;;  %v4332_v38 = vadd.f32 %v4256_v42, %v4118_v58  ;;  %v4548_v61 = vadd.f32 %v4541_v30, %v4334_v63  ;;  %v1390_v30 = vadd.f32 %v19140_v25, %v1175_v23 }
 0x835   : > { %v4546_v56 = vadd.f32 %v4470_v13, %v4332_v38  ;;  %v4762_v12 = vadd.f32 %v4755_v19, %v4548_v61  ;;  %v1604_v19 = vadd.f32 %v19148_v32, %v1390_v30 }
 0x836   : > { %v5183_v54 = vpop.f32.mrf.mxu1 }
 0x837   : > { %6940 = vrot.lane.b32.xlu0 %v6927_v7, %s17928_s21  ;;  %v4760_v8 = vadd.f32 %v4684_v14, %v4546_v56  ;;  %v4976_v42 = vadd.f32 %v4969_v47, %v4762_v12  ;;  %v1818_v47 = vadd.f32 %v19152_v41, %v1604_v19  ;;  %v21982_v19 = vld [vmem:[#allocation12_spill] sm:$0xff] }
 0x838   : > { %v19306_v22 = vpop.f32.mrf.mxu1 }
 0x839   : > { %v5112_v7 = vpop.f32.mrf.mxu0  ;;  %v5190_v13 = vadd.f32 %v5183_v54, %v4976_v42  ;;  %v2032_v54 = vadd.f32 %v19156_v45, %v1818_v47  ;;  %v21979_v42 = vld [vmem:[#allocation11_spill] sm:$0xff] }
 0x83b   : > { %6944 = vrot.lane.b32.xlu0 %v6935_v16, %s17928_s21  ;;  %v1173_v16 = vadd.f32 %v19128_v20, %v957_v15  ;;  %v19310_v49 = vpop.f32.mrf.mxu0  ;;  %v4974_v20 = vadd.f32 %v4898_v24, %v4760_v8 }
 0x83d   : > { %v1388_v36 = vadd.f32 %v19142_v26, %v1173_v16  ;;  %v5188_v26 = vadd.f32 %v5112_v7, %v4974_v20  ;;  %v2246_v16 = vadd.f32 %v19160_v34, %v2032_v54  ;;  %v21986_v54 = vld [vmem:[#allocation17_spill] sm:$0xff] }
 0x83f   : > { %v1602_v1 = vadd.f32 %v19150_v31, %v1388_v36  ;;  %v2462_v23 = vadd.f32 %v19164_v51, %v2246_v16 }
 0x841   : > { %v5326_v46 = vpop.f32.mrf.mxu0  ;;  %v1816_v17 = vadd.f32 %v19154_v39, %v1602_v1  ;;  %v2677_v30 = vadd.f32 %v21979_v42, %v2462_v23  ;;  %v21980_v1 = vld [vmem:[#allocation13_spill] sm:$0xff]  ;;  %v21989_v23 = vld [vmem:[#allocation19_spill] sm:$0xff]  ;;  %v21991_v42 = vld [vmem:[#allocation22_spill] sm:$0xff] }
 0x842   : > { %v5397_v11 = vpop.f32.mrf.mxu1  ;;  %v5402_v31 = vadd.f32 %v5326_v46, %v5188_v26  ;;  %v21978_v46 = vld [vmem:[#allocation8_spill] sm:$0xff] }
 0x843   : > { %v19318_v29 = vpop.f32.mrf.mxu0  ;;  %v5404_v14 = vadd.f32 %v5397_v11, %v5190_v13  ;;  %v2030_v25 = vadd.f32 %v19158_v44, %v1816_v17  ;;  %v21981_v13 = vld [vmem:[#allocation10_spill] sm:$0xff]  ;;  %v21983_v17 = vld [vmem:[#allocation15_spill] sm:$0xff] }
 0x844   : > { %v19314_v62 = vpop.f32.mrf.mxu1  ;;  %v6145_v51 = vsel %vm389_vm0, %v21981_v13, %v19221_v2 }
 0x845   : > { %v2244_v32 = vadd.f32 %v19162_v43, %v2030_v25  ;;  %v21984_v25 = vld [vmem:[#allocation24_spill] sm:$0xff] }
 0x847   : > { %v2460_v41 = vadd.f32 %v19166_v52, %v2244_v32 }
 0x849   : > { %v2675_v36 = vadd.f32 %v19170_v57, %v2460_v41  ;;  %v2893_v57 = vadd.f32 %v21982_v19, %v2677_v30  ;;  %v21988_v41 = vld [vmem:[#allocation20_spill] sm:$0xff] }
 0x84a   : > { %v5611_v58 = vpop.f32.mrf.mxu1 }
 0x84b   : > { %v5618_v24 = vadd.f32 %v5611_v58, %v5404_v14  ;;  %v2891_v20 = vadd.f32 %v21980_v1, %v2675_v36 }
 0x84c   : > { %v19322_v37 = vpop.f32.mrf.mxu1 }
 0x84d   : > { %v5540_v63 = vpop.f32.mrf.mxu0 }
 0x84e   : > { %v5616_v39 = vadd.f32 %v5540_v63, %v5402_v31  ;;  %v3107_v63 = vadd.f32 %v21983_v17, %v2891_v20  ;;  %v6147_v31 = vsel %vm389_vm0, %v19243_v9, %v21984_v25  ;;  %v21992_v20 = vld [vmem:[#allocation25_spill] sm:$0xff] }
 0x84f   : > { %v19326_v15 = vpop.f32.mrf.mxu0 }
 0x850   : > { %v3258_v32 = vadd.f32 %v21986_v54, %v3107_v63 }
 0x855   : > { %v5754_v61 = vpop.f32.mrf.mxu0 }
 0x856   : > { %v5825_v38 = vpop.f32.mrf.mxu1  ;;  %v5830_v44 = vadd.f32 %v5754_v61, %v5616_v39  ;;  %v6522_v39 = vsel %vm771_vm2, %v19263_v35, %v19239_v60 }
 0x857   : > { %v5832_v7 = vadd.f32 %v5825_v38, %v5618_v24  ;;  %v5756_v56 = vpop.f32.mrf.mxu0  ;;  %v21985_v38 = vld [vmem:[#allocation14_spill] sm:$0xff] }
 0x858   : > { %v19330_v0 = vpop.f32.mrf.mxu1  ;;  %v3109_v24 = vadd.f32 %v21985_v38, %v2893_v57 }
 0x85e   : > { %v6039_v11 = vpop.f32.mrf.mxu1 }
 0x85f   : > { %v6046_v12 = vadd.f32 %v6039_v11, %v5832_v7  ;;  %v21987_v7 = vld [vmem:[#allocation16_spill] sm:$0xff] }
 0x860   : > { %v3260_v16 = vadd.f32 %v21987_v7, %v3109_v24  ;;  %v6041_v24 = vpop.f32.mrf.mxu1 }
 0x861   : > { %v5968_v45 = vpop.f32.mrf.mxu0  ;;  %v6056_v43 = vadd.f32 %v21978_v46, %v6046_v12  ;;  %v19364_v12 = vpop.permute.xlu0 %6518 }
 0x862   : > { %v6044_v8 = vadd.f32 %v5968_v45, %v5830_v44  ;;  %v3477_v44 = vadd.f32 %v21988_v41, %v3258_v32  ;;  %v3479_v36 = vadd.f32 %v21989_v23, %v3260_v16  ;;  %v21990_v45 = vld [vmem:[#allocation23_spill] sm:$0xff]  ;;  %v21993_v41 = vld [vmem:[#allocation18_spill] sm:$0xff] }
 0x863   : > { %v6064_v58 = vmul.f32 0.2, %v6056_v43  ;;  %vm6060_vm7 = vcmp.gt.f32.partialorder %v6056_v43, 0.0  ;;  %v5970_v38 = vpop.f32.mrf.mxu0 }
 0x864   : > { %v6054_v34 = vadd.f32 %v21978_v46, %v6044_v8  ;;  %v6524_v8 = vsel %vm771_vm2, %v19364_v12, %v19245_v27  ;;  %v3693_v30 = vadd.f32 %v21991_v42, %v3479_v36 }
 0x865   : > { %v19348_v47 = vsel %vm6060_vm7, %v6056_v43, %v6064_v58  ;;  %v3691_v43 = vadd.f32 %v21990_v45, %v3477_v44  ;;  %v21994_v44 = vld [vmem:[#allocation7_spill] sm:$0xff] }
 0x866   : > { %vm6058_vm13 = vcmp.gt.f32.partialorder %v6054_v34, 0.0  ;;  %v6062_v52 = vmul.f32 0.2, %v6054_v34  ;;  %v6156_v61 = vmul.f32 %v6147_v31, %v19348_v47  ;;  %v6533_v35 = vmul.f32 %v6524_v8, %v19348_v47  ;;  %v21996_v8 = vld [vmem:[#allocation21_spill] sm:$0xff] }
 0x867   : > { %v3905_v1 = vadd.f32 %v19233_v10, %v3691_v43 }
 0x868   : > { %v19345_v26 = vsel %vm6058_vm13, %v6054_v34, %v6062_v52  ;;  %v3907_v34 = vadd.f32 %v21992_v20, %v3693_v30  ;;  %v21997_v30 = vld [vmem:[#allocation27_spill] sm:$0xff]  ;;  %vm21998_vm13 = vcmask 588800  }
 0x869   : > { %v6154_v14 = vmul.f32 %v6145_v51, %v19345_v26  ;;  %v6531_v11 = vmul.f32 %v6522_v39, %v19345_v26  ;;  %v4119_v58 = vadd.f32 %v19241_v55, %v3905_v1  ;;  %vm22000_vm7 = vmmov %vm21998_vm13 }
 0x86a   : > { %v4121_v52 = vadd.f32 %v19237_v18, %v3907_v34 }
 0x86b   : > { %6167 = vrot.lane.b32.xlu1 %v6154_v14, %s17931_s11  ;;  %v4333_v13 = vadd.f32 %v19257_v50, %v4119_v58 }
 0x86c   : > { %v4335_v51 = vadd.f32 %v19247_v40, %v4121_v52 }
 0x86d   : > { %v4547_v19 = vadd.f32 %v19275_v33, %v4333_v13 }
 0x86e   : > { %v4549_v57 = vadd.f32 %v19269_v48, %v4335_v51 }
 0x86f   : > { %6171 = vrot.lane.b32.xlu1 %v6156_v61, %s17931_s11  ;;  %v4761_v17 = vadd.f32 %v19289_v28, %v4547_v19  ;;  %v6732_v28 = vpop.permute.xlu1 %6731 }
 0x870   : > { %v4763_v63 = vadd.f32 %v19284_v59, %v4549_v57 }
 0x871   : > { %v4975_v10 = vadd.f32 %v19301_v53, %v4761_v17 }
 0x872   : > { %v4977_v14 = vadd.f32 %v19296_v21, %v4763_v63 }
 0x873   : > { %6544 = vrot.lane.b32.xlu1 %v6531_v11, %s17930_s29  ;;  %v5189_v55 = vadd.f32 %v19310_v49, %v4975_v10  ;;  %v6105_v11 = vsel %vm347_vm1, %v21994_v44, %v21993_v41  ;;  %v6146_v10 = vsel %vm389_vm0, %v19221_v2, %v19243_v9  ;;  %v6523_v2 = vsel %vm771_vm2, %v19239_v60, %v19364_v12 }
 0x874   : > { %v5191_v18 = vadd.f32 %v19306_v22, %v4977_v14  ;;  %v6114_v36 = vmul.f32 %v6105_v11, %v19345_v26 }
 0x875   : > { %v5403_v50 = vadd.f32 %v19318_v29, %v5189_v55  ;;  %v17687_v55 = vld [vmem:[%s21898_s0 + $0x14] sm:$0xf] }
 0x876   : > { %v5405_v40 = vadd.f32 %v19314_v62, %v5191_v18  ;;  %v7148_v9 = vrot.slane %v17687_v55, %v17999_v3  ;;  %v7144_v12 = vrot.slane %v17687_v55, %v18005_v6 }
 0x877   : > { %6548 = vrot.lane.b32.xlu1 %v6533_v35, %s17930_s29  ;;  %v5617_v33 = vadd.f32 %v19326_v15, %v5403_v50  ;;  %v7140_v50 = vrot.slane %v17687_v55, %v18001_v4 }
 0x878   : > { %v5619_v48 = vadd.f32 %v19322_v37, %v5405_v40 }
 0x879   : > { %v5831_v31 = vadd.f32 %v5756_v56, %v5617_v33 }
 0x87a   : > { %v5833_v53 = vadd.f32 %v19330_v0, %v5619_v48 }
 0x87b   : > { %v6045_v21 = vadd.f32 %v5970_v38, %v5831_v31 }
 0x87c   : > { %v6047_v22 = vadd.f32 %v6041_v24, %v5833_v53 }
 0x87d   : > { %v6055_v29 = vadd.f32 %v21978_v46, %v6045_v21 }
 0x87e   : > { %v6057_v15 = vadd.f32 %v21978_v46, %v6047_v22  ;;  %v21995_v46 = vld [vmem:[#allocation9_spill] sm:$0xff] }
 0x87f   : > { %v6063_v32 = vmul.f32 0.2, %v6055_v29  ;;  %vm6059_vm14 = vcmp.gt.f32.partialorder %v6055_v29, 0.0  ;;  %v6106_v23 = vsel %vm347_vm1, %v21993_v41, %v21995_v46  ;;  %v6107_v35 = vsel %vm347_vm1, %v21995_v46, %v21996_v8  ;;  %v21999_v41 = vld [vmem:[#allocation28_spill] sm:$0xff] }
 0x880   : > { %v6065_v7 = vmul.f32 0.2, %v6057_v15  ;;  %vm6061_vm15 = vcmp.gt.f32.partialorder %v6057_v15, 0.0  ;;  %v6116_v42 = vmul.f32 %v6107_v35, %v19348_v47 }
 0x881   : > { %v19402_v16 = vsel %vm6059_vm14, %v6055_v29, %v6063_v32  ;;  %vm22002_vm14 = vmmov %vm22000_vm7 }
 0x882   : > { %v6115_v45 = vmul.f32 %v6106_v23, %v19402_v16  ;;  %v19414_v43 = vsel %vm6061_vm15, %v6057_v15, %v6065_v7  ;;  %v6155_v14 = vmul.f32 %v6146_v10, %v19402_v16  ;;  %v6532_v33 = vmul.f32 %v6523_v2, %v19402_v16  ;;  %v22001_v23 = vld [vmem:[#allocation26_spill] sm:$0xff]  ;;  %vm22004_vm15 = vmmov %vm22000_vm7  ;;  %v17684_v2 = vld [vmem:[%s21902_s4 + $0x20] sm:$0xff] }
 0x883   : > { %v6117_v20 = vmul.f32 %v21996_v8, %v19414_v43  ;;  %v6157_v40 = vmul.f32 %v21984_v25, %v19414_v43  ;;  %v6534_v48 = vmul.f32 %v19245_v27, %v19414_v43  ;;  %v22003_v8 = vmov 0.0   ;;  %v17680_v10 = vld [vmem:[%s21902_s4 + $0x18] sm:$0xff] }
 0x898   : > { %v19396_v54 = vpop.permute.xlu1 %6755 }
 0x89c   : > { %v6943_v37 = vpop.permute.xlu1 %6942 }
 0x89d   : > { %v19393_v59 = vpop.permute.xlu0 %6542 }
 0x8a0   : > { %v6947_v57 = vpop.permute.xlu1 %6946 }
 0x8a1   : > { %v6730_v49 = vpop.permute.xlu0 %6729  ;;  %v6960_v60 = vmul.f32 %v6947_v57, %v19414_v43 }
 0x8a2   : > { %v6735_v1 = vsel %vm987_vm3, %v21997_v30, %v6730_v49  ;;  %v6736_v34 = vsel %vm987_vm3, %v6730_v49, %v6732_v28 }
 0x8a3   : > { %v6744_v58 = vmul.f32 %v6735_v1, %v19345_v26  ;;  %v6745_v52 = vmul.f32 %v6736_v34, %v19402_v16 }
 0x8a5   : > { %v6734_v62 = vpop.permute.xlu0 %6733 }
 0x8a6   : > { %v6737_v13 = vsel %vm987_vm3, %v6732_v28, %v6734_v62  ;;  %v6747_v17 = vmul.f32 %v6734_v62, %v19414_v43  ;;  %v7152_v28 = vrot.slane %v17687_v55, %v18003_v5 }
 0x8a7   : > { %v6746_v19 = vmul.f32 %v6737_v13, %v19348_v47  ;;  %v17676_v13 = vld [vmem:[%s21902_s4 + $0x10] sm:$0xff] }
 0x8a9   : > { %v6941_v56 = vpop.permute.xlu0 %6940 }
 0x8aa   : > { %v6948_v61 = vsel %vm1203_vm4, %v6941_v56, %v6943_v37  ;;  %v6956_v39 = vmul.f32 0.0, %v6941_v56 }
 0x8ab   : > { %v6957_v0 = vmul.f32 %v6948_v61, %v19345_v26 }
 0x8ac   : > { %6968 = vrot.lane.b32.xlu0 %v6956_v39, %s17928_s21 }
 0x8ad   : > { %6970 = vrot.lane.b32.xlu1 %v6957_v0, %s17928_s21  ;;  %v6945_v51 = vpop.permute.xlu0 %6944  ;;  %v17670_v0 = vld [vmem:[%s21902_s4 + $0x8] sm:$0xff] }
 0x8ae   : > { %v6950_v63 = vsel %vm1203_vm4, %v6945_v51, %v6947_v57  ;;  %v6949_v25 = vsel %vm1203_vm4, %v6943_v37, %v6945_v51 }
 0x8af   : > { %v6959_v18 = vmul.f32 %v6950_v63, %v19348_v47  ;;  %v6958_v31 = vmul.f32 %v6949_v25, %v19402_v16 }
 0x8b0   : > { %6335 = vrot.lane.b32.xlu0 %v6114_v36, %s17932_s19 }
 0x8b1   : > { %6337 = vrot.lane.b32.xlu1 %v6115_v45, %s17932_s19 }
 0x8b4   : > { %6339 = vrot.lane.b32.xlu0 %v6116_v42, %s17932_s19  ;;  %v6118_v42 = vld [vmem:[%s21902_s4] sm:$0xff] }
 0x8b5   : > { %6341 = vrot.lane.b32.xlu1 %v6117_v20, %s17932_s19 }
 0x8b8   : > { %6757 = vrot.lane.b32.xlu0 %v6744_v58, %s17929_s24 }
 0x8b9   : > { %6759 = vrot.lane.b32.xlu1 %v6745_v52, %s17929_s24 }
 0x8bc   : > { %6761 = vrot.lane.b32.xlu0 %v6746_v19, %s17929_s24 }
 0x8bd   : > { %6763 = vrot.lane.b32.xlu1 %v6747_v17, %s17929_s24 }
 0x8c0   : > { %6169 = vrot.lane.b32.xlu0 %v6155_v14, %s17931_s11 }
 0x8c1   : > { %6974 = vrot.lane.b32.xlu1 %v6959_v18, %s17928_s21 }
 0x8c4   : > { %6173 = vrot.lane.b32.xlu0 %v6157_v40, %s17931_s11 }
 0x8c5   : > { %7153 = vrot.lane.b32.xlu1 %v7140_v50, %s17929_s24 }
 0x8c8   : > { %6546 = vrot.lane.b32.xlu0 %v6532_v33, %s17930_s29 }
 0x8c9   : > { %7157 = vrot.lane.b32.xlu1 %v7148_v9, %s17929_s24 }
 0x8cc   : > { %6550 = vrot.lane.b32.xlu0 %v6534_v48, %s17930_s29 }
 0x8d0   : > { %6972 = vrot.lane.b32.xlu0 %v6958_v31, %s17928_s21 }
 0x8d4   : > { %6976 = vrot.lane.b32.xlu0 %v6960_v60, %s17928_s21 }
 0x8d8   : > { %7155 = vrot.lane.b32.xlu0 %v7144_v12, %s17929_s24 }
 0x8dc   : > { %7159 = vrot.lane.b32.xlu0 %v7152_v28, %s17929_s24 }
 0x8dd   : > { %v6168_v27 = vpop.permute.xlu1 %6167 }
 0x8de   : > { %v6175_v44 = vsel %vm22000_vm7, %v21999_v41, %v6168_v27  ;;  %v17688_v41 = vld [vmem:[%s21902_s4 + $0x28] sm:$0xff] }
 0x8e1   : > { %v6172_v38 = vpop.permute.xlu1 %6171 }
 0x8e5   : > { %v6545_v53 = vpop.permute.xlu1 %6544 }
 0x8e6   : > { %v6552_v52 = vsel %vm802_vm6, %v19393_v59, %v6545_v53 }
 0x8e9   : > { %v6549_v21 = vpop.permute.xlu1 %6548 }
 0x91e   : > { %v19473_v24 = vpop.permute.xlu0 %6968 }
 0x91f   : > { %v19475_v49 = vpop.permute.xlu1 %6970 }
 0x920   : > { %v6978_v40 = vsel %vm1203_vm4, %v19473_v24, %v19475_v49  ;;  %v17691_v24 = vld [vmem:[%s21898_s0 + $0x18] sm:$0xf] }
 0x922   : > { %v6336_v22 = vpop.permute.xlu0 %6335 }
 0x923   : > { %v6338_v29 = vpop.permute.xlu1 %6337  ;;  %v6343_v36 = vsel %vm590_vm9, %v22001_v23, %v6336_v22 }
 0x924   : > { %v6344_v11 = vsel %vm590_vm9, %v6336_v22, %v6338_v29  ;;  %v7357_v22 = vrot.slane %v17691_v24, %v18005_v6 }
 0x926   : > { %v6340_v62 = vpop.permute.xlu0 %6339 }
 0x927   : > { %v6342_v15 = vpop.permute.xlu1 %6341  ;;  %v6345_v34 = vsel %vm590_vm9, %v6338_v29, %v6340_v62  ;;  %v7353_v29 = vrot.slane %v17691_v24, %v18001_v4 }
 0x928   : > { %v6346_v30 = vsel %vm590_vm9, %v6340_v62, %v6342_v15  ;;  %v7365_v62 = vrot.slane %v17691_v24, %v18003_v5  ;;  %v7361_v15 = vrot.slane %v17691_v24, %v17999_v3 }
 0x92a   : > { %v6758_v32 = vpop.permute.xlu0 %6757 }
 0x92b   : > { %v6760_v37 = vpop.permute.xlu1 %6759  ;;  %v6765_v59 = vsel %vm1018_vm5, %v19396_v54, %v6758_v32 }
 0x92c   : > { %v6766_v51 = vsel %vm1018_vm5, %v6758_v32, %v6760_v37 }
 0x92e   : > { %v6762_v56 = vpop.permute.xlu0 %6761 }
 0x92f   : > { %v6764_v7 = vpop.permute.xlu1 %6763  ;;  %v6767_v18 = vsel %vm1018_vm5, %v6760_v37, %v6762_v56 }
 0x930   : > { %v6768_v14 = vsel %vm1018_vm5, %v6762_v56, %v6764_v7 }
 0x932   : > { %v6170_v61 = vpop.permute.xlu0 %6169 }
 0x933   : > { %v6176_v39 = vsel %vm21998_vm13, %v6168_v27, %v6170_v61  ;;  %v6177_v35 = vsel %vm22004_vm15, %v6170_v61, %v6172_v38  ;;  %v6975_v1 = vpop.permute.xlu1 %6974  ;;  %vm22005_vm13 = vmmov %vm22000_vm7  ;;  %vm22010_vm15 = vcmask 990208  }
 0x934   : > { %6216 = vmatprep.subr.mxu0 %v6176_v39 }
 0x935   : > { %6217 = vmatpush1.msra.mxu0 %v6175_v44 }
 0x936   : > { %6384 = vmatprep.subr.mxu0 %v6344_v11  ;;  %v6174_v46 = vpop.permute.xlu0 %6173  ;;  %17671 = vmatmul.mubr.msk.f32.vlgmr.msra.gmra.mxu0 %vm429_vm8, %v17670_v0 }
 0x937   : > { %6385 = vmatpush1.msra.mxu0 %v6343_v36  ;;  %v6178_v45 = vsel %vm22002_vm14, %v6172_v38, %v6174_v46  ;;  %6418 = vmatprep.mubr.f32.mxu0 %v22003_v8  ;;  %v7154_v57 = vpop.permute.xlu1 %7153  ;;  %vm22006_vm14 = vmmov %vm22000_vm7 }
 0x938   : > { %6287 = vmatprep.subr.mxu1 %v6178_v45  ;;  %v7169_v55 = vmul.f32 0.0, %v7154_v57 }
 0x939   : > { %6288 = vmatpush1.msra.mxu1 %v6177_v35 }
 0x93a   : > { %6455 = vmatprep.subr.mxu1 %v6346_v30  ;;  %v6547_v20 = vpop.permute.xlu0 %6546  ;;  %17672 = vmatmul.mubr.msk.f32.vlgmr.msra.gmra.mxu1 %vm429_vm8, %v17670_v0 }
 0x93b   : > { %17673 = vmatmul.mubr.msk.f32.vlgmr.msra.gmra.mxu0 %vm429_vm8, %v6118_v42  ;;  %6456 = vmatpush1.msra.mxu1 %v6345_v34  ;;  %v6553_v58 = vsel %vm802_vm6, %v6545_v53, %v6547_v20  ;;  %v6554_v63 = vsel %vm802_vm6, %v6547_v20, %v6549_v21  ;;  %v7158_v25 = vpop.permute.xlu1 %7157  ;;  %v17695_v34 = vld [vmem:[%s21898_s0 + $0x1c] sm:$0xf] }
 0x93c   : > { %6593 = vmatprep.subr.mxu0 %v6553_v58  ;;  %6489 = vmatprep.mubr.f32.mxu1 %v22003_v8 }
 0x93d   : > { %6594 = vmatpush1.msra.mxu0 %v6552_v52  ;;  %6627 = vmatprep.mubr.f32.mxu0 %v22003_v8 }
 0x93e   : > { %6806 = vmatprep.subr.mxu0 %v6766_v51  ;;  %v6551_v19 = vpop.permute.xlu0 %6550  ;;  %17674 = vmatmul.mubr.msk.f32.vlgmr.msra.gmra.mxu1 %vm429_vm8, %v6118_v42 }
 0x93f   : > { %17677 = vmatmul.mubr.msk.f32.vlgmr.msra.gmra.mxu0 %vm429_vm8, %v17676_v13  ;;  %v6555_v17 = vsel %vm802_vm6, %v6549_v21, %v6551_v19  ;;  %6698 = vmatprep.mubr.f32.mxu1 %v22003_v8  ;;  %v7574_v19 = vrot.slane %v17695_v34, %v17999_v3 }
 0x940   : > { %6807 = vmatpush1.msra.mxu0 %v6765_v59  ;;  %6664 = vmatprep.subr.mxu1 %v6555_v17  ;;  %v7578_v59 = vrot.slane %v17695_v34, %v18003_v5 }
 0x941   : > { %6665 = vmatpush1.msra.mxu1 %v6554_v63  ;;  %6840 = vmatprep.mubr.f32.mxu0 %v22003_v8 }
 0x942   : > { %6877 = vmatprep.subr.mxu1 %v6768_v14  ;;  %v6973_v54 = vpop.permute.xlu0 %6972  ;;  %17678 = vmatmul.mubr.msk.f32.vlgmr.msra.gmra.mxu1 %vm429_vm8, %v17676_v13  ;;  %v7566_v13 = vrot.slane %v17695_v34, %v18001_v4 }
 0x943   : > { %6878 = vmatpush1.msra.mxu1 %v6767_v18  ;;  %v6979_v50 = vsel %vm1203_vm4, %v19475_v49, %v6973_v54  ;;  %17681 = vmatmul.mubr.msk.f32.vlgmr.msra.gmra.mxu0 %vm429_vm8, %v17680_v10  ;;  %v6980_v48 = vsel %vm1203_vm4, %v6973_v54, %v6975_v1  ;;  %v17692_v54 = vld [vmem:[%s21902_s4 + $0x30] sm:$0xff] }
 0x944   : > { %7019 = vmatprep.subr.mxu0 %v6979_v50  ;;  %6911 = vmatprep.mubr.f32.mxu1 %v22003_v8 }
 0x945   : > { %7020 = vmatpush1.msra.mxu0 %v6978_v40  ;;  %7181 = vrot.lane.b32.xlu1 %v7169_v55, %s17927_s18 }
 0x946   : > { %v6977_v9 = vpop.permute.xlu0 %6976  ;;  %17682 = vmatmul.mubr.msk.f32.vlgmr.msra.gmra.mxu1 %vm429_vm8, %v17680_v10  ;;  %7053 = vmatprep.mubr.f32.mxu0 %v22003_v8 }
 0x947   : > { %v6981_v33 = vsel %vm1203_vm4, %v6975_v1, %v6977_v9  ;;  %17685 = vmatmul.mubr.msk.f32.vlgmr.msra.gmra.mxu0 %vm429_vm8, %v17684_v2  ;;  %7124 = vmatprep.mubr.f32.mxu1 %v22003_v8 }
 0x948   : > { %7090 = vmatprep.subr.mxu1 %v6981_v33  ;;  %7266 = vmatprep.mubr.f32.mxu0 %v22003_v8 }
 0x949   : > { %7091 = vmatpush1.msra.mxu1 %v6980_v48 }
 0x94a   : > { %v7156_v31 = vpop.permute.xlu0 %7155  ;;  %17686 = vmatmul.mubr.msk.f32.vlgmr.msra.gmra.mxu1 %vm429_vm8, %v17684_v2 }
 0x94b   : > { %v7161_v60 = vsel %vm1018_vm5, %v7154_v57, %v7156_v31  ;;  %v7162_v12 = vsel %vm1018_vm5, %v7156_v31, %v7158_v25  ;;  %7337 = vmatprep.mubr.f32.mxu1 %v22003_v8  ;;  %v7570_v57 = vrot.slane %v17695_v34, %v18005_v6 }
 0x94c   : > { %v7170_v28 = vmul.f32 %v7161_v60, %v19345_v26  ;;  %v7171_v27 = vmul.f32 %v7162_v12, %v19402_v16 }
 0x94e   : > { %7185 = vrot.lane.b32.xlu1 %v7171_v27, %s17927_s18  ;;  %7183 = vrot.lane.b32.xlu0 %v7170_v28, %s17927_s18  ;;  %v7160_v38 = vpop.permute.xlu0 %7159 }
 0x94f   : > { %v7163_v53 = vsel %vm1018_vm5, %v7158_v25, %v7160_v38  ;;  %v7173_v21 = vmul.f32 %v7160_v38, %v19414_v43 }
 0x950   : > { %v7172_v49 = vmul.f32 %v7163_v53, %v19348_v47 }
 0x952   : > { %7189 = vrot.lane.b32.xlu1 %v7173_v21, %s17927_s18  ;;  %7187 = vrot.lane.b32.xlu0 %v7172_v49, %s17927_s18  ;;  %v17699_v21 = vld [vmem:[%s21898_s0 + $0x20] sm:$0xf] }
 0x953   : > { %v7783_v49 = vrot.slane %v17699_v21, %v18005_v6 }
 0x956   : > { %7368 = vrot.lane.b32.xlu1 %v7357_v22, %s17930_s29  ;;  %7366 = vrot.lane.b32.xlu0 %v7353_v29, %s17930_s29  ;;  %v7779_v22 = vrot.slane %v17699_v21, %v18001_v4  ;;  %v7791_v29 = vrot.slane %v17699_v21, %v18003_v5 }
 0x95a   : > { %7372 = vrot.lane.b32.xlu1 %v7365_v62, %s17930_s29  ;;  %7370 = vrot.lane.b32.xlu0 %v7361_v15, %s17930_s29  ;;  %v7787_v62 = vrot.slane %v17699_v21, %v17999_v3 }
 0x9b7   : > { %v7182_v32 = vpop.permute.xlu1 %7181 }
 0x9c0   : > { %v7186_v37 = vpop.permute.xlu1 %7185  ;;  %v7184_v56 = vpop.permute.xlu0 %7183 }
 0x9c1   : > { %v7192_v61 = vsel %vm987_vm3, %v7184_v56, %v7186_v37  ;;  %v7191_v39 = vsel %vm987_vm3, %v7182_v32, %v7184_v56 }
 0x9c2   : > { %7232 = vmatprep.subr.mxu0 %v7192_v61 }
 0x9c3   : > { %7233 = vmatpush1.msra.mxu0 %v7191_v39 }
 0x9c4   : > { %v7190_v0 = vpop.permute.xlu1 %7189  ;;  %v7188_v7 = vpop.permute.xlu0 %7187  ;;  %17689 = vmatmul.mubr.msk.f32.vlgmr.msra.gmra.mxu0 %vm429_vm8, %v17688_v41 }
 0x9c5   : > { %v7194_v44 = vsel %vm987_vm3, %v7188_v7, %v7190_v0  ;;  %v7193_v11 = vsel %vm987_vm3, %v7186_v37, %v7188_v7  ;;  %7479 = vmatprep.mubr.f32.mxu0 %v22003_v8  ;;  %v17696_v7 = vld [vmem:[%s21902_s4 + $0x38] sm:$0xff] }
 0x9c6   : > { %7303 = vmatprep.subr.mxu1 %v7194_v44 }
 0x9c7   : > { %7304 = vmatpush1.msra.mxu1 %v7193_v11 }
 0x9c8   : > { %v7369_v46 = vpop.permute.xlu1 %7368  ;;  %v7367_v23 = vpop.permute.xlu0 %7366  ;;  %17690 = vmatmul.mubr.msk.f32.vlgmr.msra.gmra.mxu1 %vm429_vm8, %v17688_v41 }
 0x9c9   : > { %v7374_v36 = vsel %vm802_vm6, %v7367_v23, %v7369_v46  ;;  %v7382_v45 = vmul.f32 0.0, %v7367_v23  ;;  %7550 = vmatprep.mubr.f32.mxu1 %v22003_v8 }
 0x9ca   : > { %v7383_v35 = vmul.f32 %v7374_v36, %v19345_v26 }
 0x9cb   : > { %7394 = vrot.lane.b32.xlu0 %v7382_v45, %s17926_s15 }
 0x9cc   : > { %v7373_v42 = vpop.permute.xlu1 %7372  ;;  %7396 = vrot.lane.b32.xlu1 %v7383_v35, %s17926_s15  ;;  %v7371_v30 = vpop.permute.xlu0 %7370 }
 0x9cd   : > { %v7375_v1 = vsel %vm802_vm6, %v7369_v46, %v7371_v30  ;;  %v7376_v20 = vsel %vm802_vm6, %v7371_v30, %v7373_v42  ;;  %v7386_v51 = vmul.f32 %v7373_v42, %v19414_v43 }
 0x9ce   : > { %v7384_v58 = vmul.f32 %v7375_v1, %v19402_v16  ;;  %v7385_v52 = vmul.f32 %v7376_v20, %v19348_v47  ;;  %v17703_v20 = vld [vmem:[%s21898_s0 + $0x24] sm:$0xf] }
 0x9d0   : > { %7400 = vrot.lane.b32.xlu1 %v7385_v52, %s17926_s15  ;;  %7398 = vrot.lane.b32.xlu0 %v7384_v58, %s17926_s15  ;;  %v7992_v52 = vrot.slane %v17703_v20, %v18001_v4 }
 0x9d4   : > { %7579 = vrot.lane.b32.xlu1 %v7566_v13, %s17931_s11  ;;  %7402 = vrot.lane.b32.xlu0 %v7386_v51, %s17926_s15  ;;  %v8000_v51 = vrot.slane %v17703_v20, %v17999_v3 }
 0x9d8   : > { %7583 = vrot.lane.b32.xlu1 %v7574_v19, %s17931_s11  ;;  %7581 = vrot.lane.b32.xlu0 %v7570_v57, %s17931_s11  ;;  %v7996_v19 = vrot.slane %v17703_v20, %v18005_v6  ;;  %v8004_v57 = vrot.slane %v17703_v20, %v18003_v5 }
 0x9dc   : > { %7585 = vrot.lane.b32.xlu0 %v7578_v59, %s17931_s11 }
 0xa3d   : > { %v7395_v17 = vpop.permute.xlu0 %7394 }
 0xa3e   : > { %v7397_v63 = vpop.permute.xlu1 %7396 }
 0xa3f   : > { %v7404_v18 = vsel %vm771_vm2, %v7395_v17, %v7397_v63 }
 0xa42   : > { %v7401_v10 = vpop.permute.xlu1 %7400  ;;  %v7399_v14 = vpop.permute.xlu0 %7398 }
 0xa43   : > { %v7405_v55 = vsel %vm771_vm2, %v7397_v63, %v7399_v14  ;;  %v7406_v33 = vsel %vm771_vm2, %v7399_v14, %v7401_v10 }
 0xa44   : > { %7445 = vmatprep.subr.mxu0 %v7405_v55  ;;  %v17700_v55 = vld [vmem:[%s21902_s4 + $0x40] sm:$0xff] }
 0xa45   : > { %7446 = vmatpush1.msra.mxu0 %v7404_v18 }
 0xa46   : > { %v7580_v50 = vpop.permute.xlu1 %7579  ;;  %v7403_v40 = vpop.permute.xlu0 %7402  ;;  %17693 = vmatmul.mubr.msk.f32.vlgmr.msra.gmra.mxu0 %vm429_vm8, %v17692_v54 }
 0xa47   : > { %v7595_v2 = vmul.f32 0.0, %v7580_v50  ;;  %v7407_v9 = vsel %vm771_vm2, %v7401_v10, %v7403_v40  ;;  %7692 = vmatprep.mubr.f32.mxu0 %v22003_v8 }
 0xa48   : > { %7516 = vmatprep.subr.mxu1 %v7407_v9 }
 0xa49   : > { %7607 = vrot.lane.b32.xlu1 %v7595_v2, %s17925_s12  ;;  %7517 = vmatpush1.msra.mxu1 %v7406_v33 }
 0xa4a   : > { %v7584_v48 = vpop.permute.xlu1 %7583  ;;  %v7582_v25 = vpop.permute.xlu0 %7581  ;;  %17694 = vmatmul.mubr.msk.f32.vlgmr.msra.gmra.mxu1 %vm429_vm8, %v17692_v54 }
 0xa4b   : > { %v7587_v31 = vsel %vm22005_vm13, %v7580_v50, %v7582_v25  ;;  %v7588_v60 = vsel %vm22000_vm7, %v7582_v25, %v7584_v48  ;;  %7763 = vmatprep.mubr.f32.mxu1 %v22003_v8  ;;  %vm22011_vm13 = vmmov %vm22010_vm15 }
 0xa4c   : > { %v7596_v12 = vmul.f32 %v7587_v31, %v19345_v26  ;;  %v7597_v28 = vmul.f32 %v7588_v60, %v19402_v16  ;;  %vm22012_vm7 = vmmov %vm22011_vm13 }
 0xa4e   : > { %7611 = vrot.lane.b32.xlu1 %v7597_v28, %s17925_s12  ;;  %7609 = vrot.lane.b32.xlu0 %v7596_v12, %s17925_s12  ;;  %v7586_v27 = vpop.permute.xlu0 %7585 }
 0xa4f   : > { %v7589_v38 = vsel %vm22006_vm14, %v7584_v48, %v7586_v27  ;;  %v7599_v53 = vmul.f32 %v7586_v27, %v19414_v43  ;;  %vm22013_vm14 = vcmask 1039360  }
 0xa50   : > { %v7598_v24 = vmul.f32 %v7589_v38, %v19348_v47 }
 0xa52   : > { %7615 = vrot.lane.b32.xlu1 %v7599_v53, %s17925_s12  ;;  %7613 = vrot.lane.b32.xlu0 %v7598_v24, %s17925_s12  ;;  %v17707_v53 = vld [vmem:[%s21898_s0 + $0x28] sm:$0xf] }
 0xa53   : > { %v8209_v24 = vrot.slane %v17707_v53, %v18005_v6 }
 0xa56   : > { %7794 = vrot.lane.b32.xlu1 %v7783_v49, %s17932_s19  ;;  %7792 = vrot.lane.b32.xlu0 %v7779_v22, %s17932_s19  ;;  %v8205_v49 = vrot.slane %v17707_v53, %v18001_v4  ;;  %v8217_v22 = vrot.slane %v17707_v53, %v18003_v5 }
 0xa5a   : > { %7798 = vrot.lane.b32.xlu1 %v7791_v29, %s17932_s19  ;;  %7796 = vrot.lane.b32.xlu0 %v7787_v62, %s17932_s19  ;;  %v8213_v29 = vrot.slane %v17707_v53, %v17999_v3  ;;  %v17742_v53 = vld [vmem:[%s21898_s0 + $0x4c] sm:$0xf] }
 0xabb   : > { %v7608_v15 = vpop.permute.xlu1 %7607 }
 0xac0   : > { %v7612_v32 = vpop.permute.xlu1 %7611  ;;  %v7610_v37 = vpop.permute.xlu0 %7609 }
 0xac1   : > { %v7618_v56 = vsel %vm389_vm0, %v7610_v37, %v7612_v32  ;;  %v7617_v61 = vsel %vm389_vm0, %v7608_v15, %v7610_v37 }
 0xac2   : > { %7658 = vmatprep.subr.mxu0 %v7618_v56 }
 0xac3   : > { %7659 = vmatpush1.msra.mxu0 %v7617_v61 }
 0xac4   : > { %v7616_v39 = vpop.permute.xlu1 %7615  ;;  %v7614_v0 = vpop.permute.xlu0 %7613  ;;  %17697 = vmatmul.mubr.msk.f32.vlgmr.msra.gmra.mxu0 %vm429_vm8, %v17696_v7 }
 0xac5   : > { %v7620_v41 = vsel %vm389_vm0, %v7614_v0, %v7616_v39  ;;  %v7619_v44 = vsel %vm389_vm0, %v7612_v32, %v7614_v0  ;;  %7905 = vmatprep.mubr.f32.mxu0 %v22003_v8 }
 0xac6   : > { %7729 = vmatprep.subr.mxu1 %v7620_v41 }
 0xac7   : > { %7730 = vmatpush1.msra.mxu1 %v7619_v44 }
 0xac8   : > { %v7795_v11 = vpop.permute.xlu1 %7794  ;;  %v7793_v46 = vpop.permute.xlu0 %7792  ;;  %17698 = vmatmul.mubr.msk.f32.vlgmr.msra.gmra.mxu1 %vm429_vm8, %v17696_v7 }
 0xac9   : > { %v7800_v23 = vsel %vm590_vm9, %v7793_v46, %v7795_v11  ;;  %v7808_v36 = vmul.f32 0.0, %v7793_v46  ;;  %7976 = vmatprep.mubr.f32.mxu1 %v22003_v8 }
 0xaca   : > { %v7809_v45 = vmul.f32 %v7800_v23, %v19345_v26 }
 0xacb   : > { %7820 = vrot.lane.b32.xlu0 %v7808_v36, %s17924_s9 }
 0xacc   : > { %v7799_v35 = vpop.permute.xlu1 %7798  ;;  %7822 = vrot.lane.b32.xlu1 %v7809_v45, %s17924_s9  ;;  %v7797_v42 = vpop.permute.xlu0 %7796 }
 0xacd   : > { %v7801_v30 = vsel %vm590_vm9, %v7795_v11, %v7797_v42  ;;  %v7802_v1 = vsel %vm590_vm9, %v7797_v42, %v7799_v35  ;;  %v7812_v13 = vmul.f32 %v7799_v35, %v19414_v43  ;;  %v17711_v11 = vld [vmem:[%s21898_s0 + $0x2c] sm:$0xf] }
 0xace   : > { %v7810_v34 = vmul.f32 %v7801_v30, %v19402_v16  ;;  %v7811_v58 = vmul.f32 %v7802_v1, %v19348_v47  ;;  %v8418_v45 = vrot.slane %v17711_v11, %v18001_v4  ;;  %v8422_v35 = vrot.slane %v17711_v11, %v18005_v6  ;;  %v17715_v1 = vld [vmem:[%s21898_s0 + $0x30] sm:$0xf] }
 0xacf   : > { %v8426_v42 = vrot.slane %v17711_v11, %v17999_v3  ;;  %v8430_v30 = vrot.slane %v17711_v11, %v18003_v5  ;;  %v8631_v20 = vrot.slane %v17715_v1, %v18001_v4 }
 0xad0   : > { %7826 = vrot.lane.b32.xlu1 %v7811_v58, %s17924_s9  ;;  %7824 = vrot.lane.b32.xlu0 %v7810_v34, %s17924_s9  ;;  %v8635_v34 = vrot.slane %v17715_v1, %v18005_v6  ;;  %v8639_v58 = vrot.slane %v17715_v1, %v17999_v3 }
 0xad4   : > { %8005 = vrot.lane.b32.xlu1 %v7992_v52, %s21928_s20  ;;  %7828 = vrot.lane.b32.xlu0 %v7812_v13, %s17924_s9  ;;  %v8643_v52 = vrot.slane %v17715_v1, %v18003_v5  ;;  %v17722_v13 = vld [vmem:[%s21898_s0 + $0x38] sm:$0xf] }
 0xad8   : > { %8009 = vrot.lane.b32.xlu1 %v8000_v51, %s21928_s20  ;;  %8007 = vrot.lane.b32.xlu0 %v7996_v19, %s21928_s20  ;;  %v9000_v51 = vrot.slane %v17722_v13, %v18001_v4  ;;  %v9004_v19 = vrot.slane %v17722_v13, %v18005_v6 }
 0xadc   : > { %8011 = vrot.lane.b32.xlu0 %v8004_v57, %s21928_s20  ;;  %v9008_v57 = vrot.slane %v17722_v13, %v17999_v3  ;;  %s22022_s20 = smov 119  }
 0xb3d   : > { %v7821_v59 = vpop.permute.xlu0 %7820 }
 0xb3e   : > { %v7823_v17 = vpop.permute.xlu1 %7822 }
 0xb3f   : > { %v7830_v54 = vsel %vm347_vm1, %v7821_v59, %v7823_v17  ;;  %v9012_v59 = vrot.slane %v17722_v13, %v18003_v5 }
 0xb42   : > { %v7827_v63 = vpop.permute.xlu1 %7826  ;;  %v7825_v10 = vpop.permute.xlu0 %7824 }
 0xb43   : > { %v7831_v14 = vsel %vm347_vm1, %v7823_v17, %v7825_v10  ;;  %v7832_v9 = vsel %vm347_vm1, %v7825_v10, %v7827_v63  ;;  %v17726_v17 = vld [vmem:[%s21898_s0 + $0x3c] sm:$0xf] }
 0xb44   : > { %7871 = vmatprep.subr.mxu0 %v7831_v14  ;;  %v9217_v10 = vrot.slane %v17726_v17, %v18005_v6  ;;  %v9221_v14 = vrot.slane %v17726_v17, %v17999_v3 }
 0xb45   : > { %7872 = vmatpush1.msra.mxu0 %v7830_v54  ;;  %v17730_v54 = vld [vmem:[%s21898_s0 + $0x40] sm:$0xf] }
 0xb46   : > { %v8006_v18 = vpop.permute.xlu1 %8005  ;;  %v7829_v50 = vpop.permute.xlu0 %7828  ;;  %17701 = vmatmul.mubr.msk.f32.vlgmr.msra.gmra.mxu0 %vm429_vm8, %v17700_v55 }
 0xb47   : > { %v8021_v40 = vmul.f32 0.0, %v8006_v18  ;;  %v7833_v2 = vsel %vm347_vm1, %v7827_v63, %v7829_v50  ;;  %8118 = vmatprep.mubr.f32.mxu0 %v22003_v8  ;;  %v9213_v63 = vrot.slane %v17726_v17, %v18001_v4  ;;  %v9430_v50 = vrot.slane %v17730_v54, %v18005_v6 }
 0xb48   : > { %7942 = vmatprep.subr.mxu1 %v7833_v2  ;;  %v9438_v2 = vrot.slane %v17730_v54, %v18003_v5 }
 0xb49   : > { %8033 = vrot.lane.b32.xlu1 %v8021_v40, %s21930_s25  ;;  %7943 = vmatpush1.msra.mxu1 %v7832_v9  ;;  %v9434_v40 = vrot.slane %v17730_v54, %v17999_v3  ;;  %v17734_v9 = vld [vmem:[%s21898_s0 + $0x44] sm:$0xf] }
 0xb4a   : > { %v8010_v33 = vpop.permute.xlu1 %8009  ;;  %v8008_v48 = vpop.permute.xlu0 %8007  ;;  %17702 = vmatmul.mubr.msk.f32.vlgmr.msra.gmra.mxu1 %vm429_vm8, %v17700_v55  ;;  %v9225_v55 = vrot.slane %v17726_v17, %v18003_v5 }
 0xb4b   : > { %v8013_v25 = vsel %vm2274_vm10, %v8006_v18, %v8008_v48  ;;  %v8014_v31 = vsel %vm2274_vm10, %v8008_v48, %v8010_v33  ;;  %8189 = vmatprep.mubr.f32.mxu1 %v22003_v8  ;;  %v9426_v18 = vrot.slane %v17730_v54, %v18001_v4  ;;  %v9643_v48 = vrot.slane %v17734_v9, %v18005_v6 }
 0xb4c   : > { %v8022_v60 = vmul.f32 %v8013_v25, %v19345_v26  ;;  %v8023_v12 = vmul.f32 %v8014_v31, %v19402_v16  ;;  %v9647_v25 = vrot.slane %v17734_v9, %v17999_v3  ;;  %v9651_v31 = vrot.slane %v17734_v9, %v18003_v5 }
 0xb4e   : > { %8037 = vrot.lane.b32.xlu1 %v8023_v12, %s21930_s25  ;;  %8035 = vrot.lane.b32.xlu0 %v8022_v60, %s21930_s25  ;;  %v8012_v28 = vpop.permute.xlu0 %8011  ;;  %v17738_v60 = vld [vmem:[%s21898_s0 + $0x48] sm:$0xf] }
 0xb4f   : > { %v8015_v27 = vsel %vm2274_vm10, %v8010_v33, %v8012_v28  ;;  %v8025_v38 = vmul.f32 %v8012_v28, %v19414_v43  ;;  %v9639_v33 = vrot.slane %v17734_v9, %v18001_v4  ;;  %v9852_v12 = vrot.slane %v17738_v60, %v18001_v4 }
 0xb50   : > { %v8024_v21 = vmul.f32 %v8015_v27, %v19348_v47  ;;  %v9856_v28 = vrot.slane %v17738_v60, %v18005_v6  ;;  %v9860_v27 = vrot.slane %v17738_v60, %v17999_v3 }
 0xb52   : > { %8041 = vrot.lane.b32.xlu1 %v8025_v38, %s21930_s25  ;;  %8039 = vrot.lane.b32.xlu0 %v8024_v21, %s21930_s25  ;;  %v9864_v38 = vrot.slane %v17738_v60, %v18003_v5  ;;  %v10065_v21 = vrot.slane %v17742_v53, %v18001_v4 }
 0xb56   : > { %8220 = vrot.lane.b32.xlu1 %v8209_v24, %s17936_s10  ;;  %8218 = vrot.lane.b32.xlu0 %v8205_v49, %s17936_s10  ;;  %v10069_v24 = vrot.slane %v17742_v53, %v18005_v6  ;;  %v10073_v49 = vrot.slane %v17742_v53, %v17999_v3 }
 0xb5a   : > { %8224 = vrot.lane.b32.xlu1 %v8217_v22, %s17936_s10  ;;  %8222 = vrot.lane.b32.xlu0 %v8213_v29, %s17936_s10  ;;  %v10077_v22 = vrot.slane %v17742_v53, %v18003_v5  ;;  %v17746_v29 = vld [vmem:[%s21898_s0 + $0x50] sm:$0xf] }
 0xbbb   : > { %v8034_v62 = vpop.permute.xlu1 %8033 }
 0xbc0   : > { %v8038_v15 = vpop.permute.xlu1 %8037  ;;  %v8036_v32 = vpop.permute.xlu0 %8035 }
 0xbc1   : > { %v8044_v37 = vsel %vm2305_vm11, %v8036_v32, %v8038_v15  ;;  %v8043_v56 = vsel %vm2305_vm11, %v8034_v62, %v8036_v32  ;;  %v10278_v62 = vrot.slane %v17746_v29, %v18001_v4  ;;  %v10286_v32 = vrot.slane %v17746_v29, %v17999_v3 }
 0xbc2   : > { %8084 = vmatprep.subr.mxu0 %v8044_v37  ;;  %v10290_v37 = vrot.slane %v17746_v29, %v18003_v5 }
 0xbc3   : > { %8085 = vmatpush1.msra.mxu0 %v8043_v56  ;;  %v17750_v56 = vld [vmem:[%s21898_s0 + $0x54] sm:$0xf] }
 0xbc4   : > { %v8042_v61 = vpop.permute.xlu1 %8041  ;;  %v8040_v39 = vpop.permute.xlu0 %8039 }
 0xbc5   : > { %v8046_v0 = vsel %vm2305_vm11, %v8040_v39, %v8042_v61  ;;  %v8045_v7 = vsel %vm2305_vm11, %v8038_v15, %v8040_v39  ;;  %v10282_v15 = vrot.slane %v17746_v29, %v18005_v6  ;;  %v10491_v61 = vrot.slane %v17750_v56, %v18001_v4 }
 0xbc6   : > { %8155 = vmatprep.subr.mxu1 %v8046_v0  ;;  %v10495_v39 = vrot.slane %v17750_v56, %v18005_v6  ;;  %v10499_v0 = vrot.slane %v17750_v56, %v17999_v3 }
 0xbc7   : > { %8156 = vmatpush1.msra.mxu1 %v8045_v7  ;;  %v10503_v7 = vrot.slane %v17750_v56, %v18003_v5 }
 0xbc8   : > { %v19702_v41 = vpop.permute.xlu1 %8220  ;;  %v8219_v44 = vpop.permute.xlu0 %8218 }
 0xbc9   : > { %v8226_v46 = vsel %vm2490_vm12, %v8219_v44, %v19702_v41  ;;  %v8234_v23 = vmul.f32 0.0, %v8219_v44  ;;  %v17754_v44 = vld [vmem:[%s21898_s0 + $0x58] sm:$0xf] }
 0xbca   : > { %v8235_v36 = vmul.f32 %v8226_v46, %v19345_v26  ;;  %v10704_v11 = vrot.slane %v17754_v44, %v18001_v4  ;;  %v10708_v46 = vrot.slane %v17754_v44, %v18005_v6 }
 0xbcb   : > { %8246 = vrot.lane.b32.xlu0 %v8234_v23, %s17937_s16  ;;  %v10712_v23 = vrot.slane %v17754_v44, %v17999_v3 }
 0xbcc   : > { %8248 = vrot.lane.b32.xlu1 %v8235_v36, %s17937_s16  ;;  %v10716_v36 = vrot.slane %v17754_v44, %v18003_v5  ;;  %v8223_v17 = vpop.permute.xlu0 %8222 }
 0xbcf   : > { %8431 = vrot.lane.b32.xlu0 %v8418_v45, %s17938_s26  ;;  %v17758_v45 = vld [vmem:[%s21898_s0 + $0x5c] sm:$0xf] }
 0xbd0   : > { %8433 = vrot.lane.b32.xlu1 %v8422_v35, %s17938_s26  ;;  %v10917_v35 = vrot.slane %v17758_v45, %v18001_v4  ;;  %v10929_v1 = vrot.slane %v17758_v45, %v18003_v5 }
 0xbd3   : > { %8435 = vrot.lane.b32.xlu0 %v8426_v42, %s17938_s26  ;;  %v10921_v42 = vrot.slane %v17758_v45, %v18005_v6 }
 0xbd4   : > { %8437 = vrot.lane.b32.xlu1 %v8430_v30, %s17938_s26  ;;  %v10925_v30 = vrot.slane %v17758_v45, %v17999_v3 }
 0xbd7   : > { %8644 = vrot.lane.b32.xlu0 %v8631_v20, %s22007_s17  ;;  %v17762_v20 = vld [vmem:[%s21898_s0 + $0x60] sm:$0xf] }
 0xbd8   : > { %8646 = vrot.lane.b32.xlu1 %v8635_v34, %s22007_s17  ;;  %v11130_v34 = vrot.slane %v17762_v20, %v18001_v4  ;;  %v11142_v13 = vrot.slane %v17762_v20, %v18003_v5 }
 0xbdb   : > { %8648 = vrot.lane.b32.xlu0 %v8639_v58, %s22007_s17  ;;  %v11134_v58 = vrot.slane %v17762_v20, %v18005_v6 }
 0xbdc   : > { %8650 = vrot.lane.b32.xlu1 %v8643_v52, %s22007_s17  ;;  %v11138_v52 = vrot.slane %v17762_v20, %v17999_v3 }
 0xbdf   : > { %9013 = vrot.lane.b32.xlu0 %v9000_v51, %s22008_s22  ;;  %v17766_v51 = vld [vmem:[%s21898_s0 + $0x64] sm:$0xf] }
 0xbe0   : > { %9015 = vrot.lane.b32.xlu1 %v9004_v19, %s22008_s22  ;;  %v11343_v19 = vrot.slane %v17766_v51, %v18001_v4 }
 0xbe3   : > { %9017 = vrot.lane.b32.xlu0 %v9008_v57, %s22008_s22  ;;  %v17704_v57 = vld [vmem:[%s21902_s4 + $0x48] sm:$0xff] }
 0xbe4   : > { %9019 = vrot.lane.b32.xlu1 %v9012_v59, %s22008_s22  ;;  %v11347_v59 = vrot.slane %v17766_v51, %v18005_v6  ;;  %17705 = vmatmul.mubr.msk.f32.vlgmr.msra.gmra.mxu0 %vm429_vm8, %v17704_v57 }
 0xbe5   : > { %17706 = vmatmul.mubr.msk.f32.vlgmr.msra.gmra.mxu1 %vm429_vm8, %v17704_v57  ;;  %8331 = vmatprep.mubr.f32.mxu0 %v22003_v8 }
 0xbe6   : > { %8402 = vmatprep.mubr.f32.mxu1 %v22003_v8 }
 0xbe7   : > { %9226 = vrot.lane.b32.xlu0 %v9213_v63, %s22009_s13  ;;  %v11351_v63 = vrot.slane %v17766_v51, %v17999_v3 }
 0xbe8   : > { %9228 = vrot.lane.b32.xlu1 %v9217_v10, %s22009_s13  ;;  %v8225_v10 = vpop.permute.xlu1 %8224 }
 0xbe9   : > { %v8228_v54 = vsel %vm2490_vm12, %v8223_v17, %v8225_v10 }
 0xbeb   : > { %9230 = vrot.lane.b32.xlu0 %v9221_v14, %s22009_s13  ;;  %v11355_v14 = vrot.slane %v17766_v51, %v18003_v5 }
 0xbec   : > { %9232 = vrot.lane.b32.xlu1 %v9225_v55, %s22009_s13  ;;  %v8227_v55 = vsel %vm2490_vm12, %v19702_v41, %v8223_v17 }
 0xbef   : > { %9439 = vrot.lane.b32.xlu0 %v9426_v18, %s17937_s16  ;;  %v8236_v18 = vmul.f32 %v8227_v55, %v19402_v16 }
 0xbf0   : > { %9441 = vrot.lane.b32.xlu1 %v9430_v50, %s17937_s16 }
 0xbf3   : > { %9443 = vrot.lane.b32.xlu0 %v9434_v40, %s17937_s16  ;;  %v17770_v40 = vld [vmem:[%s21898_s0 + $0x68] sm:$0xf] }
 0xbf4   : > { %9445 = vrot.lane.b32.xlu1 %v9438_v2, %s17937_s16  ;;  %v8237_v2 = vmul.f32 %v8228_v54, %v19348_v47  ;;  %v11556_v41 = vrot.slane %v17770_v40, %v18001_v4  ;;  %v11564_v60 = vrot.slane %v17770_v40, %v17999_v3 }
 0xbf7   : > { %9652 = vrot.lane.b32.xlu0 %v9639_v33, %s21930_s25  ;;  %v8238_v33 = vmul.f32 %v8225_v10, %v19414_v43 }
 0xbf8   : > { %9654 = vrot.lane.b32.xlu1 %v9643_v48, %s21930_s25 }
 0xbfb   : > { %9656 = vrot.lane.b32.xlu0 %v9647_v25, %s21930_s25 }
 0xbfc   : > { %9658 = vrot.lane.b32.xlu1 %v9651_v31, %s21930_s25  ;;  %v11560_v31 = vrot.slane %v17770_v40, %v18005_v6 }
 0xbff   : > { %9865 = vrot.lane.b32.xlu0 %v9852_v12, %s17924_s9 }
 0xc00   : > { %9867 = vrot.lane.b32.xlu1 %v9856_v28, %s17924_s9 }
 0xc03   : > { %9869 = vrot.lane.b32.xlu0 %v9860_v27, %s17924_s9 }
 0xc04   : > { %9871 = vrot.lane.b32.xlu1 %v9864_v38, %s17924_s9  ;;  %v11568_v38 = vrot.slane %v17770_v40, %v18003_v5 }
 0xc07   : > { %10078 = vrot.lane.b32.xlu0 %v10065_v21, %s17925_s12 }
 0xc08   : > { %10080 = vrot.lane.b32.xlu1 %v10069_v24, %s17925_s12 }
 0xc0b   : > { %10082 = vrot.lane.b32.xlu0 %v10073_v49, %s17925_s12 }
 0xc0c   : > { %10084 = vrot.lane.b32.xlu1 %v10077_v22, %s17925_s12 }
 0xc0f   : > { %10291 = vrot.lane.b32.xlu0 %v10278_v62, %s17926_s15 }
 0xc10   : > { %10293 = vrot.lane.b32.xlu1 %v10282_v15, %s17926_s15 }
 0xc13   : > { %10295 = vrot.lane.b32.xlu0 %v10286_v32, %s17926_s15 }
 0xc14   : > { %10297 = vrot.lane.b32.xlu1 %v10290_v37, %s17926_s15 }
 0xc17   : > { %10504 = vrot.lane.b32.xlu0 %v10491_v61, %s17927_s18 }
 0xc18   : > { %10506 = vrot.lane.b32.xlu1 %v10495_v39, %s17927_s18 }
 0xc1b   : > { %10508 = vrot.lane.b32.xlu0 %v10499_v0, %s17927_s18 }
 0xc1c   : > { %10510 = vrot.lane.b32.xlu1 %v10503_v7, %s17927_s18 }
 0xc1f   : > { %10717 = vrot.lane.b32.xlu0 %v10704_v11, %s17928_s21 }
 0xc20   : > { %10719 = vrot.lane.b32.xlu1 %v10708_v46, %s17928_s21 }
 0xc23   : > { %10721 = vrot.lane.b32.xlu0 %v10712_v23, %s17928_s21 }
 0xc24   : > { %10723 = vrot.lane.b32.xlu1 %v10716_v36, %s17928_s21 }
 0xc27   : > { %10930 = vrot.lane.b32.xlu0 %v10917_v35, %s17929_s24 }
 0xc28   : > { %10932 = vrot.lane.b32.xlu1 %v10921_v42, %s17929_s24 }
 0xc2b   : > { %10934 = vrot.lane.b32.xlu0 %v10925_v30, %s17929_s24 }
 0xc2c   : > { %10936 = vrot.lane.b32.xlu1 %v10929_v1, %s17929_s24 }
 0xc2f   : > { %11143 = vrot.lane.b32.xlu0 %v11130_v34, %s17930_s29 }
 0xc30   : > { %11145 = vrot.lane.b32.xlu1 %v11134_v58, %s17930_s29 }
 0xc33   : > { %11147 = vrot.lane.b32.xlu0 %v11138_v52, %s17930_s29 }
 0xc34   : > { %11149 = vrot.lane.b32.xlu1 %v11142_v13, %s17930_s29 }
 0xc37   : > { %11356 = vrot.lane.b32.xlu0 %v11343_v19, %s17931_s11 }
 0xc38   : > { %11358 = vrot.lane.b32.xlu1 %v11347_v59, %s17931_s11 }
 0xc3b   : > { %11360 = vrot.lane.b32.xlu0 %v11351_v63, %s17931_s11 }
 0xc3c   : > { %11362 = vrot.lane.b32.xlu1 %v11355_v14, %s17931_s11 }
 0xc3d   : > { %v19874_v50 = vpop.permute.xlu0 %8246 }
 0xc3e   : > { %v19880_v9 = vpop.permute.xlu1 %8248 }
 0xc3f   : > { %8250 = vrot.lane.b32.xlu0 %v8236_v18, %s17937_s16 }
 0xc40   : > { %8252 = vrot.lane.b32.xlu1 %v8237_v2, %s17937_s16 }
 0xc41   : > { %v8432_v48 = vpop.permute.xlu0 %8431 }
 0xc42   : > { %v8434_v25 = vpop.permute.xlu1 %8433  ;;  %v8447_v61 = vmul.f32 0.0, %v8432_v48 }
 0xc43   : > { %8254 = vrot.lane.b32.xlu0 %v8238_v33, %s17937_s16  ;;  %v8439_v27 = vsel %vm22010_vm15, %v8432_v48, %v8434_v25  ;;  %vm22014_vm15 = vmmov %vm22013_vm14 }
 0xc44   : > { %11569 = vrot.lane.b32.xlu1 %v11556_v41, %s17932_s19  ;;  %v8448_v21 = vmul.f32 %v8439_v27, %v19345_v26 }
 0xc45   : > { %v8436_v12 = vpop.permute.xlu0 %8435 }
 0xc46   : > { %v8438_v28 = vpop.permute.xlu1 %8437  ;;  %v8440_v24 = vsel %vm22011_vm13, %v8434_v25, %v8436_v12  ;;  %vm22015_vm13 = vmmov %vm22013_vm14 }
 0xc47   : > { %11571 = vrot.lane.b32.xlu0 %v11560_v31, %s17932_s19  ;;  %v8441_v22 = vsel %vm22012_vm7, %v8436_v12, %v8438_v28  ;;  %v8449_v29 = vmul.f32 %v8440_v24, %v19402_v16  ;;  %v8451_v37 = vmul.f32 %v8438_v28, %v19414_v43  ;;  %vm22016_vm7 = vcmask 7168  }
 0xc48   : > { %11573 = vrot.lane.b32.xlu1 %v11564_v60, %s17932_s19  ;;  %v8450_v15 = vmul.f32 %v8441_v22, %v19348_v47 }
 0xc49   : > { %v8645_v53 = vpop.permute.xlu0 %8644 }
 0xc4a   : > { %v8647_v49 = vpop.permute.xlu1 %8646  ;;  %v8660_v20 = vmul.f32 0.0, %v8645_v53 }
 0xc4b   : > { %11575 = vrot.lane.b32.xlu0 %v11568_v38, %s17932_s19  ;;  %v8652_v39 = vsel %vm22013_vm14, %v8645_v53, %v8647_v49  ;;  %vm22017_vm14 = vmmov %vm22016_vm7 }
 0xc4c   : > { %8461 = vrot.lane.b32.xlu1 %v8448_v21, %s22009_s13  ;;  %v8661_v44 = vmul.f32 %v8652_v39, %v19345_v26 }
 0xc4d   : > { %v8649_v62 = vpop.permute.xlu0 %8648 }
 0xc4e   : > { %v8651_v32 = vpop.permute.xlu1 %8650  ;;  %v8653_v7 = vsel %vm22014_vm15, %v8647_v49, %v8649_v62  ;;  %vm22018_vm15 = vmmov %vm22016_vm7 }
 0xc4f   : > { %8463 = vrot.lane.b32.xlu0 %v8449_v29, %s22009_s13  ;;  %v8662_v46 = vmul.f32 %v8653_v7, %v19402_v16  ;;  %v8654_v23 = vsel %vm22015_vm13, %v8649_v62, %v8651_v32  ;;  %v8664_v42 = vmul.f32 %v8651_v32, %v19414_v43  ;;  %vm22019_vm13 = vcmask 56320  }
 0xc50   : > { %8465 = vrot.lane.b32.xlu1 %v8450_v15, %s22009_s13  ;;  %v8663_v45 = vmul.f32 %v8654_v23, %v19348_v47 }
 0xc51   : > { %v9014_v56 = vpop.permute.xlu0 %9013 }
 0xc52   : > { %v9016_v0 = vpop.permute.xlu1 %9015  ;;  %v9029_v14 = vmul.f32 %v9014_v56, %v19345_v26 }
 0xc53   : > { %8467 = vrot.lane.b32.xlu0 %v8451_v37, %s22009_s13  ;;  %v9021_v1 = vsel %vm22016_vm7, %v9014_v56, %v9016_v0  ;;  %vm22020_vm7 = vmmov %vm22019_vm13 }
 0xc54   : > { %8459 = vrot.lane.b32.xlu1 %v8447_v61, %s22009_s13  ;;  %v9030_v58 = vmul.f32 %v9021_v1, %v19402_v16 }
 0xc55   : > { %v9018_v11 = vpop.permute.xlu0 %9017 }
 0xc56   : > { %v9020_v36 = vpop.permute.xlu1 %9019  ;;  %v9022_v52 = vsel %vm22017_vm14, %v9016_v0, %v9018_v11  ;;  %vm22021_vm14 = vmmov %vm22020_vm7 }
 0xc57   : > { %8674 = vrot.lane.b32.xlu0 %v8661_v44, %s22008_s22  ;;  %v9023_v51 = vsel %vm22018_vm15, %v9018_v11, %v9020_v36  ;;  %v9031_v19 = vmul.f32 %v9022_v52, %v19348_v47  ;;  %v9033_v63 = vmul.f32 0.0, %v9020_v36  ;;  %vm22023_vm15 = vmmov %vm22020_vm7 }
 0xc58   : > { %8676 = vrot.lane.b32.xlu1 %v8662_v46, %s22008_s22  ;;  %v9032_v59 = vmul.f32 %v9023_v51, %v19414_v43 }
 0xc59   : > { %v9227_v35 = vpop.permute.xlu0 %9226 }
 0xc5a   : > { %v9229_v30 = vpop.permute.xlu1 %9228  ;;  %v9242_v27 = vmul.f32 %v9227_v35, %v19345_v26 }
 0xc5b   : > { %8678 = vrot.lane.b32.xlu0 %v8663_v45, %s22008_s22  ;;  %v9234_v55 = vsel %vm22019_vm13, %v9227_v35, %v9229_v30  ;;  %vm22024_vm13 = vmmov %vm22020_vm7 }
 0xc5c   : > { %8680 = vrot.lane.b32.xlu1 %v8664_v42, %s22008_s22  ;;  %v9243_v40 = vmul.f32 %v9234_v55, %v19402_v16 }
 0xc5d   : > { %v9231_v34 = vpop.permute.xlu0 %9230 }
 0xc5e   : > { %v9233_v13 = vpop.permute.xlu1 %9232  ;;  %v9235_v18 = vsel %vm22020_vm7, %v9229_v30, %v9231_v34 }
 0xc5f   : > { %8672 = vrot.lane.b32.xlu0 %v8660_v20, %s22008_s22  ;;  %v9244_v41 = vmul.f32 %v9235_v18, %v19348_v47  ;;  %v9236_v33 = vsel %vm22021_vm14, %v9231_v34, %v9233_v13  ;;  %v9246_v60 = vmul.f32 0.0, %v9233_v13  ;;  %vm22025_vm14 = vmmov %vm22020_vm7 }
 0xc60   : > { %9043 = vrot.lane.b32.xlu1 %v9030_v58, %s22007_s17  ;;  %v9245_v25 = vmul.f32 %v9236_v33, %v19414_v43 }
 0xc61   : > { %v9440_v57 = vpop.permute.xlu0 %9439 }
 0xc62   : > { %v9442_v17 = vpop.permute.xlu1 %9441  ;;  %v9455_v56 = vmul.f32 %v9440_v57, %v19345_v26 }
 0xc63   : > { %9045 = vrot.lane.b32.xlu0 %v9031_v19, %s22007_s17  ;;  %v9447_v28 = vsel %vm429_vm8, %v9440_v57, %v9442_v17 }
 0xc64   : > { %9047 = vrot.lane.b32.xlu1 %v9032_v59, %s22007_s17  ;;  %v9456_v53 = vmul.f32 %v9447_v28, %v19402_v16 }
 0xc65   : > { %v9444_v10 = vpop.permute.xlu0 %9443 }
 0xc66   : > { %v9446_v54 = vpop.permute.xlu1 %9445  ;;  %v9448_v21 = vsel %vm429_vm8, %v9442_v17, %v9444_v10 }
 0xc67   : > { %9049 = vrot.lane.b32.xlu0 %v9033_v63, %s22007_s17  ;;  %v9449_v49 = vsel %vm429_vm8, %v9444_v10, %v9446_v54  ;;  %v9457_v22 = vmul.f32 %v9448_v21, %v19348_v47  ;;  %v9459_v32 = vmul.f32 0.0, %v9446_v54 }
 0xc68   : > { %9041 = vrot.lane.b32.xlu1 %v9029_v14, %s22007_s17  ;;  %v9458_v62 = vmul.f32 %v9449_v49, %v19414_v43 }
 0xc69   : > { %v9653_v2 = vpop.permute.xlu0 %9652 }
 0xc6a   : > { %v9655_v48 = vpop.permute.xlu1 %9654  ;;  %v9668_v1 = vmul.f32 %v9653_v2, %v19345_v26 }
 0xc6b   : > { %9256 = vrot.lane.b32.xlu0 %v9243_v40, %s17938_s26  ;;  %v9660_v61 = vsel %vm2305_vm11, %v9653_v2, %v9655_v48 }
 0xc6c   : > { %9258 = vrot.lane.b32.xlu1 %v9244_v41, %s17938_s26  ;;  %v9669_v7 = vmul.f32 %v9660_v61, %v19402_v16 }
 0xc6d   : > { %v9657_v31 = vpop.permute.xlu0 %9656 }
 0xc6e   : > { %v9659_v12 = vpop.permute.xlu1 %9658  ;;  %v9661_v0 = vsel %vm2305_vm11, %v9655_v48, %v9657_v31 }
 0xc6f   : > { %9260 = vrot.lane.b32.xlu0 %v9245_v25, %s17938_s26  ;;  %v9670_v11 = vmul.f32 %v9661_v0, %v19348_v47  ;;  %v9662_v46 = vsel %vm2305_vm11, %v9657_v31, %v9659_v12  ;;  %v9672_v35 = vmul.f32 0.0, %v9659_v12 }
 0xc70   : > { %9262 = vrot.lane.b32.xlu1 %v9246_v60, %s17938_s26  ;;  %v9671_v36 = vmul.f32 %v9662_v46, %v19414_v43 }
 0xc71   : > { %v9866_v38 = vpop.permute.xlu0 %9865 }
 0xc72   : > { %v9868_v24 = vpop.permute.xlu1 %9867  ;;  %v9881_v10 = vmul.f32 %v9866_v38, %v19345_v26 }
 0xc73   : > { %9254 = vrot.lane.b32.xlu0 %v9242_v27, %s17938_s26  ;;  %v9873_v30 = vsel %vm347_vm1, %v9866_v38, %v9868_v24 }
 0xc74   : > { %9469 = vrot.lane.b32.xlu1 %v9456_v53, %s17936_s10  ;;  %v9882_v34 = vmul.f32 %v9873_v30, %v19402_v16 }
 0xc75   : > { %v9870_v29 = vpop.permute.xlu0 %9869 }
 0xc76   : > { %v9872_v15 = vpop.permute.xlu1 %9871  ;;  %v9874_v58 = vsel %vm347_vm1, %v9868_v24, %v9870_v29 }
 0xc77   : > { %9471 = vrot.lane.b32.xlu0 %v9457_v22, %s17936_s10  ;;  %v9875_v13 = vsel %vm347_vm1, %v9870_v29, %v9872_v15  ;;  %v9883_v51 = vmul.f32 %v9874_v58, %v19348_v47  ;;  %v9885_v17 = vmul.f32 0.0, %v9872_v15 }
 0xc78   : > { %9473 = vrot.lane.b32.xlu1 %v9458_v62, %s17936_s10  ;;  %v9884_v57 = vmul.f32 %v9875_v13, %v19414_v43 }
 0xc79   : > { %v10079_v37 = vpop.permute.xlu0 %10078 }
 0xc7a   : > { %v10081_v39 = vpop.permute.xlu1 %10080  ;;  %v10094_v28 = vmul.f32 %v10079_v37, %v19345_v26 }
 0xc7b   : > { %9475 = vrot.lane.b32.xlu0 %v9459_v32, %s17936_s10  ;;  %v10086_v14 = vsel %vm389_vm0, %v10079_v37, %v10081_v39 }
 0xc7c   : > { %9467 = vrot.lane.b32.xlu1 %v9455_v56, %s17936_s10  ;;  %v10095_v18 = vmul.f32 %v10086_v14, %v19402_v16 }
 0xc7d   : > { %v10083_v44 = vpop.permute.xlu0 %10082 }
 0xc7e   : > { %v10085_v23 = vpop.permute.xlu1 %10084  ;;  %v10087_v54 = vsel %vm389_vm0, %v10081_v39, %v10083_v44 }
 0xc7f   : > { %9682 = vrot.lane.b32.xlu0 %v9669_v7, %s22022_s20  ;;  %v10096_v2 = vmul.f32 %v10087_v54, %v19348_v47  ;;  %v10088_v41 = vsel %vm389_vm0, %v10083_v44, %v10085_v23  ;;  %v10098_v31 = vmul.f32 0.0, %v10085_v23 }
 0xc80   : > { %9684 = vrot.lane.b32.xlu1 %v9670_v11, %s22022_s20  ;;  %v10097_v48 = vmul.f32 %v10088_v41, %v19414_v43 }
 0xc81   : > { %v10292_v45 = vpop.permute.xlu0 %10291 }
 0xc82   : > { %v10294_v42 = vpop.permute.xlu1 %10293  ;;  %v10307_v37 = vmul.f32 %v10292_v45, %v19345_v26 }
 0xc83   : > { %9686 = vrot.lane.b32.xlu0 %v9671_v36, %s22022_s20  ;;  %v10299_v12 = vsel %vm771_vm2, %v10292_v45, %v10294_v42 }
 0xc84   : > { %9688 = vrot.lane.b32.xlu1 %v9672_v35, %s22022_s20  ;;  %v10308_v38 = vmul.f32 %v10299_v12, %v19402_v16 }
 0xc85   : > { %v10296_v20 = vpop.permute.xlu0 %10295 }
 0xc86   : > { %v10298_v52 = vpop.permute.xlu1 %10297  ;;  %v10300_v53 = vsel %vm771_vm2, %v10294_v42, %v10296_v20 }
 0xc87   : > { %9680 = vrot.lane.b32.xlu0 %v9668_v1, %s22022_s20  ;;  %v10301_v24 = vsel %vm771_vm2, %v10296_v20, %v10298_v52  ;;  %v10309_v49 = vmul.f32 %v10300_v53, %v19348_v47  ;;  %v10311_v15 = vmul.f32 0.0, %v10298_v52 }
 0xc88   : > { %9895 = vrot.lane.b32.xlu1 %v9882_v34, %s17932_s19  ;;  %v10310_v29 = vmul.f32 %v10301_v24, %v19414_v43 }
 0xc89   : > { %v19972_v19 = vpop.permute.xlu0 %10504 }
 0xc8a   : > { %v10507_v59 = vpop.permute.xlu1 %10506  ;;  %v10520_v30 = vmul.f32 %v19972_v19, %v19345_v26 }
 0xc8b   : > { %9897 = vrot.lane.b32.xlu0 %v9883_v51, %s17932_s19  ;;  %v10512_v56 = vsel %vm987_vm3, %v19972_v19, %v10507_v59 }
 0xc8c   : > { %9899 = vrot.lane.b32.xlu1 %v9884_v57, %s17932_s19  ;;  %v10521_v0 = vmul.f32 %v10512_v56, %v19402_v16 }
 0xc8d   : > { %v10509_v63 = vpop.permute.xlu0 %10508 }
 0xc8e   : > { %v10511_v55 = vpop.permute.xlu1 %10510  ;;  %v10513_v39 = vsel %vm987_vm3, %v10507_v59, %v10509_v63 }
 0xc8f   : > { %9901 = vrot.lane.b32.xlu0 %v9885_v17, %s17932_s19  ;;  %v10522_v44 = vmul.f32 %v10513_v39, %v19348_v47  ;;  %v10514_v11 = vsel %vm987_vm3, %v10509_v63, %v10511_v55  ;;  %v10524_v45 = vmul.f32 0.0, %v10511_v55  ;;  %v17708_v17 = vld [vmem:[%s21902_s4 + $0x50] sm:$0xff]  ;;  %v8256_v63 = vsel %vm429_vm8, %v19874_v50, %v19880_v9 }
 0xc90   : > { %9893 = vrot.lane.b32.xlu1 %v9881_v10, %s17932_s19  ;;  %v10523_v23 = vmul.f32 %v10514_v11, %v19414_v43 }
 0xc91   : > { %v19983_v40 = vpop.permute.xlu0 %10717 }
 0xc92   : > { %v10720_v33 = vpop.permute.xlu1 %10719  ;;  %v10733_v55 = vmul.f32 %v19983_v40, %v19345_v26 }
 0xc93   : > { %10108 = vrot.lane.b32.xlu0 %v10095_v18, %s17931_s11  ;;  %v10725_v42 = vsel %vm1203_vm4, %v19983_v40, %v10720_v33 }
 0xc94   : > { %10110 = vrot.lane.b32.xlu1 %v10096_v2, %s17931_s11  ;;  %v10734_v20 = vmul.f32 %v10725_v42, %v19402_v16 }
 0xc95   : > { %v10722_v25 = vpop.permute.xlu0 %10721 }
 0xc96   : > { %v10724_v60 = vpop.permute.xlu1 %10723  ;;  %v10726_v34 = vsel %vm1203_vm4, %v10720_v33, %v10722_v25 }
 0xc97   : > { %10112 = vrot.lane.b32.xlu0 %v10097_v48, %s17931_s11  ;;  %v10727_v52 = vsel %vm1203_vm4, %v10722_v25, %v10724_v60  ;;  %v10735_v13 = vmul.f32 %v10726_v34, %v19348_v47  ;;  %v10737_v10 = vmul.f32 0.0, %v10724_v60 }
 0xc98   : > { %10114 = vrot.lane.b32.xlu1 %v10098_v31, %s17931_s11  ;;  %v10736_v57 = vmul.f32 %v10727_v52, %v19414_v43 }
 0xc99   : > { %v19994_v27 = vpop.permute.xlu0 %10930 }
 0xc9a   : > { %v10933_v21 = vpop.permute.xlu1 %10932  ;;  %v10946_v53 = vmul.f32 %v19994_v27, %v19345_v26 }
 0xc9b   : > { %10106 = vrot.lane.b32.xlu0 %v10094_v28, %s17931_s11  ;;  %v10938_v54 = vsel %vm1018_vm5, %v19994_v27, %v10933_v21 }
 0xc9c   : > { %10321 = vrot.lane.b32.xlu1 %v10308_v38, %s17930_s29  ;;  %v10947_v40 = vmul.f32 %v10938_v54, %v19402_v16 }
 0xc9d   : > { %v20002_v22 = vpop.permute.xlu0 %10934 }
 0xc9e   : > { %v20005_v62 = vpop.permute.xlu1 %10936  ;;  %v10939_v50 = vsel %vm1018_vm5, %v10933_v21, %v20002_v22 }
 0xc9f   : > { %10323 = vrot.lane.b32.xlu0 %v10309_v49, %s17930_s29  ;;  %v10948_v33 = vmul.f32 %v10939_v50, %v19348_v47  ;;  %v10940_v48 = vsel %vm1018_vm5, %v20002_v22, %v20005_v62  ;;  %v10950_v12 = vmul.f32 0.0, %v20005_v62 }
 0xca0   : > { %10325 = vrot.lane.b32.xlu1 %v10310_v29, %s17930_s29  ;;  %v10949_v31 = vmul.f32 %v10940_v48, %v19414_v43 }
 0xca1   : > { %v20009_v32 = vpop.permute.xlu0 %11143 }
 0xca2   : > { %v20014_v61 = vpop.permute.xlu1 %11145 }
 0xca3   : > { %10327 = vrot.lane.b32.xlu0 %v10311_v15, %s17930_s29  ;;  %v11151_v38 = vsel %vm802_vm6, %v20009_v32, %v20014_v61 }
 0xca4   : > { %10319 = vrot.lane.b32.xlu1 %v10307_v37, %s17930_s29  ;;  %v11160_v24 = vmul.f32 %v11151_v38, %v19402_v16 }
 0xca5   : > { %v20020_v7 = vpop.permute.xlu0 %11147 }
 0xca6   : > { %v20024_v46 = vpop.permute.xlu1 %11149  ;;  %v11152_v49 = vsel %vm802_vm6, %v20014_v61, %v20020_v7 }
 0xca7   : > { %10534 = vrot.lane.b32.xlu0 %v10521_v0, %s17929_s24  ;;  %v11153_v62 = vsel %vm802_vm6, %v20020_v7, %v20024_v46  ;;  %v11161_v27 = vmul.f32 %v11152_v49, %v19348_v47  ;;  %v17712_v0 = vld [vmem:[%s21902_s4 + $0x58] sm:$0xff] }
 0xca8   : > { %10536 = vrot.lane.b32.xlu1 %v10522_v44, %s17929_s24  ;;  %v11162_v37 = vmul.f32 %v11153_v62, %v19414_v43  ;;  %v11163_v44 = vmul.f32 0.0, %v20024_v46 }
 0xca9   : > { %v20029_v36 = vpop.permute.xlu0 %11356 }
 0xcaa   : > { %v20031_v35 = vpop.permute.xlu1 %11358 }
 0xcab   : > { %10538 = vrot.lane.b32.xlu0 %v10523_v23, %s17929_s24  ;;  %v11159_v23 = vmul.f32 %v20009_v32, %v19345_v26 }
 0xcac   : > { %10540 = vrot.lane.b32.xlu1 %v10524_v45, %s17929_s24 }
 0xcad   : > { %v20039_v1 = vpop.permute.xlu0 %11360 }
 0xcae   : > { %v20043_v58 = vpop.permute.xlu1 %11362 }
 0xcaf   : > { %10532 = vrot.lane.b32.xlu0 %v10520_v30, %s17929_s24 }
 0xcb0   : > { %10747 = vrot.lane.b32.xlu1 %v10734_v20, %s17928_s21 }
 0xcb1   : > { %v8251_v51 = vpop.permute.xlu0 %8250 }
 0xcb2   : > { %v8253_v19 = vpop.permute.xlu1 %8252  ;;  %v8257_v59 = vsel %vm429_vm8, %v19880_v9, %v8251_v51 }
 0xcb3   : > { %10749 = vrot.lane.b32.xlu0 %v10735_v13, %s17928_s21  ;;  %8297 = vmatprep.subr.mxu0 %v8257_v59  ;;  %v8258_v9 = vsel %vm429_vm8, %v8251_v51, %v8253_v19  ;;  %v17716_v51 = vld [vmem:[%s21902_s4 + $0x60] sm:$0xff] }
 0xcb4   : > { %10751 = vrot.lane.b32.xlu1 %v10736_v57, %s17928_s21  ;;  %8298 = vmatpush1.msra.mxu0 %v8256_v63 }
 0xcb5   : > { %v8255_v14 = vpop.permute.xlu0 %8254  ;;  %17709 = vmatmul.mubr.msk.f32.vlgmr.msra.gmra.mxu0 %vm429_vm8, %v17708_v17 }
 0xcb6   : > { %v20065_v18 = vpop.permute.xlu1 %11569  ;;  %v8259_v2 = vsel %vm429_vm8, %v8253_v19, %v8255_v14  ;;  %8544 = vmatprep.mubr.f32.mxu0 %v22003_v8 }
 0xcb7   : > { %10753 = vrot.lane.b32.xlu0 %v10737_v10, %s17928_s21  ;;  %8368 = vmatprep.subr.mxu1 %v8259_v2 }
 0xcb8   : > { %10745 = vrot.lane.b32.xlu1 %v10733_v55, %s17928_s21  ;;  %8369 = vmatpush1.msra.mxu1 %v8258_v9 }
 0xcb9   : > { %v20075_v41 = vpop.permute.xlu0 %11571  ;;  %17710 = vmatmul.mubr.msk.f32.vlgmr.msra.gmra.mxu1 %vm429_vm8, %v17708_v17 }
 0xcba   : > { %v20082_v25 = vpop.permute.xlu1 %11573  ;;  %8615 = vmatprep.mubr.f32.mxu1 %v22003_v8  ;;  %v11577_v10 = vsel %vm590_vm9, %v20065_v18, %v20075_v41 }
 0xcbb   : > { %10960 = vrot.lane.b32.xlu0 %v10947_v40, %s17927_s18  ;;  %v11586_v55 = vmul.f32 %v11577_v10, %v19402_v16  ;;  %v11578_v54 = vsel %vm590_vm9, %v20075_v41, %v20082_v25 }
 0xcbc   : > { %10962 = vrot.lane.b32.xlu1 %v10948_v33, %s17927_s18 }
 0xcbd   : > { %v20088_v60 = vpop.permute.xlu0 %11575 }
 0xcbe   : > { %v8462_v28 = vpop.permute.xlu1 %8461  ;;  %v11579_v9 = vsel %vm590_vm9, %v20082_v25, %v20088_v60 }
 0xcbf   : > { %10964 = vrot.lane.b32.xlu0 %v10949_v31, %s17927_s18  ;;  %v11588_v41 = vmul.f32 %v11579_v9, %v19414_v43  ;;  %v11589_v31 = vmul.f32 0.0, %v20088_v60  ;;  %v17739_v9 = vld [vmem:[%s21902_s4 + $0x90] sm:$0xff] }
 0xcc0   : > { %10966 = vrot.lane.b32.xlu1 %v10950_v12, %s17927_s18 }
 0xcc1   : > { %v8464_v21 = vpop.permute.xlu0 %8463 }
 0xcc2   : > { %v8466_v22 = vpop.permute.xlu1 %8465  ;;  %v8470_v29 = vsel %vm22023_vm15, %v8462_v28, %v8464_v21  ;;  %vm22026_vm15 = vcmask 588800  }
 0xcc3   : > { %10958 = vrot.lane.b32.xlu0 %v10946_v53, %s17927_s18  ;;  %8510 = vmatprep.subr.mxu0 %v8470_v29  ;;  %v8471_v7 = vsel %vm22025_vm14, %v8464_v21, %v8466_v22  ;;  %v11364_v45 = vsel %vm22026_vm15, %v20029_v36, %v20031_v35  ;;  %v11795_v53 = vld [vmem:[%s21898_s0] sm:$0xf] }
 0xcc4   : > { %11173 = vrot.lane.b32.xlu1 %v11160_v24, %s17926_s15  ;;  %v11373_v32 = vmul.f32 %v11364_v45, %v19402_v16  ;;  %v11804_v62 = vrot.slane %v11795_v53, %v18005_v6 }
 0xcc5   : > { %v8468_v15 = vpop.permute.xlu0 %8467 }
 0xcc6   : > { %v8460_v56 = vpop.permute.xlu1 %8459  ;;  %v8472_v61 = vsel %vm22024_vm13, %v8466_v22, %v8468_v15  ;;  %vm22027_vm13 = vmmov %vm22026_vm15  ;;  %v17727_v22 = vld [vmem:[%s21902_s4 + $0x78] sm:$0xff]  ;;  %v11808_v15 = vrot.slane %v11795_v53, %v17999_v3 }
 0xcc7   : > { %v8469_v39 = vsel %vm22020_vm7, %v8460_v56, %v8462_v28  ;;  %11175 = vrot.lane.b32.xlu0 %v11161_v27, %s17926_s15  ;;  %8581 = vmatprep.subr.mxu1 %v8472_v61  ;;  %v11365_v46 = vsel %vm22027_vm13, %v20031_v35, %v20039_v1  ;;  %vm22028_vm7 = vcmask 7168   ;;  %vm22029_vm14 = vmmov %vm22027_vm13  ;;  %v11585_v28 = vmul.f32 %v20065_v18, %v19345_v26  ;;  %v17774_v61 = vld [vmem:[%s21898_s0 + $0x4] sm:$0xf] }
 0xcc8   : > { %11177 = vrot.lane.b32.xlu1 %v11162_v37, %s17926_s15  ;;  %8511 = vmatpush1.msra.mxu0 %v8469_v39  ;;  %v11374_v34 = vmul.f32 %v11365_v46, %v19348_v47  ;;  %v11366_v52 = vsel %vm22029_vm14, %v20039_v1, %v20043_v58  ;;  %vm22030_vm15 = vmmov %vm22028_vm7  ;;  %v11376_v1 = vmul.f32 0.0, %v20043_v58  ;;  %v11372_v58 = vmul.f32 %v20029_v36, %v19345_v26  ;;  %v17719_v36 = vld [vmem:[%s21902_s4 + $0x68] sm:$0xff]  ;;  %v17731_v46 = vld [vmem:[%s21902_s4 + $0x80] sm:$0xff] }
 0xcc9   : > { %8582 = vmatpush1.msra.mxu1 %v8471_v7  ;;  %v8675_v11 = vpop.permute.xlu0 %8674  ;;  %17713 = vmatmul.mubr.msk.f32.vlgmr.msra.gmra.mxu0 %vm429_vm8, %v17712_v0  ;;  %vm22031_vm13 = vmmov %vm22028_vm7  ;;  %v11375_v19 = vmul.f32 %v11366_v52, %v19414_v43  ;;  %vm22032_vm14 = vcmask 1039360   ;;  %v11800_v18 = vrot.slane %v11795_v53, %v18001_v4  ;;  %v11812_v39 = vrot.slane %v11795_v53, %v18003_v5 }
 0xcca   : > { %v8677_v42 = vpop.permute.xlu1 %8676  ;;  %17714 = vmatmul.mubr.msk.f32.vlgmr.msra.gmra.mxu1 %vm429_vm8, %v17712_v0  ;;  %8757 = vmatprep.mubr.f32.mxu0 %v22003_v8  ;;  %v11840_v7 = vrot.slane %v17774_v61, %v18001_v4 }
 0xccb   : > { %11179 = vrot.lane.b32.xlu0 %v11163_v44, %s17926_s15  ;;  %v8683_v30 = vsel %vm22028_vm7, %v8675_v11, %v8677_v42  ;;  %8828 = vmatprep.mubr.f32.mxu1 %v22003_v8 }
 0xccc   : > { %11171 = vrot.lane.b32.xlu1 %v11159_v23, %s17926_s15  ;;  %8723 = vmatprep.subr.mxu0 %v8683_v30 }
 0xccd   : > { %v8679_v20 = vpop.permute.xlu0 %8678 }
 0xcce   : > { %v8681_v13 = vpop.permute.xlu1 %8680  ;;  %v8684_v57 = vsel %vm22031_vm13, %v8677_v42, %v8679_v20  ;;  %vm22034_vm13 = vmmov %vm22032_vm14 }
 0xccf   : > { %11386 = vrot.lane.b32.xlu0 %v11373_v32, %s17925_s12  ;;  %v8685_v35 = vsel %vm22030_vm15, %v8679_v20, %v8681_v13  ;;  %vm22033_vm15 = vmmov %vm22032_vm14  ;;  %v11844_v20 = vrot.slane %v17774_v61, %v18005_v6 }
 0xcd0   : > { %11388 = vrot.lane.b32.xlu1 %v11374_v34, %s17925_s12  ;;  %8794 = vmatprep.subr.mxu1 %v8685_v35  ;;  %v11848_v34 = vrot.slane %v17774_v61, %v17999_v3 }
 0xcd1   : > { %8795 = vmatpush1.msra.mxu1 %v8684_v57  ;;  %v8673_v59 = vpop.permute.xlu0 %8672 }
 0xcd2   : > { %v8682_v17 = vsel %vm22028_vm7, %v8673_v59, %v8675_v11  ;;  %v9044_v63 = vpop.permute.xlu1 %9043  ;;  %8945 = vmatprep.subr.mxu1 %v19414_v43  ;;  %17718 = vmatmul.mubr.msk.f32.vlgmr.msra.gmra.mxu1 %vm429_vm8, %v17716_v51  ;;  %vm22035_vm7 = vmmov %vm22034_vm13 }
 0xcd3   : > { %11390 = vrot.lane.b32.xlu0 %v11375_v19, %s17925_s12  ;;  %8724 = vmatpush1.msra.mxu0 %v8682_v17 }
 0xcd4   : > { %8946 = vmatpush1.msra.mxu1 %v19348_v47  ;;  %11392 = vrot.lane.b32.xlu1 %v11376_v1, %s17925_s12  ;;  %v17735_v1 = vld [vmem:[%s21902_s4 + $0x88] sm:$0xff] }
 0xcd5   : > { %8874 = vmatprep.subr.mxu0 %v19402_v16  ;;  %17717 = vmatmul.mubr.msk.f32.vlgmr.msra.gmra.mxu0 %vm429_vm8, %v17716_v51  ;;  %v9046_v14 = vpop.permute.xlu0 %9045  ;;  %v11587_v16 = vmul.f32 %v11578_v54, %v19348_v47  ;;  %v17723_v47 = vld [vmem:[%s21902_s4 + $0x70] sm:$0xff]  ;;  %v11852_v51 = vrot.slane %v17774_v61, %v18003_v5 }
 0xcd6   : > { %8875 = vmatpush1.msra.mxu0 %v19345_v26  ;;  %v9048_v2 = vpop.permute.xlu1 %9047  ;;  %v9052_v50 = vsel %vm22032_vm14, %v9044_v63, %v9046_v14  ;;  %8908 = vmatprep.mubr.f32.mxu0 %v22003_v8  ;;  %vm22036_vm14 = vcmask 990208   ;;  %v11764_v26 = vld [vmem:[%s21903_s5] sm:$0xff] }
 0xcd7   : > { %11384 = vrot.lane.b32.xlu0 %v11372_v58, %s17925_s12  ;;  %9092 = vmatprep.subr.mxu0 %v9052_v50  ;;  %v9053_v43 = vsel %vm22035_vm7, %v9046_v14, %v9048_v2 }
 0xcd8   : > { %11599 = vrot.lane.b32.xlu1 %v11586_v55, %s17924_s9  ;;  %8979 = vmatprep.mubr.f32.mxu1 %v22003_v8 }
 0xcd9   : > { %v9050_v40 = vpop.permute.xlu0 %9049  ;;  %17720 = vmatmul.mubr.msk.f32.vlgmr.msra.gmra.mxu0 %vm429_vm8, %v17719_v36  ;;  %17721 = vmatmul.mubr.msk.f32.vlgmr.msra.gmra.mxu1 %vm429_vm8, %v17719_v36 }
 0xcda   : > { %v9042_v33 = vpop.permute.xlu1 %9041  ;;  %v9054_v48 = vsel %vm22033_vm15, %v9048_v2, %v9050_v40  ;;  %9197 = vmatprep.mubr.f32.mxu1 %v22003_v8  ;;  %9126 = vmatprep.mubr.f32.mxu0 %v22003_v8  ;;  %vm22037_vm15 = vmmov %vm22036_vm14 }
 0xcdb   : > { %v9051_v25 = vsel %vm22034_vm13, %v9042_v33, %v9044_v63  ;;  %11601 = vrot.lane.b32.xlu0 %v11587_v16, %s17924_s9  ;;  %9163 = vmatprep.subr.mxu1 %v9054_v48  ;;  %vm22038_vm13 = vmmov %vm22036_vm14 }
 0xcdc   : > { %11603 = vrot.lane.b32.xlu1 %v11588_v41, %s17924_s9  ;;  %9093 = vmatpush1.msra.mxu0 %v9051_v25  ;;  %vm22039_vm7 = vmmov %vm22038_vm13 }
 0xcdd   : > { %9164 = vmatpush1.msra.mxu1 %v9053_v43  ;;  %v9257_v12 = vpop.permute.xlu0 %9256  ;;  %17724 = vmatmul.mubr.msk.f32.vlgmr.msra.gmra.mxu0 %vm429_vm8, %v17723_v47 }
 0xcde   : > { %v9259_v38 = vpop.permute.xlu1 %9258  ;;  %17725 = vmatmul.mubr.msk.f32.vlgmr.msra.gmra.mxu1 %vm429_vm8, %v17723_v47  ;;  %9339 = vmatprep.mubr.f32.mxu0 %v22003_v8 }
 0xcdf   : > { %11605 = vrot.lane.b32.xlu0 %v11589_v31, %s17924_s9  ;;  %v9265_v60 = vsel %vm22036_vm14, %v9257_v12, %v9259_v38  ;;  %9410 = vmatprep.mubr.f32.mxu1 %v22003_v8  ;;  %vm22040_vm14 = vcmask 588800  }
 0xce0   : > { %11597 = vrot.lane.b32.xlu1 %v11585_v28, %s17924_s9  ;;  %9305 = vmatprep.subr.mxu0 %v9265_v60  ;;  %v17743_v28 = vld [vmem:[%s21902_s4 + $0x98] sm:$0xff] }
 0xce1   : > { %v9261_v21 = vpop.permute.xlu0 %9260 }
 0xce2   : > { %v9263_v24 = vpop.permute.xlu1 %9262  ;;  %v9266_v29 = vsel %vm22038_vm13, %v9259_v38, %v9261_v21  ;;  %vm22042_vm13 = vmmov %vm22040_vm14 }
 0xce3   : > { %11767 = vperm.xlu0 %17910, %v11764_v26   ;;  %v9267_v49 = vsel %vm22037_vm15, %v9261_v21, %v9263_v24  ;;  %vm22041_vm15 = vmmov %vm22040_vm14 }
 0xce4   : > { %9376 = vmatprep.subr.mxu1 %v9267_v49  ;;  %11813 = vrot.lane.b32.xlu1 %v11800_v18, %s17924_s9 }
 0xce5   : > { %9377 = vmatpush1.msra.mxu1 %v9266_v29  ;;  %v9255_v27 = vpop.permute.xlu0 %9254 }
 0xce6   : > { %v9264_v37 = vsel %vm22039_vm7, %v9255_v27, %v9257_v12  ;;  %v9470_v56 = vpop.permute.xlu1 %9469  ;;  %17729 = vmatmul.mubr.msk.f32.vlgmr.msra.gmra.mxu1 %vm429_vm8, %v17727_v22  ;;  %vm22043_vm7 = vmmov %vm22042_vm13 }
 0xce7   : > { %9306 = vmatpush1.msra.mxu0 %v9264_v37  ;;  %9623 = vmatprep.mubr.f32.mxu1 %v22003_v8 }
 0xce8   : > { %17728 = vmatmul.mubr.msk.f32.vlgmr.msra.gmra.mxu0 %vm429_vm8, %v17727_v22  ;;  %11815 = vrot.lane.b32.xlu0 %v11804_v62, %s17924_s9  ;;  %v17747_v22 = vld [vmem:[%s21902_s4 + $0xa0] sm:$0xff] }
 0xce9   : > { %v9472_v0 = vpop.permute.xlu0 %9471  ;;  %9552 = vmatprep.mubr.f32.mxu0 %v22003_v8  ;;  %11817 = vrot.lane.b32.xlu1 %v11808_v15, %s17924_s9 }
 0xcea   : > { %v9474_v44 = vpop.permute.xlu1 %9473  ;;  %v9478_v11 = vsel %vm2490_vm12, %v9470_v56, %v9472_v0 }
 0xceb   : > { %9518 = vmatprep.subr.mxu0 %v9478_v11  ;;  %v9479_v32 = vsel %vm2490_vm12, %v9472_v0, %v9474_v44  ;;  %v17751_v0 = vld [vmem:[%s21902_s4 + $0xa8] sm:$0xff] }
 0xcec   : > { %11819 = vrot.lane.b32.xlu0 %v11812_v39, %s17924_s9 }
 0xced   : > { %v9476_v23 = vpop.permute.xlu0 %9475  ;;  %11853 = vrot.lane.b32.xlu1 %v11840_v7, %s17925_s12 }
 0xcee   : > { %v9468_v45 = vpop.permute.xlu1 %9467  ;;  %v9480_v42 = vsel %vm2490_vm12, %v9474_v44, %v9476_v23 }
 0xcef   : > { %v9477_v30 = vsel %vm2490_vm12, %v9468_v45, %v9470_v56  ;;  %9589 = vmatprep.subr.mxu1 %v9480_v42 }
 0xcf0   : > { %9519 = vmatpush1.msra.mxu0 %v9477_v30  ;;  %9590 = vmatpush1.msra.mxu1 %v9479_v32 }
 0xcf1   : > { %v9683_v52 = vpop.permute.xlu0 %9682  ;;  %17733 = vmatmul.mubr.msk.f32.vlgmr.msra.gmra.mxu1 %vm429_vm8, %v17731_v46  ;;  %17732 = vmatmul.mubr.msk.f32.vlgmr.msra.gmra.mxu0 %vm429_vm8, %v17731_v46 }
 0xcf2   : > { %v9685_v13 = vpop.permute.xlu1 %9684  ;;  %9765 = vmatprep.mubr.f32.mxu0 %v22003_v8  ;;  %9836 = vmatprep.mubr.f32.mxu1 %v22003_v8 }
 0xcf3   : > { %v9691_v35 = vsel %vm2274_vm10, %v9683_v52, %v9685_v13  ;;  %11855 = vrot.lane.b32.xlu0 %v11844_v20, %s17925_s12  ;;  %11857 = vrot.lane.b32.xlu1 %v11848_v34, %s17925_s12  ;;  %v17755_v34 = vld [vmem:[%s21902_s4 + $0xb0] sm:$0xff] }
 0xcf4   : > { %9731 = vmatprep.subr.mxu0 %v9691_v35 }
 0xcf5   : > { %v9687_v57 = vpop.permute.xlu0 %9686 }
 0xcf6   : > { %v9689_v19 = vpop.permute.xlu1 %9688  ;;  %v9692_v17 = vsel %vm2274_vm10, %v9685_v13, %v9687_v57 }
 0xcf7   : > { %v9693_v59 = vsel %vm2274_vm10, %v9687_v57, %v9689_v19  ;;  %11859 = vrot.lane.b32.xlu0 %v11852_v51, %s17925_s12 }
 0xcf8   : > { %9802 = vmatprep.subr.mxu1 %v9693_v59 }
 0xcf9   : > { %9803 = vmatpush1.msra.mxu1 %v9692_v17  ;;  %v9681_v63 = vpop.permute.xlu0 %9680  ;;  %v17759_v17 = vld [vmem:[%s21902_s4 + $0xb8] sm:$0xff] }
 0xcfa   : > { %v9690_v10 = vsel %vm2274_vm10, %v9681_v63, %v9683_v52  ;;  %v9896_v58 = vpop.permute.xlu1 %9895  ;;  %17737 = vmatmul.mubr.msk.f32.vlgmr.msra.gmra.mxu1 %vm429_vm8, %v17735_v1 }
 0xcfb   : > { %9732 = vmatpush1.msra.mxu0 %v9690_v10  ;;  %10049 = vmatprep.mubr.f32.mxu1 %v22003_v8 }
 0xcfc   : > { %17736 = vmatmul.mubr.msk.f32.vlgmr.msra.gmra.mxu0 %vm429_vm8, %v17735_v1 }
 0xcfd   : > { %v9898_v14 = vpop.permute.xlu0 %9897  ;;  %9978 = vmatprep.mubr.f32.mxu0 %v22003_v8 }
 0xcfe   : > { %v9900_v55 = vpop.permute.xlu1 %9899  ;;  %v9904_v54 = vsel %vm590_vm9, %v9896_v58, %v9898_v14 }
 0xcff   : > { %9944 = vmatprep.subr.mxu0 %v9904_v54  ;;  %v9905_v40 = vsel %vm590_vm9, %v9898_v14, %v9900_v55 }
 0xd01   : > { %v9902_v2 = vpop.permute.xlu0 %9901 }
 0xd02   : > { %v9894_v50 = vpop.permute.xlu1 %9893  ;;  %v9906_v36 = vsel %vm590_vm9, %v9900_v55, %v9902_v2 }
 0xd03   : > { %v9903_v16 = vsel %vm590_vm9, %v9894_v50, %v9896_v58  ;;  %10015 = vmatprep.subr.mxu1 %v9906_v36 }
 0xd04   : > { %9945 = vmatpush1.msra.mxu0 %v9903_v16  ;;  %10016 = vmatpush1.msra.mxu1 %v9905_v40  ;;  %v17763_v16 = vld [vmem:[%s21902_s4 + $0xc0] sm:$0xff] }
 0xd05   : > { %v10109_v41 = vpop.permute.xlu0 %10108  ;;  %17740 = vmatmul.mubr.msk.f32.vlgmr.msra.gmra.mxu0 %vm429_vm8, %v17739_v9  ;;  %17741 = vmatmul.mubr.msk.f32.vlgmr.msra.gmra.mxu1 %vm429_vm8, %v17739_v9 }
 0xd06   : > { %v10111_v33 = vpop.permute.xlu1 %10110  ;;  %10191 = vmatprep.mubr.f32.mxu0 %v22003_v8  ;;  %10262 = vmatprep.mubr.f32.mxu1 %v22003_v8 }
 0xd07   : > { %v10117_v48 = vsel %vm22040_vm14, %v10109_v41, %v10111_v33 }
 0xd08   : > { %10157 = vmatprep.subr.mxu0 %v10117_v48 }
 0xd09   : > { %v10113_v25 = vpop.permute.xlu0 %10112 }
 0xd0a   : > { %v10115_v47 = vpop.permute.xlu1 %10114  ;;  %v10118_v31 = vsel %vm22042_vm13, %v10111_v33, %v10113_v25 }
 0xd0b   : > { %v10119_v43 = vsel %vm22041_vm15, %v10113_v25, %v10115_v47 }
 0xd0c   : > { %10228 = vmatprep.subr.mxu1 %v10119_v43 }
 0xd0d   : > { %10229 = vmatpush1.msra.mxu1 %v10118_v31  ;;  %v10107_v12 = vpop.permute.xlu0 %10106 }
 0xd0e   : > { %v10116_v38 = vsel %vm22043_vm7, %v10107_v12, %v10109_v41  ;;  %v10322_v53 = vpop.permute.xlu1 %10321  ;;  %17745 = vmatmul.mubr.msk.f32.vlgmr.msra.gmra.mxu1 %vm429_vm8, %v17743_v28  ;;  %v17767_v12 = vld [vmem:[%s21902_s4 + $0xc8] sm:$0xff] }
 0xd0f   : > { %10158 = vmatpush1.msra.mxu0 %v10116_v38  ;;  %10475 = vmatprep.mubr.f32.mxu1 %v22003_v8 }
 0xd10   : > { %17744 = vmatmul.mubr.msk.f32.vlgmr.msra.gmra.mxu0 %vm429_vm8, %v17743_v28 }
 0xd11   : > { %v10324_v60 = vpop.permute.xlu0 %10323  ;;  %10404 = vmatprep.mubr.f32.mxu0 %v22003_v8 }
 0xd12   : > { %v10326_v26 = vpop.permute.xlu1 %10325  ;;  %v10330_v18 = vsel %vm802_vm6, %v10322_v53, %v10324_v60 }
 0xd13   : > { %10370 = vmatprep.subr.mxu0 %v10330_v18  ;;  %v10331_v62 = vsel %vm802_vm6, %v10324_v60, %v10326_v26 }
 0xd15   : > { %v10328_v21 = vpop.permute.xlu0 %10327 }
 0xd16   : > { %v10320_v24 = vpop.permute.xlu1 %10319  ;;  %v10332_v49 = vsel %vm802_vm6, %v10326_v26, %v10328_v21 }
 0xd17   : > { %v10329_v29 = vsel %vm802_vm6, %v10320_v24, %v10322_v53  ;;  %10441 = vmatprep.subr.mxu1 %v10332_v49 }
 0xd18   : > { %10371 = vmatpush1.msra.mxu0 %v10329_v29  ;;  %10442 = vmatpush1.msra.mxu1 %v10331_v62  ;;  %v17771_v29 = vld [vmem:[%s21902_s4 + $0xd0] sm:$0xff]  ;;  %v20351_v62 = vpop.f32.mrf.mxu0 }
 0xd19   : > { %17748 = vmatmul.mubr.msk.f32.vlgmr.msra.gmra.mxu0 %vm429_vm8, %v17747_v22  ;;  %17749 = vmatmul.mubr.msk.f32.vlgmr.msra.gmra.mxu1 %vm429_vm8, %v17747_v22  ;;  %v10535_v27 = vpop.permute.xlu0 %10534 }
 0xd1a   : > { %v10537_v15 = vpop.permute.xlu1 %10536  ;;  %10688 = vmatprep.mubr.f32.mxu1 %v22003_v8  ;;  %10617 = vmatprep.mubr.f32.mxu0 %v22003_v8 }
 0xd1b   : > { %v10543_v37 = vsel %vm1018_vm5, %v10535_v27, %v10537_v15 }
 0xd1c   : > { %10583 = vmatprep.subr.mxu0 %v10543_v37  ;;  %v20355_v37 = vpop.f32.mrf.mxu1 }
 0xd1d   : > { %v10539_v56 = vpop.permute.xlu0 %10538 }
 0xd1e   : > { %v10541_v61 = vpop.permute.xlu1 %10540  ;;  %v10544_v7 = vsel %vm1018_vm5, %v10537_v15, %v10539_v56 }
 0xd1f   : > { %v10545_v39 = vsel %vm1018_vm5, %v10539_v56, %v10541_v61  ;;  %v20359_v56 = vpop.f32.mrf.mxu0  ;;  %v20363_v61 = vpop.f32.mrf.mxu1 }
 0xd20   : > { %10654 = vmatprep.subr.mxu1 %v10545_v39 }
 0xd21   : > { %10655 = vmatpush1.msra.mxu1 %v10544_v7  ;;  %v10533_v44 = vpop.permute.xlu0 %10532  ;;  %v6420_v39 = vpop.f32.mrf.mxu0 }
 0xd22   : > { %v10542_v11 = vsel %vm1018_vm5, %v10533_v44, %v10535_v27  ;;  %v10748_v23 = vpop.permute.xlu1 %10747  ;;  %17753 = vmatmul.mubr.msk.f32.vlgmr.msra.gmra.mxu1 %vm429_vm8, %v17751_v0 }
 0xd23   : > { %10584 = vmatpush1.msra.mxu0 %v10542_v11  ;;  %10901 = vmatprep.mubr.f32.mxu1 %v22003_v8  ;;  %v6422_v7 = vpop.f32.mrf.mxu0 }
 0xd24   : > { %17752 = vmatmul.mubr.msk.f32.vlgmr.msra.gmra.mxu0 %vm429_vm8, %v17751_v0  ;;  %v6491_v0 = vpop.f32.mrf.mxu1  ;;  %v6423_v3 = vadd.f32 %v6422_v7, %v20359_v56 }
 0xd25   : > { %v10750_v45 = vpop.permute.xlu0 %10749  ;;  %10830 = vmatprep.mubr.f32.mxu0 %v22003_v8  ;;  %v20367_v11 = vpop.f32.mrf.mxu0  ;;  %v6492_v5 = vadd.f32 %v6491_v0, %v20355_v37 }
 0xd26   : > { %v10752_v42 = vpop.permute.xlu1 %10751  ;;  %v10756_v46 = vsel %vm1203_vm4, %v10748_v23, %v10750_v45  ;;  %v20365_v44 = vpop.f32.mrf.mxu1 }
 0xd27   : > { %10796 = vmatprep.subr.mxu0 %v10756_v46  ;;  %v10757_v13 = vsel %vm1203_vm4, %v10750_v45, %v10752_v42  ;;  %v20371_v45 = vpop.f32.mrf.mxu0 }
 0xd29   : > { %v10754_v30 = vpop.permute.xlu0 %10753  ;;  %v20375_v46 = vpop.f32.mrf.mxu0 }
 0xd2a   : > { %v10746_v32 = vpop.permute.xlu1 %10745  ;;  %v10758_v20 = vsel %vm1203_vm4, %v10752_v42, %v10754_v30 }
 0xd2b   : > { %v10755_v52 = vsel %vm1203_vm4, %v10746_v32, %v10748_v23  ;;  %10867 = vmatprep.subr.mxu1 %v10758_v20  ;;  %v20369_v23 = vpop.f32.mrf.mxu1  ;;  %v20379_v32 = vpop.f32.mrf.mxu0 }
 0xd2c   : > { %10797 = vmatpush1.msra.mxu0 %v10755_v52  ;;  %10868 = vmatpush1.msra.mxu1 %v10757_v13 }
 0xd2d   : > { %17756 = vmatmul.mubr.msk.f32.vlgmr.msra.gmra.mxu0 %vm429_vm8, %v17755_v34  ;;  %17757 = vmatmul.mubr.msk.f32.vlgmr.msra.gmra.mxu1 %vm429_vm8, %v17755_v34  ;;  %v10961_v35 = vpop.permute.xlu0 %10960  ;;  %v20373_v42 = vpop.f32.mrf.mxu1 }
 0xd2e   : > { %v10963_v51 = vpop.permute.xlu1 %10962  ;;  %11114 = vmatprep.mubr.f32.mxu1 %v22003_v8  ;;  %11043 = vmatprep.mubr.f32.mxu0 %v22003_v8  ;;  %v20383_v34 = vpop.f32.mrf.mxu0 }
 0xd2f   : > { %v10969_v57 = vsel %vm987_vm3, %v10961_v35, %v10963_v51  ;;  %v20377_v30 = vpop.f32.mrf.mxu1 }
 0xd30   : > { %11009 = vmatprep.subr.mxu0 %v10969_v57  ;;  %v20387_v13 = vpop.f32.mrf.mxu0 }
 0xd31   : > { %v10965_v19 = vpop.permute.xlu0 %10964  ;;  %v20381_v20 = vpop.f32.mrf.mxu1 }
 0xd32   : > { %v10967_v59 = vpop.permute.xlu1 %10966  ;;  %v10970_v63 = vsel %vm987_vm3, %v10963_v51, %v10965_v19  ;;  %v20391_v51 = vpop.f32.mrf.mxu0 }
 0xd33   : > { %v10971_v1 = vsel %vm987_vm3, %v10965_v19, %v10967_v59  ;;  %v20385_v52 = vpop.f32.mrf.mxu1 }
 0xd34   : > { %11080 = vmatprep.subr.mxu1 %v10971_v1  ;;  %v20395_v19 = vpop.f32.mrf.mxu0 }
 0xd35   : > { %11081 = vmatpush1.msra.mxu1 %v10970_v63  ;;  %v10959_v10 = vpop.permute.xlu0 %10958 }
 0xd36   : > { %v10968_v58 = vsel %vm987_vm3, %v10959_v10, %v10961_v35  ;;  %v11174_v14 = vpop.permute.xlu1 %11173  ;;  %17761 = vmatmul.mubr.msk.f32.vlgmr.msra.gmra.mxu1 %vm429_vm8, %v17759_v17  ;;  %v20389_v35 = vpop.f32.mrf.mxu1 }
 0xd37   : > { %11010 = vmatpush1.msra.mxu0 %v10968_v58  ;;  %11327 = vmatprep.mubr.f32.mxu1 %v22003_v8  ;;  %v20399_v1 = vpop.f32.mrf.mxu0 }
 0xd38   : > { %17760 = vmatmul.mubr.msk.f32.vlgmr.msra.gmra.mxu0 %vm429_vm8, %v17759_v17  ;;  %v20393_v57 = vpop.f32.mrf.mxu1 }
 0xd39   : > { %v11176_v55 = vpop.permute.xlu0 %11175  ;;  %11256 = vmatprep.mubr.f32.mxu0 %v22003_v8  ;;  %v20403_v63 = vpop.f32.mrf.mxu0 }
 0xd3a   : > { %v11178_v54 = vpop.permute.xlu1 %11177  ;;  %v11182_v2 = vsel %vm771_vm2, %v11174_v14, %v11176_v55  ;;  %v20397_v59 = vpop.f32.mrf.mxu1 }
 0xd3b   : > { %11222 = vmatprep.subr.mxu0 %v11182_v2  ;;  %v11183_v41 = vsel %vm771_vm2, %v11176_v55, %v11178_v54  ;;  %v20407_v58 = vpop.f32.mrf.mxu0 }
 0xd3c   : > { %v20401_v17 = vpop.f32.mrf.mxu1 }
 0xd3d   : > { %v11180_v50 = vpop.permute.xlu0 %11179  ;;  %v20414_v2 = vpop.f32.mrf.mxu0 }
 0xd3e   : > { %v11172_v36 = vpop.permute.xlu1 %11171  ;;  %v11184_v9 = vsel %vm771_vm2, %v11178_v54, %v11180_v50  ;;  %v20405_v10 = vpop.f32.mrf.mxu1 }
 0xd3f   : > { %v11181_v40 = vsel %vm771_vm2, %v11172_v36, %v11174_v14  ;;  %11293 = vmatprep.subr.mxu1 %v11184_v9  ;;  %v20421_v9 = vpop.f32.mrf.mxu0 }
 0xd40   : > { %11223 = vmatpush1.msra.mxu0 %v11181_v40  ;;  %11294 = vmatpush1.msra.mxu1 %v11183_v41  ;;  %v20409_v14 = vpop.f32.mrf.mxu1 }
 0xd41   : > { %17764 = vmatmul.mubr.msk.f32.vlgmr.msra.gmra.mxu0 %vm429_vm8, %v17763_v16  ;;  %17765 = vmatmul.mubr.msk.f32.vlgmr.msra.gmra.mxu1 %vm429_vm8, %v17763_v16  ;;  %v11387_v33 = vpop.permute.xlu0 %11386 }
 0xd42   : > { %v11389_v48 = vpop.permute.xlu1 %11388  ;;  %11540 = vmatprep.mubr.f32.mxu1 %v22003_v8  ;;  %11469 = vmatprep.mubr.f32.mxu0 %v22003_v8  ;;  %v20417_v50 = vpop.f32.mrf.mxu1 }
 0xd43   : > { %v11395_v25 = vsel %vm389_vm0, %v11387_v33, %v11389_v48 }
 0xd44   : > { %11435 = vmatprep.subr.mxu0 %v11395_v25  ;;  %v20423_v16 = vpop.f32.mrf.mxu1  ;;  %v20436_v25 = vld [vmem:[%s21898_s0 + $0x8] sm:$0xf] }
 0xd45   : > { %v11391_v47 = vpop.permute.xlu0 %11390  ;;  %22047 = vst [vmem:[#allocation10_spill] sm:$0xff] %v20436_v25 }
 0xd46   : > { %v11393_v43 = vpop.permute.xlu1 %11392  ;;  %v11396_v28 = vsel %vm389_vm0, %v11389_v48, %v11391_v47  ;;  %v20431_v48 = vpop.f32.mrf.mxu1 }
 0xd47   : > { %v11397_v31 = vsel %vm389_vm0, %v11391_v47, %v11393_v43 }
 0xd48   : > { %11506 = vmatprep.subr.mxu1 %v11397_v31  ;;  %v20440_v43 = vpop.f32.mrf.mxu1  ;;  %v12217_v31 = vrot.slane %v20436_v25, %v18001_v4 }
 0xd49   : > { %11507 = vmatpush1.msra.mxu1 %v11396_v28  ;;  %v11385_v38 = vpop.permute.xlu0 %11384 }
 0xd4a   : > { %v11394_v53 = vsel %vm389_vm0, %v11385_v38, %v11387_v33  ;;  %v11600_v60 = vpop.permute.xlu1 %11599  ;;  %17769 = vmatmul.mubr.msk.f32.vlgmr.msra.gmra.mxu1 %vm429_vm8, %v17767_v12  ;;  %v20429_v33 = vpop.f32.mrf.mxu0 }
 0xd4b   : > { %11436 = vmatpush1.msra.mxu0 %v11394_v53  ;;  %11753 = vmatprep.mubr.f32.mxu1 %v22003_v8  ;;  %v20447_v28 = vpop.f32.mrf.mxu1 }
 0xd4c   : > { %17768 = vmatmul.mubr.msk.f32.vlgmr.msra.gmra.mxu0 %vm429_vm8, %v17767_v12  ;;  %v20438_v47 = vpop.f32.mrf.mxu0 }
 0xd4d   : > { %v11602_v26 = vpop.permute.xlu0 %11601  ;;  %11682 = vmatprep.mubr.f32.mxu0 %v22003_v8 }
 0xd4e   : > { %v11604_v18 = vpop.permute.xlu1 %11603  ;;  %v11608_v21 = vsel %vm347_vm1, %v11600_v60, %v11602_v26  ;;  %v20445_v12 = vpop.f32.mrf.mxu0 }
 0xd4f   : > { %11648 = vmatprep.subr.mxu0 %v11608_v21  ;;  %v11609_v15 = vsel %vm347_vm1, %v11602_v26, %v11604_v18 }
 0xd51   : > { %v11606_v24 = vpop.permute.xlu0 %11605 }
 0xd52   : > { %v11598_v49 = vpop.permute.xlu1 %11597  ;;  %v11610_v22 = vsel %vm347_vm1, %v11604_v18, %v11606_v24 }
 0xd53   : > { %v11607_v27 = vsel %vm347_vm1, %v11598_v49, %v11600_v60  ;;  %11719 = vmatprep.subr.mxu1 %v11610_v22 }
 0xd54   : > { %11649 = vmatpush1.msra.mxu0 %v11607_v27  ;;  %11720 = vmatpush1.msra.mxu1 %v11609_v15 }
 0xd55   : > { %17772 = vmatmul.mubr.msk.f32.vlgmr.msra.gmra.mxu0 %vm429_vm8, %v17771_v29  ;;  %17773 = vmatmul.mubr.msk.f32.vlgmr.msra.gmra.mxu1 %vm429_vm8, %v17771_v29 }
 0xd56   : > { %11966 = vmatprep.mubr.f32.mxu0 %v22003_v8  ;;  %12037 = vmatprep.mubr.f32.mxu1 %v22003_v8  ;;  %v20411_v55 = vpop.permute.xlu1 %11813  ;;  %v6421_v8 = vadd.f32 %v6420_v39, %v20351_v62 }
 0xd57   : > { %22044 = vst [vmem:[#allocation8_spill] sm:$0xff] %v20411_v55  ;;  %v11829_v54 = vmul.f32 0.0, %v20411_v55  ;;  %v6494_v55 = vadd.f32 %v20365_v44, %v20363_v61 }
 0xd59   : > { %12049 = vrot.lane.b32.xlu0 %v11829_v54, %s17932_s19  ;;  %v6708_v56 = vadd.f32 %v20373_v42, %v6494_v55 }
 0xd5b   : > { %v20419_v36 = vpop.permute.xlu1 %11817 }
 0xd5c   : > { %22045 = vst [vmem:[#allocation11_spill] sm:$0xff] %v20419_v36  ;;  %v6705_v36 = vadd.f32 %v20367_v11, %v6421_v8 }
 0xd5e   : > { %v6918_v37 = vadd.f32 %v20375_v46, %v6705_v36 }
 0xd5f   : > { %v20425_v40 = vpop.permute.xlu1 %11853 }
 0xd60   : > { %22046 = vst [vmem:[#allocation13_spill] sm:$0xff] %v20425_v40  ;;  %v11869_v41 = vmul.f32 0.0, %v20425_v40  ;;  %v6707_v40 = vadd.f32 %v20369_v23, %v6492_v5  ;;  %v7131_v5 = vadd.f32 %v20383_v34, %v6918_v37 }
 0xd62   : > { %11881 = vrot.lane.b32.xlu1 %v11869_v41, %s17931_s11  ;;  %v6920_v39 = vadd.f32 %v20377_v30, %v6707_v40 }
 0xd64   : > { %v7133_v61 = vadd.f32 %v20385_v52, %v6920_v39 }
 0xd66   : > { %12230 = vrot.lane.b32.xlu1 %v12217_v31, %s17926_s15  ;;  %v7346_v46 = vadd.f32 %v20393_v57, %v7133_v61 }
 0xd75   : > { %v20449_v38 = vpop.f32.mrf.mxu0 }
 0xd77   : > { %v20453_v60 = vpop.f32.mrf.mxu0 }
 0xd79   : > { %v20451_v53 = vpop.f32.mrf.mxu1 }
 0xd7b   : > { %v20455_v26 = vpop.f32.mrf.mxu1 }
 0xd89   : > { %v20457_v18 = vpop.f32.mrf.mxu0 }
 0xd8a   : > { %v20459_v21 = vpop.f32.mrf.mxu1 }
 0xd8b   : > { %v20461_v24 = vpop.f32.mrf.mxu0 }
 0xd8c   : > { %v20463_v49 = vpop.f32.mrf.mxu1 }
 0xd92   : > { %v20467_v29 = vpop.f32.mrf.mxu1 }
 0xd94   : > { %v20471_v15 = vpop.f32.mrf.mxu1 }
 0xd95   : > { %v20465_v22 = vpop.f32.mrf.mxu0 }
 0xd97   : > { %v20469_v27 = vpop.f32.mrf.mxu0 }
 0xd99   : > { %v20473_v54 = vpop.f32.mrf.mxu0  ;;  %v20475_v41 = vpop.f32.mrf.mxu1 }
 0xd9b   : > { %v20477_v31 = vpop.f32.mrf.mxu0  ;;  %v20479_v4 = vpop.f32.mrf.mxu1 }
 0xd9c   : > { %22048 = vst [vmem:[#allocation12_spill] sm:$0xff] %v20477_v31  ;;  %22049 = vst [vmem:[#allocation15_spill] sm:$0xff] %v20479_v4  ;;  %v6706_v31 = vadd.f32 %v20371_v45, %v6423_v3  ;;  %v6921_v3 = vadd.f32 %v20381_v20, %v6708_v56  ;;  %v7344_v45 = vadd.f32 %v20391_v51, %v7131_v5 }
 0xd9d   : > { %v20484_v25 = vpop.f32.mrf.mxu0 }
 0xd9e   : > { %v20486_v6 = vpop.f32.mrf.mxu1  ;;  %v6919_v0 = vadd.f32 %v20379_v32, %v6706_v31  ;;  %v7134_v42 = vadd.f32 %v20389_v35, %v6921_v3  ;;  %v7557_v20 = vadd.f32 %v20399_v1, %v7344_v45 }
 0xd9f   : > { %v20493_v4 = vpop.f32.mrf.mxu0 }
 0xda0   : > { %v20495_v62 = vpop.f32.mrf.mxu1  ;;  %v7132_v44 = vadd.f32 %v20387_v13, %v6919_v0  ;;  %v7347_v52 = vadd.f32 %v20397_v59, %v7134_v42  ;;  %v7559_v13 = vadd.f32 %v20401_v17, %v7346_v46  ;;  %v7770_v35 = vadd.f32 %v20407_v58, %v7557_v20 }
 0xda2   : > { %v7345_v30 = vadd.f32 %v20395_v19, %v7132_v44  ;;  %v7560_v57 = vadd.f32 %v20405_v10, %v7347_v52  ;;  %v7772_v19 = vadd.f32 %v20409_v14, %v7559_v13  ;;  %v7983_v59 = vadd.f32 %v20421_v9, %v7770_v35 }
 0xda3   : > { %v22050_v20 = vld [vmem:[#allocation12_spill] sm:$0xff]  ;;  %v22051_v13 = vld [vmem:[#allocation15_spill] sm:$0xff] }
 0xda4   : > { %v7558_v55 = vadd.f32 %v20403_v63, %v7345_v30  ;;  %v7773_v17 = vadd.f32 %v20417_v50, %v7560_v57  ;;  %v7985_v63 = vadd.f32 %v20423_v16, %v7772_v19  ;;  %v8196_v58 = vadd.f32 %v20438_v47, %v7983_v59 }
 0xda6   : > { %v20503_v7 = vpop.f32.mrf.mxu1  ;;  %v7771_v40 = vadd.f32 %v20414_v2, %v7558_v55  ;;  %v7986_v10 = vadd.f32 %v20431_v48, %v7773_v17  ;;  %v8198_v14 = vadd.f32 %v20440_v43, %v7985_v63  ;;  %v8409_v9 = vadd.f32 %v20449_v38, %v8196_v58 }
 0xda8   : > { %v20501_v8 = vpop.f32.mrf.mxu0  ;;  %v20511_v23 = vpop.f32.mrf.mxu1  ;;  %v7984_v37 = vadd.f32 %v20429_v33, %v7771_v40  ;;  %v8199_v50 = vadd.f32 %v20447_v28, %v7986_v10  ;;  %v8411_v16 = vadd.f32 %v20451_v53, %v8198_v14  ;;  %v8622_v47 = vadd.f32 %v20457_v18, %v8409_v9 }
 0xdaa   : > { %v20509_v11 = vpop.f32.mrf.mxu0  ;;  %v8197_v2 = vadd.f32 %v20445_v12, %v7984_v37  ;;  %v8412_v48 = vadd.f32 %v20455_v26, %v8199_v50  ;;  %v8624_v43 = vadd.f32 %v20459_v21, %v8411_v16  ;;  %v8835_v38 = vadd.f32 %v20465_v22, %v8622_v47  ;;  %v20570_v50 = vpop.permute.xlu0 %11767 }
 0xdac   : > { %v8410_v33 = vadd.f32 %v20453_v60, %v8197_v2  ;;  %v8625_v28 = vadd.f32 %v20463_v49, %v8412_v48  ;;  %v8837_v53 = vadd.f32 %v20467_v29, %v8624_v43  ;;  %v8986_v18 = vadd.f32 %v20473_v54, %v8835_v38 }
 0xdae   : > { %v8623_v12 = vadd.f32 %v20461_v24, %v8410_v33  ;;  %v8838_v26 = vadd.f32 %v20471_v15, %v8625_v28  ;;  %v8988_v21 = vadd.f32 %v20475_v41, %v8837_v53  ;;  %v9204_v22 = vadd.f32 %v20484_v25, %v8986_v18 }
 0xdb0   : > { %v8836_v60 = vadd.f32 %v20469_v27, %v8623_v12  ;;  %v8989_v49 = vadd.f32 %v22051_v13, %v8838_v26  ;;  %v9206_v29 = vadd.f32 %v20486_v6, %v8988_v21  ;;  %v9417_v15 = vadd.f32 %v20501_v8, %v9204_v22 }
 0xdb1   : > { %v20517_v32 = vpop.f32.mrf.mxu0  ;;  %v20519_v34 = vpop.f32.mrf.mxu1 }
 0xdb2   : > { %v8987_v52 = vadd.f32 %v22050_v20, %v8836_v60  ;;  %v9207_v41 = vadd.f32 %v20495_v62, %v8989_v49  ;;  %v9419_v19 = vadd.f32 %v20503_v7, %v9206_v29  ;;  %v9630_v17 = vadd.f32 %v20517_v32, %v9417_v15 }
 0xdb3   : > { %v20525_v36 = vpop.f32.mrf.mxu0  ;;  %v20527_v51 = vpop.f32.mrf.mxu1 }
 0xdb4   : > { %v9205_v35 = vadd.f32 %v20493_v4, %v8987_v52  ;;  %v9420_v6 = vadd.f32 %v20511_v23, %v9207_v41  ;;  %v9632_v63 = vadd.f32 %v20519_v34, %v9419_v19 }
 0xdb6   : > { %v9418_v40 = vadd.f32 %v20509_v11, %v9205_v35  ;;  %v9633_v8 = vadd.f32 %v20527_v51, %v9420_v6 }
 0xdb8   : > { %v9631_v58 = vadd.f32 %v20525_v36, %v9418_v40 }
 0xdba   : > { %v9838_v1 = vpop.f32.mrf.mxu1 }
 0xdbb   : > { %v9845_v62 = vadd.f32 %v9838_v1, %v9632_v63 }
 0xdbc   : > { %v9767_v31 = vpop.f32.mrf.mxu0  ;;  %v9840_v39 = vpop.f32.mrf.mxu1 }
 0xdbd   : > { %v9843_v10 = vadd.f32 %v9767_v31, %v9630_v17  ;;  %v9846_v16 = vadd.f32 %v9840_v39, %v9633_v8  ;;  %v20572_v31 = vpop.permute.xlu0 %11815 }
 0xdbe   : > { %v9769_v56 = vpop.f32.mrf.mxu0 }
 0xdbf   : > { %v9844_v2 = vadd.f32 %v9769_v56, %v9631_v58 }
 0xdc5   : > { %v9980_v0 = vpop.f32.mrf.mxu0  ;;  %v10051_v5 = vpop.f32.mrf.mxu1 }
 0xdc6   : > { %v10056_v32 = vadd.f32 %v9980_v0, %v9843_v10  ;;  %v10058_v23 = vadd.f32 %v10051_v5, %v9845_v62 }
 0xdc7   : > { %v9982_v3 = vpop.f32.mrf.mxu0  ;;  %v10053_v61 = vpop.f32.mrf.mxu1 }
 0xdc8   : > { %v10057_v33 = vadd.f32 %v9982_v3, %v9844_v2  ;;  %v10059_v43 = vadd.f32 %v10053_v61, %v9846_v16  ;;  %v22053_v16 = vld [vmem:[#allocation8_spill] sm:$0xff] }
 0xdce   : > { %v10264_v45 = vpop.f32.mrf.mxu1 }
 0xdcf   : > { %v10271_v36 = vadd.f32 %v10264_v45, %v10058_v23  ;;  %v11821_v23 = vsel %vm347_vm1, %v22053_v16, %v20572_v31 }
 0xdd0   : > { %v10193_v44 = vpop.f32.mrf.mxu0  ;;  %v10266_v46 = vpop.f32.mrf.mxu1 }
 0xdd1   : > { %v10269_v48 = vadd.f32 %v10193_v44, %v10056_v32  ;;  %v10272_v28 = vadd.f32 %v10266_v46, %v10059_v43  ;;  %v20574_v44 = vpop.permute.xlu0 %11819 }
 0xdd2   : > { %v10195_v42 = vpop.f32.mrf.mxu0 }
 0xdd3   : > { %v10270_v12 = vadd.f32 %v10195_v42, %v10057_v33 }
 0xdd9   : > { %v10406_v30 = vpop.f32.mrf.mxu0  ;;  %v10477_v24 = vpop.f32.mrf.mxu1 }
 0xdda   : > { %v10482_v38 = vadd.f32 %v10406_v30, %v10269_v48  ;;  %v10484_v56 = vadd.f32 %v10477_v24, %v10271_v36 }
 0xddb   : > { %v10408_v55 = vpop.f32.mrf.mxu0  ;;  %v10479_v27 = vpop.f32.mrf.mxu1 }
 0xddc   : > { %v10483_v53 = vadd.f32 %v10408_v55, %v10270_v12  ;;  %v10485_v5 = vadd.f32 %v10479_v27, %v10272_v28 }
 0xde2   : > { %v10690_v57 = vpop.f32.mrf.mxu1 }
 0xde3   : > { %v10697_v60 = vadd.f32 %v10690_v57, %v10484_v56 }
 0xde4   : > { %v10619_v54 = vpop.f32.mrf.mxu0  ;;  %v10692_v59 = vpop.f32.mrf.mxu1 }
 0xde5   : > { %v10695_v18 = vadd.f32 %v10619_v54, %v10482_v38  ;;  %v10698_v20 = vadd.f32 %v10692_v59, %v10485_v5  ;;  %v11856_v54 = vpop.permute.xlu0 %11855 }
 0xde6   : > { %v10621_v25 = vpop.f32.mrf.mxu0 }
 0xde7   : > { %v10696_v3 = vadd.f32 %v10621_v25, %v10483_v53 }
 0xded   : > { %v10832_v37 = vpop.f32.mrf.mxu0  ;;  %v10903_v4 = vpop.f32.mrf.mxu1 }
 0xdee   : > { %v10908_v26 = vadd.f32 %v10832_v37, %v10695_v18  ;;  %v10910_v21 = vadd.f32 %v10903_v4, %v10697_v60 }
 0xdef   : > { %v10834_v14 = vpop.f32.mrf.mxu0  ;;  %v10905_v7 = vpop.f32.mrf.mxu1 }
 0xdf0   : > { %v10909_v52 = vadd.f32 %v10834_v14, %v10696_v3  ;;  %v10911_v30 = vadd.f32 %v10905_v7, %v10698_v20  ;;  %v11858_v14 = vpop.permute.xlu1 %11857  ;;  %v11860_v7 = vpop.permute.xlu0 %11859  ;;  %v22055_v3 = vld [vmem:[#allocation6_spill] sm:$0xff]  ;;  %v22058_v20 = vld [vmem:[#allocation5_spill] sm:$0xff] }
 0xdf1   : > { %v11862_v53 = vsel %vm389_vm0, %v11856_v54, %v11858_v14 }
 0xdf4   : > { %v11882_v5 = vpop.permute.xlu1 %11881 }
 0xdf6   : > { %v11116_v11 = vpop.f32.mrf.mxu1 }
 0xdf7   : > { %v11123_v22 = vadd.f32 %v11116_v11, %v10910_v21 }
 0xdf8   : > { %v11045_v9 = vpop.f32.mrf.mxu0  ;;  %v11118_v34 = vpop.f32.mrf.mxu1 }
 0xdf9   : > { %v11121_v42 = vadd.f32 %v11045_v9, %v10908_v26  ;;  %v11124_v55 = vadd.f32 %v11118_v34, %v10911_v30  ;;  %v22052_v9 = vld [vmem:[#allocation13_spill] sm:$0xff]  ;;  %v11863_v34 = vsel %vm389_vm0, %v11858_v14, %v11860_v7  ;;  %v22056_v26 = vld [vmem:[#allocation10_spill] sm:$0xff] }
 0xdfa   : > { %v11047_v47 = vpop.f32.mrf.mxu0  ;;  %v11861_v32 = vsel %vm389_vm0, %v22052_v9, %v11856_v54  ;;  %v12221_v21 = vrot.slane %v22056_v26, %v22055_v3 }
 0xdfb   : > { %v11122_v24 = vadd.f32 %v11047_v47, %v10909_v52  ;;  %v12229_v52 = vrot.slane %v22056_v26, %v22058_v20 }
 0xe01   : > { %v11258_v51 = vpop.f32.mrf.mxu0  ;;  %v11329_v1 = vpop.f32.mrf.mxu1 }
 0xe02   : > { %v11334_v46 = vadd.f32 %v11258_v51, %v11121_v42  ;;  %v11336_v13 = vadd.f32 %v11329_v1, %v11123_v22  ;;  %v22054_v51 = vld [vmem:[#allocation11_spill] sm:$0xff]  ;;  %v12231_v22 = vpop.permute.xlu1 %12230  ;;  %v12050_v42 = vpop.permute.xlu0 %12049 }
 0xe03   : > { %v11260_v0 = vpop.f32.mrf.mxu0  ;;  %v11331_v39 = vpop.f32.mrf.mxu1  ;;  %v11823_v1 = vsel %vm347_vm1, %v22054_v51, %v20574_v44 }
 0xe04   : > { %v11335_v35 = vadd.f32 %v11260_v0, %v11122_v24  ;;  %v11337_v19 = vadd.f32 %v11331_v39, %v11124_v55 }
 0xe0a   : > { %v11542_v61 = vpop.f32.mrf.mxu1 }
 0xe0b   : > { %v11549_v27 = vadd.f32 %v11542_v61, %v11336_v13  ;;  %v22057_v61 = vld [vmem:[#allocation3_spill] sm:$0xff] }
 0xe0c   : > { %v11471_v45 = vpop.f32.mrf.mxu0  ;;  %v11544_v49 = vpop.f32.mrf.mxu1 }
 0xe0d   : > { %v11547_v57 = vadd.f32 %v11471_v45, %v11334_v46  ;;  %v11550_v63 = vadd.f32 %v11544_v49, %v11337_v19  ;;  %v12225_v45 = vrot.slane %v22056_v26, %v22057_v61  ;;  %v17800_v26 = vld [vmem:[%s21898_s0 + $0x1c] sm:$0xf] }
 0xe0e   : > { %v11473_v29 = vpop.f32.mrf.mxu0 }
 0xe0f   : > { %v11548_v40 = vadd.f32 %v11473_v29, %v11335_v35  ;;  %v17775_v35 = vld [vmem:[%s21904_s6 + $0x4] sm:$0x7] }
 0xe15   : > { %v11684_v15 = vpop.f32.mrf.mxu0  ;;  %v11755_v41 = vpop.f32.mrf.mxu1 }
 0xe16   : > { %v11760_v25 = vadd.f32 %v11684_v15, %v11547_v57  ;;  %v11762_v59 = vadd.f32 %v11755_v41, %v11549_v27 }
 0xe17   : > { %v11686_v17 = vpop.f32.mrf.mxu0  ;;  %v11757_v6 = vpop.f32.mrf.mxu1 }
 0xe18   : > { %v11770_v37 = vadd.f32 %v20570_v50, %v11760_v25  ;;  %v11772_v4 = vadd.f32 %v20570_v50, %v11762_v59  ;;  %v11761_v58 = vadd.f32 %v11686_v17, %v11548_v40  ;;  %v11763_v62 = vadd.f32 %v11757_v6, %v11550_v63  ;;  %v11834_v59 = vld [vmem:[%s21904_s6] sm:$0x7] }
 0xe19   : > { %v22062_v40 = vmov 0.0  }
 0xe1a   : > { %vm11774_vm14 = vcmp.gt.f32.partialorder %v11770_v37, 0.0  ;;  %v11778_v10 = vmul.f32 0.2, %v11770_v37  ;;  %v11780_v8 = vmul.f32 0.2, %v11772_v4  ;;  %vm11776_vm15 = vcmp.gt.f32.partialorder %v11772_v4, 0.0 }
 0xe1b   : > { %v11771_v2 = vadd.f32 %v20570_v50, %v11761_v58  ;;  %v11773_v43 = vadd.f32 %v20570_v50, %v11763_v62  ;;  %v11822_v50 = vsel %vm347_vm1, %v20572_v31, %v22054_v51 }
 0xe1c   : > { %v20579_v11 = vsel %vm11774_vm14, %v11770_v37, %v11778_v10  ;;  %v20588_v47 = vsel %vm11776_vm15, %v11772_v4, %v11780_v8  ;;  %vm22059_vm14 = vcmask 588800  }
 0xe1d   : > { %v11870_v33 = vmul.f32 %v11861_v32, %v20579_v11  ;;  %v11779_v48 = vmul.f32 0.2, %v11771_v2  ;;  %v11830_v36 = vmul.f32 %v11821_v23, %v20579_v11  ;;  %vm11775_vm13 = vcmp.gt.f32.partialorder %v11771_v2, 0.0  ;;  %vm22060_vm15 = vmmov %vm22059_vm14  ;;  %v22064_v32 = vld [vmem:[#allocation4_spill] sm:$0xff] }
 0xe1e   : > { %v11872_v12 = vmul.f32 %v11863_v34, %v20588_v47  ;;  %v11781_v56 = vmul.f32 0.2, %v11773_v43  ;;  %v11832_v28 = vmul.f32 %v11823_v1, %v20588_v47  ;;  %vm11777_vm7 = vcmp.gt.f32.partialorder %v11773_v43, 0.0 }
 0xe1f   : > { %11883 = vrot.lane.b32.xlu0 %v11870_v33, %s17931_s11  ;;  %12051 = vrot.lane.b32.xlu1 %v11830_v36, %s17932_s19  ;;  %v20598_v38 = vsel %vm11775_vm13, %v11771_v2, %v11779_v48  ;;  %vm22061_vm13 = vmmov %vm22059_vm14  ;;  %v17784_v2 = vld [vmem:[%s21898_s0 + $0xc] sm:$0xf]  ;;  %v17788_v48 = vld [vmem:[%s21898_s0 + $0x10] sm:$0xf] }
 0xe20   : > { %v11831_v60 = vmul.f32 %v11822_v50, %v20598_v38  ;;  %v20608_v18 = vsel %vm11777_vm7, %v11773_v43, %v11781_v56  ;;  %v11871_v0 = vmul.f32 %v11862_v53, %v20598_v38  ;;  %vm22063_vm7 = vmmov %vm22061_vm13  ;;  %v12430_v16 = vrot.slane %v17784_v2, %v22064_v32 }
 0xe21   : > { %v11833_v39 = vmul.f32 %v20574_v44, %v20608_v18  ;;  %v11873_v31 = vmul.f32 %v11860_v7, %v20608_v18  ;;  %v12246_v44 = vmul.f32 0.0, %v12231_v22  ;;  %v12434_v23 = vrot.slane %v17784_v2, %v22055_v3 }
 0xe22   : > { %v12438_v33 = vrot.slane %v17784_v2, %v22057_v61  ;;  %v12442_v34 = vrot.slane %v17784_v2, %v22058_v20  ;;  %v12643_v43 = vrot.slane %v17788_v48, %v22064_v32  ;;  %v12647_v36 = vrot.slane %v17788_v48, %v22055_v3 }
 0xe23   : > { %11887 = vrot.lane.b32.xlu0 %v11872_v12, %s17931_s11  ;;  %12055 = vrot.lane.b32.xlu1 %v11832_v28, %s17932_s19  ;;  %v12651_v51 = vrot.slane %v17788_v48, %v22057_v61  ;;  %v12655_v1 = vrot.slane %v17788_v48, %v22058_v20  ;;  %v17792_v12 = vld [vmem:[%s21898_s0 + $0x14] sm:$0xf]  ;;  %v17835_v48 = vld [vmem:[%s21898_s0 + $0x40] sm:$0xf] }
 0xe24   : > { %v12856_v56 = vrot.slane %v17792_v12, %v22064_v32  ;;  %v12860_v28 = vrot.slane %v17792_v12, %v22055_v3  ;;  %v12864_v50 = vrot.slane %v17792_v12, %v22057_v61  ;;  %v12868_v53 = vrot.slane %v17792_v12, %v22058_v20  ;;  %v17839_v12 = vld [vmem:[%s21898_s0 + $0x44] sm:$0xf] }
 0xe27   : > { %12053 = vrot.lane.b32.xlu0 %v11831_v60, %s17932_s19  ;;  %11885 = vrot.lane.b32.xlu1 %v11871_v0, %s17931_s11  ;;  %v17796_v60 = vld [vmem:[%s21898_s0 + $0x18] sm:$0xf] }
 0xe28   : > { %v13069_v0 = vrot.slane %v17796_v60, %v22064_v32 }
 0xe2b   : > { %12057 = vrot.lane.b32.xlu0 %v11833_v39, %s17932_s19  ;;  %11889 = vrot.lane.b32.xlu1 %v11873_v31, %s17931_s11  ;;  %v13073_v39 = vrot.slane %v17796_v60, %v22055_v3  ;;  %v13081_v31 = vrot.slane %v17796_v60, %v22058_v20 }
 0xe2f   : > { %12232 = vrot.lane.b32.xlu0 %v12221_v21, %s17926_s15  ;;  %12234 = vrot.lane.b32.xlu1 %v12225_v45, %s17926_s15  ;;  %v13282_v21 = vrot.slane %v17800_v26, %v22064_v32  ;;  %v13286_v45 = vrot.slane %v17800_v26, %v22055_v3 }
 0xe33   : > { %12236 = vrot.lane.b32.xlu0 %v12229_v52, %s17926_s15  ;;  %12258 = vrot.lane.b32.xlu1 %v12246_v44, %s17930_s29  ;;  %v13290_v52 = vrot.slane %v17800_v26, %v22057_v61  ;;  %v17804_v44 = vld [vmem:[%s21898_s0 + $0x20] sm:$0xf] }
 0xe91   : > { %v11884_v30 = vpop.permute.xlu0 %11883  ;;  %v12052_v24 = vpop.permute.xlu1 %12051 }
 0xe92   : > { %v11891_v27 = vsel %vm22060_vm15, %v11882_v5, %v11884_v30  ;;  %v12059_v41 = vsel %vm590_vm9, %v12050_v42, %v12052_v24  ;;  %v13077_v5 = vrot.slane %v17796_v60, %v22057_v61  ;;  %v13495_v42 = vrot.slane %v17804_v44, %v22064_v32  ;;  %vm22067_vm15 = vmmov %vm22063_vm7 }
 0xe93   : > { %v15367_v60 = vrot.slane %v17839_v12, %v22058_v20 }
 0xe95   : > { %v11888_v46 = vpop.permute.xlu0 %11887  ;;  %v12056_v13 = vpop.permute.xlu1 %12055 }
 0xe99   : > { %v12054_v49 = vpop.permute.xlu0 %12053  ;;  %v11886_v29 = vpop.permute.xlu1 %11885 }
 0xe9a   : > { %v11892_v55 = vsel %vm22059_vm14, %v11884_v30, %v11886_v29  ;;  %v12060_v57 = vsel %vm590_vm9, %v12052_v24, %v12054_v49  ;;  %v11893_v25 = vsel %vm22063_vm7, %v11886_v29, %v11888_v46  ;;  %v12061_v4 = vsel %vm590_vm9, %v12054_v49, %v12056_v13  ;;  %vm22066_vm14 = vmmov %vm22063_vm7 }
 0xe9b   : > { %11932 = vmatprep.subr.mxu0 %v11892_v55  ;;  %v13499_v30 = vrot.slane %v17804_v44, %v22055_v3  ;;  %v13503_v24 = vrot.slane %v17804_v44, %v22057_v61 }
 0xe9c   : > { %11933 = vmatpush1.msra.mxu0 %v11891_v27  ;;  %v17812_v27 = vld [vmem:[%s21898_s0 + $0x28] sm:$0xf] }
 0xe9d   : > { %v12058_v54 = vpop.permute.xlu0 %12057  ;;  %v11890_v15 = vpop.permute.xlu1 %11889  ;;  %12100 = vmatprep.subr.mxu0 %v12060_v57  ;;  %17776 = vmatmul.mubr.msk.f32.vlgmr.msra.gmra.mxu0 %vm429_vm8, %v17775_v35  ;;  %v13921_v57 = vrot.slane %v17812_v27, %v22064_v32 }
 0xe9e   : > { %12101 = vmatpush1.msra.mxu0 %v12059_v41  ;;  %v11894_v19 = vsel %vm22061_vm13, %v11888_v46, %v11890_v15  ;;  %12134 = vmatprep.mubr.f32.mxu0 %v22062_v40  ;;  %v12062_v17 = vsel %vm590_vm9, %v12056_v13, %v12058_v54  ;;  %v13507_v46 = vrot.slane %v17804_v44, %v22058_v20  ;;  %v17808_v13 = vld [vmem:[%s21898_s0 + $0x24] sm:$0xf]  ;;  %vm22068_vm13 = vmmov %vm22063_vm7  ;;  %vm22069_vm7 = vcmask 990208  }
 0xe9f   : > { %12003 = vmatprep.subr.mxu1 %v11894_v19  ;;  %v13708_v49 = vrot.slane %v17808_v13, %v22064_v32  ;;  %v13712_v29 = vrot.slane %v17808_v13, %v22055_v3  ;;  %v13716_v55 = vrot.slane %v17808_v13, %v22057_v61  ;;  %v13925_v54 = vrot.slane %v17812_v27, %v22055_v3  ;;  %v17816_v19 = vld [vmem:[%s21898_s0 + $0x2c] sm:$0xf] }
 0xea0   : > { %12004 = vmatpush1.msra.mxu1 %v11893_v25  ;;  %v13929_v15 = vrot.slane %v17812_v27, %v22057_v61  ;;  %v13933_v41 = vrot.slane %v17812_v27, %v22058_v20  ;;  %v14134_v25 = vrot.slane %v17816_v19, %v22064_v32 }
 0xea1   : > { %v12233_v6 = vpop.permute.xlu0 %12232  ;;  %v12235_v63 = vpop.permute.xlu1 %12234  ;;  %12171 = vmatprep.subr.mxu1 %v12062_v17  ;;  %17777 = vmatmul.mubr.msk.f32.vlgmr.msra.gmra.mxu1 %vm429_vm8, %v17775_v35  ;;  %v13720_v35 = vrot.slane %v17808_v13, %v22058_v20  ;;  %v14142_v17 = vrot.slane %v17816_v19, %v22057_v61 }
 0xea2   : > { %v12238_v37 = vsel %vm771_vm2, %v12231_v22, %v12233_v6  ;;  %v12239_v58 = vsel %vm771_vm2, %v12233_v6, %v12235_v63  ;;  %12172 = vmatpush1.msra.mxu1 %v12061_v4  ;;  %17778 = vmatmul.mubr.msk.f32.vlgmr.msra.gmra.mxu0 %vm429_vm8, %v11834_v59  ;;  %v13294_v22 = vrot.slane %v17800_v26, %v22058_v20 }
 0xea3   : > { %v12247_v10 = vmul.f32 %v12238_v37, %v20579_v11  ;;  %v12248_v8 = vmul.f32 %v12239_v58, %v20598_v38  ;;  %12205 = vmatprep.mubr.f32.mxu1 %v22062_v40  ;;  %12343 = vmatprep.mubr.f32.mxu0 %v22062_v40  ;;  %v14146_v6 = vrot.slane %v17816_v19, %v22058_v20 }
 0xea5   : > { %12260 = vrot.lane.b32.xlu0 %v12247_v10, %s17930_s29  ;;  %v12237_v62 = vpop.permute.xlu0 %12236  ;;  %12262 = vrot.lane.b32.xlu1 %v12248_v8, %s17930_s29  ;;  %v17827_v8 = vld [vmem:[%s21898_s0 + $0x38] sm:$0xf] }
 0xea6   : > { %v12240_v14 = vsel %vm771_vm2, %v12235_v63, %v12237_v62  ;;  %v12250_v7 = vmul.f32 %v12237_v62, %v20608_v18  ;;  %17779 = vmatmul.mubr.msk.f32.vlgmr.msra.gmra.mxu1 %vm429_vm8, %v11834_v59  ;;  %v14138_v59 = vrot.slane %v17816_v19, %v22055_v3  ;;  %v17820_v63 = vld [vmem:[%s21898_s0 + $0x30] sm:$0xf]  ;;  %v14716_v62 = vrot.slane %v17827_v8, %v22064_v32 }
 0xea7   : > { %v12249_v9 = vmul.f32 %v12240_v14, %v20588_v47  ;;  %12414 = vmatprep.mubr.f32.mxu1 %v22062_v40  ;;  %v14347_v37 = vrot.slane %v17820_v63, %v22064_v32  ;;  %v14351_v4 = vrot.slane %v17820_v63, %v22055_v3  ;;  %v14355_v58 = vrot.slane %v17820_v63, %v22057_v61 }
 0xea8   : > { %v14359_v10 = vrot.slane %v17820_v63, %v22058_v20  ;;  %v14720_v14 = vrot.slane %v17827_v8, %v22055_v3  ;;  %v14728_v2 = vrot.slane %v17827_v8, %v22058_v20 }
 0xea9   : > { %12264 = vrot.lane.b32.xlu0 %v12249_v9, %s17930_s29  ;;  %12266 = vrot.lane.b32.xlu1 %v12250_v7, %s17930_s29  ;;  %v14724_v7 = vrot.slane %v17827_v8, %v22057_v61  ;;  %v17831_v9 = vld [vmem:[%s21898_s0 + $0x3c] sm:$0xf] }
 0xead   : > { %12443 = vrot.lane.b32.xlu0 %v12430_v16, %s17927_s18  ;;  %12445 = vrot.lane.b32.xlu1 %v12434_v23, %s17927_s18  ;;  %v14929_v16 = vrot.slane %v17831_v9, %v22064_v32  ;;  %v14933_v23 = vrot.slane %v17831_v9, %v22055_v3 }
 0xeb1   : > { %12447 = vrot.lane.b32.xlu0 %v12438_v33, %s17927_s18  ;;  %12449 = vrot.lane.b32.xlu1 %v12442_v34, %s17927_s18  ;;  %v14937_v33 = vrot.slane %v17831_v9, %v22057_v61  ;;  %v14941_v34 = vrot.slane %v17831_v9, %v22058_v20 }
 0xeb5   : > { %12656 = vrot.lane.b32.xlu0 %v12643_v43, %s17928_s21  ;;  %12658 = vrot.lane.b32.xlu1 %v12647_v36, %s17928_s21  ;;  %v15142_v43 = vrot.slane %v17835_v48, %v22064_v32  ;;  %v15146_v36 = vrot.slane %v17835_v48, %v22055_v3 }
 0xeb9   : > { %12660 = vrot.lane.b32.xlu0 %v12651_v51, %s17928_s21  ;;  %12662 = vrot.lane.b32.xlu1 %v12655_v1, %s17928_s21  ;;  %v15150_v51 = vrot.slane %v17835_v48, %v22057_v61  ;;  %v15154_v1 = vrot.slane %v17835_v48, %v22058_v20 }
 0xebd   : > { %12869 = vrot.lane.b32.xlu0 %v12856_v56, %s17929_s24  ;;  %12871 = vrot.lane.b32.xlu1 %v12860_v28, %s17929_s24  ;;  %v15355_v56 = vrot.slane %v17839_v12, %v22064_v32  ;;  %v15359_v28 = vrot.slane %v17839_v12, %v22055_v3 }
 0xec1   : > { %12873 = vrot.lane.b32.xlu0 %v12864_v50, %s17929_s24  ;;  %12875 = vrot.lane.b32.xlu1 %v12868_v53, %s17929_s24  ;;  %v12259_v50 = vpop.permute.xlu1 %12258  ;;  %v15363_v53 = vrot.slane %v17839_v12, %v22057_v61 }
 0xec5   : > { %13082 = vrot.lane.b32.xlu0 %v13069_v0, %s17930_s29  ;;  %13084 = vrot.lane.b32.xlu1 %v13073_v39, %s17930_s29  ;;  %v17843_v0 = vld [vmem:[%s21898_s0 + $0x48] sm:$0xf] }
 0xec9   : > { %13086 = vrot.lane.b32.xlu0 %v13077_v5, %s17930_s29  ;;  %13088 = vrot.lane.b32.xlu1 %v13081_v31, %s17930_s29 }
 0xecd   : > { %13295 = vrot.lane.b32.xlu0 %v13282_v21, %s17931_s11  ;;  %13297 = vrot.lane.b32.xlu1 %v13286_v45, %s17931_s11  ;;  %v15568_v21 = vrot.slane %v17843_v0, %v22064_v32  ;;  %v15572_v45 = vrot.slane %v17843_v0, %v22055_v3 }
 0xed1   : > { %13299 = vrot.lane.b32.xlu0 %v13290_v52, %s17931_s11  ;;  %13301 = vrot.lane.b32.xlu1 %v13294_v22, %s17931_s11 }
 0xed5   : > { %13508 = vrot.lane.b32.xlu0 %v13495_v42, %s17932_s19  ;;  %13510 = vrot.lane.b32.xlu1 %v13499_v30, %s17932_s19  ;;  %v15576_v30 = vrot.slane %v17843_v0, %v22057_v61 }
 0xed9   : > { %13512 = vrot.lane.b32.xlu0 %v13503_v24, %s17932_s19  ;;  %13514 = vrot.lane.b32.xlu1 %v13507_v46, %s17932_s19  ;;  %v15580_v24 = vrot.slane %v17843_v0, %v22058_v20 }
 0xedd   : > { %13721 = vrot.lane.b32.xlu0 %v13708_v49, %s22022_s20  ;;  %13723 = vrot.lane.b32.xlu1 %v13712_v29, %s22022_s20  ;;  %v17781_v49 = vld [vmem:[%s21904_s6 + $0x8] sm:$0x7] }
 0xee1   : > { %13725 = vrot.lane.b32.xlu0 %v13716_v55, %s22022_s20  ;;  %13727 = vrot.lane.b32.xlu1 %v13720_v35, %s22022_s20 }
 0xee5   : > { %13934 = vrot.lane.b32.xlu0 %v13921_v57, %s17936_s10  ;;  %13936 = vrot.lane.b32.xlu1 %v13925_v54, %s17936_s10 }
 0xee9   : > { %13938 = vrot.lane.b32.xlu0 %v13929_v15, %s17936_s10  ;;  %13940 = vrot.lane.b32.xlu1 %v13933_v41, %s17936_s10 }
 0xeed   : > { %14147 = vrot.lane.b32.xlu0 %v14134_v25, %s17938_s26  ;;  %14149 = vrot.lane.b32.xlu1 %v14138_v59, %s17938_s26  ;;  %v17847_v59 = vld [vmem:[%s21898_s0 + $0x4c] sm:$0xf] }
 0xeee   : > { %v15789_v8 = vrot.slane %v17847_v59, %v22057_v61 }
 0xef1   : > { %14151 = vrot.lane.b32.xlu0 %v14142_v17, %s17938_s26  ;;  %14153 = vrot.lane.b32.xlu1 %v14146_v6, %s17938_s26 }
 0xef5   : > { %14360 = vrot.lane.b32.xlu0 %v14347_v37, %s22007_s17  ;;  %14362 = vrot.lane.b32.xlu1 %v14351_v4, %s22007_s17  ;;  %v15781_v37 = vrot.slane %v17847_v59, %v22064_v32 }
 0xef9   : > { %14364 = vrot.lane.b32.xlu0 %v14355_v58, %s22007_s17  ;;  %14366 = vrot.lane.b32.xlu1 %v14359_v10, %s22007_s17  ;;  %v15785_v58 = vrot.slane %v17847_v59, %v22055_v3 }
 0xefd   : > { %14729 = vrot.lane.b32.xlu0 %v14716_v62, %s22008_s22  ;;  %14731 = vrot.lane.b32.xlu1 %v14720_v14, %s22008_s22  ;;  %v15793_v14 = vrot.slane %v17847_v59, %v22058_v20 }
 0xf01   : > { %14733 = vrot.lane.b32.xlu0 %v14724_v7, %s22008_s22  ;;  %14735 = vrot.lane.b32.xlu1 %v14728_v2, %s22008_s22 }
 0xf05   : > { %14942 = vrot.lane.b32.xlu0 %v14929_v16, %s22009_s13  ;;  %14944 = vrot.lane.b32.xlu1 %v14933_v23, %s22009_s13 }
 0xf09   : > { %14946 = vrot.lane.b32.xlu0 %v14937_v33, %s22009_s13  ;;  %14948 = vrot.lane.b32.xlu1 %v14941_v34, %s22009_s13 }
 0xf0d   : > { %15155 = vrot.lane.b32.xlu0 %v15142_v43, %s17937_s16  ;;  %15157 = vrot.lane.b32.xlu1 %v15146_v36, %s17937_s16 }
 0xf11   : > { %15159 = vrot.lane.b32.xlu0 %v15150_v51, %s17937_s16  ;;  %15161 = vrot.lane.b32.xlu1 %v15154_v1, %s17937_s16  ;;  %v17851_v51 = vld [vmem:[%s21898_s0 + $0x50] sm:$0xf] }
 0xf15   : > { %15368 = vrot.lane.b32.xlu0 %v15355_v56, %s22065_s30  ;;  %15370 = vrot.lane.b32.xlu1 %v15359_v28, %s22065_s30 }
 0xf17   : > { %v12261_v39 = vpop.permute.xlu0 %12260  ;;  %v12263_v5 = vpop.permute.xlu1 %12262 }
 0xf18   : > { %v12268_v31 = vsel %vm802_vm6, %v12259_v50, %v12261_v39  ;;  %v12269_v26 = vsel %vm802_vm6, %v12261_v39, %v12263_v5  ;;  %v15994_v50 = vrot.slane %v17851_v51, %v22064_v32  ;;  %v16002_v39 = vrot.slane %v17851_v51, %v22057_v61 }
 0xf19   : > { %15372 = vrot.lane.b32.xlu0 %v15363_v53, %s22065_s30  ;;  %15374 = vrot.lane.b32.xlu1 %v15367_v60, %s22065_s30  ;;  %v15998_v60 = vrot.slane %v17851_v51, %v22055_v3 }
 0xf1a   : > { %12309 = vmatprep.subr.mxu0 %v12269_v26 }
 0xf1b   : > { %12310 = vmatpush1.msra.mxu0 %v12268_v31  ;;  %v12265_v52 = vpop.permute.xlu0 %12264  ;;  %v12267_v22 = vpop.permute.xlu1 %12266  ;;  %v16006_v31 = vrot.slane %v17851_v51, %v22058_v20 }
 0xf1c   : > { %v12270_v44 = vsel %vm802_vm6, %v12263_v5, %v12265_v52  ;;  %v12271_v42 = vsel %vm802_vm6, %v12265_v52, %v12267_v22  ;;  %17782 = vmatmul.mubr.msk.f32.vlgmr.msra.gmra.mxu0 %vm429_vm8, %v17781_v49 }
 0xf1d   : > { %15581 = vrot.lane.b32.xlu0 %v15568_v21, %s17924_s9  ;;  %15583 = vrot.lane.b32.xlu1 %v15572_v45, %s17924_s9 }
 0xf1e   : > { %12380 = vmatprep.subr.mxu1 %v12271_v42  ;;  %12556 = vmatprep.mubr.f32.mxu0 %v22062_v40 }
 0xf1f   : > { %12381 = vmatpush1.msra.mxu1 %v12270_v44  ;;  %v12444_v46 = vpop.permute.xlu0 %12443  ;;  %v12446_v13 = vpop.permute.xlu1 %12445 }
 0xf20   : > { %v12451_v29 = vsel %vm987_vm3, %v12444_v46, %v12446_v13  ;;  %17783 = vmatmul.mubr.msk.f32.vlgmr.msra.gmra.mxu1 %vm429_vm8, %v17781_v49  ;;  %v12459_v6 = vmul.f32 0.0, %v12444_v46  ;;  %v17855_v49 = vld [vmem:[%s21898_s0 + $0x54] sm:$0xf] }
 0xf21   : > { %15585 = vrot.lane.b32.xlu0 %v15576_v30, %s17924_s9  ;;  %15587 = vrot.lane.b32.xlu1 %v15580_v24, %s17924_s9  ;;  %v12460_v55 = vmul.f32 %v12451_v29, %v20579_v11 }
 0xf22   : > { %12627 = vmatprep.mubr.f32.mxu1 %v22062_v40 }
 0xf23   : > { %v12448_v35 = vpop.permute.xlu0 %12447  ;;  %v12450_v27 = vpop.permute.xlu1 %12449 }
 0xf24   : > { %v12452_v57 = vsel %vm987_vm3, %v12446_v13, %v12448_v35  ;;  %v12453_v54 = vsel %vm987_vm3, %v12448_v35, %v12450_v27  ;;  %v12463_v17 = vmul.f32 %v12450_v27, %v20608_v18  ;;  %v16207_v27 = vrot.slane %v17855_v49, %v22064_v32 }
 0xf25   : > { %v12461_v15 = vmul.f32 %v12452_v57, %v20598_v38  ;;  %12473 = vrot.lane.b32.xlu0 %v12460_v55, %s17929_s24  ;;  %v12462_v41 = vmul.f32 %v12453_v54, %v20588_v47  ;;  %v16211_v54 = vrot.slane %v17855_v49, %v22055_v3 }
 0xf27   : > { %12475 = vrot.lane.b32.xlu1 %v12461_v15, %s17929_s24  ;;  %v12657_v19 = vpop.permute.xlu0 %12656  ;;  %v12659_v25 = vpop.permute.xlu1 %12658 }
 0xf28   : > { %v12664_v7 = vsel %vm1203_vm4, %v12657_v19, %v12659_v25  ;;  %v12672_v28 = vmul.f32 0.0, %v12657_v19 }
 0xf29   : > { %12477 = vrot.lane.b32.xlu0 %v12462_v41, %s17929_s24  ;;  %v12673_v23 = vmul.f32 %v12664_v7, %v20579_v11  ;;  %v16215_v41 = vrot.slane %v17855_v49, %v22057_v61 }
 0xf2b   : > { %12479 = vrot.lane.b32.xlu1 %v12463_v17, %s17929_s24  ;;  %v12661_v63 = vpop.permute.xlu0 %12660  ;;  %v12663_v4 = vpop.permute.xlu1 %12662 }
 0xf2c   : > { %v12665_v9 = vsel %vm1203_vm4, %v12659_v25, %v12661_v63  ;;  %v12666_v33 = vsel %vm1203_vm4, %v12661_v63, %v12663_v4  ;;  %v12676_v1 = vmul.f32 %v12663_v4, %v20608_v18  ;;  %v16219_v25 = vrot.slane %v17855_v49, %v22058_v20 }
 0xf2d   : > { %12471 = vrot.lane.b32.xlu0 %v12459_v6, %s17929_s24  ;;  %v12674_v34 = vmul.f32 %v12665_v9, %v20598_v38  ;;  %v12675_v36 = vmul.f32 %v12666_v33, %v20588_v47 }
 0xf2f   : > { %15794 = vrot.lane.b32.xlu1 %v15781_v37, %s17925_s12  ;;  %v12870_v10 = vpop.permute.xlu0 %12869  ;;  %v12872_v62 = vpop.permute.xlu1 %12871 }
 0xf30   : > { %v12877_v26 = vsel %vm1018_vm5, %v12870_v10, %v12872_v62  ;;  %v12885_v55 = vmul.f32 0.0, %v12870_v10 }
 0xf31   : > { %15796 = vrot.lane.b32.xlu0 %v15785_v58, %s17925_s12  ;;  %v12886_v52 = vmul.f32 %v12877_v26, %v20579_v11 }
 0xf33   : > { %15798 = vrot.lane.b32.xlu1 %v15789_v8, %s17925_s12  ;;  %v12874_v2 = vpop.permute.xlu0 %12873  ;;  %v12876_v16 = vpop.permute.xlu1 %12875 }
 0xf34   : > { %v12878_v45 = vsel %vm1018_vm5, %v12872_v62, %v12874_v2  ;;  %v12879_v44 = vsel %vm1018_vm5, %v12874_v2, %v12876_v16  ;;  %v12889_v29 = vmul.f32 %v12876_v16, %v20608_v18 }
 0xf35   : > { %15800 = vrot.lane.b32.xlu0 %v15793_v14, %s17925_s12  ;;  %v12887_v30 = vmul.f32 %v12878_v45, %v20598_v38  ;;  %v12888_v24 = vmul.f32 %v12879_v44, %v20588_v47  ;;  %v17859_v14 = vld [vmem:[%s21898_s0 + $0x58] sm:$0xf] }
 0xf37   : > { %12686 = vrot.lane.b32.xlu1 %v12673_v23, %s17928_s21  ;;  %v20866_v48 = vpop.permute.xlu0 %13082  ;;  %v13085_v43 = vpop.permute.xlu1 %13084  ;;  %v16420_v23 = vrot.slane %v17859_v14, %v22064_v32 }
 0xf38   : > { %v13090_v59 = vsel %vm802_vm6, %v20866_v48, %v13085_v43  ;;  %v13098_v16 = vmul.f32 0.0, %v20866_v48  ;;  %v16432_v48 = vrot.slane %v17859_v14, %v22058_v20 }
 0xf39   : > { %12688 = vrot.lane.b32.xlu0 %v12674_v34, %s17928_s21  ;;  %v13099_v37 = vmul.f32 %v13090_v59, %v20579_v11  ;;  %v16424_v34 = vrot.slane %v17859_v14, %v22055_v3 }
 0xf3b   : > { %12690 = vrot.lane.b32.xlu1 %v12675_v36, %s17928_s21  ;;  %v13087_v12 = vpop.permute.xlu0 %13086  ;;  %v13089_v56 = vpop.permute.xlu1 %13088  ;;  %v16428_v36 = vrot.slane %v17859_v14, %v22057_v61  ;;  %v17867_v14 = vld [vmem:[%s21898_s0 + $0x60] sm:$0xf] }
 0xf3c   : > { %v13091_v6 = vsel %vm802_vm6, %v13085_v43, %v13087_v12  ;;  %v13092_v4 = vsel %vm802_vm6, %v13087_v12, %v13089_v56  ;;  %v13102_v7 = vmul.f32 %v13089_v56, %v20608_v18 }
 0xf3d   : > { %12692 = vrot.lane.b32.xlu0 %v12676_v1, %s17928_s21  ;;  %v13100_v58 = vmul.f32 %v13091_v6, %v20598_v38  ;;  %v13101_v62 = vmul.f32 %v13092_v4, %v20588_v47 }
 0xf3f   : > { %12684 = vrot.lane.b32.xlu1 %v12672_v28, %s17928_s21  ;;  %v20878_v53 = vpop.permute.xlu0 %13295  ;;  %v20881_v0 = vpop.permute.xlu1 %13297 }
 0xf40   : > { %v13303_v1 = vsel %vm22066_vm14, %v20878_v53, %v20881_v0  ;;  %v13311_v44 = vmul.f32 0.0, %v20878_v53  ;;  %vm22070_vm14 = vmmov %vm22069_vm7 }
 0xf41   : > { %16007 = vrot.lane.b32.xlu0 %v15994_v50, %s17926_s15  ;;  %v13312_v28 = vmul.f32 %v13303_v1, %v20579_v11 }
 0xf43   : > { %16009 = vrot.lane.b32.xlu1 %v15998_v60, %s17926_s15  ;;  %v20886_v5 = vpop.permute.xlu0 %13299  ;;  %v20890_v21 = vpop.permute.xlu1 %13301 }
 0xf44   : > { %v13304_v56 = vsel %vm22067_vm15, %v20881_v0, %v20886_v5  ;;  %v13305_v60 = vsel %vm22068_vm13, %v20886_v5, %v20890_v21  ;;  %v13315_v5 = vmul.f32 %v20890_v21, %v20608_v18  ;;  %vm22071_vm15 = vmmov %vm22069_vm7  ;;  %vm22072_vm13 = vcmask 1039360  }
 0xf45   : > { %16011 = vrot.lane.b32.xlu0 %v16002_v39, %s17926_s15  ;;  %v13314_v26 = vmul.f32 %v13305_v60, %v20588_v47 }
 0xf47   : > { %16013 = vrot.lane.b32.xlu1 %v16006_v31, %s17926_s15  ;;  %v20896_v22 = vpop.permute.xlu0 %13508  ;;  %v20899_v42 = vpop.permute.xlu1 %13510  ;;  %v13313_v31 = vmul.f32 %v13304_v56, %v20598_v38 }
 0xf49   : > { %12899 = vrot.lane.b32.xlu0 %v12886_v52, %s17927_s18  ;;  %v17863_v52 = vld [vmem:[%s21898_s0 + $0x5c] sm:$0xf] }
 0xf4a   : > { %v16641_v21 = vrot.slane %v17863_v52, %v22057_v61  ;;  %v16645_v53 = vrot.slane %v17863_v52, %v22058_v20 }
 0xf4b   : > { %12901 = vrot.lane.b32.xlu1 %v12887_v30, %s17927_s18  ;;  %v20905_v46 = vpop.permute.xlu0 %13512  ;;  %v20907_v13 = vpop.permute.xlu1 %13514 }
 0xf4d   : > { %12903 = vrot.lane.b32.xlu0 %v12888_v24, %s17927_s18  ;;  %v16633_v24 = vrot.slane %v17863_v52, %v22064_v32 }
 0xf4f   : > { %12905 = vrot.lane.b32.xlu1 %v12889_v29, %s17927_s18  ;;  %v20915_v35 = vpop.permute.xlu0 %13721  ;;  %v20918_v57 = vpop.permute.xlu1 %13723  ;;  %v16637_v29 = vrot.slane %v17863_v52, %v22055_v3 }
 0xf51   : > { %12897 = vrot.lane.b32.xlu0 %v12885_v55, %s17927_s18 }
 0xf53   : > { %16220 = vrot.lane.b32.xlu1 %v16207_v27, %s17927_s18  ;;  %v20923_v15 = vpop.permute.xlu0 %13725  ;;  %v20926_v19 = vpop.permute.xlu1 %13727 }
 0xf55   : > { %16222 = vrot.lane.b32.xlu0 %v16211_v54, %s17927_s18  ;;  %v13516_v54 = vsel %vm590_vm9, %v20896_v22, %v20899_v42 }
 0xf56   : > { %v13525_v6 = vmul.f32 %v13516_v54, %v20579_v11  ;;  %v13737_v54 = vmul.f32 0.0, %v20915_v35 }
 0xf57   : > { %16224 = vrot.lane.b32.xlu1 %v16215_v41, %s17927_s18  ;;  %v20933_v17 = vpop.permute.xlu0 %13934  ;;  %v20936_v63 = vpop.permute.xlu1 %13936 }
 0xf59   : > { %16226 = vrot.lane.b32.xlu0 %v16219_v25, %s17927_s18  ;;  %v13517_v25 = vsel %vm590_vm9, %v20899_v42, %v20905_v46 }
 0xf5a   : > { %v13526_v4 = vmul.f32 %v13517_v25, %v20598_v38 }
 0xf5b   : > { %13112 = vrot.lane.b32.xlu1 %v13099_v37, %s17926_s15  ;;  %v20943_v10 = vpop.permute.xlu0 %13938  ;;  %v20945_v8 = vpop.permute.xlu1 %13940  ;;  %v13518_v37 = vsel %vm590_vm9, %v20905_v46, %v20907_v13 }
 0xf5c   : > { %v13527_v42 = vmul.f32 %v13518_v37, %v20588_v47 }
 0xf5d   : > { %13114 = vrot.lane.b32.xlu0 %v13100_v58, %s17926_s15 }
 0xf5f   : > { %13116 = vrot.lane.b32.xlu1 %v13101_v62, %s17926_s15  ;;  %v20954_v2 = vpop.permute.xlu0 %14147  ;;  %v20956_v9 = vpop.permute.xlu1 %14149 }
 0xf61   : > { %13118 = vrot.lane.b32.xlu0 %v13102_v7, %s17926_s15  ;;  %v13528_v7 = vmul.f32 %v20907_v13, %v20608_v18  ;;  %v16854_v13 = vrot.slane %v17867_v14, %v22057_v61 }
 0xf63   : > { %13110 = vrot.lane.b32.xlu1 %v13098_v16, %s17926_s15  ;;  %v20962_v33 = vpop.permute.xlu0 %14151  ;;  %v20965_v43 = vpop.permute.xlu1 %14153 }
 0xf65   : > { %16433 = vrot.lane.b32.xlu0 %v16420_v23, %s17928_s21  ;;  %v13524_v23 = vmul.f32 0.0, %v20896_v22  ;;  %v16858_v22 = vrot.slane %v17867_v14, %v22058_v20 }
 0xf67   : > { %16435 = vrot.lane.b32.xlu1 %v16424_v34, %s17928_s21  ;;  %v20970_v51 = vpop.permute.xlu0 %14360  ;;  %v20976_v12 = vpop.permute.xlu1 %14362  ;;  %v16846_v34 = vrot.slane %v17867_v14, %v22064_v32 }
 0xf69   : > { %16437 = vrot.lane.b32.xlu0 %v16428_v36, %s17928_s21 }
 0xf6b   : > { %16439 = vrot.lane.b32.xlu1 %v16432_v48, %s17928_s21  ;;  %v20984_v50 = vpop.permute.xlu0 %14364  ;;  %v20989_v39 = vpop.permute.xlu1 %14366  ;;  %v16850_v48 = vrot.slane %v17867_v14, %v22055_v3 }
 0xf6d   : > { %13325 = vrot.lane.b32.xlu0 %v13312_v28, %s17925_s12  ;;  %v13729_v28 = vsel %vm2274_vm10, %v20915_v35, %v20918_v57 }
 0xf6f   : > { %13327 = vrot.lane.b32.xlu1 %v13313_v31, %s17925_s12  ;;  %v20995_v0 = vpop.permute.xlu0 %14729  ;;  %v20997_v45 = vpop.permute.xlu1 %14731  ;;  %v13730_v31 = vsel %vm2274_vm10, %v20918_v57, %v20923_v15 }
 0xf71   : > { %13329 = vrot.lane.b32.xlu0 %v13314_v26, %s17925_s12  ;;  %v13738_v26 = vmul.f32 %v13729_v28, %v20579_v11  ;;  %v13943_v28 = vsel %vm2490_vm12, %v20936_v63, %v20943_v10 }
 0xf73   : > { %13331 = vrot.lane.b32.xlu1 %v13315_v5, %s17925_s12  ;;  %v21007_v30 = vpop.permute.xlu0 %14733  ;;  %v21010_v49 = vpop.permute.xlu1 %14735  ;;  %v13731_v5 = vsel %vm2274_vm10, %v20923_v15, %v20926_v19 }
 0xf75   : > { %13323 = vrot.lane.b32.xlu0 %v13311_v44, %s17925_s12 }
 0xf77   : > { %16646 = vrot.lane.b32.xlu1 %v16633_v24, %s17929_s24  ;;  %v21015_v55 = vpop.permute.xlu0 %14942  ;;  %v21018_v27 = vpop.permute.xlu1 %14944  ;;  %v13739_v24 = vmul.f32 %v13730_v31, %v20598_v38 }
 0xf79   : > { %16648 = vrot.lane.b32.xlu0 %v16637_v29, %s17929_s24  ;;  %v13740_v29 = vmul.f32 %v13731_v5, %v20588_v47 }
 0xf7b   : > { %16650 = vrot.lane.b32.xlu1 %v16641_v21, %s17929_s24  ;;  %v21026_v41 = vpop.permute.xlu0 %14946  ;;  %v21031_v59 = vpop.permute.xlu1 %14948  ;;  %v17871_v21 = vld [vmem:[%s21898_s0 + $0x64] sm:$0xf] }
 0xf7c   : > { %v17067_v14 = vrot.slane %v17871_v21, %v22057_v61  ;;  %v17071_v35 = vrot.slane %v17871_v21, %v22058_v20 }
 0xf7d   : > { %16652 = vrot.lane.b32.xlu0 %v16645_v53, %s17929_s24  ;;  %v13741_v53 = vmul.f32 %v20926_v19, %v20608_v18 }
 0xf7f   : > { %13538 = vrot.lane.b32.xlu1 %v13525_v6, %s17924_s9  ;;  %v21040_v58 = vpop.permute.xlu0 %15155  ;;  %v21042_v62 = vpop.permute.xlu1 %15157  ;;  %v17059_v6 = vrot.slane %v17871_v21, %v22064_v32 }
 0xf81   : > { %13540 = vrot.lane.b32.xlu0 %v13526_v4, %s17924_s9  ;;  %v17063_v4 = vrot.slane %v17871_v21, %v22055_v3 }
 0xf83   : > { %13542 = vrot.lane.b32.xlu1 %v13527_v42, %s17924_s9  ;;  %v21052_v46 = vpop.permute.xlu0 %15159  ;;  %v21054_v16 = vpop.permute.xlu1 %15161 }
 0xf85   : > { %13544 = vrot.lane.b32.xlu0 %v13528_v7, %s17924_s9 }
 0xf87   : > { %13536 = vrot.lane.b32.xlu1 %v13524_v23, %s17924_s9  ;;  %v21060_v36 = vpop.permute.xlu0 %15368  ;;  %v21063_v1 = vpop.permute.xlu1 %15370  ;;  %v13942_v23 = vsel %vm2490_vm12, %v20933_v17, %v20936_v63  ;;  %v13952_v63 = vmul.f32 %v13943_v28, %v20598_v38  ;;  %v14157_v28 = vsel %vm22071_vm15, %v20962_v33, %v20965_v43  ;;  %vm22075_vm15 = vcmask 7168  }
 0xf89   : > { %16859 = vrot.lane.b32.xlu0 %v16846_v34, %s17930_s29 }
 0xf8b   : > { %16861 = vrot.lane.b32.xlu1 %v16850_v48, %s17930_s29  ;;  %v21068_v56 = vpop.permute.xlu0 %15372  ;;  %v21074_v60 = vpop.permute.xlu1 %15374 }
 0xf8d   : > { %16863 = vrot.lane.b32.xlu0 %v16854_v13, %s17930_s29 }
 0xf8f   : > { %16865 = vrot.lane.b32.xlu1 %v16858_v22, %s17930_s29  ;;  %v21082_v52 = vpop.permute.xlu0 %15581  ;;  %v21087_v44 = vpop.permute.xlu1 %15583  ;;  %v17785_v22 = vld [vmem:[%s21904_s6 + $0xc] sm:$0x7] }
 0xf91   : > { %13751 = vrot.lane.b32.xlu0 %v13738_v26, %s22065_s30  ;;  %v13951_v26 = vmul.f32 %v13942_v23, %v20579_v11 }
 0xf93   : > { %13753 = vrot.lane.b32.xlu1 %v13739_v24, %s22065_s30  ;;  %v21093_v57 = vpop.permute.xlu0 %15585  ;;  %v21100_v15 = vpop.permute.xlu1 %15587  ;;  %v13944_v24 = vsel %vm2490_vm12, %v20943_v10, %v20945_v8  ;;  %v17875_v10 = vld [vmem:[%s21898_s0 + $0x68] sm:$0xf] }
 0xf94   : > { %v13953_v21 = vmul.f32 %v13944_v24, %v20588_v47 }
 0xf95   : > { %13755 = vrot.lane.b32.xlu0 %v13740_v29, %s22065_s30 }
 0xf97   : > { %13757 = vrot.lane.b32.xlu1 %v13741_v53, %s22065_s30  ;;  %v12474_v25 = vpop.permute.xlu0 %12473 }
 0xf99   : > { %v12476_v37 = vpop.permute.xlu1 %12475  ;;  %13749 = vrot.lane.b32.xlu0 %v13737_v54, %s22065_s30  ;;  %v13954_v54 = vmul.f32 %v20945_v8, %v20608_v18  ;;  %v17280_v8 = vrot.slane %v17875_v10, %v22057_v61  ;;  %v17789_v61 = vld [vmem:[%s21904_s6 + $0x10] sm:$0x7] }
 0xf9a   : > { %v12482_v42 = vsel %vm1018_vm5, %v12474_v25, %v12476_v37 }
 0xf9b   : > { %17072 = vrot.lane.b32.xlu1 %v17059_v6, %s17931_s11  ;;  %12522 = vmatprep.subr.mxu0 %v12482_v42  ;;  %v12478_v19 = vpop.permute.xlu0 %12477  ;;  %v13950_v6 = vmul.f32 0.0, %v20933_v17 }
 0xf9c   : > { %v12483_v13 = vsel %vm1018_vm5, %v12476_v37, %v12478_v19 }
 0xf9d   : > { %v12480_v7 = vpop.permute.xlu1 %12479  ;;  %17074 = vrot.lane.b32.xlu0 %v17063_v4, %s17931_s11  ;;  %v17272_v4 = vrot.slane %v17875_v10, %v22064_v32  ;;  %v14155_v32 = vsel %vm22069_vm7, %v20954_v2, %v20956_v9  ;;  %vm22073_vm7 = vmmov %vm22072_vm13 }
 0xf9e   : > { %v12484_v34 = vsel %vm1018_vm5, %v12478_v19, %v12480_v7  ;;  %v17276_v19 = vrot.slane %v17875_v10, %v22055_v3 }
 0xf9f   : > { %17076 = vrot.lane.b32.xlu1 %v17067_v14, %s17931_s11  ;;  %12593 = vmatprep.subr.mxu1 %v12484_v34  ;;  %v12472_v48 = vpop.permute.xlu0 %12471 }
 0xfa0   : > { %v12481_v31 = vsel %vm1018_vm5, %v12472_v48, %v12474_v25  ;;  %12594 = vmatpush1.msra.mxu1 %v12483_v13  ;;  %v14164_v13 = vmul.f32 %v14155_v32, %v20579_v11  ;;  %v14737_v32 = vsel %vm22075_vm15, %v20995_v0, %v20997_v45 }
 0xfa1   : > { %v21127_v5 = vpop.permute.xlu1 %15794  ;;  %17078 = vrot.lane.b32.xlu0 %v17071_v35, %s17931_s11  ;;  %12523 = vmatpush1.msra.mxu0 %v12481_v31  ;;  %v17284_v35 = vrot.slane %v17875_v10, %v22058_v20  ;;  %v14156_v20 = vsel %vm22070_vm14, %v20956_v9, %v20962_v33  ;;  %v14167_v33 = vmul.f32 %v20965_v43, %v20608_v18  ;;  %v14163_v10 = vmul.f32 0.0, %v20954_v2  ;;  %vm22074_vm14 = vmmov %vm22073_vm7 }
 0xfa2   : > { %17787 = vmatmul.mubr.msk.f32.vlgmr.msra.gmra.mxu1 %vm429_vm8, %v17785_v22  ;;  %17786 = vmatmul.mubr.msk.f32.vlgmr.msra.gmra.mxu0 %vm429_vm8, %v17785_v22  ;;  %v14165_v9 = vmul.f32 %v14156_v20, %v20598_v38 }
 0xfa3   : > { %13964 = vrot.lane.b32.xlu1 %v13951_v26, %s17937_s16  ;;  %v21137_v29 = vpop.permute.xlu0 %15796  ;;  %12840 = vmatprep.mubr.f32.mxu1 %v22062_v40  ;;  %v14166_v26 = vmul.f32 %v14157_v28, %v20588_v47 }
 0xfa4   : > { %12769 = vmatprep.mubr.f32.mxu0 %v22062_v40 }
 0xfa5   : > { %v21142_v53 = vpop.permute.xlu1 %15798  ;;  %13966 = vrot.lane.b32.xlu0 %v13952_v63, %s17937_s16 }
 0xfa7   : > { %13968 = vrot.lane.b32.xlu1 %v13953_v21, %s17937_s16  ;;  %v21151_v25 = vpop.permute.xlu0 %15800  ;;  %v14368_v21 = vsel %vm22072_vm13, %v20970_v51, %v20976_v12  ;;  %vm22076_vm13 = vmmov %vm22075_vm15 }
 0xfa9   : > { %v12687_v37 = vpop.permute.xlu1 %12686  ;;  %13970 = vrot.lane.b32.xlu0 %v13954_v54, %s17937_s16 }
 0xfab   : > { %13962 = vrot.lane.b32.xlu1 %v13950_v6, %s17937_s16  ;;  %v12689_v42 = vpop.permute.xlu0 %12688  ;;  %v14369_v6 = vsel %vm22073_vm7, %v20976_v12, %v20984_v50  ;;  %vm22077_vm7 = vmmov %vm22076_vm13 }
 0xfac   : > { %v12695_v14 = vsel %vm1203_vm4, %v12687_v37, %v12689_v42  ;;  %v14378_v2 = vmul.f32 %v14369_v6, %v20598_v38 }
 0xfad   : > { %v12691_v7 = vpop.permute.xlu1 %12690  ;;  %17285 = vrot.lane.b32.xlu0 %v17272_v4, %s17932_s19  ;;  %12735 = vmatprep.subr.mxu0 %v12695_v14  ;;  %v14370_v4 = vsel %vm22074_vm14, %v20984_v50, %v20989_v39  ;;  %vm22078_vm14 = vcmask 56320  }
 0xfae   : > { %v12696_v34 = vsel %vm1203_vm4, %v12689_v42, %v12691_v7  ;;  %v14379_v14 = vmul.f32 %v14370_v4, %v20588_v47  ;;  %vm22079_vm15 = vmmov %vm22078_vm14 }
 0xfaf   : > { %17287 = vrot.lane.b32.xlu1 %v17276_v19, %s17932_s19  ;;  %v12693_v17 = vpop.permute.xlu0 %12692 }
 0xfb0   : > { %v12697_v23 = vsel %vm1203_vm4, %v12691_v7, %v12693_v17 }
 0xfb1   : > { %v12685_v3 = vpop.permute.xlu1 %12684  ;;  %17289 = vrot.lane.b32.xlu0 %v17280_v8, %s17932_s19  ;;  %12806 = vmatprep.subr.mxu1 %v12697_v23  ;;  %v14380_v8 = vmul.f32 %v20989_v39, %v20608_v18 }
 0xfb2   : > { %v12694_v48 = vsel %vm1203_vm4, %v12685_v3, %v12687_v37  ;;  %12807 = vmatpush1.msra.mxu1 %v12696_v34  ;;  %v14377_v37 = vmul.f32 %v14368_v21, %v20579_v11  ;;  %v14376_v3 = vmul.f32 0.0, %v20970_v51  ;;  %v14738_v34 = vsel %vm22076_vm13, %v20997_v45, %v21007_v30  ;;  %vm22080_vm13 = vmmov %vm22078_vm14 }
 0xfb3   : > { %17291 = vrot.lane.b32.xlu1 %v17284_v35, %s17932_s19  ;;  %12736 = vmatpush1.msra.mxu0 %v12694_v48  ;;  %v21178_v22 = vpop.permute.xlu0 %16007  ;;  %v17793_v35 = vld [vmem:[%s21904_s6 + $0x14] sm:$0x7]  ;;  %v14739_v51 = vsel %vm22077_vm7, %v21007_v30, %v21010_v49  ;;  %v14747_v45 = vmul.f32 %v14738_v34, %v20588_v47  ;;  %v14950_v30 = vsel %vm22078_vm14, %v21015_v55, %v21018_v27  ;;  %v15175_v34 = vmul.f32 0.0, %v21054_v16 }
 0xfb4   : > { %17791 = vmatmul.mubr.msk.f32.vlgmr.msra.gmra.mxu1 %vm429_vm8, %v17789_v61  ;;  %17790 = vmatmul.mubr.msk.f32.vlgmr.msra.gmra.mxu0 %vm429_vm8, %v17789_v61  ;;  %v14746_v61 = vmul.f32 %v14737_v32, %v20598_v38 }
 0xfb5   : > { %v21186_v31 = vpop.permute.xlu1 %16009  ;;  %14177 = vrot.lane.b32.xlu0 %v14164_v13, %s22009_s13  ;;  %13053 = vmatprep.mubr.f32.mxu1 %v22062_v40  ;;  %v14748_v13 = vmul.f32 %v14739_v51, %v20608_v18 }
 0xfb6   : > { %12982 = vmatprep.mubr.f32.mxu0 %v22062_v40 }
 0xfb7   : > { %14179 = vrot.lane.b32.xlu1 %v14165_v9, %s22009_s13  ;;  %v21193_v24 = vpop.permute.xlu0 %16011  ;;  %v14749_v9 = vmul.f32 0.0, %v21010_v49  ;;  %v14959_v49 = vmul.f32 %v14950_v30, %v20598_v38  ;;  %v15378_v30 = vsel %vm2305_vm11, %v21068_v56, %v21074_v60 }
 0xfb9   : > { %v21197_v63 = vpop.permute.xlu1 %16013  ;;  %14181 = vrot.lane.b32.xlu0 %v14166_v26, %s22009_s13 }
 0xfbb   : > { %14183 = vrot.lane.b32.xlu1 %v14167_v33, %s22009_s13  ;;  %v12900_v54 = vpop.permute.xlu0 %12899  ;;  %v14745_v33 = vmul.f32 %v20995_v0, %v20579_v11 }
 0xfbd   : > { %v12902_v43 = vpop.permute.xlu1 %12901  ;;  %14175 = vrot.lane.b32.xlu0 %v14163_v10, %s22009_s13  ;;  %v14951_v10 = vsel %vm22079_vm15, %v21018_v27, %v21026_v41 }
 0xfbe   : > { %v12908_v42 = vsel %vm987_vm3, %v12900_v54, %v12902_v43  ;;  %v14960_v0 = vmul.f32 %v14951_v10, %v20588_v47 }
 0xfbf   : > { %14390 = vrot.lane.b32.xlu1 %v14377_v37, %s22008_s22  ;;  %12948 = vmatprep.subr.mxu0 %v12908_v42  ;;  %v12904_v19 = vpop.permute.xlu0 %12903  ;;  %v14952_v37 = vsel %vm22080_vm13, %v21026_v41, %v21031_v59 }
 0xfc0   : > { %v12909_v17 = vsel %vm987_vm3, %v12902_v43, %v12904_v19  ;;  %v14961_v27 = vmul.f32 %v14952_v37, %v20608_v18 }
 0xfc1   : > { %v12906_v12 = vpop.permute.xlu1 %12905  ;;  %14392 = vrot.lane.b32.xlu0 %v14378_v2, %s22008_s22 }
 0xfc2   : > { %v12910_v7 = vsel %vm987_vm3, %v12904_v19, %v12906_v12  ;;  %v17797_v19 = vld [vmem:[%s21904_s6 + $0x18] sm:$0x7] }
 0xfc3   : > { %14394 = vrot.lane.b32.xlu1 %v14379_v14, %s22008_s22  ;;  %13019 = vmatprep.subr.mxu1 %v12910_v7  ;;  %v12898_v50 = vpop.permute.xlu0 %12897  ;;  %v14962_v14 = vmul.f32 0.0, %v21031_v59  ;;  %v15163_v7 = vsel %vm429_vm8, %v21040_v58, %v21042_v62  ;;  %v15164_v59 = vsel %vm429_vm8, %v21042_v62, %v21052_v46 }
 0xfc4   : > { %v12907_v23 = vsel %vm987_vm3, %v12898_v50, %v12900_v54  ;;  %13020 = vmatpush1.msra.mxu1 %v12909_v17  ;;  %v15172_v17 = vmul.f32 %v15163_v7, %v20598_v38  ;;  %v15173_v32 = vmul.f32 %v15164_v59, %v20588_v47  ;;  %v15601_v7 = vmul.f32 0.0, %v21100_v15 }
 0xfc5   : > { %v21231_v39 = vpop.permute.xlu1 %16220  ;;  %14396 = vrot.lane.b32.xlu0 %v14380_v8, %s22008_s22  ;;  %12949 = vmatpush1.msra.mxu0 %v12907_v23  ;;  %v14958_v8 = vmul.f32 %v21015_v55, %v20579_v11  ;;  %v15165_v55 = vsel %vm429_vm8, %v21052_v46, %v21054_v16  ;;  %v15376_v46 = vsel %vm2305_vm11, %v21060_v36, %v21063_v1 }
 0xfc6   : > { %17795 = vmatmul.mubr.msk.f32.vlgmr.msra.gmra.mxu1 %vm429_vm8, %v17793_v35  ;;  %17794 = vmatmul.mubr.msk.f32.vlgmr.msra.gmra.mxu0 %vm429_vm8, %v17793_v35  ;;  %v15174_v62 = vmul.f32 %v15165_v55, %v20608_v18  ;;  %v15377_v16 = vsel %vm2305_vm11, %v21063_v1, %v21068_v56  ;;  %v17801_v1 = vld [vmem:[%s21904_s6 + $0x1c] sm:$0x7]  ;;  %v15597_v59 = vmul.f32 %v21082_v52, %v20579_v11 }
 0xfc7   : > { %14388 = vrot.lane.b32.xlu1 %v14376_v3, %s22008_s22  ;;  %v21241_v20 = vpop.permute.xlu0 %16222  ;;  %13266 = vmatprep.mubr.f32.mxu1 %v22062_v40  ;;  %v15803_v55 = vsel %vm389_vm0, %v21137_v29, %v21142_v53 }
 0xfc8   : > { %13195 = vmatprep.mubr.f32.mxu0 %v22062_v40 }
 0xfc9   : > { %v21249_v48 = vpop.permute.xlu1 %16224  ;;  %14759 = vrot.lane.b32.xlu0 %v14746_v61, %s22007_s17 }
 0xfcb   : > { %14761 = vrot.lane.b32.xlu1 %v14747_v45, %s22007_s17  ;;  %v21254_v28 = vpop.permute.xlu0 %16226  ;;  %v15171_v45 = vmul.f32 %v21040_v58, %v20579_v11  ;;  %v15386_v58 = vmul.f32 %v15377_v16, %v20588_v47  ;;  %v16015_v16 = vsel %vm771_vm2, %v21178_v22, %v21186_v31 }
 0xfcd   : > { %v13113_v26 = vpop.permute.xlu1 %13112  ;;  %14763 = vrot.lane.b32.xlu0 %v14748_v13, %s22007_s17 }
 0xfcf   : > { %14765 = vrot.lane.b32.xlu1 %v14749_v9, %s22007_s17  ;;  %v13115_v21 = vpop.permute.xlu0 %13114  ;;  %v15385_v9 = vmul.f32 %v15376_v46, %v20598_v38 }
 0xfd0   : > { %v13121_v54 = vsel %vm771_vm2, %v13113_v26, %v13115_v21 }
 0xfd1   : > { %v13117_v6 = vpop.permute.xlu1 %13116  ;;  %14757 = vrot.lane.b32.xlu0 %v14745_v33, %s22007_s17  ;;  %13161 = vmatprep.subr.mxu0 %v13121_v54 }
 0xfd2   : > { %v13122_v2 = vsel %vm771_vm2, %v13115_v21, %v13117_v6 }
 0xfd3   : > { %14972 = vrot.lane.b32.xlu1 %v14959_v49, %s17938_s26  ;;  %v13119_v43 = vpop.permute.xlu0 %13118  ;;  %v15387_v49 = vmul.f32 %v15378_v30, %v20608_v18  ;;  %v16016_v30 = vsel %vm771_vm2, %v21186_v31, %v21193_v24 }
 0xfd4   : > { %v13123_v4 = vsel %vm771_vm2, %v13117_v6, %v13119_v43  ;;  %v15388_v6 = vmul.f32 0.0, %v21074_v60  ;;  %v15384_v43 = vmul.f32 %v21060_v36, %v20579_v11  ;;  %v15590_v60 = vsel %vm347_vm1, %v21087_v44, %v21093_v57 }
 0xfd5   : > { %v13111_v42 = vpop.permute.xlu1 %13110  ;;  %14974 = vrot.lane.b32.xlu0 %v14960_v0, %s17938_s26  ;;  %13232 = vmatprep.subr.mxu1 %v13123_v4  ;;  %v15589_v0 = vsel %vm347_vm1, %v21082_v52, %v21087_v44  ;;  %v15599_v36 = vmul.f32 %v15590_v60, %v20588_v47  ;;  %v17805_v52 = vld [vmem:[%s21904_s6 + $0x20] sm:$0x7] }
 0xfd6   : > { %v13120_v41 = vsel %vm771_vm2, %v13111_v42, %v13113_v26  ;;  %13233 = vmatpush1.msra.mxu1 %v13122_v2  ;;  %v15591_v2 = vsel %vm347_vm1, %v21093_v57, %v21100_v15  ;;  %v15802_v57 = vsel %vm389_vm0, %v21127_v5, %v21137_v29 }
 0xfd7   : > { %14976 = vrot.lane.b32.xlu1 %v14961_v27, %s17938_s26  ;;  %13162 = vmatpush1.msra.mxu0 %v13120_v41  ;;  %v21285_v12 = vpop.permute.xlu0 %16433  ;;  %v15598_v27 = vmul.f32 %v15589_v0, %v20598_v38  ;;  %v15600_v41 = vmul.f32 %v15591_v2, %v20608_v18  ;;  %v16023_v0 = vmul.f32 %v21178_v22, %v20579_v11 }
 0xfd8   : > { %17799 = vmatmul.mubr.msk.f32.vlgmr.msra.gmra.mxu1 %vm429_vm8, %v17797_v19  ;;  %17798 = vmatmul.mubr.msk.f32.vlgmr.msra.gmra.mxu0 %vm429_vm8, %v17797_v19 }
 0xfd9   : > { %v21294_v50 = vpop.permute.xlu1 %16435  ;;  %14978 = vrot.lane.b32.xlu0 %v14962_v14, %s17938_s26  ;;  %13479 = vmatprep.mubr.f32.mxu1 %v22062_v40 }
 0xfda   : > { %13408 = vmatprep.mubr.f32.mxu0 %v22062_v40 }
 0xfdb   : > { %14970 = vrot.lane.b32.xlu1 %v14958_v8, %s17938_s26  ;;  %v21304_v35 = vpop.permute.xlu0 %16437 }
 0xfdd   : > { %v21310_v23 = vpop.permute.xlu1 %16439  ;;  %15185 = vrot.lane.b32.xlu0 %v15172_v17, %s17936_s10 }
 0xfdf   : > { %15187 = vrot.lane.b32.xlu1 %v15173_v32, %s17936_s10  ;;  %v13326_v3 = vpop.permute.xlu0 %13325  ;;  %v15811_v32 = vmul.f32 %v15802_v57, %v20598_v38  ;;  %v16236_v57 = vmul.f32 %v21231_v39, %v20579_v11 }
 0xfe1   : > { %v13328_v61 = vpop.permute.xlu1 %13327  ;;  %15189 = vrot.lane.b32.xlu0 %v15174_v62, %s17936_s10 }
 0xfe2   : > { %v13334_v51 = vsel %vm389_vm0, %v13326_v3, %v13328_v61 }
 0xfe3   : > { %15191 = vrot.lane.b32.xlu1 %v15175_v34, %s17936_s10  ;;  %13374 = vmatprep.subr.mxu0 %v13334_v51  ;;  %v13330_v13 = vpop.permute.xlu0 %13329  ;;  %v15804_v34 = vsel %vm389_vm0, %v21142_v53, %v21151_v25  ;;  %v15814_v53 = vmul.f32 0.0, %v21151_v25  ;;  %v16024_v25 = vmul.f32 %v16015_v16, %v20598_v38 }
 0xfe4   : > { %v13335_v10 = vsel %vm389_vm0, %v13328_v61, %v13330_v13  ;;  %v15812_v61 = vmul.f32 %v15803_v55, %v20588_v47  ;;  %v15813_v51 = vmul.f32 %v15804_v34, %v20608_v18  ;;  %v16453_v34 = vmul.f32 0.0, %v21310_v23 }
 0xfe5   : > { %v13332_v26 = vpop.permute.xlu1 %13331  ;;  %15183 = vrot.lane.b32.xlu0 %v15171_v45, %s17936_s10  ;;  %s17882_s10 = sshll.u32 %s22117_s28, 4 }
 0xfe6   : > { %v13336_v33 = vsel %vm389_vm0, %v13330_v13, %v13332_v26 }
 0xfe7   : > { %15398 = vrot.lane.b32.xlu1 %v15385_v9, %s22022_s20  ;;  %13445 = vmatprep.subr.mxu1 %v13336_v33  ;;  %v13324_v21 = vpop.permute.xlu0 %13323  ;;  %v15810_v9 = vmul.f32 %v21127_v5, %v20579_v11 }
 0xfe8   : > { %v13333_v54 = vsel %vm389_vm0, %v13324_v21, %v13326_v3  ;;  %13446 = vmatpush1.msra.mxu1 %v13335_v10  ;;  %v16025_v21 = vmul.f32 %v16016_v30, %v20588_v47 }
 0xfe9   : > { %v21341_v56 = vpop.permute.xlu1 %16646  ;;  %15400 = vrot.lane.b32.xlu0 %v15386_v58, %s22022_s20  ;;  %13375 = vmatpush1.msra.mxu0 %v13333_v54  ;;  %v16017_v58 = vsel %vm771_vm2, %v21193_v24, %v21197_v63  ;;  %v16027_v54 = vmul.f32 0.0, %v21197_v63  ;;  %v16228_v24 = vsel %vm987_vm3, %v21231_v39, %v21241_v20  ;;  %v17809_v63 = vld [vmem:[%s21904_s6 + $0x24] sm:$0x7] }
 0xfea   : > { %17803 = vmatmul.mubr.msk.f32.vlgmr.msra.gmra.mxu1 %vm429_vm8, %v17801_v1  ;;  %17802 = vmatmul.mubr.msk.f32.vlgmr.msra.gmra.mxu0 %vm429_vm8, %v17801_v1  ;;  %v16026_v1 = vmul.f32 %v16017_v58, %v20608_v18 }
 0xfeb   : > { %15402 = vrot.lane.b32.xlu1 %v15387_v49, %s22022_s20  ;;  %v21348_v37 = vpop.permute.xlu0 %16648  ;;  %13692 = vmatprep.mubr.f32.mxu1 %v22062_v40 }
 0xfec   : > { %13621 = vmatprep.mubr.f32.mxu0 %v22062_v40 }
 0xfed   : > { %v21357_v4 = vpop.permute.xlu1 %16650  ;;  %15404 = vrot.lane.b32.xlu0 %v15388_v6, %s22022_s20 }
 0xfef   : > { %15396 = vrot.lane.b32.xlu1 %v15384_v43, %s22022_s20  ;;  %v21365_v42 = vpop.permute.xlu0 %16652 }
 0xff1   : > { %v13539_v19 = vpop.permute.xlu1 %13538  ;;  %15611 = vrot.lane.b32.xlu0 %v15598_v27, %s17932_s19  ;;  %v16229_v27 = vsel %vm987_vm3, %v21241_v20, %v21249_v48 }
 0xff2   : > { %v16238_v20 = vmul.f32 %v16229_v27, %v20588_v47  ;;  %v17817_v27 = vld [vmem:[%s21904_s6 + $0x2c] sm:$0x7] }
 0xff3   : > { %15613 = vrot.lane.b32.xlu1 %v15599_v36, %s17932_s19  ;;  %v13541_v44 = vpop.permute.xlu0 %13540  ;;  %v16237_v36 = vmul.f32 %v16228_v24, %v20598_v38 }
 0xff4   : > { %v13547_v14 = vsel %vm347_vm1, %v13539_v19, %v13541_v44 }
 0xff5   : > { %v13543_v8 = vpop.permute.xlu1 %13542  ;;  %15615 = vrot.lane.b32.xlu0 %v15600_v41, %s17932_s19  ;;  %13587 = vmatprep.subr.mxu0 %v13547_v14 }
 0xff6   : > { %v13548_v3 = vsel %vm347_vm1, %v13541_v44, %v13543_v8 }
 0xff7   : > { %15617 = vrot.lane.b32.xlu1 %v15601_v7, %s17932_s19  ;;  %v13545_v17 = vpop.permute.xlu0 %13544 }
 0xff8   : > { %v13549_v15 = vsel %vm347_vm1, %v13543_v8, %v13545_v17  ;;  %v16441_v8 = vsel %vm1203_vm4, %v21285_v12, %v21294_v50  ;;  %v16442_v17 = vsel %vm1203_vm4, %v21294_v50, %v21304_v35 }
 0xff9   : > { %v13537_v62 = vpop.permute.xlu1 %13536  ;;  %15609 = vrot.lane.b32.xlu0 %v15597_v59, %s17932_s19  ;;  %13658 = vmatprep.subr.mxu1 %v13549_v15  ;;  %v16443_v15 = vsel %vm1203_vm4, %v21304_v35, %v21310_v23  ;;  %v16451_v39 = vmul.f32 %v16442_v17, %v20588_v47  ;;  %v16449_v23 = vmul.f32 %v21285_v12, %v20579_v11  ;;  %s305_s19 = scalar_lea.vmem %s21906_s8, %s17882_s10 }
 0xffa   : > { %v13546_v29 = vsel %vm347_vm1, %v13537_v62, %v13539_v19  ;;  %13659 = vmatpush1.msra.mxu1 %v13548_v3  ;;  %v16230_v19 = vsel %vm987_vm3, %v21249_v48, %v21254_v28  ;;  %v16240_v48 = vmul.f32 0.0, %v21254_v28  ;;  %v16450_v28 = vmul.f32 %v16441_v8, %v20598_v38 }
 0xffb   : > { %15824 = vrot.lane.b32.xlu1 %v15811_v32, %s17931_s11  ;;  %13588 = vmatpush1.msra.mxu0 %v13546_v29  ;;  %v21399_v46 = vpop.permute.xlu0 %16859  ;;  %v16239_v44 = vmul.f32 %v16230_v19, %v20608_v18  ;;  %v16452_v3 = vmul.f32 %v16443_v15, %v20608_v18  ;;  %v16656_v12 = vsel %vm1018_vm5, %v21357_v4, %v21365_v42 }
 0xffc   : > { %17807 = vmatmul.mubr.msk.f32.vlgmr.msra.gmra.mxu1 %vm429_vm8, %v17805_v52  ;;  %17806 = vmatmul.mubr.msk.f32.vlgmr.msra.gmra.mxu0 %vm429_vm8, %v17805_v52  ;;  %v16665_v58 = vmul.f32 %v16656_v12, %v20608_v18 }
 0xffd   : > { %v21404_v45 = vpop.permute.xlu1 %16861  ;;  %15826 = vrot.lane.b32.xlu0 %v15812_v61, %s17931_s11  ;;  %13905 = vmatprep.mubr.f32.mxu1 %v22062_v40  ;;  %v17813_v61 = vld [vmem:[%s21904_s6 + $0x28] sm:$0x7] }
 0xffe   : > { %13834 = vmatprep.mubr.f32.mxu0 %v22062_v40 }
 0xfff   : > { %15828 = vrot.lane.b32.xlu1 %v15813_v51, %s17931_s11  ;;  %v21411_v13 = vpop.permute.xlu0 %16863  ;;  %v16654_v51 = vsel %vm1018_vm5, %v21341_v56, %v21348_v37 }
0x1000   : > { %v16663_v30 = vmul.f32 %v16654_v51, %v20598_v38 }
0x1001   : > { %v21418_v26 = vpop.permute.xlu1 %16865  ;;  %15830 = vrot.lane.b32.xlu0 %v15814_v53, %s17931_s11 }
0x1003   : > { %15822 = vrot.lane.b32.xlu1 %v15810_v9, %s17931_s11  ;;  %v13752_v33 = vpop.permute.xlu0 %13751  ;;  %v16655_v9 = vsel %vm1018_vm5, %v21348_v37, %v21357_v4  ;;  %v16867_v4 = vsel %vm802_vm6, %v21399_v46, %v21404_v45 }
0x1004   : > { %v16664_v37 = vmul.f32 %v16655_v9, %v20588_v47  ;;  %v17828_v9 = vld [vmem:[%s21904_s6 + $0x38] sm:$0x7] }
0x1005   : > { %v13754_v5 = vpop.permute.xlu1 %13753  ;;  %16037 = vrot.lane.b32.xlu0 %v16024_v25, %s17930_s29 }
0x1006   : > { %v13760_v10 = vsel %vm2305_vm11, %v13752_v33, %v13754_v5 }
0x1007   : > { %16039 = vrot.lane.b32.xlu1 %v16025_v21, %s17930_s29  ;;  %13800 = vmatprep.subr.mxu0 %v13760_v10  ;;  %v13756_v31 = vpop.permute.xlu0 %13755 }
0x1008   : > { %v13761_v43 = vsel %vm2305_vm11, %v13754_v5, %v13756_v31  ;;  %v16666_v5 = vmul.f32 0.0, %v21365_v42  ;;  %v16876_v42 = vmul.f32 %v16867_v4, %v20598_v38 }
0x1009   : > { %v13758_v49 = vpop.permute.xlu1 %13757  ;;  %16041 = vrot.lane.b32.xlu0 %v16026_v1, %s17930_s29  ;;  %v16662_v1 = vmul.f32 %v21341_v56, %v20579_v11 }
0x100a   : > { %v13762_v6 = vsel %vm2305_vm11, %v13756_v31, %v13758_v49 }
0x100b   : > { %16043 = vrot.lane.b32.xlu1 %v16027_v54, %s17930_s29  ;;  %13871 = vmatprep.subr.mxu1 %v13762_v6  ;;  %v13750_v60 = vpop.permute.xlu0 %13749  ;;  %v16868_v54 = vsel %vm802_vm6, %v21404_v45, %v21411_v13  ;;  %v16869_v6 = vsel %vm802_vm6, %v21411_v13, %v21418_v26 }
0x100c   : > { %v13759_v2 = vsel %vm2305_vm11, %v13750_v60, %v13752_v33  ;;  %13872 = vmatpush1.msra.mxu1 %v13761_v43  ;;  %vm22081_vm11 = vmmov %vm22080_vm13  ;;  %v16877_v56 = vmul.f32 %v16868_v54, %v20588_v47  ;;  %v16878_v45 = vmul.f32 %v16869_v6, %v20608_v18  ;;  %vm22085_vm13 = vcmask 588800  }
0x100d   : > { %v21452_v22 = vpop.permute.xlu1 %17072  ;;  %16035 = vrot.lane.b32.xlu0 %v16023_v0, %s17930_s29  ;;  %13801 = vmatpush1.msra.mxu0 %v13759_v2  ;;  %vm22082_vm7 = vmmov %vm22081_vm11  ;;  %v16879_v2 = vmul.f32 0.0, %v21418_v26 }
0x100e   : > { %17811 = vmatmul.mubr.msk.f32.vlgmr.msra.gmra.mxu1 %vm429_vm8, %v17809_v63  ;;  %17810 = vmatmul.mubr.msk.f32.vlgmr.msra.gmra.mxu0 %vm429_vm8, %v17809_v63  ;;  %vm22083_vm14 = vmmov %vm22082_vm7 }
0x100f   : > { %16250 = vrot.lane.b32.xlu1 %v16237_v36, %s17929_s24  ;;  %v21462_v41 = vpop.permute.xlu0 %17074  ;;  %14118 = vmatprep.mubr.f32.mxu1 %v22062_v40  ;;  %vm22084_vm15 = vmmov %vm22082_vm7 }
0x1010   : > { %14047 = vmatprep.mubr.f32.mxu0 %v22062_v40  ;;  %v17080_v19 = vsel %vm22085_vm13, %v21452_v22, %v21462_v41 }
0x1011   : > { %v21467_v14 = vpop.permute.xlu1 %17076  ;;  %16252 = vrot.lane.b32.xlu0 %v16238_v20, %s17929_s24  ;;  %v16875_v20 = vmul.f32 %v21399_v46, %v20579_v11  ;;  %v17089_v8 = vmul.f32 %v17080_v19, %v20598_v38 }
0x1013   : > { %16254 = vrot.lane.b32.xlu1 %v16239_v44, %s17929_s24  ;;  %v21472_v7 = vpop.permute.xlu0 %17078 }
0x1015   : > { %v13965_v59 = vpop.permute.xlu1 %13964  ;;  %16256 = vrot.lane.b32.xlu0 %v16240_v48, %s17929_s24 }
0x1017   : > { %16248 = vrot.lane.b32.xlu1 %v16236_v57, %s17929_s24  ;;  %v13967_v55 = vpop.permute.xlu0 %13966 }
0x1018   : > { %v13973_v32 = vsel %vm429_vm8, %v13965_v59, %v13967_v55 }
0x1019   : > { %v13969_v62 = vpop.permute.xlu1 %13968  ;;  %16463 = vrot.lane.b32.xlu0 %v16450_v28, %s17928_s21  ;;  %14013 = vmatprep.subr.mxu0 %v13973_v32  ;;  %v17821_v32 = vld [vmem:[%s21904_s6 + $0x30] sm:$0x7] }
0x101a   : > { %v13974_v29 = vsel %vm429_vm8, %v13967_v55, %v13969_v62 }
0x101b   : > { %16465 = vrot.lane.b32.xlu1 %v16451_v39, %s17928_s21  ;;  %v13971_v50 = vpop.permute.xlu0 %13970 }
0x101c   : > { %v13975_v52 = vsel %vm429_vm8, %v13969_v62, %v13971_v50  ;;  %v17092_v62 = vmul.f32 0.0, %v21472_v7 }
0x101d   : > { %v13963_v35 = vpop.permute.xlu1 %13962  ;;  %16467 = vrot.lane.b32.xlu0 %v16452_v3, %s17928_s21  ;;  %14084 = vmatprep.subr.mxu1 %v13975_v52  ;;  %v17088_v3 = vmul.f32 %v21452_v22, %v20579_v11  ;;  %v17824_v22 = vld [vmem:[%s21904_s6 + $0x34] sm:$0x7] }
0x101e   : > { %v13972_v53 = vsel %vm429_vm8, %v13963_v35, %v13965_v59  ;;  %14085 = vmatpush1.msra.mxu1 %v13974_v29 }
0x101f   : > { %16469 = vrot.lane.b32.xlu1 %v16453_v34, %s17928_s21  ;;  %14014 = vmatpush1.msra.mxu0 %v13972_v53  ;;  %v21507_v16 = vpop.permute.xlu0 %17285 }
0x1020   : > { %17815 = vmatmul.mubr.msk.f32.vlgmr.msra.gmra.mxu1 %vm429_vm8, %v17813_v61  ;;  %17814 = vmatmul.mubr.msk.f32.vlgmr.msra.gmra.mxu0 %vm429_vm8, %v17813_v61 }
0x1021   : > { %v21515_v25 = vpop.permute.xlu1 %17287  ;;  %16461 = vrot.lane.b32.xlu0 %v16449_v23, %s17928_s21  ;;  %14331 = vmatprep.mubr.f32.mxu1 %v22062_v40 }
0x1022   : > { %14260 = vmatprep.mubr.f32.mxu0 %v22062_v40  ;;  %v17293_v50 = vsel %vm590_vm9, %v21507_v16, %v21515_v25 }
0x1023   : > { %16676 = vrot.lane.b32.xlu1 %v16663_v30, %s17927_s18  ;;  %v21525_v33 = vpop.permute.xlu0 %17289  ;;  %v17302_v35 = vmul.f32 %v17293_v50, %v20598_v38 }
0x1025   : > { %v21528_v21 = vpop.permute.xlu1 %17291  ;;  %16678 = vrot.lane.b32.xlu0 %v16664_v37, %s17927_s18 }
0x1026   : > { %v17295_v51 = vsel %vm590_vm9, %v21525_v33, %v21528_v21  ;;  %v17305_v12 = vmul.f32 0.0, %v21528_v21  ;;  %v17480_v21 = vld [vmem:[%s21905_s7] sm:$0x7] }
0x1027   : > { %16680 = vrot.lane.b32.xlu1 %v16665_v58, %s17927_s18  ;;  %v14178_v10 = vpop.permute.xlu0 %14177  ;;  %v17304_v30 = vmul.f32 %v17295_v51, %v20608_v18 }
0x1029   : > { %v14180_v31 = vpop.permute.xlu1 %14179  ;;  %16682 = vrot.lane.b32.xlu0 %v16666_v5, %s17927_s18 }
0x102a   : > { %v14186_v49 = vsel %vm22081_vm11, %v14178_v10, %v14180_v31  ;;  %vm22086_vm11 = vmmov %vm22085_vm13 }
0x102b   : > { %16674 = vrot.lane.b32.xlu1 %v16662_v1, %s17927_s18  ;;  %14226 = vmatprep.subr.mxu0 %v14186_v49  ;;  %v14182_v24 = vpop.permute.xlu0 %14181  ;;  %v17081_v26 = vsel %vm22086_vm11, %v21462_v41, %v21467_v14 }
0x102c   : > { %v14187_v60 = vsel %vm22083_vm14, %v14180_v31, %v14182_v24  ;;  %vm22088_vm14 = vmmov %vm22086_vm11  ;;  %v17090_v59 = vmul.f32 %v17081_v26, %v20588_v47 }
0x102d   : > { %v14184_v0 = vpop.permute.xlu1 %14183  ;;  %16889 = vrot.lane.b32.xlu0 %v16876_v42, %s17926_s15  ;;  %v17082_v46 = vsel %vm22088_vm14, %v21467_v14, %v21472_v7  ;;  %v17294_v7 = vsel %vm590_vm9, %v21515_v25, %v21525_v33 }
0x102e   : > { %v14188_v43 = vsel %vm22082_vm7, %v14182_v24, %v14184_v0  ;;  %vm22087_vm7 = vcmask 7168   ;;  %v17091_v28 = vmul.f32 %v17082_v46, %v20608_v18  ;;  %v17303_v61 = vmul.f32 %v17294_v7, %v20588_v47  ;;  %v17836_v0 = vld [vmem:[%s21904_s6 + $0x40] sm:$0x7]  ;;  %v17848_v7 = vld [vmem:[%s21904_s6 + $0x4c] sm:$0x7] }
0x102f   : > { %16891 = vrot.lane.b32.xlu1 %v16877_v56, %s17926_s15  ;;  %14297 = vmatprep.subr.mxu1 %v14188_v43  ;;  %v14176_v63 = vpop.permute.xlu0 %14175  ;;  %vm22090_vm13 = vmmov %vm22087_vm7 }
0x1030   : > { %v14185_v13 = vsel %vm22084_vm15, %v14176_v63, %v14178_v10  ;;  %14298 = vmatpush1.msra.mxu1 %v14187_v60  ;;  %vm22089_vm15 = vmmov %vm22087_vm7 }
0x1031   : > { %v14391_v36 = vpop.permute.xlu1 %14390  ;;  %16893 = vrot.lane.b32.xlu0 %v16878_v45, %s17926_s15  ;;  %14227 = vmatpush1.msra.mxu0 %v14185_v13  ;;  %vm22091_vm11 = vmmov %vm22087_vm7 }
0x1032   : > { %17819 = vmatmul.mubr.msk.f32.vlgmr.msra.gmra.mxu1 %vm429_vm8, %v17817_v27  ;;  %17818 = vmatmul.mubr.msk.f32.vlgmr.msra.gmra.mxu0 %vm429_vm8, %v17817_v27 }
0x1033   : > { %16895 = vrot.lane.b32.xlu1 %v16879_v2, %s17926_s15  ;;  %v14393_v44 = vpop.permute.xlu0 %14392  ;;  %14544 = vmatprep.mubr.f32.mxu1 %v22062_v40 }
0x1034   : > { %v14399_v48 = vsel %vm22087_vm7, %v14391_v36, %v14393_v44  ;;  %14473 = vmatprep.mubr.f32.mxu0 %v22062_v40  ;;  %vm22092_vm7 = vcmask 1039360  }
0x1035   : > { %v14395_v57 = vpop.permute.xlu1 %14394  ;;  %16887 = vrot.lane.b32.xlu0 %v16875_v20, %s17926_s15  ;;  %14439 = vmatprep.subr.mxu0 %v14399_v48  ;;  %vm22093_vm14 = vmmov %vm22092_vm7  ;;  %v17840_v20 = vld [vmem:[%s21904_s6 + $0x44] sm:$0x7] }
0x1036   : > { %v14400_v55 = vsel %vm22090_vm13, %v14393_v44, %v14395_v57  ;;  %vm22095_vm13 = vmmov %vm22092_vm7 }
0x1037   : > { %17102 = vrot.lane.b32.xlu1 %v17089_v8, %s17925_s12  ;;  %v14397_v17 = vpop.permute.xlu0 %14396 }
0x1038   : > { %v14401_v41 = vsel %vm22089_vm15, %v14395_v57, %v14397_v17  ;;  %vm22094_vm15 = vmmov %vm22092_vm7 }
0x1039   : > { %v14389_v15 = vpop.permute.xlu1 %14388  ;;  %17104 = vrot.lane.b32.xlu0 %v17090_v59, %s17925_s12  ;;  %14510 = vmatprep.subr.mxu1 %v14401_v41 }
0x103a   : > { %v14398_v14 = vsel %vm22091_vm11, %v14389_v15, %v14391_v36  ;;  %14511 = vmatpush1.msra.mxu1 %v14400_v55  ;;  %vm22096_vm11 = vcmask 990208  }
0x103b   : > { %17106 = vrot.lane.b32.xlu1 %v17091_v28, %s17925_s12  ;;  %14440 = vmatpush1.msra.mxu0 %v14398_v14  ;;  %v14760_v39 = vpop.permute.xlu0 %14759  ;;  %v17844_v28 = vld [vmem:[%s21904_s6 + $0x48] sm:$0x7] }
0x103c   : > { %14661 = vmatprep.subr.mxu1 %v20608_v18  ;;  %17823 = vmatmul.mubr.msk.f32.vlgmr.msra.gmra.mxu1 %vm429_vm8, %v17821_v32  ;;  %v17301_v18 = vmul.f32 %v21507_v16, %v20579_v11 }
0x103d   : > { %14590 = vmatprep.subr.mxu0 %v20598_v38  ;;  %14662 = vmatpush1.msra.mxu1 %v20588_v47  ;;  %v14762_v52 = vpop.permute.xlu1 %14761 }
0x103e   : > { %17108 = vrot.lane.b32.xlu0 %v17092_v62, %s17925_s12  ;;  %17822 = vmatmul.mubr.msk.f32.vlgmr.msra.gmra.mxu0 %vm429_vm8, %v17821_v32  ;;  %v14768_v34 = vsel %vm22092_vm7, %v14760_v39, %v14762_v52  ;;  %vm22097_vm7 = vmmov %vm22096_vm11 }
0x103f   : > { %14591 = vmatpush1.msra.mxu0 %v20579_v11  ;;  %17100 = vrot.lane.b32.xlu1 %v17088_v3, %s17925_s12  ;;  %v14764_v29 = vpop.permute.xlu0 %14763  ;;  %v17832_v11 = vld [vmem:[%s21904_s6 + $0x3c] sm:$0x7] }
0x1040   : > { %14808 = vmatprep.subr.mxu0 %v14768_v34  ;;  %14695 = vmatprep.mubr.f32.mxu1 %v22062_v40  ;;  %v14769_v38 = vsel %vm22094_vm15, %v14762_v52, %v14764_v29  ;;  %vm22099_vm15 = vmmov %vm22097_vm7 }
0x1041   : > { %v14766_v53 = vpop.permute.xlu1 %14765  ;;  %14624 = vmatprep.mubr.f32.mxu0 %v22062_v40  ;;  %17826 = vmatmul.mubr.msk.f32.vlgmr.msra.gmra.mxu1 %vm429_vm8, %v17824_v22 }
0x1042   : > { %17315 = vrot.lane.b32.xlu0 %v17302_v35, %s17924_s9  ;;  %v14770_v23 = vsel %vm22093_vm14, %v14764_v29, %v14766_v53  ;;  %17825 = vmatmul.mubr.msk.f32.vlgmr.msra.gmra.mxu0 %vm429_vm8, %v17824_v22  ;;  %vm22098_vm14 = vmmov %vm22097_vm7 }
0x1043   : > { %17317 = vrot.lane.b32.xlu1 %v17303_v61, %s17924_s9  ;;  %14879 = vmatprep.subr.mxu1 %v14770_v23  ;;  %v14758_v47 = vpop.permute.xlu0 %14757 }
0x1044   : > { %v14767_v25 = vsel %vm22095_vm13, %v14758_v47, %v14760_v39  ;;  %14880 = vmatpush1.msra.mxu1 %v14769_v38  ;;  %14913 = vmatprep.mubr.f32.mxu1 %v22062_v40  ;;  %v17852_v47 = vld [vmem:[%s21904_s6 + $0x50] sm:$0x7] }
0x1045   : > { %v14973_v37 = vpop.permute.xlu1 %14972  ;;  %14809 = vmatpush1.msra.mxu0 %v14767_v25  ;;  %14842 = vmatprep.mubr.f32.mxu0 %v22062_v40 }
0x1046   : > { %17319 = vrot.lane.b32.xlu0 %v17304_v30, %s17924_s9  ;;  %17830 = vmatmul.mubr.msk.f32.vlgmr.msra.gmra.mxu1 %vm429_vm8, %v17828_v9 }
0x1047   : > { %17321 = vrot.lane.b32.xlu1 %v17305_v12, %s17924_s9  ;;  %v14975_v33 = vpop.permute.xlu0 %14974  ;;  %17829 = vmatmul.mubr.msk.f32.vlgmr.msra.gmra.mxu0 %vm429_vm8, %v17828_v9 }
0x1048   : > { %v14981_v58 = vsel %vm22096_vm11, %v14973_v37, %v14975_v33  ;;  %15126 = vmatprep.mubr.f32.mxu1 %v22062_v40  ;;  %15055 = vmatprep.mubr.f32.mxu0 %v22062_v40 }
0x1049   : > { %v14977_v5 = vpop.permute.xlu1 %14976  ;;  %15021 = vmatprep.subr.mxu0 %v14981_v58 }
0x104a   : > { %17313 = vrot.lane.b32.xlu0 %v17301_v18, %s17924_s9  ;;  %v14982_v16 = vsel %vm22098_vm14, %v14975_v33, %v14977_v5 }
0x104b   : > { %v14979_v10 = vpop.permute.xlu0 %14978  ;;  %17483 = vperm.xlu1 %17911, %v17480_v21  }
0x104c   : > { %v14983_v4 = vsel %vm22097_vm7, %v14977_v5, %v14979_v10  ;;  %v17856_v5 = vld [vmem:[%s21904_s6 + $0x54] sm:$0x7] }
0x104d   : > { %v14971_v1 = vpop.permute.xlu1 %14970  ;;  %15092 = vmatprep.subr.mxu1 %v14983_v4 }
0x104e   : > { %v14980_v31 = vsel %vm22099_vm15, %v14971_v1, %v14973_v37  ;;  %15093 = vmatpush1.msra.mxu1 %v14982_v16 }
0x104f   : > { %15022 = vmatpush1.msra.mxu0 %v14980_v31  ;;  %v15186_v54 = vpop.permute.xlu0 %15185  ;;  %17834 = vmatmul.mubr.msk.f32.vlgmr.msra.gmra.mxu1 %vm429_vm8, %v17832_v11 }
0x1050   : > { %17833 = vmatmul.mubr.msk.f32.vlgmr.msra.gmra.mxu0 %vm429_vm8, %v17832_v11  ;;  %15339 = vmatprep.mubr.f32.mxu1 %v22062_v40 }
0x1051   : > { %v15188_v49 = vpop.permute.xlu1 %15187  ;;  %15268 = vmatprep.mubr.f32.mxu0 %v22062_v40 }
0x1052   : > { %v15194_v42 = vsel %vm2490_vm12, %v15186_v54, %v15188_v49 }
0x1053   : > { %15234 = vmatprep.subr.mxu0 %v15194_v42  ;;  %v15190_v24 = vpop.permute.xlu0 %15189 }
0x1054   : > { %v15195_v43 = vsel %vm2490_vm12, %v15188_v49, %v15190_v24 }
0x1055   : > { %v15192_v6 = vpop.permute.xlu1 %15191 }
0x1056   : > { %v15196_v56 = vsel %vm2490_vm12, %v15190_v24, %v15192_v6  ;;  %v17860_v24 = vld [vmem:[%s21904_s6 + $0x58] sm:$0x7] }
0x1057   : > { %15305 = vmatprep.subr.mxu1 %v15196_v56  ;;  %v15184_v45 = vpop.permute.xlu0 %15183 }
0x1058   : > { %v15193_v60 = vsel %vm2490_vm12, %v15184_v45, %v15186_v54  ;;  %15306 = vmatpush1.msra.mxu1 %v15195_v43 }
0x1059   : > { %v15399_v63 = vpop.permute.xlu1 %15398  ;;  %15235 = vmatpush1.msra.mxu0 %v15193_v60  ;;  %17838 = vmatmul.mubr.msk.f32.vlgmr.msra.gmra.mxu1 %vm429_vm8, %v17836_v0 }
0x105a   : > { %17837 = vmatmul.mubr.msk.f32.vlgmr.msra.gmra.mxu0 %vm429_vm8, %v17836_v0  ;;  %15552 = vmatprep.mubr.f32.mxu1 %v22062_v40 }
0x105b   : > { %v15401_v27 = vpop.permute.xlu0 %15400  ;;  %15481 = vmatprep.mubr.f32.mxu0 %v22062_v40 }
0x105c   : > { %v15407_v13 = vsel %vm2274_vm10, %v15399_v63, %v15401_v27 }
0x105d   : > { %v15403_v2 = vpop.permute.xlu1 %15402  ;;  %15447 = vmatprep.subr.mxu0 %v15407_v13 }
0x105e   : > { %v15408_v44 = vsel %vm2274_vm10, %v15401_v27, %v15403_v2 }
0x105f   : > { %v15405_v36 = vpop.permute.xlu0 %15404 }
0x1060   : > { %v15409_v19 = vsel %vm2274_vm10, %v15403_v2, %v15405_v36  ;;  %v17864_v2 = vld [vmem:[%s21904_s6 + $0x5c] sm:$0x7] }
0x1061   : > { %v15397_v26 = vpop.permute.xlu1 %15396  ;;  %15518 = vmatprep.subr.mxu1 %v15409_v19 }
0x1062   : > { %v15406_v48 = vsel %vm2274_vm10, %v15397_v26, %v15399_v63  ;;  %15519 = vmatpush1.msra.mxu1 %v15408_v44  ;;  %vm22100_vm10 = vcmask 588800  }
0x1063   : > { %15448 = vmatpush1.msra.mxu0 %v15406_v48  ;;  %v15612_v8 = vpop.permute.xlu0 %15611  ;;  %17842 = vmatmul.mubr.msk.f32.vlgmr.msra.gmra.mxu1 %vm429_vm8, %v17840_v20  ;;  %vm22101_vm12 = vmmov %vm22100_vm10 }
0x1064   : > { %17841 = vmatmul.mubr.msk.f32.vlgmr.msra.gmra.mxu0 %vm429_vm8, %v17840_v20  ;;  %15765 = vmatprep.mubr.f32.mxu1 %v22062_v40 }
0x1065   : > { %v15614_v57 = vpop.permute.xlu1 %15613  ;;  %15694 = vmatprep.mubr.f32.mxu0 %v22062_v40 }
0x1066   : > { %v15620_v46 = vsel %vm590_vm9, %v15612_v8, %v15614_v57 }
0x1067   : > { %15660 = vmatprep.subr.mxu0 %v15620_v46  ;;  %v15616_v59 = vpop.permute.xlu0 %15615 }
0x1068   : > { %v15621_v55 = vsel %vm590_vm9, %v15614_v57, %v15616_v59 }
0x1069   : > { %v15618_v17 = vpop.permute.xlu1 %15617 }
0x106a   : > { %v15622_v41 = vsel %vm590_vm9, %v15616_v59, %v15618_v17  ;;  %v17868_v59 = vld [vmem:[%s21904_s6 + $0x60] sm:$0x7] }
0x106b   : > { %15731 = vmatprep.subr.mxu1 %v15622_v41  ;;  %v15610_v15 = vpop.permute.xlu0 %15609 }
0x106c   : > { %v15619_v32 = vsel %vm590_vm9, %v15610_v15, %v15612_v8  ;;  %15732 = vmatpush1.msra.mxu1 %v15621_v55  ;;  %vm22102_vm9 = vmmov %vm22100_vm10 }
0x106d   : > { %v15825_v14 = vpop.permute.xlu1 %15824  ;;  %15661 = vmatpush1.msra.mxu0 %v15619_v32  ;;  %17846 = vmatmul.mubr.msk.f32.vlgmr.msra.gmra.mxu1 %vm429_vm8, %v17844_v28  ;;  %vm22103_vm13 = vmmov %vm22102_vm9 }
0x106e   : > { %17845 = vmatmul.mubr.msk.f32.vlgmr.msra.gmra.mxu0 %vm429_vm8, %v17844_v28  ;;  %15978 = vmatprep.mubr.f32.mxu1 %v22062_v40 }
0x106f   : > { %v15827_v39 = vpop.permute.xlu0 %15826  ;;  %15907 = vmatprep.mubr.f32.mxu0 %v22062_v40 }
0x1070   : > { %v15833_v62 = vsel %vm22100_vm10, %v15825_v14, %v15827_v39 }
0x1071   : > { %v15829_v3 = vpop.permute.xlu1 %15828  ;;  %15873 = vmatprep.subr.mxu0 %v15833_v62 }
0x1072   : > { %v15834_v34 = vsel %vm22102_vm9, %v15827_v39, %v15829_v3 }
0x1073   : > { %v15831_v50 = vpop.permute.xlu0 %15830 }
0x1074   : > { %v15835_v52 = vsel %vm22101_vm12, %v15829_v3, %v15831_v50  ;;  %v17872_v50 = vld [vmem:[%s21904_s6 + $0x64] sm:$0x7] }
0x1075   : > { %v15823_v22 = vpop.permute.xlu1 %15822  ;;  %15944 = vmatprep.subr.mxu1 %v15835_v52 }
0x1076   : > { %v15832_v29 = vsel %vm22103_vm13, %v15823_v22, %v15825_v14  ;;  %15945 = vmatpush1.msra.mxu1 %v15834_v34 }
0x1077   : > { %15874 = vmatpush1.msra.mxu0 %v15832_v29  ;;  %v16038_v35 = vpop.permute.xlu0 %16037  ;;  %17850 = vmatmul.mubr.msk.f32.vlgmr.msra.gmra.mxu1 %vm429_vm8, %v17848_v7 }
0x1078   : > { %17849 = vmatmul.mubr.msk.f32.vlgmr.msra.gmra.mxu0 %vm429_vm8, %v17848_v7  ;;  %16191 = vmatprep.mubr.f32.mxu1 %v22062_v40 }
0x1079   : > { %v16040_v61 = vpop.permute.xlu1 %16039  ;;  %16120 = vmatprep.mubr.f32.mxu0 %v22062_v40 }
0x107a   : > { %v16046_v51 = vsel %vm802_vm6, %v16038_v35, %v16040_v61 }
0x107b   : > { %16086 = vmatprep.subr.mxu0 %v16046_v51  ;;  %v16042_v53 = vpop.permute.xlu0 %16041 }
0x107c   : > { %v16047_v9 = vsel %vm802_vm6, %v16040_v61, %v16042_v53 }
0x107d   : > { %v16044_v23 = vpop.permute.xlu1 %16043 }
0x107e   : > { %v16048_v38 = vsel %vm802_vm6, %v16042_v53, %v16044_v23  ;;  %v17876_v53 = vld [vmem:[%s21904_s6 + $0x68] sm:$0x7] }
0x107f   : > { %16157 = vmatprep.subr.mxu1 %v16048_v38  ;;  %v16036_v30 = vpop.permute.xlu0 %16035  ;;  %v12039_v38 = vpop.f32.mrf.mxu1 }
0x1080   : > { %v16045_v25 = vsel %vm802_vm6, %v16036_v30, %v16038_v35  ;;  %16158 = vmatpush1.msra.mxu1 %v16047_v9 }
0x1081   : > { %v16251_v12 = vpop.permute.xlu1 %16250  ;;  %16087 = vmatpush1.msra.mxu0 %v16045_v25  ;;  %17854 = vmatmul.mubr.msk.f32.vlgmr.msra.gmra.mxu1 %vm429_vm8, %v17852_v47  ;;  %v12041_v30 = vpop.f32.mrf.mxu1 }
0x1082   : > { %17853 = vmatmul.mubr.msk.f32.vlgmr.msra.gmra.mxu0 %vm429_vm8, %v17852_v47  ;;  %16404 = vmatprep.mubr.f32.mxu1 %v22062_v40 }
0x1083   : > { %v16253_v37 = vpop.permute.xlu0 %16252  ;;  %16333 = vmatprep.mubr.f32.mxu0 %v22062_v40 }
0x1084   : > { %v16259_v33 = vsel %vm1018_vm5, %v16251_v12, %v16253_v37 }
0x1085   : > { %v16255_v18 = vpop.permute.xlu1 %16254  ;;  %16299 = vmatprep.subr.mxu0 %v16259_v33 }
0x1086   : > { %v16260_v10 = vsel %vm1018_vm5, %v16253_v37, %v16255_v18 }
0x1087   : > { %v16257_v58 = vpop.permute.xlu0 %16256 }
0x1088   : > { %v16261_v21 = vsel %vm1018_vm5, %v16255_v18, %v16257_v58 }
0x1089   : > { %v16249_v4 = vpop.permute.xlu1 %16248  ;;  %16370 = vmatprep.subr.mxu1 %v16261_v21 }
0x108a   : > { %v16258_v11 = vsel %vm1018_vm5, %v16249_v4, %v16251_v12  ;;  %16371 = vmatpush1.msra.mxu1 %v16260_v10  ;;  %v12207_v12 = vpop.f32.mrf.mxu1 }
0x108b   : > { %16300 = vmatpush1.msra.mxu0 %v16258_v11  ;;  %17858 = vmatmul.mubr.msk.f32.vlgmr.msra.gmra.mxu1 %vm429_vm8, %v17856_v5  ;;  %v16464_v16 = vpop.permute.xlu0 %16463 }
0x108c   : > { %17857 = vmatmul.mubr.msk.f32.vlgmr.msra.gmra.mxu0 %vm429_vm8, %v17856_v5  ;;  %16617 = vmatprep.mubr.f32.mxu1 %v22062_v40  ;;  %v12209_v33 = vpop.f32.mrf.mxu1 }
0x108d   : > { %v16466_v1 = vpop.permute.xlu1 %16465  ;;  %16546 = vmatprep.mubr.f32.mxu0 %v22062_v40 }
0x108e   : > { %v16472_v31 = vsel %vm1203_vm4, %v16464_v16, %v16466_v1  ;;  %v12416_v58 = vpop.f32.mrf.mxu1 }
0x108f   : > { %16512 = vmatprep.subr.mxu0 %v16472_v31  ;;  %v16468_v54 = vpop.permute.xlu0 %16467 }
0x1090   : > { %v16473_v6 = vsel %vm1203_vm4, %v16466_v1, %v16468_v54  ;;  %v12418_v5 = vpop.f32.mrf.mxu1 }
0x1091   : > { %v16470_v49 = vpop.permute.xlu1 %16469 }
0x1092   : > { %v16474_v42 = vsel %vm1203_vm4, %v16468_v54, %v16470_v49  ;;  %v12629_v4 = vpop.f32.mrf.mxu1 }
0x1093   : > { %16583 = vmatprep.subr.mxu1 %v16474_v42  ;;  %v16462_v56 = vpop.permute.xlu0 %16461 }
0x1094   : > { %v16471_v0 = vsel %vm1203_vm4, %v16462_v56, %v16464_v16  ;;  %16584 = vmatpush1.msra.mxu1 %v16473_v6  ;;  %v12631_v16 = vpop.f32.mrf.mxu1 }
0x1095   : > { %v16677_v43 = vpop.permute.xlu1 %16676  ;;  %16513 = vmatpush1.msra.mxu0 %v16471_v0  ;;  %17862 = vmatmul.mubr.msk.f32.vlgmr.msra.gmra.mxu1 %vm429_vm8, %v17860_v24 }
0x1096   : > { %17861 = vmatmul.mubr.msk.f32.vlgmr.msra.gmra.mxu0 %vm429_vm8, %v17860_v24  ;;  %16830 = vmatprep.mubr.f32.mxu1 %v22062_v40  ;;  %v12842_v31 = vpop.f32.mrf.mxu1 }
0x1097   : > { %v16679_v45 = vpop.permute.xlu0 %16678  ;;  %16759 = vmatprep.mubr.f32.mxu0 %v22062_v40 }
0x1098   : > { %v16685_v60 = vsel %vm987_vm3, %v16677_v43, %v16679_v45  ;;  %v12844_v49 = vpop.f32.mrf.mxu1 }
0x1099   : > { %v16681_v63 = vpop.permute.xlu1 %16680  ;;  %16725 = vmatprep.subr.mxu0 %v16685_v60 }
0x109a   : > { %v16686_v36 = vsel %vm987_vm3, %v16679_v45, %v16681_v63  ;;  %v13055_v24 = vpop.f32.mrf.mxu1 }
0x109b   : > { %v16683_v27 = vpop.permute.xlu0 %16682 }
0x109c   : > { %v16687_v13 = vsel %vm987_vm3, %v16681_v63, %v16683_v27  ;;  %v13057_v56 = vpop.f32.mrf.mxu1 }
0x109d   : > { %v16675_v19 = vpop.permute.xlu1 %16674  ;;  %16796 = vmatprep.subr.mxu1 %v16687_v13 }
0x109e   : > { %v16684_v20 = vsel %vm987_vm3, %v16675_v19, %v16677_v43  ;;  %16797 = vmatpush1.msra.mxu1 %v16686_v36  ;;  %v13268_v43 = vpop.f32.mrf.mxu1 }
0x109f   : > { %16726 = vmatpush1.msra.mxu0 %v16684_v20  ;;  %17866 = vmatmul.mubr.msk.f32.vlgmr.msra.gmra.mxu1 %vm429_vm8, %v17864_v2  ;;  %v16890_v44 = vpop.permute.xlu0 %16889 }
0x10a0   : > { %17865 = vmatmul.mubr.msk.f32.vlgmr.msra.gmra.mxu0 %vm429_vm8, %v17864_v2  ;;  %17043 = vmatprep.mubr.f32.mxu1 %v22062_v40  ;;  %v13270_v60 = vpop.f32.mrf.mxu1 }
0x10a1   : > { %v16892_v26 = vpop.permute.xlu1 %16891  ;;  %16972 = vmatprep.mubr.f32.mxu0 %v22062_v40 }
0x10a2   : > { %v16898_v48 = vsel %vm771_vm2, %v16890_v44, %v16892_v26 }
0x10a3   : > { %16938 = vmatprep.subr.mxu0 %v16898_v48  ;;  %v16894_v8 = vpop.permute.xlu0 %16893 }
0x10a4   : > { %v16899_v17 = vsel %vm771_vm2, %v16892_v26, %v16894_v8 }
0x10a5   : > { %v16896_v57 = vpop.permute.xlu1 %16895 }
0x10a6   : > { %v16900_v46 = vsel %vm771_vm2, %v16894_v8, %v16896_v57 }
0x10a7   : > { %17009 = vmatprep.subr.mxu1 %v16900_v46  ;;  %v16888_v41 = vpop.permute.xlu0 %16887 }
0x10a8   : > { %v16897_v28 = vsel %vm771_vm2, %v16888_v41, %v16890_v44  ;;  %17010 = vmatpush1.msra.mxu1 %v16899_v17 }
0x10a9   : > { %v17103_v55 = vpop.permute.xlu1 %17102  ;;  %16939 = vmatpush1.msra.mxu0 %v16897_v28  ;;  %17870 = vmatmul.mubr.msk.f32.vlgmr.msra.gmra.mxu1 %vm429_vm8, %v17868_v59 }
0x10aa   : > { %17869 = vmatmul.mubr.msk.f32.vlgmr.msra.gmra.mxu0 %vm429_vm8, %v17868_v59  ;;  %17256 = vmatprep.mubr.f32.mxu1 %v22062_v40  ;;  %v21776_v27 = vpop.f32.mrf.mxu1 }
0x10ab   : > { %v17105_v15 = vpop.permute.xlu0 %17104  ;;  %17185 = vmatprep.mubr.f32.mxu0 %v22062_v40 }
0x10ac   : > { %v17111_v32 = vsel %vm389_vm0, %v17103_v55, %v17105_v15  ;;  %v21780_v2 = vpop.f32.mrf.mxu1 }
0x10ad   : > { %v17107_v14 = vpop.permute.xlu1 %17106  ;;  %17151 = vmatprep.subr.mxu0 %v17111_v32 }
0x10ae   : > { %v17112_v52 = vsel %vm389_vm0, %v17105_v15, %v17107_v14 }
0x10b0   : > { %v17109_v39 = vpop.permute.xlu0 %17108 }
0x10b1   : > { %v17101_v62 = vpop.permute.xlu1 %17100  ;;  %v17113_v3 = vsel %vm389_vm0, %v17107_v14, %v17109_v39 }
0x10b2   : > { %v17110_v7 = vsel %vm389_vm0, %v17101_v62, %v17103_v55  ;;  %17222 = vmatprep.subr.mxu1 %v17113_v3 }
0x10b3   : > { %17223 = vmatpush1.msra.mxu1 %v17112_v52  ;;  %17152 = vmatpush1.msra.mxu0 %v17110_v7 }
0x10b4   : > { %17874 = vmatmul.mubr.msk.f32.vlgmr.msra.gmra.mxu1 %vm429_vm8, %v17872_v50  ;;  %v17316_v34 = vpop.permute.xlu0 %17315  ;;  %17873 = vmatmul.mubr.msk.f32.vlgmr.msra.gmra.mxu0 %vm429_vm8, %v17872_v50 }
0x10b5   : > { %v17318_v22 = vpop.permute.xlu1 %17317  ;;  %17469 = vmatprep.mubr.f32.mxu1 %v22062_v40  ;;  %17398 = vmatprep.mubr.f32.mxu0 %v22062_v40  ;;  %v11968_v40 = vpop.f32.mrf.mxu0 }
0x10b6   : > { %v17324_v29 = vsel %vm347_vm1, %v17316_v34, %v17318_v22 }
0x10b7   : > { %17364 = vmatprep.subr.mxu0 %v17324_v29  ;;  %v11970_v25 = vpop.f32.mrf.mxu0 }
0x10b8   : > { %v17320_v35 = vpop.permute.xlu0 %17319 }
0x10b9   : > { %v17322_v61 = vpop.permute.xlu1 %17321  ;;  %v17325_v23 = vsel %vm347_vm1, %v17318_v22, %v17320_v35  ;;  %v12136_v37 = vpop.f32.mrf.mxu0  ;;  %v12208_v22 = vadd.f32 %v12207_v12, %v12039_v38 }
0x10ba   : > { %v17326_v51 = vsel %vm347_vm1, %v17320_v35, %v17322_v61  ;;  %v12137_v35 = vadd.f32 %v12136_v37, %v11968_v40  ;;  %v12210_v61 = vadd.f32 %v12209_v33, %v12041_v30 }
0x10bb   : > { %17435 = vmatprep.subr.mxu1 %v17326_v51  ;;  %v12138_v18 = vpop.f32.mrf.mxu0 }
0x10bc   : > { %v17314_v47 = vpop.permute.xlu0 %17313  ;;  %17436 = vmatpush1.msra.mxu1 %v17325_v23  ;;  %v21784_v19 = vpop.f32.mrf.mxu1  ;;  %v12423_v23 = vadd.f32 %v12416_v58, %v12208_v22 }
0x10bd   : > { %v17323_v9 = vsel %vm347_vm1, %v17314_v47, %v17316_v34  ;;  %17878 = vmatmul.mubr.msk.f32.vlgmr.msra.gmra.mxu1 %vm429_vm8, %v17876_v53  ;;  %v12345_v21 = vpop.f32.mrf.mxu0 }
0x10be   : > { %17365 = vmatpush1.msra.mxu0 %v17323_v9  ;;  %v21788_v44 = vpop.f32.mrf.mxu1  ;;  %v12421_v9 = vadd.f32 %v12345_v21, %v12137_v35 }
0x10bf   : > { %17877 = vmatmul.mubr.msk.f32.vlgmr.msra.gmra.mxu0 %vm429_vm8, %v17876_v53  ;;  %v12347_v10 = vpop.f32.mrf.mxu0  ;;  %v12139_v53 = vadd.f32 %v12138_v18, %v11970_v25 }
0x10c1   : > { %v12558_v11 = vpop.f32.mrf.mxu0 }
0x10c3   : > { %v12560_v1 = vpop.f32.mrf.mxu0 }
0x10c5   : > { %v12771_v54 = vpop.f32.mrf.mxu0 }
0x10c7   : > { %v12773_v42 = vpop.f32.mrf.mxu0 }
0x10c9   : > { %v12984_v6 = vpop.f32.mrf.mxu0 }
0x10cb   : > { %v12986_v0 = vpop.f32.mrf.mxu0 }
0x10cd   : > { %v13197_v45 = vpop.f32.mrf.mxu0 }
0x10ce   : > { %v21792_v48 = vpop.f32.mrf.mxu1 }
0x10cf   : > { %v21774_v63 = vpop.f32.mrf.mxu0 }
0x10d0   : > { %v21796_v57 = vpop.f32.mrf.mxu1 }
0x10d1   : > { %v21778_v13 = vpop.f32.mrf.mxu0 }
0x10d3   : > { %v21782_v36 = vpop.f32.mrf.mxu0 }
0x10d5   : > { %v21786_v20 = vpop.f32.mrf.mxu0 }
0x10d7   : > { %v21790_v26 = vpop.f32.mrf.mxu0 }
0x10d9   : > { %v21794_v8 = vpop.f32.mrf.mxu0 }
0x10db   : > { %v21798_v46 = vpop.f32.mrf.mxu0 }
0x10e0   : > { %v21800_v59 = vpop.f32.mrf.mxu1  ;;  %v21802_v17 = vpop.f32.mrf.mxu0 }
0x10e2   : > { %v21804_v41 = vpop.f32.mrf.mxu1  ;;  %v21806_v28 = vpop.f32.mrf.mxu0 }
0x10f2   : > { %v21808_v55 = vpop.f32.mrf.mxu1  ;;  %v21810_v15 = vpop.f32.mrf.mxu0 }
0x10f4   : > { %v21812_v32 = vpop.f32.mrf.mxu1  ;;  %v21814_v14 = vpop.f32.mrf.mxu0 }
0x10fc   : > { %v21816_v39 = vpop.f32.mrf.mxu1 }
0x10fe   : > { %v21818_v62 = vpop.f32.mrf.mxu0  ;;  %v21820_v3 = vpop.f32.mrf.mxu1 }
0x10ff   : > { %22104 = vst [vmem:[#allocation24_spill] sm:$0xff] %v21818_v62  ;;  %22105 = vst [vmem:[#allocation14_spill] sm:$0xff] %v21820_v3  ;;  %v12424_v3 = vadd.f32 %v12418_v5, %v12210_v61  ;;  %v12636_v62 = vadd.f32 %v12629_v4, %v12423_v23 }
0x1100   : > { %v21822_v50 = vpop.f32.mrf.mxu0 }
0x1101   : > { %22106 = vst [vmem:[#allocation17_spill] sm:$0xff] %v21822_v50  ;;  %v21824_v52 = vpop.f32.mrf.mxu1  ;;  %v12637_v38 = vadd.f32 %v12631_v16, %v12424_v3  ;;  %v12849_v30 = vadd.f32 %v12842_v31, %v12636_v62 }
0x1102   : > { %22107 = vst [vmem:[#allocation16_spill] sm:$0xff] %v21824_v52  ;;  %v21826_v7 = vpop.f32.mrf.mxu0  ;;  %v12422_v52 = vadd.f32 %v12347_v10, %v12139_v53 }
0x1103   : > { %22108 = vst [vmem:[#allocation20_spill] sm:$0xff] %v21826_v7  ;;  %v21828_v34 = vpop.f32.mrf.mxu1  ;;  %v12850_v33 = vadd.f32 %v12844_v49, %v12637_v38  ;;  %v13062_v21 = vadd.f32 %v13055_v24, %v12849_v30 }
0x1104   : > { %22109 = vst [vmem:[#allocation19_spill] sm:$0xff] %v21828_v34  ;;  %v21830_v29 = vpop.f32.mrf.mxu0  ;;  %v12634_v34 = vadd.f32 %v12558_v11, %v12421_v9  ;;  %v12635_v40 = vadd.f32 %v12560_v1, %v12422_v52 }
0x1105   : > { %v13063_v4 = vadd.f32 %v13057_v56, %v12850_v33  ;;  %v13275_v16 = vadd.f32 %v13268_v43, %v13062_v21 }
0x1106   : > { %v21832_v51 = vpop.f32.mrf.mxu1  ;;  %v12847_v25 = vadd.f32 %v12771_v54, %v12634_v34  ;;  %v12848_v58 = vadd.f32 %v12773_v42, %v12635_v40  ;;  %v22110_v30 = vld [vmem:[#allocation24_spill] sm:$0xff] }
0x1107   : > { %v21834_v47 = vpop.f32.mrf.mxu0  ;;  %v13276_v31 = vadd.f32 %v13270_v60, %v13063_v4  ;;  %v13488_v49 = vadd.f32 %v21776_v27, %v13275_v16 }
0x1108   : > { %v21836_v50 = vpop.f32.mrf.mxu1  ;;  %v13060_v10 = vadd.f32 %v12984_v6, %v12847_v25  ;;  %v13061_v11 = vadd.f32 %v12986_v0, %v12848_v58  ;;  %v22111_v25 = vld [vmem:[#allocation14_spill] sm:$0xff]  ;;  %v22112_v58 = vld [vmem:[#allocation17_spill] sm:$0xff] }
0x1109   : > { %v21838_v7 = vpop.f32.mrf.mxu0  ;;  %v13489_v24 = vadd.f32 %v21780_v2, %v13276_v31  ;;  %v13701_v0 = vadd.f32 %v21784_v19, %v13488_v49  ;;  %v22113_v21 = vld [vmem:[#allocation16_spill] sm:$0xff] }
0x110a   : > { %v13273_v1 = vadd.f32 %v13197_v45, %v13060_v10  ;;  %v13274_v54 = vadd.f32 %v21774_v63, %v13061_v11 }
0x110b   : > { %v13702_v45 = vadd.f32 %v21788_v44, %v13489_v24  ;;  %v13914_v27 = vadd.f32 %v21792_v48, %v13701_v0 }
0x110c   : > { %v13486_v42 = vadd.f32 %v21778_v13, %v13273_v1  ;;  %v13487_v56 = vadd.f32 %v21782_v36, %v13274_v54 }
0x110d   : > { %v13915_v2 = vadd.f32 %v21796_v57, %v13702_v45  ;;  %v14127_v19 = vadd.f32 %v21800_v59, %v13914_v27 }
0x110e   : > { %v13699_v34 = vadd.f32 %v21786_v20, %v13486_v42  ;;  %v13700_v63 = vadd.f32 %v21790_v26, %v13487_v56 }
0x110f   : > { %v21840_v12 = vpop.f32.mrf.mxu1  ;;  %v14128_v44 = vadd.f32 %v21804_v41, %v13915_v2  ;;  %v14340_v48 = vadd.f32 %v21808_v55, %v14127_v19 }
0x1110   : > { %v21842_v37 = vpop.f32.mrf.mxu0  ;;  %v13912_v13 = vadd.f32 %v21794_v8, %v13699_v34  ;;  %v13913_v36 = vadd.f32 %v21798_v46, %v13700_v63 }
0x1111   : > { %v21844_v18 = vpop.f32.mrf.mxu1  ;;  %v14341_v57 = vadd.f32 %v21812_v32, %v14128_v44  ;;  %v14553_v59 = vadd.f32 %v21816_v39, %v14340_v48  ;;  %v22115_v32 = vld [vmem:[#allocation19_spill] sm:$0xff] }
0x1112   : > { %v21846_v5 = vpop.f32.mrf.mxu0  ;;  %v14125_v20 = vadd.f32 %v21802_v17, %v13912_v13  ;;  %v14126_v26 = vadd.f32 %v21806_v28, %v13913_v36 }
0x1113   : > { %v14554_v41 = vadd.f32 %v22111_v25, %v14341_v57  ;;  %v14704_v55 = vadd.f32 %v22113_v21, %v14553_v59 }
0x1114   : > { %v14338_v8 = vadd.f32 %v21810_v15, %v14125_v20  ;;  %v14339_v46 = vadd.f32 %v21814_v14, %v14126_v26  ;;  %v22114_v15 = vld [vmem:[#allocation20_spill] sm:$0xff] }
0x1115   : > { %v14705_v16 = vadd.f32 %v22115_v32, %v14554_v41  ;;  %v14922_v39 = vadd.f32 %v21832_v51, %v14704_v55 }
0x1116   : > { %v14551_v17 = vadd.f32 %v22110_v30, %v14338_v8  ;;  %v14552_v28 = vadd.f32 %v22112_v58, %v14339_v46 }
0x1117   : > { %v14923_v49 = vadd.f32 %v21836_v50, %v14705_v16  ;;  %v15135_v0 = vadd.f32 %v21840_v12, %v14922_v39 }
0x1118   : > { %v14702_v11 = vadd.f32 %v22114_v15, %v14551_v17  ;;  %v14703_v14 = vadd.f32 %v21830_v29, %v14552_v28 }
0x1119   : > { %v21848_v22 = vpop.f32.mrf.mxu1  ;;  %v15136_v63 = vadd.f32 %v21844_v18, %v14923_v49 }
0x111a   : > { %v21850_v3 = vpop.f32.mrf.mxu0  ;;  %v14920_v54 = vadd.f32 %v21834_v47, %v14702_v11  ;;  %v14921_v56 = vadd.f32 %v21838_v7, %v14703_v14  ;;  %v15348_v51 = vadd.f32 %v21848_v22, %v15135_v0  ;;  %v17484_v0 = vpop.permute.xlu1 %17483 }
0x111b   : > { %v15343_v62 = vpop.f32.mrf.mxu1 }
0x111c   : > { %v15272_v52 = vpop.f32.mrf.mxu0  ;;  %v15133_v45 = vadd.f32 %v21842_v37, %v14920_v54  ;;  %v15134_v29 = vadd.f32 %v21846_v5, %v14921_v56  ;;  %v15349_v2 = vadd.f32 %v15343_v62, %v15136_v63 }
0x111e   : > { %v15346_v50 = vadd.f32 %v21850_v3, %v15133_v45  ;;  %v15347_v19 = vadd.f32 %v15272_v52, %v15134_v29 }
0x1123   : > { %v15554_v6 = vpop.f32.mrf.mxu1 }
0x1124   : > { %v15483_v43 = vpop.f32.mrf.mxu0  ;;  %v15561_v7 = vadd.f32 %v15554_v6, %v15348_v51 }
0x1125   : > { %v15556_v60 = vpop.f32.mrf.mxu1  ;;  %v15559_v12 = vadd.f32 %v15483_v43, %v15346_v50 }
0x1126   : > { %v15485_v35 = vpop.f32.mrf.mxu0  ;;  %v15562_v44 = vadd.f32 %v15556_v60, %v15349_v2 }
0x1127   : > { %v15560_v48 = vadd.f32 %v15485_v35, %v15347_v19 }
0x112d   : > { %v15767_v61 = vpop.f32.mrf.mxu1 }
0x112e   : > { %v15696_v53 = vpop.f32.mrf.mxu0  ;;  %v15774_v18 = vadd.f32 %v15767_v61, %v15561_v7 }
0x112f   : > { %v15769_v23 = vpop.f32.mrf.mxu1  ;;  %v15772_v57 = vadd.f32 %v15696_v53, %v15559_v12 }
0x1130   : > { %v15698_v9 = vpop.f32.mrf.mxu0  ;;  %v15775_v5 = vadd.f32 %v15769_v23, %v15562_v44 }
0x1131   : > { %v15773_v22 = vadd.f32 %v15698_v9, %v15560_v48 }
0x1137   : > { %v15980_v38 = vpop.f32.mrf.mxu1 }
0x1138   : > { %v15909_v40 = vpop.f32.mrf.mxu0  ;;  %v15987_v59 = vadd.f32 %v15980_v38, %v15774_v18 }
0x1139   : > { %v15982_v33 = vpop.f32.mrf.mxu1  ;;  %v15985_v3 = vadd.f32 %v15909_v40, %v15772_v57 }
0x113a   : > { %v15911_v10 = vpop.f32.mrf.mxu0  ;;  %v15988_v62 = vadd.f32 %v15982_v33, %v15775_v5 }
0x113b   : > { %v15986_v6 = vadd.f32 %v15911_v10, %v15773_v22 }
0x1141   : > { %v16193_v4 = vpop.f32.mrf.mxu1 }
0x1142   : > { %v16122_v1 = vpop.f32.mrf.mxu0  ;;  %v16200_v25 = vadd.f32 %v16193_v4, %v15987_v59 }
0x1143   : > { %v16195_v31 = vpop.f32.mrf.mxu1  ;;  %v16198_v41 = vadd.f32 %v16122_v1, %v15985_v3 }
0x1144   : > { %v16124_v42 = vpop.f32.mrf.mxu0  ;;  %v16201_v43 = vadd.f32 %v16195_v31, %v15988_v62 }
0x1145   : > { %v16199_v28 = vadd.f32 %v16124_v42, %v15986_v6 }
0x114b   : > { %v16406_v24 = vpop.f32.mrf.mxu1 }
0x114c   : > { %v16335_v34 = vpop.f32.mrf.mxu0  ;;  %v16413_v60 = vadd.f32 %v16406_v24, %v16200_v25 }
0x114d   : > { %v16408_v27 = vpop.f32.mrf.mxu1  ;;  %v16411_v35 = vadd.f32 %v16335_v34, %v16198_v41 }
0x114e   : > { %v16337_v13 = vpop.f32.mrf.mxu0  ;;  %v16414_v61 = vadd.f32 %v16408_v27, %v16201_v43 }
0x114f   : > { %v16412_v55 = vadd.f32 %v16337_v13, %v16199_v28 }
0x1155   : > { %v16619_v47 = vpop.f32.mrf.mxu1 }
0x1156   : > { %v16548_v36 = vpop.f32.mrf.mxu0  ;;  %v16626_v21 = vadd.f32 %v16619_v47, %v16413_v60 }
0x1157   : > { %v16621_v20 = vpop.f32.mrf.mxu1  ;;  %v16624_v9 = vadd.f32 %v16548_v36, %v16411_v35 }
0x1158   : > { %v16550_v26 = vpop.f32.mrf.mxu0  ;;  %v16627_v38 = vadd.f32 %v16621_v20, %v16414_v61 }
0x1159   : > { %v16625_v40 = vadd.f32 %v16550_v26, %v16412_v55 }
0x115f   : > { %v16832_v37 = vpop.f32.mrf.mxu1 }
0x1160   : > { %v16761_v8 = vpop.f32.mrf.mxu0  ;;  %v16839_v15 = vadd.f32 %v16832_v37, %v16626_v21 }
0x1161   : > { %v16834_v46 = vpop.f32.mrf.mxu1  ;;  %v16837_v33 = vadd.f32 %v16761_v8, %v16624_v9 }
0x1162   : > { %v16763_v30 = vpop.f32.mrf.mxu0  ;;  %v16840_v4 = vadd.f32 %v16834_v46, %v16627_v38 }
0x1163   : > { %v16838_v16 = vadd.f32 %v16763_v30, %v16625_v40 }
0x1169   : > { %v17045_v17 = vpop.f32.mrf.mxu1 }
0x116a   : > { %v16974_v52 = vpop.f32.mrf.mxu0  ;;  %v17052_v32 = vadd.f32 %v17045_v17, %v16839_v15 }
0x116b   : > { %v17047_v58 = vpop.f32.mrf.mxu1  ;;  %v17050_v1 = vadd.f32 %v16974_v52, %v16837_v33 }
0x116c   : > { %v16976_v53 = vpop.f32.mrf.mxu0  ;;  %v17053_v14 = vadd.f32 %v17047_v58, %v16840_v4 }
0x116d   : > { %v17051_v49 = vadd.f32 %v16976_v53, %v16838_v16 }
0x1174   : > { %v17258_v23 = vpop.f32.mrf.mxu1  ;;  %v17187_v11 = vpop.f32.mrf.mxu0 }
0x1175   : > { %v17265_v39 = vadd.f32 %v17258_v23, %v17052_v32  ;;  %v17263_v42 = vadd.f32 %v17187_v11, %v17050_v1 }
0x1176   : > { %v17260_v10 = vpop.f32.mrf.mxu1  ;;  %v17189_v31 = vpop.f32.mrf.mxu0 }
0x1177   : > { %v17266_v24 = vadd.f32 %v17260_v10, %v17053_v14  ;;  %v17264_v63 = vadd.f32 %v17189_v31, %v17051_v49 }
0x117d   : > { %v17471_v54 = vpop.f32.mrf.mxu1 }
0x117e   : > { %v17478_v56 = vadd.f32 %v17471_v54, %v17265_v39 }
0x117f   : > { %v17400_v34 = vpop.f32.mrf.mxu0  ;;  %v17473_v45 = vpop.f32.mrf.mxu1 }
0x1180   : > { %v17476_v27 = vadd.f32 %v17400_v34, %v17263_v42  ;;  %v17479_v29 = vadd.f32 %v17473_v45, %v17266_v24  ;;  %v17488_v13 = vadd.f32 %v17484_v0, %v17478_v56 }
0x1181   : > { %v17402_v51 = vpop.f32.mrf.mxu0 }
0x1182   : > { %v17489_v47 = vadd.f32 %v17484_v0, %v17479_v29  ;;  %v17477_v50 = vadd.f32 %v17402_v51, %v17264_v63  ;;  %v17486_v2 = vadd.f32 %v17484_v0, %v17476_v27 }
0x1184   : > { %v17495_v36 = vcombine.low %v17488_v13, %v17489_v47  ;;  %v17487_v19 = vadd.f32 %v17484_v0, %v17477_v50 }
0x1186   : > { %17499 = vst [vmem:[%s305_s19 + $0x8] sm:$0x77] %v17495_v36  ;;  %v17494_v7 = vcombine.low %v17486_v2, %v17487_v19 }
0x1188   : > { %17498 = vst [vmem:[%s305_s19] sm:$0x77] %v17494_v7 }
0x1189 PF: > { %s18_s27 = sadd.s32 1, %s17922_s27  }
0x118a   : > { %p15_p4 = scmp.ge.s32.totalorder %s18_s27, 4  }
0x118c   :  { %17 = sbr.rel (!%p15_p4) target bundleno = 1 (0x1), region = 185 }

</bundles_post_ra>
